<compile_context>
chip_gen: v5e
topology: v5e:2x2
jax: 0.10.0
libtpu: 0.0.40
codegen_flags: <defaults>
</compile_context>

<pallas_src>
import jax
import jax.numpy as jnp
from jax.experimental import pallas as pl
from jax.experimental.pallas import tpu as pltpu

IN_DIM = 784
HID_DIM = 512
OUT_DIM = 10
OUT_PAD = 128        # lane-dense padded output width (10 -> 128)
MIN_TB = 256         # minimum batch rows per grid step (multiple of 8)
MAX_TB = 1024        # maximum batch rows per grid step (VMEM-safe everywhere)


def _round_up(n, m):
    return ((n + m - 1) // m) * m


def mlp_kernel(x_ref, w1_ref, b1_ref, w2_ref, b2_ref, o_ref):
    # fc1: (TB, 784)bf16 @ (784, 512)bf16 -> f32 accumulate, +bias, ReLU in f32.
    x = x_ref[...].astype(jnp.bfloat16)   # no-op when x is already bf16
    h = jnp.dot(x, w1_ref[...], preferred_element_type=jnp.float32)
    h = jnp.maximum(h + b1_ref[...], 0.0)
    # fc2: (TB, 512)bf16 @ (512, 128)bf16 -> f32 accumulate, +bias, store bf16.
    out = jnp.dot(h.astype(jnp.bfloat16), w2_ref[...],
                  preferred_element_type=jnp.float32)
    o_ref[...] = (out + b2_ref[...]).astype(o_ref.dtype)
    # TODO(synk): the PyTorch forward's print() side effects are intentionally omitted.


def mlp_forward(x, w1, b1, w2, b2, *, tb=None):
    """x: (B, 784) bf16 (f32 also accepted, cast in-kernel).
    w1:(784,512)bf16, b1:(1,512)f32, w2:(512,128)bf16, b2:(1,128)f32.
    Returns (B, 10) f32 logits."""
    B = x.shape[0]
    if tb is None:
        # Big tiles amortize per-step overhead; keep >= 2 grid steps so both
        # v7x TensorCores get work on the parallel batch axis.
        tb = min(MAX_TB, max(MIN_TB, _round_up(max(B // 2, 1), MIN_TB)))
    num_tiles = pl.cdiv(B, tb)
    pB = num_tiles * tb
    if pB != B:
        x = jnp.pad(x, ((0, pB - B), (0, 0)))

    out_padded = pl.pallas_call(
        mlp_kernel,
        out_shape=jax.ShapeDtypeStruct((pB, OUT_PAD), jnp.bfloat16),
        grid=(num_tiles,),
        in_specs=[
            pl.BlockSpec((tb, IN_DIM), lambda i: (i, 0)),          # x: tiled on batch
            pl.BlockSpec((IN_DIM, HID_DIM), lambda i: (0, 0)),     # w1: VMEM-resident
            pl.BlockSpec((1, HID_DIM), lambda i: (0, 0)),          # b1: VMEM-resident
            pl.BlockSpec((HID_DIM, OUT_PAD), lambda i: (0, 0)),    # w2: VMEM-resident
            pl.BlockSpec((1, OUT_PAD), lambda i: (0, 0)),          # b2: VMEM-resident
        ],
        out_specs=pl.BlockSpec((tb, OUT_PAD), lambda i: (i, 0)),
        compiler_params=pltpu.CompilerParams(
            dimension_semantics=("parallel",),
        ),
    )(x, w1, b1, w2, b2)

    # Slice off batch/lane padding; upcast logits to f32 on the host side.
    return out_padded[:B, :OUT_DIM].astype(jnp.float32)


def init_params(key):
    """Deterministic init mimicking nn.Linear's U(-1/sqrt(fan_in), 1/sqrt(fan_in)).

    Weights stored as (in, out) == transpose of PyTorch's (out, in) layout,
    cast to bf16; fc2 weight/bias zero-padded along out dim 10 -> 128.
    """
    k1, k2, k3, k4 = jax.random.split(key, 4)
    bound1 = 1.0 / (IN_DIM ** 0.5)
    bound2 = 1.0 / (HID_DIM ** 0.5)

    w1 = jax.random.uniform(k1, (IN_DIM, HID_DIM), jnp.float32, -bound1, bound1)
    b1 = jax.random.uniform(k2, (1, HID_DIM), jnp.float32, -bound1, bound1)
    w2 = jax.random.uniform(k3, (HID_DIM, OUT_DIM), jnp.float32, -bound2, bound2)
    b2 = jax.random.uniform(k4, (1, OUT_DIM), jnp.float32, -bound2, bound2)

    w1 = w1.astype(jnp.bfloat16)
    w2 = jnp.pad(w2, ((0, 0), (0, OUT_PAD - OUT_DIM))).astype(jnp.bfloat16)
    b2 = jnp.pad(b2, ((0, 0), (0, OUT_PAD - OUT_DIM)))  # f32, zero-padded
    return w1, b1, w2, b2


if __name__ == "__main__":
    key = jax.random.PRNGKey(0)
    k_params, k_x = jax.random.split(key)
    w1, b1, w2, b2 = init_params(k_params)

    B = 512  # -> tb=256, 2 grid steps (exercises batch tiling / megacore split)
    # x is produced natively in bf16 (no standalone wrapper cast).
    x = jax.random.normal(k_x, (B, IN_DIM), jnp.bfloat16)

    out = mlp_forward(x, w1, b1, w2, b2)
    out = jax.block_until_ready(out)
    assert out.shape == (B, OUT_DIM)

    # Reference in plain JAX with the same mixed precision (bf16 matmul inputs,
    # f32 accumulation, bf16 output) so the tolerance stays tight.
    h_ref = jnp.dot(x, w1, preferred_element_type=jnp.float32) + b1
    h_ref = jnp.maximum(h_ref, 0.0)
    ref = jnp.dot(h_ref.astype(jnp.bfloat16), w2,
                  preferred_element_type=jnp.float32) + b2
    ref = ref.astype(jnp.bfloat16)[:, :OUT_DIM].astype(jnp.float32)
    assert jnp.allclose(out, ref, atol=2e-2, rtol=2e-2), \
        float(jnp.max(jnp.abs(out - ref)))

    # Sanity check against full-f32 math as well (loose: bf16 quantization).
    xf = x.astype(jnp.float32)
    ref_f32 = (jnp.maximum(xf @ w1.astype(jnp.float32) + b1, 0.0)
               @ w2.astype(jnp.float32) + b2)
    assert jnp.allclose(out, ref_f32[:, :OUT_DIM], atol=6e-2, rtol=6e-2)

    print("KERNEL_OK")
</pallas_src>

<mosaic_0001>
module attributes {stable_mosaic.version = 11 : i64} {
  func.func @mlp_kernel(%arg0: i32, %arg1: memref<256x784xbf16, #tpu.memory_space<vmem>>, %arg2: memref<784x512xbf16, #tpu.memory_space<vmem>>, %arg3: memref<1x512xf32, #tpu.memory_space<vmem>>, %arg4: memref<512x128xbf16, #tpu.memory_space<vmem>>, %arg5: memref<1x128xf32, #tpu.memory_space<vmem>>, %arg6: memref<256x128xbf16, #tpu.memory_space<vmem>>) attributes {dimension_semantics = [#tpu.dimension_semantics<parallel>], iteration_bounds = array<i64: 2>, scalar_prefetch = 0 : i64, scratch_operands = 0 : i64, tpu.core_type = #tpu.core_type<tc>, window_params = [{transform_indices = @transform_0, window_bounds = array<i64: 256, 784>}, {pipeline_mode = #tpu.pipeline_mode<synchronous>, transform_indices = @transform_1, window_bounds = array<i64: 784, 512>}, {pipeline_mode = #tpu.pipeline_mode<synchronous>, transform_indices = @transform_2, window_bounds = array<i64: 1, 512>}, {pipeline_mode = #tpu.pipeline_mode<synchronous>, transform_indices = @transform_3, window_bounds = array<i64: 512, 128>}, {pipeline_mode = #tpu.pipeline_mode<synchronous>, transform_indices = @transform_4, window_bounds = array<i64: 1, 128>}, {transform_indices = @transform_5, window_bounds = array<i64: 256, 128>}]} {
    %c0 = arith.constant 0 : index
    %c0_0 = arith.constant 0 : index
    %0 = vector.load %arg1[%c0, %c0_0] : memref<256x784xbf16, #tpu.memory_space<vmem>>, vector<256x784xbf16>
    %c0_1 = arith.constant 0 : index
    %c0_2 = arith.constant 0 : index
    %1 = vector.load %arg2[%c0_1, %c0_2] : memref<784x512xbf16, #tpu.memory_space<vmem>>, vector<784x512xbf16>
    %cst = arith.constant dense<0.000000e+00> : vector<256x512xf32>
    %2 = tpu.matmul %0, %1, %cst {dimension_numbers = #tpu.dot_dimension_numbers<[1], [0], [0], [1], [0, 0, 1, 1], [], []>} : vector<256x784xbf16>, vector<784x512xbf16>, vector<256x512xf32> -> vector<256x512xf32>
    %c0_3 = arith.constant 0 : index
    %c0_4 = arith.constant 0 : index
    %3 = vector.load %arg3[%c0_3, %c0_4] : memref<1x512xf32, #tpu.memory_space<vmem>>, vector<1x512xf32>
    %4 = vector.broadcast %3 : vector<1x512xf32> to vector<256x512xf32>
    %5 = arith.addf %2, %4 : vector<256x512xf32>
    %cst_5 = arith.constant 0.000000e+00 : f32
    %6 = vector.broadcast %cst_5 : f32 to vector<256x512xf32>
    %7 = arith.maximumf %5, %6 : vector<256x512xf32>
    %8 = arith.truncf %7 : vector<256x512xf32> to vector<256x512xbf16>
    %c0_6 = arith.constant 0 : index
    %c0_7 = arith.constant 0 : index
    %9 = vector.load %arg4[%c0_6, %c0_7] : memref<512x128xbf16, #tpu.memory_space<vmem>>, vector<512x128xbf16>
    %cst_8 = arith.constant dense<0.000000e+00> : vector<256x128xf32>
    %10 = tpu.matmul %8, %9, %cst_8 {dimension_numbers = #tpu.dot_dimension_numbers<[1], [0], [0], [1], [0, 0, 1, 1], [], []>} : vector<256x512xbf16>, vector<512x128xbf16>, vector<256x128xf32> -> vector<256x128xf32>
    %c0_9 = arith.constant 0 : index
    %c0_10 = arith.constant 0 : index
    %11 = vector.load %arg5[%c0_9, %c0_10] : memref<1x128xf32, #tpu.memory_space<vmem>>, vector<1x128xf32>
    %12 = vector.broadcast %11 : vector<1x128xf32> to vector<256x128xf32>
    %13 = arith.addf %10, %12 : vector<256x128xf32>
    %14 = arith.truncf %13 : vector<256x128xf32> to vector<256x128xbf16>
    %c0_11 = arith.constant 0 : index
    %c0_12 = arith.constant 0 : index
    %15 = vector.load %arg6[%c0_11, %c0_12] : memref<256x128xbf16, #tpu.memory_space<vmem>>, vector<256x128xbf16>
    tpu.vector_store %arg6[%c0_11, %c0_12], %14 {strides = array<i32>} : memref<256x128xbf16, #tpu.memory_space<vmem>>, vector<256x128xbf16>,
    return
  }
  func.func @transform_0(%arg0: i32) -> (i32, i32) {
    %c0_i32 = arith.constant 0 : i32
    %c0_i32_0 = arith.constant 0 : i32
    return %arg0, %c0_i32 : i32, i32
  }
  func.func @transform_1(%arg0: i32) -> (i32, i32) {
    %c0_i32 = arith.constant 0 : i32
    %c0_i32_0 = arith.constant 0 : i32
    %c0_i32_1 = arith.constant 0 : i32
    return %c0_i32, %c0_i32_0 : i32, i32
  }
  func.func @transform_2(%arg0: i32) -> (i32, i32) {
    %c0_i32 = arith.constant 0 : i32
    %c0_i32_0 = arith.constant 0 : i32
    %c0_i32_1 = arith.constant 0 : i32
    return %c0_i32, %c0_i32_0 : i32, i32
  }
  func.func @transform_3(%arg0: i32) -> (i32, i32) {
    %c0_i32 = arith.constant 0 : i32
    %c0_i32_0 = arith.constant 0 : i32
    %c0_i32_1 = arith.constant 0 : i32
    return %c0_i32, %c0_i32_0 : i32, i32
  }
  func.func @transform_4(%arg0: i32) -> (i32, i32) {
    %c0_i32 = arith.constant 0 : i32
    %c0_i32_0 = arith.constant 0 : i32
    %c0_i32_1 = arith.constant 0 : i32
    return %c0_i32, %c0_i32_0 : i32, i32
  }
  func.func @transform_5(%arg0: i32) -> (i32, i32) {
    %c0_i32 = arith.constant 0 : i32
    %c0_i32_0 = arith.constant 0 : i32
    return %arg0, %c0_i32 : i32, i32
  }
}

</mosaic_0001>

<bundles_post_ra>
// kernel: tpu_custom_call.1
= control target key start
LH: loop header
LB: loop body
LE: loop exit
PB: predicated region body
PF: predicated region fallthrough
CT: control target
= control target key end

     0   :  { %10 = vsyncpa [#allocation3], 0  ;;  %s10903_s0 = inlined_call_operand.vmem [shape: bf16[512,784], index: 0, kind: input, shape index: {}]   ;;  %s10904_s1 = inlined_call_operand.vmem [shape: bf16[784,512], index: 1, kind: input, shape index: {}]   ;;  %s10905_s2 = inlined_call_operand.vmem [shape: f32[1,512], index: 2, kind: input, shape index: {}]   ;;  %s10906_s3 = inlined_call_operand.vmem [shape: bf16[512,128], index: 3, kind: input, shape index: {}]   ;;  %s10907_s4 = inlined_call_operand.vmem [shape: f32[1,128], index: 4, kind: input, shape index: {}]   ;;  %s10908_s5 = inlined_call_operand.hbm [shape: bf16[512,128], index: 5, kind: output, shape index: {}]  }
   0x1   :  { %12 = vsyncpa [#allocation3 + $0x1], 0  ;;  %s7608_s18 = smov 0   ;;  %s7610_s19 = smov 0  }
   0x2   :  { %s7612_s20 = smov 0   ;;  %s7614_s21 = smov 0  }
   0x3 LB: > { %s7629_s22 = sadd.s32 4294967295, %s7574_s21   ;;  %s5595_s23 = sadd.s32 4294967294, %s7574_s21   ;;  %s7574_s21 = sphi %s7614_s21, %s11619_s21   ;;  %s7570_s20 = sphi %s7612_s20, %s11618_s20   ;;  %s7566_s19 = sphi %s7610_s19, %s11617_s19   ;;  %s7562_s18 = sphi %s7608_s18, %s11616_s18  }
   0x4   : > { %s7633_s24 = sadd.s32 1, %s7574_s21   ;;  %s135_s25 = sadd.s32 1, %s7570_s20 }
   0x5   : > { %s132_s26 = ssub.s32 %s7574_s21, %s7633_s24  ;;  %p145_p0 = scmp.ne.s32.totalorder %s7570_s20, %s7566_s19 }
   0x6   : > { %p133_p1 = scmp.eq.s32.totalorder %s132_s26, 0  ;;  %p146_p2 = scmp.eq.s32.totalorder %s7629_s22, 1 }
   0x7   : > { %p151_p3 = scmp.ne.s32.totalorder %s7566_s19, %s7562_s18  ;;  %p152_p4 = scmp.eq.s32.totalorder %s5595_s23, 1 }
   0x8   : > { %s7644_s27 = scalar_select %p133_p1, %s7570_s20, %s135_s25  }
   0x9   : > { %p7646_p5 = por %p146_p2, %p145_p0  ;;  %p7650_p6 = por %p152_p4, %p151_p3 }
   0xa   : > { %p5598_p7 = scmp.ge.s32.totalorder %s7574_s21, 1  ;;  %p192_p8 = scmp.lt.s32.totalorder %s7574_s21, 3 }
   0xc   : > { %p193_p9 = pnand %p5598_p7, %p192_p8 }
   0xe   : > { %196 = sbr.rel (%p193_p9) target bundleno = 2237 (0x8bd), region = 40 }
  0x13   : > { %v6164_v0 = vld [vmem:[%s10904_s1 + $0xe0] sm:$0xf]  ;;  %v7173_v1 = vld [vmem:[%s10904_s1 + $0xec] sm:$0xf0]  ;;  %s5600_s25 = sshll.u32 %s7629_s22, 5  ;;  %vm2104_vm0 = vcmask 130048  }
  0x14   : > { %v6292_v2 = vld [vmem:[%s10904_s1 + $0x1e0] sm:$0xf]  ;;  %v6165_v3 = vor.u32 %v7173_v1, %v6164_v0  ;;  %v7205_v4 = vld [vmem:[%s10904_s1 + $0x1ec] sm:$0xf0]  ;;  %p222_p10 = scmp.lt.s32.totalorder %s5600_s25, 63  ;;  %s7371_s30 = sshll.u32 %s7629_s22, 7 }
  0x15   : > { %v6420_v5 = vld [vmem:[%s10904_s1 + $0x2e0] sm:$0xf]  ;;  %v7237_v6 = vld [vmem:[%s10904_s1 + $0x2ec] sm:$0xf0]  ;;  %v6293_v7 = vor.u32 %v7205_v4, %v6292_v2  ;;  %s5529_s9 = scalar_lea.hbm %s10908_s5, %s7371_s30  ;;  %s7532_s15 = scalar_lea.hbm %s10908_s5, 256 }
  0x16   : > { %v6421_v8 = vor.u32 %v7237_v6, %v6420_v5  ;;  %v6548_v9 = vld [vmem:[%s10904_s1 + $0x3e0] sm:$0xf]  ;;  %v7269_v10 = vld [vmem:[%s10904_s1 + $0x3ec] sm:$0xf0]  ;;  %2153 = vmatpush.bf16.msra.mxu0 %v6165_v3  ;;  %s11621_s25 = smov (!%p222_p10, %s5600_s25), 63  ;;  %s5532_s11 = sshll.u32 %s5529_s9, 4  ;;  %s5533_s11 = int_to_ptr.hbm [resolvable:$true] %s5532_s11 }
  0x17   : > { %v6148_v11 = vld [vmem:[%s10904_s1 + $0xc0] sm:$0xf]  ;;  %v6549_v12 = vor.u32 %v7269_v10, %v6548_v9  ;;  %v7169_v13 = vld [vmem:[%s10904_s1 + $0xcc] sm:$0xf0]  ;;  %2242 = vmatpush.bf16.msra.mxu1 %v6293_v7  ;;  %s7467_s7 = smul.u32 28, %s11621_s25  ;;  %s218_s25 = sand.u32 1, %s7566_s19  }
  0x18   : > { %v6276_v14 = vld [vmem:[%s10904_s1 + $0x1c0] sm:$0xf]  ;;  %v7201_v15 = vld [vmem:[%s10904_s1 + $0x1cc] sm:$0xf0]  ;;  %2331 = vmatpush.bf16.msra.mxu2 %v6421_v8  ;;  %v6149_v16 = vor.u32 %v7169_v13, %v6148_v11  ;;  %s5599_s17 = sshll.u32 %s218_s25, 7  ;;  %s5518_s22 = scalar_lea.sflag [#allocation3], %s218_s25 }
  0x19   : > { %v6277_v17 = vor.u32 %v7201_v15, %v6276_v14  ;;  %v6404_v18 = vld [vmem:[%s10904_s1 + $0x2c0] sm:$0xf]  ;;  %v7233_v19 = vld [vmem:[%s10904_s1 + $0x2cc] sm:$0xf0]  ;;  %2420 = vmatpush.bf16.msra.mxu3 %v6549_v12  ;;  %s7867_s26 = scalar_lea.vmem %s10903_s0, %s7467_s7  ;;  %s10797_s23 = scalar_lea.vmem [#allocation2], %s5599_s17 }
  0x1a   : > { %v6532_v20 = vld [vmem:[%s10904_s1 + $0x3c0] sm:$0xf]  ;;  %v6405_v21 = vor.u32 %v7233_v19, %v6404_v18  ;;  %v7265_v22 = vld [vmem:[%s10904_s1 + $0x3cc] sm:$0xf0]  ;;  %2154 = vmatpush.bf16.msra.mxu0 %v6149_v16  ;;  %s5530_s10 = sshll.u32 %s10797_s23, 4  ;;  %s7526_s7 = sshra.s32 %s5533_s11, 4  ;;  %s5531_s10 = int_to_ptr.vmem [resolvable:$true] %s5530_s10  ;;  %s7527_s7 = int_to_ptr.hbm [resolvable:$true] %s7526_s7 }
  0x1b   : > { %v6132_v23 = vld [vmem:[%s10904_s1 + $0xa0] sm:$0xf]  ;;  %v7165_v24 = vld [vmem:[%s10904_s1 + $0xac] sm:$0xf0]  ;;  %v6533_v25 = vor.u32 %v7265_v22, %v6532_v20  ;;  %2243 = vmatpush.bf16.msra.mxu1 %v6277_v17  ;;  %s7528_s12 = scalar_lea.hbm %s7527_s7, 128  ;;  %p7533_p0 = scmp.lt.s32.totalorder %s7527_s7, %s10908_s5 }
  0x1c   : > { %v6260_v26 = vld [vmem:[%s10904_s1 + $0x1a0] sm:$0xf]  ;;  %v7197_v27 = vld [vmem:[%s10904_s1 + $0x1ac] sm:$0xf0]  ;;  %v6133_v29 = vor.u32 %v7165_v24, %v6132_v23  ;;  %2332 = vmatpush.bf16.msra.mxu2 %v6405_v21  ;;  %p7529_p11 = scmp.ne.s32.totalorder %s7527_s7, %s7528_s12  ;;  %p7534_p1 = scmp.lt.s32.totalorder %s7532_s15, %s7528_s12 }
  0x1d   : > { %v6388_v28 = vld [vmem:[%s10904_s1 + $0x2a0] sm:$0xf]  ;;  %v7229_v30 = vld [vmem:[%s10904_s1 + $0x2ac] sm:$0xf0]  ;;  %v6261_v33 = vor.u32 %v7197_v27, %v6260_v26  ;;  %2421 = vmatpush.bf16.msra.mxu3 %v6533_v25 }
  0x1e   : > { %v6516_v31 = vld [vmem:[%s10904_s1 + $0x3a0] sm:$0xf]  ;;  %v7261_v32 = vld [vmem:[%s10904_s1 + $0x3ac] sm:$0xf0]  ;;  %v6389_v34 = vor.u32 %v7229_v30, %v6388_v28  ;;  %2155 = vmatpush.bf16.msra.mxu0 %v6133_v29  ;;  %p7530_p12 = pnand %p7529_p11, %p7646_p5  ;;  %p7535_p2 = por %p7534_p1, %p7533_p0 }
  0x1f   : > { %v6116_v35 = vld [vmem:[%s10904_s1 + $0x80] sm:$0xf]  ;;  %v7161_v36 = vld [vmem:[%s10904_s1 + $0x8c] sm:$0xf0]  ;;  %v6517_v38 = vor.u32 %v7261_v32, %v6516_v31  ;;  %2244 = vmatpush.bf16.msra.mxu1 %v6261_v33  ;;  %v7171_v32 = vld [vmem:[%s10904_s1 + $0xe4] sm:$0xf] }
  0x20   : > { %v6244_v37 = vld [vmem:[%s10904_s1 + $0x180] sm:$0xf]  ;;  %v7193_v39 = vld [vmem:[%s10904_s1 + $0x18c] sm:$0xf0]  ;;  %v6117_v44 = vor.u32 %v7161_v36, %v6116_v35  ;;  %2333 = vmatpush.bf16.msra.mxu2 %v6389_v34  ;;  %v6166_v33 = vld [vmem:[%s10904_s1 + $0xf0] sm:$0xf0]  ;;  %p7531_p13 = pneg %p7530_p12 }
  0x21   : > { %v6372_v40 = vld [vmem:[%s10904_s1 + $0x280] sm:$0xf]  ;;  %v7225_v41 = vld [vmem:[%s10904_s1 + $0x28c] sm:$0xf0]  ;;  %v6245_v45 = vor.u32 %v7193_v39, %v6244_v37  ;;  %2422 = vmatpush.bf16.msra.mxu3 %v6517_v38 }
  0x22   : > { %v6500_v42 = vld [vmem:[%s10904_s1 + $0x380] sm:$0xf]  ;;  %v7257_v43 = vld [vmem:[%s10904_s1 + $0x38c] sm:$0xf0]  ;;  %v6373_v46 = vor.u32 %v7225_v41, %v6372_v40  ;;  %2156 = vmatpush.bf16.msra.mxu0 %v6117_v44  ;;  %v7034_v41 = vld [vmem:[%s7867_s26 + $0x18] sm:$0xf0]  ;;  %p7536_p3 = pnand %p7535_p2, %p7531_p13 }
  0x23   : > { %v6100_v47 = vld [vmem:[%s10904_s1 + $0x60] sm:$0xf]  ;;  %v7157_v48 = vld [vmem:[%s10904_s1 + $0x6c] sm:$0xf0]  ;;  %v6501_v50 = vor.u32 %v7257_v43, %v6500_v42  ;;  %2245 = vmatpush.bf16.msra.mxu1 %v6245_v45  ;;  %v7031_v42 = vld [vmem:[%s7867_s26 + $0x4] sm:$0xf] }
  0x24   : > { %v6228_v49 = vld [vmem:[%s10904_s1 + $0x160] sm:$0xf]  ;;  %v7189_v51 = vld [vmem:[%s10904_s1 + $0x16c] sm:$0xf0]  ;;  %v6101_v56 = vor.u32 %v7157_v48, %v6100_v47  ;;  %2334 = vmatpush.bf16.msra.mxu2 %v6373_v46  ;;  %v5612_v46 = vld [vmem:[%s7867_s26 + $0x8] sm:$0xf]  ;;  %v6169_v48 = vor.u32 %v7171_v32, %v6166_v33 }
  0x25   : > { %v6356_v52 = vld [vmem:[%s10904_s1 + $0x260] sm:$0xf]  ;;  %v7221_v53 = vld [vmem:[%s10904_s1 + $0x26c] sm:$0xf0]  ;;  %v6229_v57 = vor.u32 %v7189_v51, %v6228_v49  ;;  %2423 = vmatpush.bf16.msra.mxu3 %v6501_v50  ;;  %v7035_v47 = vld [vmem:[%s7867_s26 + $0x20] sm:$0xf0] }
  0x26   : > { %v6484_v54 = vld [vmem:[%s10904_s1 + $0x360] sm:$0xf]  ;;  %v7253_v55 = vld [vmem:[%s10904_s1 + $0x36c] sm:$0xf0]  ;;  %v6357_v58 = vor.u32 %v7221_v53, %v6356_v52  ;;  %2157 = vmatpush.bf16.msra.mxu0 %v6101_v56  ;;  %v7888_v50 = vor.u32 %v7035_v47, %v5612_v46  ;;  %v7032_v51 = vld [vmem:[%s7867_s26 + $0xc] sm:$0xf] }
  0x27   : > { %v6084_v59 = vld [vmem:[%s10904_s1 + $0x40] sm:$0xf]  ;;  %v7153_v60 = vld [vmem:[%s10904_s1 + $0x4c] sm:$0xf0]  ;;  %v6485_v62 = vor.u32 %v7253_v55, %v6484_v54  ;;  %2246 = vmatpush.bf16.msra.mxu1 %v6229_v57  ;;  %v5614_v52 = vld [vmem:[%s7867_s26 + $0x24] sm:$0xf0] }
  0x28   : > { %v6212_v61 = vld [vmem:[%s10904_s1 + $0x140] sm:$0xf]  ;;  %v7185_v63 = vld [vmem:[%s10904_s1 + $0x14c] sm:$0xf0]  ;;  %v6085_v4 = vor.u32 %v7153_v60, %v6084_v59  ;;  %2335 = vmatpush.bf16.msra.mxu2 %v6357_v58  ;;  %11159 = vst [vmem:[#allocation7_spill] sm:$0xff] %v7888_v50  ;;  %v7892_v53 = vor.u32 %v7032_v51, %v5614_v52 }
  0x29   : > { %v6340_v0 = vld [vmem:[%s10904_s1 + $0x240] sm:$0xf]  ;;  %v7217_v1 = vld [vmem:[%s10904_s1 + $0x24c] sm:$0xf0]  ;;  %v6213_v7 = vor.u32 %v7185_v63, %v6212_v61  ;;  %2424 = vmatpush.bf16.msra.mxu3 %v6485_v62  ;;  %v7167_v58 = vld [vmem:[%s10904_s1 + $0xc4] sm:$0xf] }
  0x2a   : > { %v6468_v2 = vld [vmem:[%s10904_s1 + $0x340] sm:$0xf]  ;;  %v7249_v3 = vld [vmem:[%s10904_s1 + $0x34c] sm:$0xf0]  ;;  %v6341_v8 = vor.u32 %v7217_v1, %v6340_v0  ;;  %2158 = vmatpush.bf16.msra.mxu0 %v6085_v4  ;;  %11160 = vst [vmem:[#allocation8_spill] sm:$0xff] %v7892_v53 }
  0x2b   : > { %v6068_v5 = vld [vmem:[%s10904_s1 + $0x20] sm:$0xf]  ;;  %v7149_v6 = vld [vmem:[%s10904_s1 + $0x2c] sm:$0xf0]  ;;  %v6469_v12 = vor.u32 %v7249_v3, %v6468_v2  ;;  %2247 = vmatpush.bf16.msra.mxu1 %v6213_v7  ;;  %v6150_v60 = vld [vmem:[%s10904_s1 + $0xd0] sm:$0xf0] }
  0x2c   : > { %v6196_v9 = vld [vmem:[%s10904_s1 + $0x120] sm:$0xf]  ;;  %v7181_v10 = vld [vmem:[%s10904_s1 + $0x12c] sm:$0xf0]  ;;  %v6069_v17 = vor.u32 %v7149_v6, %v6068_v5  ;;  %2336 = vmatpush.bf16.msra.mxu2 %v6341_v8  ;;  %v6153_v63 = vor.u32 %v7167_v58, %v6150_v60  ;;  %v5632_v1 = vld [vmem:[%s7867_s26 + $0x38] sm:$0xf] }
  0x2d   : > { %v6324_v11 = vld [vmem:[%s10904_s1 + $0x220] sm:$0xf]  ;;  %v7213_v13 = vld [vmem:[%s10904_s1 + $0x22c] sm:$0xf0]  ;;  %v6197_v21 = vor.u32 %v7181_v10, %v6196_v9  ;;  %2425 = vmatpush.bf16.msra.mxu3 %v6469_v12  ;;  %v7041_v2 = vld [vmem:[%s7867_s26 + $0x50] sm:$0xf0] }
  0x2e   : > { %v6452_v14 = vld [vmem:[%s10904_s1 + $0x320] sm:$0xf]  ;;  %v7245_v15 = vld [vmem:[%s10904_s1 + $0x32c] sm:$0xf0]  ;;  %v6325_v22 = vor.u32 %v7213_v13, %v6324_v11  ;;  %2159 = vmatpush.bf16.msra.mxu0 %v6069_v17  ;;  %v7038_v3 = vld [vmem:[%s7867_s26 + $0x3c] sm:$0xf]  ;;  %v7924_v9 = vor.u32 %v7041_v2, %v5632_v1 }
  0x2f   : > { %v6052_v16 = vld [vmem:[%s10904_s1] sm:$0xf]  ;;  %v7145_v18 = vld [vmem:[%s10904_s1 + $0xc] sm:$0xf0]  ;;  %v6453_v25 = vor.u32 %v7245_v15, %v6452_v14  ;;  %2248 = vmatpush.bf16.msra.mxu1 %v6197_v21  ;;  %v5634_v4 = vld [vmem:[%s7867_s26 + $0x54] sm:$0xf0] }
  0x30   : > { %v6180_v19 = vld [vmem:[%s10904_s1 + $0x100] sm:$0xf]  ;;  %v7177_v20 = vld [vmem:[%s10904_s1 + $0x10c] sm:$0xf0]  ;;  %v6053_v30 = vor.u32 %v7145_v18, %v6052_v16  ;;  %2337 = vmatpush.bf16.msra.mxu2 %v6325_v22  ;;  %v7042_v6 = vld [vmem:[%s7867_s26 + $0x58] sm:$0xf0]  ;;  %v7926_v10 = vor.u32 %v7038_v3, %v5634_v4 }
  0x31   : > { %v6308_v23 = vld [vmem:[%s10904_s1 + $0x200] sm:$0xf]  ;;  %v7209_v24 = vld [vmem:[%s10904_s1 + $0x20c] sm:$0xf0]  ;;  %v6181_v34 = vor.u32 %v7177_v20, %v6180_v19  ;;  %2426 = vmatpush.bf16.msra.mxu3 %v6453_v25  ;;  %v7039_v7 = vld [vmem:[%s7867_s26 + $0x44] sm:$0xf] }
  0x32   : > { %v6436_v26 = vld [vmem:[%s10904_s1 + $0x300] sm:$0xf]  ;;  %v7241_v27 = vld [vmem:[%s10904_s1 + $0x30c] sm:$0xf0]  ;;  %v6309_v35 = vor.u32 %v7209_v24, %v6308_v23  ;;  %2160 = vmatpush.bf16.msra.mxu0 %v6053_v30  ;;  %11161 = vst [vmem:[#allocation9_spill] sm:$0xff] %v7924_v9 }
  0x33   : > { %v6820_v28 = vld [vmem:[%s10904_s1 + $0x600] sm:$0xf]  ;;  %v7337_v29 = vld [vmem:[%s10904_s1 + $0x60c] sm:$0xf0]  ;;  %v6437_v39 = vor.u32 %v7241_v27, %v6436_v26  ;;  %2249 = vmatpush.bf16.msra.mxu1 %v6181_v34  ;;  %11162 = vst [vmem:[#allocation10_spill] sm:$0xff] %v7926_v10 }
  0x34   : > { %v6676_v31 = vld [vmem:[%s10904_s1 + $0x4e0] sm:$0xf]  ;;  %v7301_v36 = vld [vmem:[%s10904_s1 + $0x4ec] sm:$0xf0]  ;;  %v6821_v43 = vor.u32 %v7337_v29, %v6820_v28  ;;  %2338 = vmatpush.bf16.msra.mxu2 %v6309_v35  ;;  %v7048_v14 = vld [vmem:[%s7867_s26 + $0x88] sm:$0xf0] }
  0x35   : > { %v6804_v37 = vld [vmem:[%s10904_s1 + $0x5e0] sm:$0xf]  ;;  %v7333_v38 = vld [vmem:[%s10904_s1 + $0x5ec] sm:$0xf0]  ;;  %v6677_v54 = vor.u32 %v7301_v36, %v6676_v31  ;;  %2427 = vmatpush.bf16.msra.mxu3 %v6437_v39  ;;  %v7045_v15 = vld [vmem:[%s7867_s26 + $0x74] sm:$0xf] }
  0x36   : > { %v5604_v40 = vld [vmem:[%s7867_s26] sm:$0xf]  ;;  %v6805_v55 = vor.u32 %v7333_v38, %v6804_v37  ;;  %v7297_v57 = vld [vmem:[%s10904_s1 + $0x4cc] sm:$0xf0]  ;;  %v5668_v17 = vld [vmem:[%s7867_s26 + $0x78] sm:$0xf] }
  0x37   : > { %v7881_v44 = vor.u32 %v7034_v41, %v5604_v40  ;;  %v5606_v45 = vld [vmem:[%s7867_s26 + $0x1c] sm:$0xf0]  ;;  %2339 = vmatmul.bf16.vlgmr.msra.gmra.mxu2 %v7888_v50  ;;  %2509 = vmatpush.bf16.msrb.mxu0 %v6677_v54  ;;  %v7329_v62 = vld [vmem:[%s10904_s1 + $0x5cc] sm:$0xf0]  ;;  %v7049_v18 = vld [vmem:[%s7867_s26 + $0x90] sm:$0xf0] }
  0x38   : > { %v7886_v49 = vor.u32 %v7031_v42, %v5606_v45  ;;  %2694 = vmatpush.bf16.msrb.mxu2 %v6821_v43  ;;  %2428 = vmatmul.bf16.vlgmr.msra.gmra.mxu3 %v7892_v53  ;;  %v6660_v56 = vld [vmem:[%s10904_s1 + $0x4c0] sm:$0xf]  ;;  %v5660_v13 = vld [vmem:[%s7867_s26 + $0x70] sm:$0xf]  ;;  %v7046_v19 = vld [vmem:[%s7867_s26 + $0x7c] sm:$0xf]  ;;  %v7948_v23 = vor.u32 %v7049_v18, %v5668_v17 }
  0x39   : > { %11157 = vst [vmem:[#allocation5_spill] sm:$0xff] %v7881_v44  ;;  %2161 = vmatmul.bf16.vlgmr.msra.gmra.mxu0 %v7881_v44  ;;  %2776 = vmatpush.bf16.msrb.mxu3 %v6169_v48  ;;  %v6661_v59 = vor.u32 %v7297_v57, %v6660_v56  ;;  %v6788_v61 = vld [vmem:[%s10904_s1 + $0x5c0] sm:$0xf]  ;;  %v5662_v16 = vld [vmem:[%s7867_s26 + $0x8c] sm:$0xf0]  ;;  %v7944_v21 = vor.u32 %v7048_v14, %v5660_v13 }
  0x3a   : > { %11158 = vst [vmem:[#allocation6_spill] sm:$0xff] %v7886_v49  ;;  %2250 = vmatmul.bf16.vlgmr.msra.gmra.mxu1 %v7886_v49  ;;  %v6789_v0 = vor.u32 %v7329_v62, %v6788_v61  ;;  %v5640_v5 = vld [vmem:[%s7867_s26 + $0x40] sm:$0xf]  ;;  %v5670_v20 = vld [vmem:[%s7867_s26 + $0x94] sm:$0xf0]  ;;  %v7946_v22 = vor.u32 %v7045_v15, %v5662_v16 }
  0x3b   : > { %2598 = vmatpush.bf16.msrb.mxu1 %v6805_v55  ;;  %2510 = vmatpush.bf16.msrb.mxu0 %v6661_v59  ;;  %v5642_v8 = vld [vmem:[%s7867_s26 + $0x5c] sm:$0xf0]  ;;  %v7928_v11 = vor.u32 %v7042_v6, %v5640_v5  ;;  %11165 = vst [vmem:[#allocation13_spill] sm:$0xff] %v7944_v21  ;;  %v7950_v24 = vor.u32 %v7046_v19, %v5670_v20  ;;  %v7293_v26 = vld [vmem:[%s10904_s1 + $0x4ac] sm:$0xf0] }
  0x3c   : > { %v7930_v12 = vor.u32 %v7039_v7, %v5642_v8  ;;  %11166 = vst [vmem:[#allocation14_spill] sm:$0xff] %v7946_v22  ;;  %v6644_v25 = vld [vmem:[%s10904_s1 + $0x4a0] sm:$0xf]  ;;  %v7163_v27 = vld [vmem:[%s10904_s1 + $0xa4] sm:$0xf] }
  0x3d   : > { %2777 = vmatpush.bf16.msrb.mxu3 %v6153_v63  ;;  %11163 = vst [vmem:[#allocation11_spill] sm:$0xff] %v7928_v11  ;;  %v6645_v28 = vor.u32 %v7293_v26, %v6644_v25  ;;  %v6134_v29 = vld [vmem:[%s10904_s1 + $0xb0] sm:$0xf0]  ;;  %v6772_v30 = vld [vmem:[%s10904_s1 + $0x5a0] sm:$0xf] }
  0x3e   : > { %11164 = vst [vmem:[#allocation12_spill] sm:$0xff] %v7930_v12  ;;  %v7325_v31 = vld [vmem:[%s10904_s1 + $0x5ac] sm:$0xf0]  ;;  %v6137_v32 = vor.u32 %v7163_v27, %v6134_v29  ;;  %v5688_v34 = vld [vmem:[%s7867_s26 + $0xa8] sm:$0xf] }
  0x3f   : > { %2599 = vmatpush.bf16.msrb.mxu1 %v6789_v0  ;;  %11167 = vst [vmem:[#allocation15_spill] sm:$0xff] %v7948_v23  ;;  %v6773_v33 = vor.u32 %v7325_v31, %v6772_v30  ;;  %2511 = vmatpush.bf16.msrb.mxu0 %v6645_v28  ;;  %v7055_v35 = vld [vmem:[%s7867_s26 + $0xc0] sm:$0xf0]  ;;  %v7052_v36 = vld [vmem:[%s7867_s26 + $0xac] sm:$0xf] }
  0x40   : > { %11168 = vst [vmem:[#allocation16_spill] sm:$0xff] %v7950_v24  ;;  %v5690_v37 = vld [vmem:[%s7867_s26 + $0xc4] sm:$0xf0]  ;;  %v5696_v38 = vld [vmem:[%s7867_s26 + $0xb0] sm:$0xf]  ;;  %v7982_v42 = vor.u32 %v7055_v35, %v5688_v34 }
  0x41   : > { %2778 = vmatpush.bf16.msrb.mxu3 %v6137_v32  ;;  %v7056_v39 = vld [vmem:[%s7867_s26 + $0xc8] sm:$0xf0]  ;;  %v7053_v40 = vld [vmem:[%s7867_s26 + $0xb4] sm:$0xf]  ;;  %v5698_v41 = vld [vmem:[%s7867_s26 + $0xcc] sm:$0xf0]  ;;  %v7984_v43 = vor.u32 %v7052_v36, %v5690_v37 }
  0x42   : > { %11169 = vst [vmem:[#allocation17_spill] sm:$0xff] %v7982_v42  ;;  %v7986_v45 = vor.u32 %v7056_v39, %v5696_v38  ;;  %v7988_v46 = vor.u32 %v7053_v40, %v5698_v41  ;;  %v5716_v47 = vld [vmem:[%s7867_s26 + $0xe0] sm:$0xf]  ;;  %v7062_v48 = vld [vmem:[%s7867_s26 + $0xf8] sm:$0xf0] }
  0x43   : > { %2600 = vmatpush.bf16.msrb.mxu1 %v6773_v33  ;;  %11170 = vst [vmem:[#allocation18_spill] sm:$0xff] %v7984_v43  ;;  %v7059_v51 = vld [vmem:[%s7867_s26 + $0xe4] sm:$0xf]  ;;  %v5718_v52 = vld [vmem:[%s7867_s26 + $0xfc] sm:$0xf0]  ;;  %v8002_v58 = vor.u32 %v7062_v48, %v5716_v47 }
  0x44   : > { %11171 = vst [vmem:[#allocation19_spill] sm:$0xff] %v7986_v45  ;;  %v5724_v54 = vld [vmem:[%s7867_s26 + $0xe8] sm:$0xf]  ;;  %v7063_v55 = vld [vmem:[%s7867_s26 + $0x100] sm:$0xf0]  ;;  %v8004_v59 = vor.u32 %v7059_v51, %v5718_v52 }
  0x45   : > { %11172 = vst [vmem:[#allocation20_spill] sm:$0xff] %v7988_v46  ;;  %v7060_v56 = vld [vmem:[%s7867_s26 + $0xec] sm:$0xf]  ;;  %v5726_v57 = vld [vmem:[%s7867_s26 + $0x104] sm:$0xf0]  ;;  %v8006_v60 = vor.u32 %v7063_v55, %v5724_v54 }
  0x46   : > { %11173 = vst [vmem:[#allocation21_spill] sm:$0xff] %v8002_v58  ;;  %v8008_v61 = vor.u32 %v7060_v56, %v5726_v57  ;;  %v6628_v62 = vld [vmem:[%s10904_s1 + $0x480] sm:$0xf]  ;;  %v7289_v63 = vld [vmem:[%s10904_s1 + $0x48c] sm:$0xf0] }
  0x47   : > { %2344 = vmatmul.bf16.gmra.mxu2 %v7928_v11  ;;  %11174 = vst [vmem:[#allocation22_spill] sm:$0xff] %v8004_v59  ;;  %v7159_v0 = vld [vmem:[%s10904_s1 + $0x84] sm:$0xf]  ;;  %v6629_v1 = vor.u32 %v7289_v63, %v6628_v62  ;;  %v6118_v2 = vld [vmem:[%s10904_s1 + $0x90] sm:$0xf0] }
  0x48   : > { %2433 = vmatmul.bf16.gmra.mxu3 %v7930_v12  ;;  %11175 = vst [vmem:[#allocation23_spill] sm:$0xff] %v8006_v60  ;;  %v6756_v3 = vld [vmem:[%s10904_s1 + $0x580] sm:$0xf]  ;;  %v7321_v4 = vld [vmem:[%s10904_s1 + $0x58c] sm:$0xf0]  ;;  %v6121_v5 = vor.u32 %v7159_v0, %v6118_v2 }
  0x49   : > { %2166 = vmatmul.bf16.gmra.mxu0 %v7924_v9  ;;  %11176 = vst [vmem:[#allocation24_spill] sm:$0xff] %v8008_v61  ;;  %v6757_v6 = vor.u32 %v7321_v4, %v6756_v3  ;;  %v5744_v7 = vld [vmem:[%s7867_s26 + $0x118] sm:$0xf]  ;;  %v7069_v8 = vld [vmem:[%s7867_s26 + $0x130] sm:$0xf0] }
  0x4a   : > { %2255 = vmatmul.bf16.gmra.mxu1 %v7926_v10  ;;  %2512 = vmatpush.bf16.msrb.mxu0 %v6629_v1  ;;  %v7066_v13 = vld [vmem:[%s7867_s26 + $0x11c] sm:$0xf]  ;;  %v5746_v14 = vld [vmem:[%s7867_s26 + $0x134] sm:$0xf0]  ;;  %v5752_v15 = vld [vmem:[%s7867_s26 + $0x120] sm:$0xf]  ;;  %v8040_v19 = vor.u32 %v7069_v8, %v5744_v7 }
  0x4b   : > { %2779 = vmatpush.bf16.msrb.mxu3 %v6121_v5  ;;  %2601 = vmatpush.bf16.msrb.mxu1 %v6757_v6  ;;  %v7070_v16 = vld [vmem:[%s7867_s26 + $0x138] sm:$0xf0]  ;;  %v7067_v17 = vld [vmem:[%s7867_s26 + $0x124] sm:$0xf]  ;;  %v5754_v18 = vld [vmem:[%s7867_s26 + $0x13c] sm:$0xf0]  ;;  %v8042_v20 = vor.u32 %v7066_v13, %v5746_v14 }
  0x4c   : > { %11177 = vst [vmem:[#allocation25_spill] sm:$0xff] %v8040_v19  ;;  %v8044_v25 = vor.u32 %v7070_v16, %v5752_v15  ;;  %v8046_v26 = vor.u32 %v7067_v17, %v5754_v18  ;;  %v5772_v27 = vld [vmem:[%s7867_s26 + $0x150] sm:$0xf]  ;;  %v7076_v28 = vld [vmem:[%s7867_s26 + $0x168] sm:$0xf0] }
  0x4d   : > { %11178 = vst [vmem:[#allocation26_spill] sm:$0xff] %v8042_v20  ;;  %v7073_v29 = vld [vmem:[%s7867_s26 + $0x154] sm:$0xf]  ;;  %v5774_v30 = vld [vmem:[%s7867_s26 + $0x16c] sm:$0xf0]  ;;  %v8060_v35 = vor.u32 %v7076_v28, %v5772_v27 }
  0x4e   : > { %11179 = vst [vmem:[#allocation27_spill] sm:$0xff] %v8044_v25  ;;  %v5780_v31 = vld [vmem:[%s7867_s26 + $0x158] sm:$0xf]  ;;  %v7077_v32 = vld [vmem:[%s7867_s26 + $0x170] sm:$0xf0]  ;;  %v8062_v36 = vor.u32 %v7073_v29, %v5774_v30 }
  0x4f   : > { %11180 = vst [vmem:[#allocation28_spill] sm:$0xff] %v8046_v26  ;;  %v7074_v33 = vld [vmem:[%s7867_s26 + $0x15c] sm:$0xf]  ;;  %v5782_v34 = vld [vmem:[%s7867_s26 + $0x174] sm:$0xf0]  ;;  %v8064_v37 = vor.u32 %v7077_v32, %v5780_v31 }
  0x50   : > { %11181 = vst [vmem:[#allocation29_spill] sm:$0xff] %v8060_v35  ;;  %v8066_v38 = vor.u32 %v7074_v33, %v5782_v34  ;;  %v6612_v39 = vld [vmem:[%s10904_s1 + $0x460] sm:$0xf]  ;;  %v7285_v40 = vld [vmem:[%s10904_s1 + $0x46c] sm:$0xf0] }
  0x51   : > { %11182 = vst [vmem:[#allocation30_spill] sm:$0xff] %v8062_v36  ;;  %v7155_v41 = vld [vmem:[%s10904_s1 + $0x64] sm:$0xf]  ;;  %v6613_v47 = vor.u32 %v7285_v40, %v6612_v39  ;;  %v6102_v48 = vld [vmem:[%s10904_s1 + $0x70] sm:$0xf0] }
  0x52   : > { %11183 = vst [vmem:[#allocation31_spill] sm:$0xff] %v8064_v37  ;;  %v6105_v51 = vor.u32 %v7155_v41, %v6102_v48  ;;  %v6740_v52 = vld [vmem:[%s10904_s1 + $0x560] sm:$0xf]  ;;  %v7317_v54 = vld [vmem:[%s10904_s1 + $0x56c] sm:$0xf0] }
  0x53   : > { %11184 = vst [vmem:[#allocation32_spill] sm:$0xff] %v8066_v38  ;;  %2513 = vmatpush.bf16.msrb.mxu0 %v6613_v47  ;;  %v6741_v55 = vor.u32 %v7317_v54, %v6740_v52  ;;  %v5800_v56 = vld [vmem:[%s7867_s26 + $0x188] sm:$0xf]  ;;  %v7083_v57 = vld [vmem:[%s7867_s26 + $0x1a0] sm:$0xf0] }
  0x54   : > { %2780 = vmatpush.bf16.msrb.mxu3 %v6105_v51  ;;  %v7080_v62 = vld [vmem:[%s7867_s26 + $0x18c] sm:$0xf]  ;;  %v5802_v63 = vld [vmem:[%s7867_s26 + $0x1a4] sm:$0xf0]  ;;  %v5808_v0 = vld [vmem:[%s7867_s26 + $0x190] sm:$0xf]  ;;  %v8098_v4 = vor.u32 %v7083_v57, %v5800_v56 }
  0x55   : > { %v7084_v1 = vld [vmem:[%s7867_s26 + $0x1a8] sm:$0xf0]  ;;  %2602 = vmatpush.bf16.msrb.mxu1 %v6741_v55  ;;  %v7081_v2 = vld [vmem:[%s7867_s26 + $0x194] sm:$0xf]  ;;  %v5810_v3 = vld [vmem:[%s7867_s26 + $0x1ac] sm:$0xf0]  ;;  %v8100_v5 = vor.u32 %v7080_v62, %v5802_v63 }
  0x56   : > { %11185 = vst [vmem:[#allocation33_spill] sm:$0xff] %v8098_v4  ;;  %v8102_v6 = vor.u32 %v7084_v1, %v5808_v0  ;;  %v8104_v7 = vor.u32 %v7081_v2, %v5810_v3  ;;  %v554_v8 = vld [vmem:[%s10905_s2] sm:$0xf]  ;;  %v7090_v15 = vld [vmem:[%s7867_s26 + $0x1d8] sm:$0xf0] }
  0x57   : > { %2349 = vmatmul.bf16.gmra.mxu2 %v7948_v23  ;;  %11186 = vst [vmem:[#allocation34_spill] sm:$0xff] %v8100_v5  ;;  %v8113_v13 = vperm.slane %v554_v8, 0  ;;  %v5828_v14 = vld [vmem:[%s7867_s26 + $0x1c0] sm:$0xf]  ;;  %v7087_v16 = vld [vmem:[%s7867_s26 + $0x1c4] sm:$0xf] }
  0x58   : > { %2438 = vmatmul.bf16.gmra.mxu3 %v7950_v24  ;;  %11187 = vst [vmem:[#allocation35_spill] sm:$0xff] %v8102_v6  ;;  %v5830_v17 = vld [vmem:[%s7867_s26 + $0x1dc] sm:$0xf0]  ;;  %v5836_v18 = vld [vmem:[%s7867_s26 + $0x1c8] sm:$0xf]  ;;  %v8123_v30 = vor.u32 %v7090_v15, %v5828_v14 }
  0x59   : > { %2171 = vmatmul.bf16.gmra.mxu0 %v7944_v21  ;;  %11188 = vst [vmem:[#allocation36_spill] sm:$0xff] %v8104_v7  ;;  %v7091_v27 = vld [vmem:[%s7867_s26 + $0x1e0] sm:$0xf0]  ;;  %v7088_v28 = vld [vmem:[%s7867_s26 + $0x1cc] sm:$0xf]  ;;  %v8125_v32 = vor.u32 %v7087_v16, %v5830_v17 }
  0x5a   : > { %2260 = vmatmul.bf16.gmra.mxu1 %v7946_v22  ;;  %v5838_v29 = vld [vmem:[%s7867_s26 + $0x1e4] sm:$0xf0]  ;;  %11189 = vst [vmem:[#allocation37_spill] sm:$0xff] %v8123_v30  ;;  %v8127_v33 = vor.u32 %v7091_v27, %v5836_v18  ;;  %v6596_v47 = vld [vmem:[%s10904_s1 + $0x440] sm:$0xf] }
  0x5b   : > { %11190 = vst [vmem:[#allocation38_spill] sm:$0xff] %v8125_v32  ;;  %v8130_v40 = vor.u32 %v7088_v28, %v5838_v29  ;;  %v7281_v48 = vld [vmem:[%s10904_s1 + $0x44c] sm:$0xf0]  ;;  %v7151_v51 = vld [vmem:[%s10904_s1 + $0x44] sm:$0xf] }
  0x5c   : > { %11191 = vst [vmem:[#allocation39_spill] sm:$0xff] %v8127_v33  ;;  %v6597_v52 = vor.u32 %v7281_v48, %v6596_v47  ;;  %v6086_v54 = vld [vmem:[%s10904_s1 + $0x50] sm:$0xf0]  ;;  %v6724_v3 = vld [vmem:[%s10904_s1 + $0x540] sm:$0xf] }
  0x5d   : > { %11192 = vst [vmem:[#allocation40_spill] sm:$0xff] %v8130_v40  ;;  %v6089_v56 = vor.u32 %v7151_v51, %v6086_v54  ;;  %v7313_v8 = vld [vmem:[%s10904_s1 + $0x54c] sm:$0xf0]  ;;  %v5856_v16 = vld [vmem:[%s7867_s26 + $0x1f8] sm:$0xf] }
  0x5e   : > { %2514 = vmatpush.bf16.msrb.mxu0 %v6597_v52  ;;  %v6725_v15 = vor.u32 %v7313_v8, %v6724_v3  ;;  %v7097_v17 = vld [vmem:[%s7867_s26 + $0x210] sm:$0xf0]  ;;  %v7094_v18 = vld [vmem:[%s7867_s26 + $0x1fc] sm:$0xf]  ;;  %v5858_v27 = vld [vmem:[%s7867_s26 + $0x214] sm:$0xf0] }
  0x5f   : > { %2781 = vmatpush.bf16.msrb.mxu3 %v6089_v56  ;;  %v5864_v28 = vld [vmem:[%s7867_s26 + $0x200] sm:$0xf]  ;;  %v7098_v29 = vld [vmem:[%s7867_s26 + $0x218] sm:$0xf0]  ;;  %v8167_v52 = vor.u32 %v7094_v18, %v5858_v27  ;;  %v5884_v18 = vld [vmem:[%s7867_s26 + $0x230] sm:$0xf] }
  0x60   : > { %2603 = vmatpush.bf16.msrb.mxu1 %v6725_v15  ;;  %v8169_v54 = vor.u32 %v7098_v29, %v5864_v28  ;;  %v7104_v27 = vld [vmem:[%s7867_s26 + $0x248] sm:$0xf0]  ;;  %v7101_v28 = vld [vmem:[%s7867_s26 + $0x234] sm:$0xf]  ;;  %v5886_v29 = vld [vmem:[%s7867_s26 + $0x24c] sm:$0xf0] }
  0x61   : > { %11194 = vst [vmem:[#allocation42_spill] sm:$0xff] %v8167_v52 }
  0x62   : > { %11195 = vst [vmem:[#allocation43_spill] sm:$0xff] %v8169_v54 }
  0x67   : > { %2354 = vmatmul.bf16.gmra.mxu2 %v7986_v45 }
  0x68   : > { %2443 = vmatmul.bf16.gmra.mxu3 %v7988_v46 }
  0x69   : > { %2176 = vmatmul.bf16.gmra.mxu0 %v7982_v42 }
  0x6a   : > { %2265 = vmatmul.bf16.gmra.mxu1 %v7984_v43 }
  0x77   : > { %2359 = vmatmul.bf16.gmra.mxu2 %v8006_v60 }
  0x78   : > { %2448 = vmatmul.bf16.gmra.mxu3 %v8008_v61 }
  0x79   : > { %2181 = vmatmul.bf16.gmra.mxu0 %v8002_v58 }
  0x7a   : > { %2270 = vmatmul.bf16.gmra.mxu1 %v8004_v59 }
  0x87   : > { %2364 = vmatmul.bf16.gmra.mxu2 %v8044_v25 }
  0x88   : > { %2453 = vmatmul.bf16.gmra.mxu3 %v8046_v26 }
  0x89   : > { %2186 = vmatmul.bf16.gmra.mxu0 %v8040_v19 }
  0x8a   : > { %2275 = vmatmul.bf16.gmra.mxu1 %v8042_v20 }
  0x97   : > { %2369 = vmatmul.bf16.gmra.mxu2 %v8064_v37 }
  0x98   : > { %2458 = vmatmul.bf16.gmra.mxu3 %v8066_v38 }
  0x99   : > { %2191 = vmatmul.bf16.gmra.mxu0 %v8060_v35 }
  0x9a   : > { %2280 = vmatmul.bf16.gmra.mxu1 %v8062_v36 }
  0xa7   : > { %2374 = vmatmul.bf16.gmra.mxu2 %v8102_v6 }
  0xa8   : > { %2463 = vmatmul.bf16.gmra.mxu3 %v8104_v7 }
  0xa9   : > { %2196 = vmatmul.bf16.gmra.mxu0 %v8098_v4 }
  0xaa   : > { %2285 = vmatmul.bf16.gmra.mxu1 %v8100_v5 }
  0xb6   : > { %v2162_v31 = vpop.f32.mrf.mxu0 }
  0xb7   : > { %v2163_v34 = vadd.f32 %v2162_v31, %v8113_v13  ;;  %v2251_v39 = vpop.f32.mrf.mxu1  ;;  %2379 = vmatmul.bf16.gmra.mxu2 %v8127_v33  ;;  %v7095_v31 = vld [vmem:[%s7867_s26 + $0x204] sm:$0xf] }
  0xb8   : > { %2468 = vmatmul.bf16.gmra.mxu3 %v8130_v40 }
  0xb9   : > { %v2252_v41 = vadd.f32 %v2251_v39, %v2163_v34  ;;  %2201 = vmatmul.bf16.gmra.mxu0 %v8123_v30  ;;  %v5866_v34 = vld [vmem:[%s7867_s26 + $0x21c] sm:$0xf0] }
  0xba   : > { %2290 = vmatmul.bf16.gmra.mxu1 %v8125_v32  ;;  %v2340_v55 = vpop.f32.mrf.mxu2 }
  0xbb   : > { %v2341_v57 = vadd.f32 %v2340_v55, %v2252_v41  ;;  %v2429_v62 = vpop.f32.mrf.mxu3  ;;  %v8165_v41 = vor.u32 %v7097_v17, %v5856_v16 }
  0xbd   : > { %v8149_v2 = vadd.f32 %v2429_v62, %v2341_v57  ;;  %11193 = vst [vmem:[#allocation41_spill] sm:$0xff] %v8165_v41  ;;  %v8172_v57 = vor.u32 %v7095_v31, %v5866_v34  ;;  %v5892_v31 = vld [vmem:[%s7867_s26 + $0x238] sm:$0xf]  ;;  %v7105_v34 = vld [vmem:[%s7867_s26 + $0x250] sm:$0xf0] }
  0xbe   : > { %v2164_v63 = vpop.f32.mrf.mxu0 }
  0xbf   : > { %v2165_v0 = vadd.f32 %v2164_v63, %v8113_v13  ;;  %v2253_v1 = vpop.f32.mrf.mxu1  ;;  %11196 = vst [vmem:[#allocation44_spill] sm:$0xff] %v8172_v57 }
  0xc1   : > { %v2254_v14 = vadd.f32 %v2253_v1, %v2165_v0 }
  0xc2   : > { %v2342_v39 = vpop.f32.mrf.mxu2 }
  0xc3   : > { %v2343_v47 = vadd.f32 %v2342_v39, %v2254_v14  ;;  %v2431_v48 = vpop.f32.mrf.mxu3  ;;  %v7102_v39 = vld [vmem:[%s7867_s26 + $0x23c] sm:$0xf] }
  0xc5   : > { %v8174_v62 = vadd.f32 %v2431_v48, %v2343_v47  ;;  %v5894_v47 = vld [vmem:[%s7867_s26 + $0x254] sm:$0xf0] }
  0xc6   : > { %v2167_v51 = vpop.f32.mrf.mxu0 }
  0xc7   : > { %v2168_v55 = vadd.f32 %v2167_v51, %v8113_v13  ;;  %v2256_v56 = vpop.f32.mrf.mxu1  ;;  %2384 = vmatmul.bf16.gmra.mxu2 %v8169_v54  ;;  %v8191_v51 = vor.u32 %v7104_v27, %v5884_v18  ;;  %v7277_v18 = vld [vmem:[%s10904_s1 + $0x42c] sm:$0xf0]  ;;  %v7147_v27 = vld [vmem:[%s10904_s1 + $0x24] sm:$0xf] }
  0xc8   : > { %2473 = vmatmul.bf16.gmra.mxu3 %v8172_v57 }
  0xc9   : > { %v2257_v63 = vadd.f32 %v2256_v56, %v2168_v55  ;;  %2206 = vmatmul.bf16.gmra.mxu0 %v8165_v41  ;;  %11197 = vst [vmem:[#allocation45_spill] sm:$0xff] %v8191_v51 }
  0xca   : > { %2295 = vmatmul.bf16.gmra.mxu1 %v8167_v52  ;;  %v2345_v0 = vpop.f32.mrf.mxu2 }
  0xcb   : > { %v2346_v1 = vadd.f32 %v2345_v0, %v2257_v63  ;;  %v2434_v3 = vpop.f32.mrf.mxu3  ;;  %v8193_v0 = vor.u32 %v7101_v28, %v5886_v29  ;;  %v6070_v29 = vld [vmem:[%s10904_s1 + $0x30] sm:$0xf0] }
  0xcd   : > { %v8181_v16 = vadd.f32 %v2434_v3, %v2346_v1  ;;  %11198 = vst [vmem:[#allocation46_spill] sm:$0xff] %v8193_v0 }
  0xce   : > { %v2169_v8 = vpop.f32.mrf.mxu0 }
  0xcf   : > { %v2170_v14 = vadd.f32 %v2169_v8, %v8113_v13  ;;  %v2258_v15 = vpop.f32.mrf.mxu1  ;;  %v8195_v8 = vor.u32 %v7105_v34, %v5892_v31  ;;  %v6073_v34 = vor.u32 %v7147_v27, %v6070_v29  ;;  %v7111_v27 = vld [vmem:[%s7867_s26 + $0x280] sm:$0xf0]  ;;  %v5914_v29 = vld [vmem:[%s7867_s26 + $0x284] sm:$0xf0] }
  0xd1   : > { %v2259_v17 = vadd.f32 %v2258_v15, %v2170_v14  ;;  %11199 = vst [vmem:[#allocation47_spill] sm:$0xff] %v8195_v8  ;;  %v8198_v14 = vor.u32 %v7102_v39, %v5894_v47  ;;  %2782 = vmatpush.bf16.msrb.mxu3 %v6073_v34  ;;  %v7109_v34 = vld [vmem:[%s7867_s26 + $0x274] sm:$0xf] }
  0xd2   : > { %v2347_v48 = vpop.f32.mrf.mxu2 }
  0xd3   : > { %v2348_v55 = vadd.f32 %v2347_v48, %v2259_v17  ;;  %v2436_v56 = vpop.f32.mrf.mxu3  ;;  %11200 = vst [vmem:[#allocation48_spill] sm:$0xff] %v8198_v14  ;;  %v6580_v17 = vld [vmem:[%s10904_s1 + $0x420] sm:$0xf] }
  0xd4   : > { %v6581_v28 = vor.u32 %v7277_v18, %v6580_v17  ;;  %v5912_v18 = vld [vmem:[%s7867_s26 + $0x268] sm:$0xf] }
  0xd5   : > { %v8200_v15 = vadd.f32 %v2436_v56, %v2348_v55 }
  0xd6   : > { %v2172_v63 = vpop.f32.mrf.mxu0  ;;  %2515 = vmatpush.bf16.msrb.mxu0 %v6581_v28  ;;  %v7108_v28 = vld [vmem:[%s7867_s26 + $0x26c] sm:$0xf] }
  0xd7   : > { %v2173_v1 = vadd.f32 %v2172_v63, %v8113_v13  ;;  %v2261_v3 = vpop.f32.mrf.mxu1  ;;  %2389 = vmatmul.bf16.gmra.mxu2 %v8195_v8  ;;  %v8237_v52 = vor.u32 %v7108_v28, %v5914_v29 }
  0xd8   : > { %2478 = vmatmul.bf16.gmra.mxu3 %v8198_v14  ;;  %v8235_v14 = vor.u32 %v7111_v27, %v5912_v18 }
  0xd9   : > { %v2262_v57 = vadd.f32 %v2261_v3, %v2173_v1  ;;  %2211 = vmatmul.bf16.gmra.mxu0 %v8191_v51  ;;  %v6708_v1 = vld [vmem:[%s10904_s1 + $0x520] sm:$0xf]  ;;  %11202 = vst [vmem:[#allocation50_spill] sm:$0xff] %v8237_v52 }
  0xda   : > { %2300 = vmatmul.bf16.gmra.mxu1 %v8193_v0  ;;  %v2350_v31 = vpop.f32.mrf.mxu2  ;;  %11201 = vst [vmem:[#allocation49_spill] sm:$0xff] %v8235_v14 }
  0xdb   : > { %v2351_v39 = vadd.f32 %v2350_v31, %v2262_v57  ;;  %v2439_v47 = vpop.f32.mrf.mxu3  ;;  %v7309_v57 = vld [vmem:[%s10904_s1 + $0x52c] sm:$0xf0] }
  0xdc   : > { %v6709_v17 = vor.u32 %v7309_v57, %v6708_v1  ;;  %v5920_v31 = vld [vmem:[%s7867_s26 + $0x270] sm:$0xf] }
  0xdd   : > { %v8219_v63 = vadd.f32 %v2439_v47, %v2351_v39  ;;  %v5922_v39 = vld [vmem:[%s7867_s26 + $0x28c] sm:$0xf0] }
  0xde   : > { %v2174_v48 = vpop.f32.mrf.mxu0  ;;  %2604 = vmatpush.bf16.msrb.mxu1 %v6709_v17  ;;  %v8242_v1 = vor.u32 %v7109_v34, %v5922_v39  ;;  %v7115_v34 = vld [vmem:[%s7867_s26 + $0x2a4] sm:$0xf]  ;;  %v5942_v39 = vld [vmem:[%s7867_s26 + $0x2bc] sm:$0xf0] }
  0xdf   : > { %v2175_v55 = vadd.f32 %v2174_v48, %v8113_v13  ;;  %v2263_v56 = vpop.f32.mrf.mxu1  ;;  %v7112_v48 = vld [vmem:[%s7867_s26 + $0x288] sm:$0xf0]  ;;  %v8263_v32 = vor.u32 %v7115_v34, %v5942_v39 }
  0xe0   : > { %v8239_v40 = vor.u32 %v7112_v48, %v5920_v31  ;;  %11204 = vst [vmem:[#allocation52_spill] sm:$0xff] %v8242_v1  ;;  %v5940_v31 = vld [vmem:[%s7867_s26 + $0x2a0] sm:$0xf]  ;;  %v7118_v48 = vld [vmem:[%s7867_s26 + $0x2b8] sm:$0xf0] }
  0xe1   : > { %v2264_v3 = vadd.f32 %v2263_v56, %v2175_v55  ;;  %11206 = vst [vmem:[#allocation54_spill] sm:$0xff] %v8263_v32 }
  0xe2   : > { %v2352_v47 = vpop.f32.mrf.mxu2  ;;  %11203 = vst [vmem:[#allocation51_spill] sm:$0xff] %v8239_v40 }
  0xe3   : > { %v2353_v8 = vadd.f32 %v2352_v47, %v2264_v3  ;;  %v2441_v0 = vpop.f32.mrf.mxu3  ;;  %v5948_v47 = vld [vmem:[%s7867_s26 + $0x2a8] sm:$0xf] }
  0xe5   : > { %v8244_v57 = vadd.f32 %v2441_v0, %v2353_v8 }
  0xe6   : > { %v2177_v54 = vpop.f32.mrf.mxu0 }
  0xe7   : > { %v2178_v55 = vadd.f32 %v2177_v54, %v8113_v13  ;;  %v2266_v56 = vpop.f32.mrf.mxu1  ;;  %2394 = vmatmul.bf16.gmra.mxu2 %v8239_v40  ;;  %v5950_v40 = vld [vmem:[%s7867_s26 + $0x2c4] sm:$0xf0] }
  0xe8   : > { %2483 = vmatmul.bf16.gmra.mxu3 %v8242_v1 }
  0xe9   : > { %v2267_v17 = vadd.f32 %v2266_v56, %v2178_v55  ;;  %2216 = vmatmul.bf16.gmra.mxu0 %v8235_v14  ;;  %v7119_v55 = vld [vmem:[%s7867_s26 + $0x2c0] sm:$0xf0]  ;;  %v7116_v56 = vld [vmem:[%s7867_s26 + $0x2ac] sm:$0xf] }
  0xea   : > { %2305 = vmatmul.bf16.gmra.mxu1 %v8237_v52  ;;  %v2355_v54 = vpop.f32.mrf.mxu2  ;;  %v8261_v52 = vor.u32 %v7118_v48, %v5940_v31  ;;  %v6054_v31 = vld [vmem:[%s10904_s1 + $0x10] sm:$0xf0] }
  0xeb   : > { %v2356_v3 = vadd.f32 %v2355_v54, %v2267_v17  ;;  %v2444_v18 = vpop.f32.mrf.mxu3 }
  0xec   : > { %11205 = vst [vmem:[#allocation53_spill] sm:$0xff] %v8261_v52 }
  0xed   : > { %v8251_v28 = vadd.f32 %v2444_v18, %v2356_v3 }
  0xee   : > { %v2179_v0 = vpop.f32.mrf.mxu0 }
  0xef   : > { %v2180_v8 = vadd.f32 %v2179_v0, %v8113_v13  ;;  %v2268_v27 = vpop.f32.mrf.mxu1  ;;  %v8265_v0 = vor.u32 %v7119_v55, %v5948_v47 }
  0xf1   : > { %v2269_v29 = vadd.f32 %v2268_v27, %v2180_v8  ;;  %11207 = vst [vmem:[#allocation55_spill] sm:$0xff] %v8265_v0  ;;  %v8268_v8 = vor.u32 %v7116_v56, %v5950_v40  ;;  %v7143_v40 = vld [vmem:[%s10904_s1 + $0x4] sm:$0xf] }
  0xf2   : > { %v2357_v1 = vpop.f32.mrf.mxu2  ;;  %v6057_v34 = vor.u32 %v7143_v40, %v6054_v31  ;;  %v7125_v40 = vld [vmem:[%s7867_s26 + $0x2f0] sm:$0xf0]  ;;  %v5970_v31 = vld [vmem:[%s7867_s26 + $0x2f4] sm:$0xf0] }
  0xf3   : > { %v2358_v17 = vadd.f32 %v2357_v1, %v2269_v29  ;;  %v2446_v54 = vpop.f32.mrf.mxu3  ;;  %11208 = vst [vmem:[#allocation56_spill] sm:$0xff] %v8268_v8  ;;  %v6564_v1 = vld [vmem:[%s10904_s1 + $0x400] sm:$0xf] }
  0xf4   : > { %2783 = vmatpush.bf16.msrb.mxu3 %v6057_v34  ;;  %v7123_v34 = vld [vmem:[%s7867_s26 + $0x2e4] sm:$0xf] }
  0xf5   : > { %v8270_v27 = vadd.f32 %v2446_v54, %v2358_v17 }
  0xf6   : > { %v2182_v33 = vpop.f32.mrf.mxu0 }
  0xf7   : > { %v2183_v3 = vadd.f32 %v2182_v33, %v8113_v13  ;;  %v2271_v18 = vpop.f32.mrf.mxu1  ;;  %2399 = vmatmul.bf16.gmra.mxu2 %v8265_v0  ;;  %v7273_v33 = vld [vmem:[%s10904_s1 + $0x40c] sm:$0xf0] }
  0xf8   : > { %2488 = vmatmul.bf16.gmra.mxu3 %v8268_v8  ;;  %v6565_v29 = vor.u32 %v7273_v33, %v6564_v1  ;;  %v5968_v33 = vld [vmem:[%s7867_s26 + $0x2d8] sm:$0xf] }
  0xf9   : > { %v2272_v7 = vadd.f32 %v2271_v18, %v2183_v3  ;;  %2221 = vmatmul.bf16.gmra.mxu0 %v8261_v52  ;;  %v6692_v3 = vld [vmem:[%s10904_s1 + $0x500] sm:$0xf]  ;;  %v8305_v8 = vor.u32 %v7125_v40, %v5968_v33 }
  0xfa   : > { %2310 = vmatmul.bf16.gmra.mxu1 %v8263_v32  ;;  %v2360_v48 = vpop.f32.mrf.mxu2  ;;  %2516 = vmatpush.bf16.msrb.mxu0 %v6565_v29  ;;  %v7122_v29 = vld [vmem:[%s7867_s26 + $0x2dc] sm:$0xf] }
  0xfb   : > { %v2361_v39 = vadd.f32 %v2360_v48, %v2272_v7  ;;  %v2449_v47 = vpop.f32.mrf.mxu3  ;;  %v7305_v7 = vld [vmem:[%s10904_s1 + $0x50c] sm:$0xf0]  ;;  %v5976_v48 = vld [vmem:[%s7867_s26 + $0x2e0] sm:$0xf]  ;;  %11209 = vst [vmem:[#allocation57_spill] sm:$0xff] %v8305_v8  ;;  %v8307_v5 = vor.u32 %v7122_v29, %v5970_v31 }
  0xfc   : > { %v6693_v1 = vor.u32 %v7305_v7, %v6692_v3 }
  0xfd   : > { %v8289_v54 = vadd.f32 %v2449_v47, %v2361_v39  ;;  %v5978_v39 = vld [vmem:[%s7867_s26 + $0x2fc] sm:$0xf0]  ;;  %11210 = vst [vmem:[#allocation58_spill] sm:$0xff] %v8307_v5 }
  0xfe   : > { %v2184_v55 = vpop.f32.mrf.mxu0  ;;  %2605 = vmatpush.bf16.msrb.mxu1 %v6693_v1  ;;  %v8312_v3 = vor.u32 %v7123_v34, %v5978_v39  ;;  %v7129_v34 = vld [vmem:[%s7867_s26 + $0x314] sm:$0xf]  ;;  %v5998_v39 = vld [vmem:[%s7867_s26 + $0x32c] sm:$0xf0] }
  0xff   : > { %v2185_v56 = vadd.f32 %v2184_v55, %v8113_v13  ;;  %v2273_v17 = vpop.f32.mrf.mxu1  ;;  %v7126_v55 = vld [vmem:[%s7867_s26 + $0x2f8] sm:$0xf0]  ;;  %v8333_v36 = vor.u32 %v7129_v34, %v5998_v39  ;;  %v6678_v34 = vld [vmem:[%s10904_s1 + $0x4f0] sm:$0xf0] }
 0x100   : > { %v8309_v38 = vor.u32 %v7126_v55, %v5976_v48  ;;  %11212 = vst [vmem:[#allocation60_spill] sm:$0xff] %v8312_v3  ;;  %v5996_v48 = vld [vmem:[%s7867_s26 + $0x310] sm:$0xf]  ;;  %v7132_v55 = vld [vmem:[%s7867_s26 + $0x328] sm:$0xf0] }
 0x101   : > { %v2274_v18 = vadd.f32 %v2273_v17, %v2185_v56  ;;  %11214 = vst [vmem:[#allocation62_spill] sm:$0xff] %v8333_v36 }
 0x102   : > { %v2362_v47 = vpop.f32.mrf.mxu2  ;;  %11211 = vst [vmem:[#allocation59_spill] sm:$0xff] %v8309_v38 }
 0x103   : > { %v2363_v0 = vadd.f32 %v2362_v47, %v2274_v18  ;;  %v2451_v32 = vpop.f32.mrf.mxu3  ;;  %v6004_v47 = vld [vmem:[%s7867_s26 + $0x318] sm:$0xf] }
 0x105   : > { %v8314_v7 = vadd.f32 %v2451_v32, %v2363_v0 }
 0x106   : > { %v2187_v6 = vpop.f32.mrf.mxu0 }
 0x107   : > { %v2188_v56 = vadd.f32 %v2187_v6, %v8113_v13  ;;  %v2276_v17 = vpop.f32.mrf.mxu1  ;;  %2404 = vmatmul.bf16.gmra.mxu2 %v8309_v38  ;;  %v6006_v38 = vld [vmem:[%s7867_s26 + $0x334] sm:$0xf0] }
 0x108   : > { %2493 = vmatmul.bf16.gmra.mxu3 %v8312_v3 }
 0x109   : > { %v2277_v1 = vadd.f32 %v2276_v17, %v2188_v56  ;;  %2226 = vmatmul.bf16.gmra.mxu0 %v8305_v8  ;;  %v7133_v56 = vld [vmem:[%s7867_s26 + $0x330] sm:$0xf0]  ;;  %v7130_v17 = vld [vmem:[%s7867_s26 + $0x31c] sm:$0xf] }
 0x10a   : > { %2315 = vmatmul.bf16.gmra.mxu1 %v8307_v5  ;;  %v2365_v6 = vpop.f32.mrf.mxu2  ;;  %v8331_v5 = vor.u32 %v7132_v55, %v5996_v48  ;;  %v6294_v48 = vld [vmem:[%s10904_s1 + $0x1f0] sm:$0xf0]  ;;  %v7299_v55 = vld [vmem:[%s10904_s1 + $0x4e4] sm:$0xf] }
 0x10b   : > { %v2366_v18 = vadd.f32 %v2365_v6, %v2277_v1  ;;  %v2454_v33 = vpop.f32.mrf.mxu3 }
 0x10c   : > { %11213 = vst [vmem:[#allocation61_spill] sm:$0xff] %v8331_v5 }
 0x10d   : > { %v8321_v29 = vadd.f32 %v2454_v33, %v2366_v18 }
 0x10e   : > { %v2189_v32 = vpop.f32.mrf.mxu0 }
 0x10f   : > { %v2190_v0 = vadd.f32 %v2189_v32, %v8113_v13  ;;  %v2278_v40 = vpop.f32.mrf.mxu1  ;;  %v8335_v32 = vor.u32 %v7133_v56, %v6004_v47  ;;  %v6681_v56 = vor.u32 %v7299_v55, %v6678_v34  ;;  %v7139_v55 = vld [vmem:[%s7867_s26 + $0x360] sm:$0xf0]  ;;  %v7136_v34 = vld [vmem:[%s7867_s26 + $0x34c] sm:$0xf] }
 0x111   : > { %v2279_v31 = vadd.f32 %v2278_v40, %v2190_v0  ;;  %11215 = vst [vmem:[#allocation63_spill] sm:$0xff] %v8335_v32  ;;  %v8338_v0 = vor.u32 %v7130_v17, %v6006_v38  ;;  %v7203_v38 = vld [vmem:[%s10904_s1 + $0x1e4] sm:$0xf]  ;;  %3132 = vmatpush.bf16.msra.mxu3 %v6681_v56  ;;  %v6034_v56 = vld [vmem:[%s7867_s26 + $0x36c] sm:$0xf0] }
 0x112   : > { %v2367_v3 = vpop.f32.mrf.mxu2  ;;  %v6297_v47 = vor.u32 %v7203_v38, %v6294_v48 }
 0x113   : > { %v2368_v1 = vadd.f32 %v2367_v3, %v2279_v31  ;;  %v2456_v6 = vpop.f32.mrf.mxu3  ;;  %11216 = vst [vmem:[#allocation64_spill] sm:$0xff] %v8338_v0  ;;  %v7267_v3 = vld [vmem:[%s10904_s1 + $0x3e4] sm:$0xf] }
 0x114   : > { %2865 = vmatpush.bf16.msra.mxu0 %v6297_v47  ;;  %v7137_v47 = vld [vmem:[%s7867_s26 + $0x354] sm:$0xf] }
 0x115   : > { %v8340_v40 = vadd.f32 %v2456_v6, %v2368_v1 }
 0x116   : > { %v2192_v37 = vpop.f32.mrf.mxu0 }
 0x117   : > { %v2193_v18 = vadd.f32 %v2192_v37, %v8113_v13  ;;  %v2281_v33 = vpop.f32.mrf.mxu1  ;;  %2409 = vmatmul.bf16.gmra.mxu2 %v8335_v32  ;;  %v6550_v37 = vld [vmem:[%s10904_s1 + $0x3f0] sm:$0xf0] }
 0x118   : > { %2498 = vmatmul.bf16.gmra.mxu3 %v8338_v0  ;;  %v6553_v31 = vor.u32 %v7267_v3, %v6550_v37  ;;  %v7235_v37 = vld [vmem:[%s10904_s1 + $0x2e4] sm:$0xf]  ;;  %v7140_v0 = vld [vmem:[%s7867_s26 + $0x368] sm:$0xf0] }
 0x119   : > { %v2282_v26 = vadd.f32 %v2281_v33, %v2193_v18  ;;  %2231 = vmatmul.bf16.gmra.mxu0 %v8331_v5 }
 0x11a   : > { %2320 = vmatmul.bf16.gmra.mxu1 %v8333_v36  ;;  %v2370_v39 = vpop.f32.mrf.mxu2  ;;  %3043 = vmatpush.bf16.msra.mxu2 %v6553_v31  ;;  %v6024_v31 = vld [vmem:[%s7867_s26 + $0x348] sm:$0xf] }
 0x11b   : > { %v2371_v17 = vadd.f32 %v2370_v39, %v2282_v26  ;;  %v2459_v1 = vpop.f32.mrf.mxu3  ;;  %v6422_v26 = vld [vmem:[%s10904_s1 + $0x2f0] sm:$0xf0]  ;;  %v6026_v39 = vld [vmem:[%s7867_s26 + $0x364] sm:$0xf0] }
 0x11c   : > { %v6425_v48 = vor.u32 %v7235_v37, %v6422_v26  ;;  %v8383_v20 = vor.u32 %v7136_v34, %v6026_v39  ;;  %v8388_v37 = vor.u32 %v7137_v47, %v6034_v56  ;;  %v5620_v39 = vld [vmem:[%s7867_s26 + $0x10] sm:$0xf]  ;;  %v7033_v47 = vld [vmem:[%s7867_s26 + $0x14] sm:$0xf] }
 0x11d   : > { %v8365_v3 = vadd.f32 %v2459_v1, %v2371_v17  ;;  %v8381_v1 = vor.u32 %v7139_v55, %v6024_v31  ;;  %v5622_v56 = vld [vmem:[%s7867_s26 + $0x2c] sm:$0xf0] }
 0x11e   : > { %v2194_v6 = vpop.f32.mrf.mxu0  ;;  %2954 = vmatpush.bf16.msra.mxu1 %v6425_v48  ;;  %11218 = vst [vmem:[#allocation66_spill] sm:$0xff] %v8383_v20 }
 0x11f   : > { %v2195_v18 = vadd.f32 %v2194_v6, %v8113_v13  ;;  %v2283_v33 = vpop.f32.mrf.mxu1  ;;  %v6032_v6 = vld [vmem:[%s7867_s26 + $0x350] sm:$0xf]  ;;  %11217 = vst [vmem:[#allocation65_spill] sm:$0xff] %v8381_v1 }
 0x120   : > { %v8385_v61 = vor.u32 %v7140_v0, %v6032_v6  ;;  %11220 = vst [vmem:[#allocation68_spill] sm:$0xff] %v8388_v37  ;;  %v7036_v6 = vld [vmem:[%s7867_s26 + $0x28] sm:$0xf0] }
 0x121   : > { %v2284_v38 = vadd.f32 %v2283_v33, %v2195_v18 }
 0x122   : > { %v2372_v17 = vpop.f32.mrf.mxu2  ;;  %11219 = vst [vmem:[#allocation67_spill] sm:$0xff] %v8385_v61 }
 0x123   : > { %v2373_v32 = vadd.f32 %v2372_v17, %v2284_v38  ;;  %v2461_v36 = vpop.f32.mrf.mxu3  ;;  %v5628_v17 = vld [vmem:[%s7867_s26 + $0x18] sm:$0xf] }
 0x125   : > { %v8390_v26 = vadd.f32 %v2461_v36, %v2373_v32 }
 0x126   : > { %v2197_v25 = vpop.f32.mrf.mxu0 }
 0x127   : > { %v2198_v18 = vadd.f32 %v2197_v25, %v8113_v13  ;;  %v2286_v33 = vpop.f32.mrf.mxu1  ;;  %2414 = vmatmul.bf16.gmra.mxu2 %v8385_v61  ;;  %v8405_v61 = vor.u32 %v7036_v6, %v5620_v39  ;;  %v6278_v39 = vld [vmem:[%s10904_s1 + $0x1d0] sm:$0xf0]  ;;  %v7295_v6 = vld [vmem:[%s10904_s1 + $0x4c4] sm:$0xf] }
 0x128   : > { %2503 = vmatmul.bf16.gmra.mxu3 %v8388_v37 }
 0x129   : > { %v2287_v48 = vadd.f32 %v2286_v33, %v2198_v18  ;;  %2236 = vmatmul.bf16.gmra.mxu0 %v8381_v1  ;;  %v7037_v18 = vld [vmem:[%s7867_s26 + $0x30] sm:$0xf0]  ;;  %11221 = vst [vmem:[#allocation69_spill] sm:$0xff] %v8405_v61 }
 0x12a   : > { %2325 = vmatmul.bf16.gmra.mxu1 %v8383_v20  ;;  %v2375_v25 = vpop.f32.mrf.mxu2  ;;  %v8409_v60 = vor.u32 %v7037_v18, %v5628_v17 }
 0x12b   : > { %v2376_v0 = vadd.f32 %v2375_v25, %v2287_v48  ;;  %v2464_v38 = vpop.f32.mrf.mxu3  ;;  %v8407_v25 = vor.u32 %v7033_v47, %v5622_v56  ;;  %v6662_v47 = vld [vmem:[%s10904_s1 + $0x4d0] sm:$0xf0] }
 0x12c   : > { %11223 = vst [vmem:[#allocation71_spill] sm:$0xff] %v8409_v60  ;;  %v6665_v18 = vor.u32 %v7295_v6, %v6662_v47  ;;  %v5648_v47 = vld [vmem:[%s7867_s26 + $0x48] sm:$0xf] }
 0x12d   : > { %v8397_v55 = vadd.f32 %v2464_v38, %v2376_v0  ;;  %11222 = vst [vmem:[#allocation70_spill] sm:$0xff] %v8407_v25 }
 0x12e   : > { %v2199_v31 = vpop.f32.mrf.mxu0  ;;  %3133 = vmatpush.bf16.msra.mxu3 %v6665_v18 }
 0x12f   : > { %v2200_v36 = vadd.f32 %v2199_v31, %v8113_v13  ;;  %v2288_v32 = vpop.f32.mrf.mxu1 }
 0x131   : > { %v2289_v34 = vadd.f32 %v2288_v32, %v2200_v36  ;;  %v7263_v32 = vld [vmem:[%s10904_s1 + $0x3c4] sm:$0xf] }
 0x132   : > { %v2377_v33 = vpop.f32.mrf.mxu2 }
 0x133   : > { %v2378_v37 = vadd.f32 %v2377_v33, %v2289_v34  ;;  %v2466_v20 = vpop.f32.mrf.mxu3  ;;  %v6534_v34 = vld [vmem:[%s10904_s1 + $0x3d0] sm:$0xf0] }
 0x135   : > { %v8412_v31 = vadd.f32 %v2466_v20, %v2378_v37  ;;  %v7199_v20 = vld [vmem:[%s10904_s1 + $0x1c4] sm:$0xf]  ;;  %v6537_v37 = vor.u32 %v7263_v32, %v6534_v34 }
 0x136   : > { %v2202_v48 = vpop.f32.mrf.mxu0  ;;  %v6281_v17 = vor.u32 %v7199_v20, %v6278_v39  ;;  %v7231_v20 = vld [vmem:[%s10904_s1 + $0x2c4] sm:$0xf] }
 0x137   : > { %v2203_v0 = vadd.f32 %v2202_v48, %v8113_v13  ;;  %v2291_v38 = vpop.f32.mrf.mxu1  ;;  %6834 = vmatmul.msk.bf16.vlgmr.msrb.gmra.mxu2 %vm2104_vm0, %v8409_v60  ;;  %v7044_v60 = vld [vmem:[%s7867_s26 + $0x68] sm:$0xf0] }
 0x138   : > { %2784 = vmatmul.bf16.vlgmr.msrb.gmra.mxu3 %v7881_v44  ;;  %3044 = vmatpush.bf16.msra.mxu2 %v6537_v37  ;;  %v7040_v37 = vld [vmem:[%s7867_s26 + $0x4c] sm:$0xf]  ;;  %v5650_v44 = vld [vmem:[%s7867_s26 + $0x64] sm:$0xf0] }
 0x139   : > { %v2292_v36 = vadd.f32 %v2291_v38, %v2203_v0  ;;  %2517 = vmatmul.bf16.vlgmr.msrb.gmra.mxu0 %v8405_v61  ;;  %v8454_v59 = vor.u32 %v7040_v37, %v5650_v44 }
 0x13a   : > { %2606 = vmatmul.bf16.vlgmr.msrb.gmra.mxu1 %v8407_v25  ;;  %v2380_v56 = vpop.f32.mrf.mxu2  ;;  %2866 = vmatpush.bf16.msra.mxu0 %v6281_v17 }
 0x13b   : > { %v2381_v33 = vadd.f32 %v2380_v56, %v2292_v36  ;;  %v2469_v48 = vpop.f32.mrf.mxu3  ;;  %v6406_v36 = vld [vmem:[%s10904_s1 + $0x2d0] sm:$0xf0]  ;;  %v7043_v56 = vld [vmem:[%s7867_s26 + $0x60] sm:$0xf0]  ;;  %11225 = vst [vmem:[#allocation73_spill] sm:$0xff] %v8454_v59 }
 0x13c   : > { %v6409_v6 = vor.u32 %v7231_v20, %v6406_v36  ;;  %v8452_v18 = vor.u32 %v7043_v56, %v5648_v47 }
 0x13d   : > { %v8438_v34 = vadd.f32 %v2469_v48, %v2381_v33 }
 0x13e   : > { %v2204_v0 = vpop.f32.mrf.mxu0  ;;  %2955 = vmatpush.bf16.msra.mxu1 %v6409_v6  ;;  %11224 = vst [vmem:[#allocation72_spill] sm:$0xff] %v8452_v18 }
 0x13f   : > { %v2205_v38 = vadd.f32 %v2204_v0, %v8113_v13  ;;  %v2293_v32 = vpop.f32.mrf.mxu1  ;;  %v5656_v0 = vld [vmem:[%s7867_s26 + $0x50] sm:$0xf] }
 0x140   : > { %v8456_v46 = vor.u32 %v7044_v60, %v5656_v0  ;;  %v5676_v0 = vld [vmem:[%s7867_s26 + $0x80] sm:$0xf] }
 0x141   : > { %v2294_v39 = vadd.f32 %v2293_v32, %v2205_v38 }
 0x142   : > { %v2382_v17 = vpop.f32.mrf.mxu2  ;;  %11226 = vst [vmem:[#allocation74_spill] sm:$0xff] %v8456_v46 }
 0x143   : > { %v2383_v33 = vadd.f32 %v2382_v17, %v2294_v39  ;;  %v2471_v48 = vpop.f32.mrf.mxu3  ;;  %v7050_v17 = vld [vmem:[%s7867_s26 + $0x98] sm:$0xf0] }
 0x145   : > { %v8459_v20 = vadd.f32 %v2471_v48, %v2383_v33  ;;  %v7047_v33 = vld [vmem:[%s7867_s26 + $0x84] sm:$0xf]  ;;  %v5678_v48 = vld [vmem:[%s7867_s26 + $0x9c] sm:$0xf0] }
 0x146   : > { %v2207_v25 = vpop.f32.mrf.mxu0 }
 0x147   : > { %v2208_v38 = vadd.f32 %v2207_v25, %v8113_v13  ;;  %v2296_v32 = vpop.f32.mrf.mxu1  ;;  %6835 = vmatmul.msk.bf16.gmra.mxu2 %vm2104_vm0, %v8456_v46  ;;  %v8475_v46 = vor.u32 %v7050_v17, %v5676_v0  ;;  %v7291_v0 = vld [vmem:[%s10904_s1 + $0x4a4] sm:$0xf]  ;;  %v6646_v17 = vld [vmem:[%s10904_s1 + $0x4b0] sm:$0xf0] }
 0x148   : > { %2789 = vmatmul.bf16.gmra.mxu3 %v7924_v9 }
 0x149   : > { %v2297_v36 = vadd.f32 %v2296_v32, %v2208_v38  ;;  %2522 = vmatmul.bf16.gmra.mxu0 %v8452_v18  ;;  %v5684_v38 = vld [vmem:[%s7867_s26 + $0x88] sm:$0xf]  ;;  %v7051_v32 = vld [vmem:[%s7867_s26 + $0xa0] sm:$0xf0]  ;;  %11227 = vst [vmem:[#allocation75_spill] sm:$0xff] %v8475_v46 }
 0x14a   : > { %2611 = vmatmul.bf16.gmra.mxu1 %v8454_v59  ;;  %v2385_v44 = vpop.f32.mrf.mxu2  ;;  %v8479_v43 = vor.u32 %v7051_v32, %v5684_v38  ;;  %v6649_v38 = vor.u32 %v7291_v0, %v6646_v17  ;;  %v5704_v17 = vld [vmem:[%s7867_s26 + $0xb8] sm:$0xf] }
 0x14b   : > { %v2386_v60 = vadd.f32 %v2385_v44, %v2297_v36  ;;  %v2474_v25 = vpop.f32.mrf.mxu3  ;;  %v8477_v44 = vor.u32 %v7047_v33, %v5678_v48 }
 0x14c   : > { %11229 = vst [vmem:[#allocation77_spill] sm:$0xff] %v8479_v43  ;;  %3134 = vmatpush.bf16.msra.mxu3 %v6649_v38 }
 0x14d   : > { %v8467_v56 = vadd.f32 %v2474_v25, %v2386_v60  ;;  %11228 = vst [vmem:[#allocation76_spill] sm:$0xff] %v8477_v44 }
 0x14e   : > { %v2209_v39 = vpop.f32.mrf.mxu0 }
 0x14f   : > { %v2210_v6 = vadd.f32 %v2209_v39, %v8113_v13  ;;  %v2298_v47 = vpop.f32.mrf.mxu1 }
 0x151   : > { %v2299_v37 = vadd.f32 %v2298_v47, %v2210_v6  ;;  %v6518_v47 = vld [vmem:[%s10904_s1 + $0x3b0] sm:$0xf0] }
 0x152   : > { %v2387_v59 = vpop.f32.mrf.mxu2 }
 0x153   : > { %v2388_v9 = vadd.f32 %v2387_v59, %v2299_v37  ;;  %v2476_v45 = vpop.f32.mrf.mxu3  ;;  %v7259_v59 = vld [vmem:[%s10904_s1 + $0x3a4] sm:$0xf]  ;;  %v6262_v37 = vld [vmem:[%s10904_s1 + $0x1b0] sm:$0xf0] }
 0x155   : > { %v8482_v39 = vadd.f32 %v2476_v45, %v2388_v9  ;;  %v7195_v9 = vld [vmem:[%s10904_s1 + $0x1a4] sm:$0xf]  ;;  %v6521_v45 = vor.u32 %v7259_v59, %v6518_v47 }
 0x156   : > { %v2212_v36 = vpop.f32.mrf.mxu0  ;;  %v6265_v48 = vor.u32 %v7195_v9, %v6262_v37  ;;  %v7227_v9 = vld [vmem:[%s10904_s1 + $0x2a4] sm:$0xf] }
 0x157   : > { %v2213_v60 = vadd.f32 %v2212_v36, %v8113_v13  ;;  %v2301_v25 = vpop.f32.mrf.mxu1  ;;  %6836 = vmatmul.msk.bf16.gmra.mxu2 %vm2104_vm0, %v8479_v43  ;;  %v7058_v43 = vld [vmem:[%s7867_s26 + $0xd8] sm:$0xf0] }
 0x158   : > { %2794 = vmatmul.bf16.gmra.mxu3 %v7944_v21  ;;  %3045 = vmatpush.bf16.msra.mxu2 %v6521_v45  ;;  %v7054_v45 = vld [vmem:[%s7867_s26 + $0xbc] sm:$0xf]  ;;  %v5706_v21 = vld [vmem:[%s7867_s26 + $0xd4] sm:$0xf0] }
 0x159   : > { %v2302_v6 = vadd.f32 %v2301_v25, %v2213_v60  ;;  %2527 = vmatmul.bf16.gmra.mxu0 %v8475_v46  ;;  %v8524_v46 = vor.u32 %v7054_v45, %v5706_v21 }
 0x15a   : > { %2616 = vmatmul.bf16.gmra.mxu1 %v8477_v44  ;;  %v2390_v33 = vpop.f32.mrf.mxu2  ;;  %2867 = vmatpush.bf16.msra.mxu0 %v6265_v48 }
 0x15b   : > { %v2391_v32 = vadd.f32 %v2390_v33, %v2302_v6  ;;  %v2479_v36 = vpop.f32.mrf.mxu3  ;;  %v6390_v6 = vld [vmem:[%s10904_s1 + $0x2b0] sm:$0xf0]  ;;  %11231 = vst [vmem:[#allocation79_spill] sm:$0xff] %v8524_v46 }
 0x15c   : > { %v6393_v0 = vor.u32 %v7227_v9, %v6390_v6  ;;  %v7057_v33 = vld [vmem:[%s7867_s26 + $0xd0] sm:$0xf0] }
 0x15d   : > { %v8508_v47 = vadd.f32 %v2479_v36, %v2391_v32  ;;  %v8522_v38 = vor.u32 %v7057_v33, %v5704_v17 }
 0x15e   : > { %v2214_v60 = vpop.f32.mrf.mxu0  ;;  %2956 = vmatpush.bf16.msra.mxu1 %v6393_v0 }
 0x15f   : > { %v2215_v25 = vadd.f32 %v2214_v60, %v8113_v13  ;;  %v2303_v59 = vpop.f32.mrf.mxu1  ;;  %v5712_v60 = vld [vmem:[%s7867_s26 + $0xc0] sm:$0xf]  ;;  %11230 = vst [vmem:[#allocation78_spill] sm:$0xff] %v8522_v38 }
 0x160   : > { %v8526_v24 = vor.u32 %v7058_v43, %v5712_v60  ;;  %v5732_v60 = vld [vmem:[%s7867_s26 + $0xf0] sm:$0xf] }
 0x161   : > { %v2304_v37 = vadd.f32 %v2303_v59, %v2215_v25 }
 0x162   : > { %v2392_v48 = vpop.f32.mrf.mxu2  ;;  %11232 = vst [vmem:[#allocation80_spill] sm:$0xff] %v8526_v24 }
 0x163   : > { %v2393_v32 = vadd.f32 %v2392_v48, %v2304_v37  ;;  %v2481_v36 = vpop.f32.mrf.mxu3  ;;  %v7064_v48 = vld [vmem:[%s7867_s26 + $0x108] sm:$0xf0] }
 0x165   : > { %v8529_v9 = vadd.f32 %v2481_v36, %v2393_v32  ;;  %v7061_v32 = vld [vmem:[%s7867_s26 + $0xf4] sm:$0xf]  ;;  %v5734_v36 = vld [vmem:[%s7867_s26 + $0x10c] sm:$0xf0] }
 0x166   : > { %v2217_v44 = vpop.f32.mrf.mxu0 }
 0x167   : > { %v2218_v25 = vadd.f32 %v2217_v44, %v8113_v13  ;;  %v2306_v59 = vpop.f32.mrf.mxu1  ;;  %11233 = vst [vmem:[#allocation81_spill] sm:$0xff] %v8529_v9  ;;  %6837 = vmatmul.msk.bf16.gmra.mxu2 %vm2104_vm0, %v8526_v24  ;;  %v8545_v24 = vor.u32 %v7064_v48, %v5732_v60  ;;  %v7287_v60 = vld [vmem:[%s10904_s1 + $0x484] sm:$0xf]  ;;  %v6630_v48 = vld [vmem:[%s10904_s1 + $0x490] sm:$0xf0] }
 0x168   : > { %2799 = vmatmul.bf16.gmra.mxu3 %v7982_v42 }
 0x169   : > { %v2307_v6 = vadd.f32 %v2306_v59, %v2218_v25  ;;  %2532 = vmatmul.bf16.gmra.mxu0 %v8522_v38  ;;  %v5740_v25 = vld [vmem:[%s7867_s26 + $0xf8] sm:$0xf]  ;;  %v7065_v59 = vld [vmem:[%s7867_s26 + $0x110] sm:$0xf0]  ;;  %11234 = vst [vmem:[#allocation82_spill] sm:$0xff] %v8545_v24 }
 0x16a   : > { %2621 = vmatmul.bf16.gmra.mxu1 %v8524_v46  ;;  %v2395_v21 = vpop.f32.mrf.mxu2  ;;  %v8549_v9 = vor.u32 %v7065_v59, %v5740_v25  ;;  %v6633_v25 = vor.u32 %v7287_v60, %v6630_v48  ;;  %v5760_v48 = vld [vmem:[%s7867_s26 + $0x128] sm:$0xf] }
 0x16b   : > { %v2396_v43 = vadd.f32 %v2395_v21, %v2307_v6  ;;  %v2484_v44 = vpop.f32.mrf.mxu3  ;;  %v8547_v21 = vor.u32 %v7061_v32, %v5734_v36 }
 0x16c   : > { %11236 = vst [vmem:[#allocation84_spill] sm:$0xff] %v8549_v9  ;;  %3135 = vmatpush.bf16.msra.mxu3 %v6633_v25 }
 0x16d   : > { %v8537_v33 = vadd.f32 %v2484_v44, %v2396_v43  ;;  %11235 = vst [vmem:[#allocation83_spill] sm:$0xff] %v8547_v21 }
 0x16e   : > { %v2219_v37 = vpop.f32.mrf.mxu0 }
 0x16f   : > { %v2220_v0 = vadd.f32 %v2219_v37, %v8113_v13  ;;  %v2308_v17 = vpop.f32.mrf.mxu1 }
 0x171   : > { %v2309_v45 = vadd.f32 %v2308_v17, %v2220_v0  ;;  %v6502_v17 = vld [vmem:[%s10904_s1 + $0x390] sm:$0xf0] }
 0x172   : > { %v2397_v46 = vpop.f32.mrf.mxu2 }
 0x173   : > { %v2398_v42 = vadd.f32 %v2397_v46, %v2309_v45  ;;  %v2486_v38 = vpop.f32.mrf.mxu3  ;;  %v7255_v46 = vld [vmem:[%s10904_s1 + $0x384] sm:$0xf]  ;;  %v6246_v45 = vld [vmem:[%s10904_s1 + $0x190] sm:$0xf0] }
 0x175   : > { %v8552_v37 = vadd.f32 %v2486_v38, %v2398_v42  ;;  %v7191_v42 = vld [vmem:[%s10904_s1 + $0x184] sm:$0xf]  ;;  %v6505_v38 = vor.u32 %v7255_v46, %v6502_v17 }
 0x176   : > { %v2222_v6 = vpop.f32.mrf.mxu0  ;;  %v6249_v36 = vor.u32 %v7191_v42, %v6246_v45  ;;  %v7223_v42 = vld [vmem:[%s10904_s1 + $0x284] sm:$0xf] }
 0x177   : > { %v2223_v43 = vadd.f32 %v2222_v6, %v8113_v13  ;;  %v2311_v44 = vpop.f32.mrf.mxu1  ;;  %6838 = vmatmul.msk.bf16.gmra.mxu2 %vm2104_vm0, %v8549_v9  ;;  %v7072_v9 = vld [vmem:[%s7867_s26 + $0x148] sm:$0xf0] }
 0x178   : > { %2804 = vmatmul.bf16.gmra.mxu3 %v8002_v58  ;;  %3046 = vmatpush.bf16.msra.mxu2 %v6505_v38  ;;  %v7068_v38 = vld [vmem:[%s7867_s26 + $0x12c] sm:$0xf]  ;;  %v5762_v58 = vld [vmem:[%s7867_s26 + $0x144] sm:$0xf0] }
 0x179   : > { %v2312_v0 = vadd.f32 %v2311_v44, %v2223_v43  ;;  %2537 = vmatmul.bf16.gmra.mxu0 %v8545_v24  ;;  %v8594_v24 = vor.u32 %v7068_v38, %v5762_v58 }
 0x17a   : > { %2626 = vmatmul.bf16.gmra.mxu1 %v8547_v21  ;;  %v2400_v32 = vpop.f32.mrf.mxu2  ;;  %2868 = vmatpush.bf16.msra.mxu0 %v6249_v36 }
 0x17b   : > { %v2401_v59 = vadd.f32 %v2400_v32, %v2312_v0  ;;  %v2489_v6 = vpop.f32.mrf.mxu3  ;;  %v6374_v0 = vld [vmem:[%s10904_s1 + $0x290] sm:$0xf0]  ;;  %v7071_v32 = vld [vmem:[%s7867_s26 + $0x140] sm:$0xf0]  ;;  %11239 = vst [vmem:[#allocation87_spill] sm:$0xff] %v8594_v24 }
 0x17c   : > { %v6377_v60 = vor.u32 %v7223_v42, %v6374_v0  ;;  %v8592_v25 = vor.u32 %v7071_v32, %v5760_v48 }
 0x17d   : > { %v8578_v17 = vadd.f32 %v2489_v6, %v2401_v59 }
 0x17e   : > { %v2224_v43 = vpop.f32.mrf.mxu0  ;;  %2957 = vmatpush.bf16.msra.mxu1 %v6377_v60  ;;  %11238 = vst [vmem:[#allocation86_spill] sm:$0xff] %v8592_v25 }
 0x17f   : > { %v2225_v44 = vadd.f32 %v2224_v43, %v8113_v13  ;;  %v2313_v46 = vpop.f32.mrf.mxu1  ;;  %11237 = vst [vmem:[#allocation85_spill] sm:$0xff] %v8578_v17  ;;  %v5768_v43 = vld [vmem:[%s7867_s26 + $0x130] sm:$0xf] }
 0x180   : > { %v8596_v17 = vor.u32 %v7072_v9, %v5768_v43  ;;  %v5788_v43 = vld [vmem:[%s7867_s26 + $0x160] sm:$0xf] }
 0x181   : > { %v2314_v45 = vadd.f32 %v2313_v46, %v2225_v44 }
 0x182   : > { %v2402_v36 = vpop.f32.mrf.mxu2  ;;  %11240 = vst [vmem:[#allocation88_spill] sm:$0xff] %v8596_v17 }
 0x183   : > { %v2403_v59 = vadd.f32 %v2402_v36, %v2314_v45  ;;  %v2491_v6 = vpop.f32.mrf.mxu3  ;;  %v7078_v36 = vld [vmem:[%s7867_s26 + $0x178] sm:$0xf0] }
 0x185   : > { %v8599_v42 = vadd.f32 %v2491_v6, %v2403_v59  ;;  %v7075_v59 = vld [vmem:[%s7867_s26 + $0x164] sm:$0xf]  ;;  %v5790_v6 = vld [vmem:[%s7867_s26 + $0x17c] sm:$0xf0] }
 0x186   : > { %v2227_v21 = vpop.f32.mrf.mxu0 }
 0x187   : > { %v2228_v44 = vadd.f32 %v2227_v21, %v8113_v13  ;;  %v2316_v46 = vpop.f32.mrf.mxu1  ;;  %11241 = vst [vmem:[#allocation89_spill] sm:$0xff] %v8599_v42  ;;  %6839 = vmatmul.msk.bf16.gmra.mxu2 %vm2104_vm0, %v8596_v17  ;;  %v8615_v17 = vor.u32 %v7078_v36, %v5788_v43  ;;  %v7283_v43 = vld [vmem:[%s10904_s1 + $0x464] sm:$0xf]  ;;  %v6614_v36 = vld [vmem:[%s10904_s1 + $0x470] sm:$0xf0] }
 0x188   : > { %2809 = vmatmul.bf16.gmra.mxu3 %v8040_v19 }
 0x189   : > { %v2317_v0 = vadd.f32 %v2316_v46, %v2228_v44  ;;  %2542 = vmatmul.bf16.gmra.mxu0 %v8592_v25  ;;  %v5796_v44 = vld [vmem:[%s7867_s26 + $0x168] sm:$0xf]  ;;  %v7079_v46 = vld [vmem:[%s7867_s26 + $0x180] sm:$0xf0]  ;;  %11242 = vst [vmem:[#allocation90_spill] sm:$0xff] %v8615_v17 }
 0x18a   : > { %2631 = vmatmul.bf16.gmra.mxu1 %v8594_v24  ;;  %v2405_v58 = vpop.f32.mrf.mxu2  ;;  %v8619_v42 = vor.u32 %v7079_v46, %v5796_v44  ;;  %v6617_v44 = vor.u32 %v7283_v43, %v6614_v36  ;;  %v5816_v36 = vld [vmem:[%s7867_s26 + $0x198] sm:$0xf] }
 0x18b   : > { %v2406_v9 = vadd.f32 %v2405_v58, %v2317_v0  ;;  %v2494_v21 = vpop.f32.mrf.mxu3  ;;  %v8617_v58 = vor.u32 %v7075_v59, %v5790_v6 }
 0x18c   : > { %11244 = vst [vmem:[#allocation92_spill] sm:$0xff] %v8619_v42  ;;  %3136 = vmatpush.bf16.msra.mxu3 %v6617_v44 }
 0x18d   : > { %v8607_v32 = vadd.f32 %v2494_v21, %v2406_v9  ;;  %11243 = vst [vmem:[#allocation91_spill] sm:$0xff] %v8617_v58 }
 0x18e   : > { %v2229_v45 = vpop.f32.mrf.mxu0 }
 0x18f   : > { %v2230_v60 = vadd.f32 %v2229_v45, %v8113_v13  ;;  %v2318_v48 = vpop.f32.mrf.mxu1 }
 0x191   : > { %v2319_v38 = vadd.f32 %v2318_v48, %v2230_v60  ;;  %v6486_v48 = vld [vmem:[%s10904_s1 + $0x370] sm:$0xf0] }
 0x192   : > { %v2407_v24 = vpop.f32.mrf.mxu2 }
 0x193   : > { %v2408_v19 = vadd.f32 %v2407_v24, %v2319_v38  ;;  %v2496_v25 = vpop.f32.mrf.mxu3  ;;  %v7251_v24 = vld [vmem:[%s10904_s1 + $0x364] sm:$0xf]  ;;  %v6230_v38 = vld [vmem:[%s10904_s1 + $0x170] sm:$0xf0] }
 0x195   : > { %v8622_v45 = vadd.f32 %v2496_v25, %v2408_v19  ;;  %v7187_v19 = vld [vmem:[%s10904_s1 + $0x164] sm:$0xf]  ;;  %v6489_v25 = vor.u32 %v7251_v24, %v6486_v48 }
 0x196   : > { %v2232_v0 = vpop.f32.mrf.mxu0  ;;  %v6233_v6 = vor.u32 %v7187_v19, %v6230_v38  ;;  %v7219_v19 = vld [vmem:[%s10904_s1 + $0x264] sm:$0xf] }
 0x197   : > { %v2233_v9 = vadd.f32 %v2232_v0, %v8113_v13  ;;  %v2321_v21 = vpop.f32.mrf.mxu1  ;;  %6840 = vmatmul.msk.bf16.gmra.mxu2 %vm2104_vm0, %v8619_v42  ;;  %v7086_v42 = vld [vmem:[%s7867_s26 + $0x1b8] sm:$0xf0] }
 0x198   : > { %2814 = vmatmul.bf16.gmra.mxu3 %v8060_v35  ;;  %3047 = vmatpush.bf16.msra.mxu2 %v6489_v25  ;;  %v7082_v25 = vld [vmem:[%s7867_s26 + $0x19c] sm:$0xf]  ;;  %v5818_v35 = vld [vmem:[%s7867_s26 + $0x1b4] sm:$0xf0] }
 0x199   : > { %v2322_v60 = vadd.f32 %v2321_v21, %v2233_v9  ;;  %2547 = vmatmul.bf16.gmra.mxu0 %v8615_v17  ;;  %v8664_v17 = vor.u32 %v7082_v25, %v5818_v35 }
 0x19a   : > { %2636 = vmatmul.bf16.gmra.mxu1 %v8617_v58  ;;  %v2410_v59 = vpop.f32.mrf.mxu2  ;;  %2869 = vmatpush.bf16.msra.mxu0 %v6233_v6 }
 0x19b   : > { %v2411_v46 = vadd.f32 %v2410_v59, %v2322_v60  ;;  %v2499_v0 = vpop.f32.mrf.mxu3  ;;  %v6358_v60 = vld [vmem:[%s10904_s1 + $0x270] sm:$0xf0]  ;;  %11247 = vst [vmem:[#allocation95_spill] sm:$0xff] %v8664_v17 }
 0x19c   : > { %v6361_v43 = vor.u32 %v7219_v19, %v6358_v60  ;;  %v7085_v59 = vld [vmem:[%s7867_s26 + $0x1b0] sm:$0xf0] }
 0x19d   : > { %v8648_v48 = vadd.f32 %v2499_v0, %v2411_v46  ;;  %v8662_v44 = vor.u32 %v7085_v59, %v5816_v36 }
 0x19e   : > { %v2234_v9 = vpop.f32.mrf.mxu0  ;;  %2958 = vmatpush.bf16.msra.mxu1 %v6361_v43 }
 0x19f   : > { %v2235_v21 = vadd.f32 %v2234_v9, %v8113_v13  ;;  %v2323_v24 = vpop.f32.mrf.mxu1  ;;  %11245 = vst [vmem:[#allocation93_spill] sm:$0xff] %v8648_v48  ;;  %v5824_v9 = vld [vmem:[%s7867_s26 + $0x1a0] sm:$0xf] }
 0x1a0   : > { %11246 = vst [vmem:[#allocation94_spill] sm:$0xff] %v8662_v44  ;;  %v8666_v48 = vor.u32 %v7086_v42, %v5824_v9  ;;  %v5844_v9 = vld [vmem:[%s7867_s26 + $0x1d0] sm:$0xf] }
 0x1a1   : > { %v2324_v38 = vadd.f32 %v2323_v24, %v2235_v21 }
 0x1a2   : > { %v2412_v6 = vpop.f32.mrf.mxu2  ;;  %11248 = vst [vmem:[#allocation96_spill] sm:$0xff] %v8666_v48 }
 0x1a3   : > { %v2413_v46 = vadd.f32 %v2412_v6, %v2324_v38  ;;  %v2501_v0 = vpop.f32.mrf.mxu3  ;;  %v7092_v6 = vld [vmem:[%s7867_s26 + $0x1e8] sm:$0xf0] }
 0x1a5   : > { %v8669_v19 = vadd.f32 %v2501_v0, %v2413_v46  ;;  %v7089_v46 = vld [vmem:[%s7867_s26 + $0x1d4] sm:$0xf]  ;;  %v5846_v0 = vld [vmem:[%s7867_s26 + $0x1ec] sm:$0xf0] }
 0x1a6   : > { %v2237_v58 = vpop.f32.mrf.mxu0 }
 0x1a7   : > { %v2238_v21 = vadd.f32 %v2237_v58, %v8113_v13  ;;  %v2326_v24 = vpop.f32.mrf.mxu1  ;;  %11249 = vst [vmem:[#allocation97_spill] sm:$0xff] %v8669_v19  ;;  %6841 = vmatmul.msk.bf16.gmra.mxu2 %vm2104_vm0, %v8666_v48  ;;  %v8685_v48 = vor.u32 %v7092_v6, %v5844_v9 }
 0x1a8   : > { %2819 = vmatmul.bf16.gmra.mxu3 %v8098_v4 }
 0x1a9   : > { %v2327_v60 = vadd.f32 %v2326_v24, %v2238_v21  ;;  %2552 = vmatmul.bf16.gmra.mxu0 %v8662_v44  ;;  %v5852_v21 = vld [vmem:[%s7867_s26 + $0x1d8] sm:$0xf]  ;;  %v7093_v24 = vld [vmem:[%s7867_s26 + $0x1f0] sm:$0xf0]  ;;  %11250 = vst [vmem:[#allocation98_spill] sm:$0xff] %v8685_v48 }
 0x1aa   : > { %2641 = vmatmul.bf16.gmra.mxu1 %v8664_v17  ;;  %v2415_v35 = vpop.f32.mrf.mxu2  ;;  %v8689_v19 = vor.u32 %v7093_v24, %v5852_v21 }
 0x1ab   : > { %v2416_v42 = vadd.f32 %v2415_v35, %v2327_v60  ;;  %v2504_v58 = vpop.f32.mrf.mxu3  ;;  %v8687_v35 = vor.u32 %v7089_v46, %v5846_v0 }
 0x1ac   : > { %11252 = vst [vmem:[#allocation100_spill] sm:$0xff] %v8689_v19 }
 0x1ad   : > { %v8677_v59 = vadd.f32 %v2504_v58, %v2416_v42  ;;  %11251 = vst [vmem:[#allocation99_spill] sm:$0xff] %v8687_v35 }
 0x1ae   : > { %v2239_v38 = vpop.f32.mrf.mxu0 }
 0x1af   : > { %v2240_v43 = vadd.f32 %v2239_v38, %v8113_v13  ;;  %v2328_v36 = vpop.f32.mrf.mxu1 }
 0x1b1   : > { %v2329_v25 = vadd.f32 %v2328_v36, %v2240_v43  ;;  %v6214_v43 = vld [vmem:[%s10904_s1 + $0x150] sm:$0xf0]  ;;  %v7279_v36 = vld [vmem:[%s10904_s1 + $0x444] sm:$0xf] }
 0x1b2   : > { %v2417_v17 = vpop.f32.mrf.mxu2 }
 0x1b3   : > { %v2418_v4 = vadd.f32 %v2417_v17, %v2329_v25  ;;  %v2506_v44 = vpop.f32.mrf.mxu3  ;;  %v7247_v17 = vld [vmem:[%s10904_s1 + $0x344] sm:$0xf]  ;;  %v6598_v25 = vld [vmem:[%s10904_s1 + $0x450] sm:$0xf0] }
 0x1b4   : > { %v6601_v46 = vor.u32 %v7279_v36, %v6598_v25  ;;  %v7096_v36 = vld [vmem:[%s7867_s26 + $0x20c] sm:$0xf]  ;;  %v5874_v25 = vld [vmem:[%s7867_s26 + $0x224] sm:$0xf0] }
 0x1b5   : > { %v8692_v58 = vadd.f32 %v2506_v44, %v2418_v4  ;;  %v7183_v4 = vld [vmem:[%s10904_s1 + $0x144] sm:$0xf] }
 0x1b6   : > { %v2518_v60 = vpop.f32.mrf.mxu0  ;;  %v6217_v6 = vor.u32 %v7183_v4, %v6214_v43  ;;  %3137 = vmatpush.bf16.msra.mxu3 %v6601_v46  ;;  %v5872_v4 = vld [vmem:[%s7867_s26 + $0x208] sm:$0xf]  ;;  %v7099_v43 = vld [vmem:[%s7867_s26 + $0x220] sm:$0xf0] }
 0x1b7   : > { %v2519_v13 = vadd.f32 %v2518_v60, %v8149_v2  ;;  %v2607_v42 = vpop.f32.mrf.mxu1  ;;  %6842 = vmatmul.msk.bf16.gmra.mxu2 %vm2104_vm0, %v8689_v19  ;;  %v6470_v2 = vld [vmem:[%s10904_s1 + $0x350] sm:$0xf0]  ;;  %v8736_v19 = vor.u32 %v7096_v36, %v5874_v25 }
 0x1b8   : > { %2824 = vmatmul.bf16.gmra.mxu3 %v8123_v30  ;;  %v6473_v44 = vor.u32 %v7247_v17, %v6470_v2  ;;  %2870 = vmatpush.bf16.msra.mxu0 %v6217_v6  ;;  %v6342_v17 = vld [vmem:[%s10904_s1 + $0x250] sm:$0xf0]  ;;  %v8732_v6 = vor.u32 %v7099_v43, %v5872_v4 }
 0x1b9   : > { %v2608_v38 = vadd.f32 %v2607_v42, %v2519_v13  ;;  %2557 = vmatmul.bf16.gmra.mxu0 %v8685_v48  ;;  %v7215_v42 = vld [vmem:[%s10904_s1 + $0x244] sm:$0xf]  ;;  %11254 = vst [vmem:[#allocation102_spill] sm:$0xff] %v8736_v19 }
 0x1ba   : > { %2646 = vmatmul.bf16.gmra.mxu1 %v8687_v35  ;;  %v2696_v9 = vpop.f32.mrf.mxu2  ;;  %3048 = vmatpush.bf16.msra.mxu2 %v6473_v44  ;;  %v6345_v2 = vor.u32 %v7215_v42, %v6342_v17  ;;  %v5880_v44 = vld [vmem:[%s7867_s26 + $0x210] sm:$0xf]  ;;  %11253 = vst [vmem:[#allocation101_spill] sm:$0xff] %v8732_v6 }
 0x1bb   : > { %v2697_v0 = vadd.f32 %v2696_v9, %v2608_v38  ;;  %v8717_v21 = vpop.f32.mrf.mxu3  ;;  %v7100_v9 = vld [vmem:[%s7867_s26 + $0x228] sm:$0xf0] }
 0x1bc   : > { %2959 = vmatpush.bf16.msra.mxu1 %v6345_v2  ;;  %v8738_v35 = vor.u32 %v7100_v9, %v5880_v44  ;;  %v5900_v44 = vld [vmem:[%s7867_s26 + $0x240] sm:$0xf]  ;;  %v7106_v9 = vld [vmem:[%s7867_s26 + $0x258] sm:$0xf0] }
 0x1bd   : > { %v4645_v42 = vmax.f32 %v2697_v0, 0.0 }
 0x1be   : > { %v2520_v24 = vpop.f32.mrf.mxu0  ;;  %11255 = vst [vmem:[#allocation103_spill] sm:$0xff] %v8738_v35 }
 0x1bf   : > { %v2521_v60 = vadd.f32 %v2520_v24, %v8174_v62  ;;  %v2609_v13 = vpop.f32.mrf.mxu1 }
 0x1c1   : > { %v2610_v38 = vadd.f32 %v2609_v13, %v2521_v60 }
 0x1c2   : > { %v2698_v62 = vpop.f32.mrf.mxu2 }
 0x1c3   : > { %v2699_v46 = vadd.f32 %v2698_v62, %v2610_v38  ;;  %v8734_v24 = vpop.f32.mrf.mxu3  ;;  %v7103_v62 = vld [vmem:[%s7867_s26 + $0x244] sm:$0xf] }
 0x1c5   : > { %v4649_v17 = vmax.f32 %v2699_v46, 0.0  ;;  %v5902_v46 = vld [vmem:[%s7867_s26 + $0x25c] sm:$0xf0] }
 0x1c6   : > { %v2523_v30 = vpop.f32.mrf.mxu0 }
 0x1c7   : > { %v2524_v60 = vadd.f32 %v2523_v30, %v8181_v16  ;;  %v2612_v13 = vpop.f32.mrf.mxu1  ;;  %v8742_v38 = vpack.c.bf16 %v4649_v17, %v4645_v42  ;;  %6843 = vmatmul.msk.bf16.gmra.mxu2 %vm2104_vm0, %v8738_v35  ;;  %v8757_v17 = vor.u32 %v7106_v9, %v5900_v44  ;;  %v7243_v44 = vld [vmem:[%s10904_s1 + $0x324] sm:$0xf]  ;;  %v6198_v9 = vld [vmem:[%s10904_s1 + $0x130] sm:$0xf0] }
 0x1c8   : > { %2829 = vmatmul.bf16.gmra.mxu3 %v8165_v41 }
 0x1c9   : > { %v2613_v2 = vadd.f32 %v2612_v13, %v2524_v60  ;;  %2562 = vmatmul.bf16.gmra.mxu0 %v8732_v6  ;;  %11256 = vst [vmem:[#allocation104_spill] sm:$0xff] %v8742_v38  ;;  %v5908_v60 = vld [vmem:[%s7867_s26 + $0x248] sm:$0xf]  ;;  %v7107_v13 = vld [vmem:[%s7867_s26 + $0x260] sm:$0xf0] }
 0x1ca   : > { %2651 = vmatmul.bf16.gmra.mxu1 %v8736_v19  ;;  %v2701_v30 = vpop.f32.mrf.mxu2  ;;  %11257 = vst [vmem:[#allocation105_spill] sm:$0xff] %v8757_v17  ;;  %v8763_v35 = vor.u32 %v7107_v13, %v5908_v60 }
 0x1cb   : > { %v2702_v16 = vadd.f32 %v2701_v30, %v2613_v2  ;;  %v8748_v0 = vpop.f32.mrf.mxu3  ;;  %v8761_v30 = vor.u32 %v7103_v62, %v5902_v46  ;;  %v7275_v62 = vld [vmem:[%s10904_s1 + $0x424] sm:$0xf]  ;;  %v6582_v46 = vld [vmem:[%s10904_s1 + $0x430] sm:$0xf0] }
 0x1cc   : > { %11259 = vst [vmem:[#allocation107_spill] sm:$0xff] %v8763_v35 }
 0x1cd   : > { %11258 = vst [vmem:[#allocation106_spill] sm:$0xff] %v8761_v30 }
 0x1ce   : > { %v2525_v4 = vpop.f32.mrf.mxu0 }
 0x1cf   : > { %v2526_v43 = vadd.f32 %v2525_v4, %v8200_v15  ;;  %v2614_v36 = vpop.f32.mrf.mxu1 }
 0x1d1   : > { %v2615_v25 = vadd.f32 %v2614_v36, %v2526_v43  ;;  %v4653_v43 = vmax.f32 %v2702_v16, 0.0 }
 0x1d2   : > { %v2703_v42 = vpop.f32.mrf.mxu2 }
 0x1d3   : > { %v2704_v38 = vadd.f32 %v2703_v42, %v2615_v25  ;;  %v8759_v41 = vpop.f32.mrf.mxu3  ;;  %v6585_v42 = vor.u32 %v7275_v62, %v6582_v46  ;;  %v7113_v62 = vld [vmem:[%s7867_s26 + $0x290] sm:$0xf0]  ;;  %v7110_v46 = vld [vmem:[%s7867_s26 + $0x27c] sm:$0xf] }
 0x1d5   : > { %v4657_v36 = vmax.f32 %v2704_v38, 0.0  ;;  %v7179_v38 = vld [vmem:[%s10904_s1 + $0x124] sm:$0xf]  ;;  %3138 = vmatpush.bf16.msra.mxu3 %v6585_v42 }
 0x1d6   : > { %v2528_v2 = vpop.f32.mrf.mxu0  ;;  %v6201_v13 = vor.u32 %v7179_v38, %v6198_v9  ;;  %v5928_v9 = vld [vmem:[%s7867_s26 + $0x278] sm:$0xf] }
 0x1d7   : > { %v2529_v15 = vadd.f32 %v2528_v2, %v8219_v63  ;;  %v2617_v4 = vpop.f32.mrf.mxu1  ;;  %6844 = vmatmul.msk.bf16.gmra.mxu2 %vm2104_vm0, %v8763_v35  ;;  %v8770_v25 = vpack.c.bf16 %v4657_v36, %v4653_v43  ;;  %v6454_v63 = vld [vmem:[%s10904_s1 + $0x330] sm:$0xf0] }
 0x1d8   : > { %2834 = vmatmul.bf16.gmra.mxu3 %v8191_v51  ;;  %v6457_v16 = vor.u32 %v7243_v44, %v6454_v63  ;;  %2871 = vmatpush.bf16.msra.mxu0 %v6201_v13  ;;  %v7211_v44 = vld [vmem:[%s10904_s1 + $0x224] sm:$0xf]  ;;  %v6326_v63 = vld [vmem:[%s10904_s1 + $0x230] sm:$0xf0]  ;;  %v8806_v13 = vor.u32 %v7113_v62, %v5928_v9 }
 0x1d9   : > { %v2618_v19 = vadd.f32 %v2617_v4, %v2529_v15  ;;  %2567 = vmatmul.bf16.gmra.mxu0 %v8757_v17  ;;  %11260 = vst [vmem:[#allocation108_spill] sm:$0xff] %v8770_v25  ;;  %v6329_v38 = vor.u32 %v7211_v44, %v6326_v63  ;;  %v7114_v25 = vld [vmem:[%s7867_s26 + $0x298] sm:$0xf0] }
 0x1da   : > { %2656 = vmatmul.bf16.gmra.mxu1 %v8761_v30  ;;  %v2706_v60 = vpop.f32.mrf.mxu2  ;;  %3049 = vmatpush.bf16.msra.mxu2 %v6457_v16  ;;  %v5936_v16 = vld [vmem:[%s7867_s26 + $0x280] sm:$0xf]  ;;  %11261 = vst [vmem:[#allocation109_spill] sm:$0xff] %v8806_v13 }
 0x1db   : > { %v2707_v2 = vadd.f32 %v2706_v60, %v2618_v19  ;;  %v8791_v15 = vpop.f32.mrf.mxu3  ;;  %v5930_v60 = vld [vmem:[%s7867_s26 + $0x294] sm:$0xf0]  ;;  %2960 = vmatpush.bf16.msra.mxu1 %v6329_v38  ;;  %v8812_v30 = vor.u32 %v7114_v25, %v5936_v16  ;;  %v7120_v16 = vld [vmem:[%s7867_s26 + $0x2c8] sm:$0xf0] }
 0x1dc   : > { %v8810_v35 = vor.u32 %v7110_v46, %v5930_v60  ;;  %v5956_v60 = vld [vmem:[%s7867_s26 + $0x2b0] sm:$0xf] }
 0x1dd   : > { %11263 = vst [vmem:[#allocation111_spill] sm:$0xff] %v8812_v30  ;;  %v4661_v44 = vmax.f32 %v2707_v2, 0.0 }
 0x1de   : > { %v2530_v4 = vpop.f32.mrf.mxu0  ;;  %11262 = vst [vmem:[#allocation110_spill] sm:$0xff] %v8810_v35 }
 0x1df   : > { %v2531_v43 = vadd.f32 %v2530_v4, %v8244_v57  ;;  %v2619_v36 = vpop.f32.mrf.mxu1 }
 0x1e1   : > { %v2620_v19 = vadd.f32 %v2619_v36, %v2531_v43 }
 0x1e2   : > { %v2708_v57 = vpop.f32.mrf.mxu2 }
 0x1e3   : > { %v2709_v42 = vadd.f32 %v2708_v57, %v2620_v19  ;;  %v8808_v4 = vpop.f32.mrf.mxu3  ;;  %v7117_v57 = vld [vmem:[%s7867_s26 + $0x2b4] sm:$0xf] }
 0x1e5   : > { %v4665_v63 = vmax.f32 %v2709_v42, 0.0  ;;  %v5958_v42 = vld [vmem:[%s7867_s26 + $0x2cc] sm:$0xf0] }
 0x1e6   : > { %v2533_v51 = vpop.f32.mrf.mxu0 }
 0x1e7   : > { %v2534_v43 = vadd.f32 %v2533_v51, %v8251_v28  ;;  %v2622_v36 = vpop.f32.mrf.mxu1  ;;  %6845 = vmatmul.msk.bf16.gmra.mxu2 %vm2104_vm0, %v8812_v30  ;;  %v8819_v25 = vpack.c.bf16 %v4665_v63, %v4661_v44  ;;  %v8831_v44 = vor.u32 %v7120_v16, %v5956_v60  ;;  %v6182_v16 = vld [vmem:[%s10904_s1 + $0x110] sm:$0xf0] }
 0x1e8   : > { %2839 = vmatmul.bf16.gmra.mxu3 %v8235_v14 }
 0x1e9   : > { %v2623_v38 = vadd.f32 %v2622_v36, %v2534_v43  ;;  %2572 = vmatmul.bf16.gmra.mxu0 %v8806_v13  ;;  %11264 = vst [vmem:[#allocation112_spill] sm:$0xff] %v8819_v25  ;;  %v5964_v43 = vld [vmem:[%s7867_s26 + $0x2b8] sm:$0xf]  ;;  %v7121_v36 = vld [vmem:[%s7867_s26 + $0x2d0] sm:$0xf0] }
 0x1ea   : > { %2661 = vmatmul.bf16.gmra.mxu1 %v8810_v35  ;;  %v2711_v51 = vpop.f32.mrf.mxu2  ;;  %11265 = vst [vmem:[#allocation113_spill] sm:$0xff] %v8831_v44  ;;  %v8837_v14 = vor.u32 %v7121_v36, %v5964_v43 }
 0x1eb   : > { %v2712_v28 = vadd.f32 %v2711_v51, %v2623_v38  ;;  %v8822_v2 = vpop.f32.mrf.mxu3  ;;  %v8835_v51 = vor.u32 %v7117_v57, %v5958_v42  ;;  %v7271_v57 = vld [vmem:[%s10904_s1 + $0x404] sm:$0xf]  ;;  %v6566_v42 = vld [vmem:[%s10904_s1 + $0x410] sm:$0xf0] }
 0x1ec   : > { %11267 = vst [vmem:[#allocation115_spill] sm:$0xff] %v8837_v14 }
 0x1ed   : > { %11266 = vst [vmem:[#allocation114_spill] sm:$0xff] %v8835_v51 }
 0x1ee   : > { %v2535_v19 = vpop.f32.mrf.mxu0 }
 0x1ef   : > { %v2536_v9 = vadd.f32 %v2535_v19, %v8270_v27  ;;  %v2624_v62 = vpop.f32.mrf.mxu1 }
 0x1f1   : > { %v2625_v46 = vadd.f32 %v2624_v62, %v2536_v9  ;;  %v4669_v9 = vmax.f32 %v2712_v28, 0.0  ;;  %v7175_v28 = vld [vmem:[%s10904_s1 + $0x104] sm:$0xf] }
 0x1f2   : > { %v2713_v30 = vpop.f32.mrf.mxu2  ;;  %v6185_v36 = vor.u32 %v7175_v28, %v6182_v16  ;;  %v5984_v16 = vld [vmem:[%s7867_s26 + $0x2e8] sm:$0xf] }
 0x1f3   : > { %v2714_v63 = vadd.f32 %v2713_v30, %v2625_v46  ;;  %v8833_v25 = vpop.f32.mrf.mxu3  ;;  %v7239_v46 = vld [vmem:[%s10904_s1 + $0x304] sm:$0xf] }
 0x1f4   : > { %2872 = vmatpush.bf16.msra.mxu0 %v6185_v36 }
 0x1f5   : > { %v4673_v62 = vmax.f32 %v2714_v63, 0.0  ;;  %v6569_v63 = vor.u32 %v7271_v57, %v6566_v42  ;;  %v7127_v57 = vld [vmem:[%s7867_s26 + $0x300] sm:$0xf0]  ;;  %v7124_v42 = vld [vmem:[%s7867_s26 + $0x2ec] sm:$0xf] }
 0x1f6   : > { %v2538_v38 = vpop.f32.mrf.mxu0  ;;  %v8880_v36 = vor.u32 %v7127_v57, %v5984_v16 }
 0x1f7   : > { %v2539_v27 = vadd.f32 %v2538_v38, %v8289_v54  ;;  %v2627_v19 = vpop.f32.mrf.mxu1  ;;  %6846 = vmatmul.msk.bf16.gmra.mxu2 %vm2104_vm0, %v8837_v14  ;;  %v8844_v30 = vpack.c.bf16 %v4673_v62, %v4669_v9  ;;  %v6438_v54 = vld [vmem:[%s10904_s1 + $0x310] sm:$0xf0]  ;;  %3139 = vmatpush.bf16.msra.mxu3 %v6569_v63 }
 0x1f8   : > { %2844 = vmatmul.bf16.gmra.mxu3 %v8261_v52  ;;  %v6441_v60 = vor.u32 %v7239_v46, %v6438_v54  ;;  %v7207_v46 = vld [vmem:[%s10904_s1 + $0x204] sm:$0xf]  ;;  %v6310_v54 = vld [vmem:[%s10904_s1 + $0x210] sm:$0xf0]  ;;  %11269 = vst [vmem:[#allocation117_spill] sm:$0xff] %v8880_v36 }
 0x1f9   : > { %v2628_v35 = vadd.f32 %v2627_v19, %v2539_v27  ;;  %2577 = vmatmul.bf16.gmra.mxu0 %v8831_v44  ;;  %11268 = vst [vmem:[#allocation116_spill] sm:$0xff] %v8844_v30  ;;  %v6313_v28 = vor.u32 %v7207_v46, %v6310_v54  ;;  %v7128_v30 = vld [vmem:[%s7867_s26 + $0x308] sm:$0xf0] }
 0x1fa   : > { %2666 = vmatmul.bf16.gmra.mxu1 %v8835_v51  ;;  %v2716_v43 = vpop.f32.mrf.mxu2  ;;  %3050 = vmatpush.bf16.msra.mxu2 %v6441_v60  ;;  %v5992_v60 = vld [vmem:[%s7867_s26 + $0x2f0] sm:$0xf] }
 0x1fb   : > { %v2717_v38 = vadd.f32 %v2716_v43, %v2628_v35  ;;  %v8865_v27 = vpop.f32.mrf.mxu3  ;;  %v5986_v43 = vld [vmem:[%s7867_s26 + $0x304] sm:$0xf0]  ;;  %2961 = vmatpush.bf16.msra.mxu1 %v6313_v28  ;;  %v8886_v51 = vor.u32 %v7128_v30, %v5992_v60  ;;  %v7134_v60 = vld [vmem:[%s7867_s26 + $0x338] sm:$0xf0] }
 0x1fc   : > { %v8884_v14 = vor.u32 %v7124_v42, %v5986_v43  ;;  %v6012_v43 = vld [vmem:[%s7867_s26 + $0x320] sm:$0xf] }
 0x1fd   : > { %11271 = vst [vmem:[#allocation119_spill] sm:$0xff] %v8886_v51  ;;  %v4677_v46 = vmax.f32 %v2717_v38, 0.0 }
 0x1fe   : > { %v2540_v19 = vpop.f32.mrf.mxu0  ;;  %11270 = vst [vmem:[#allocation118_spill] sm:$0xff] %v8884_v14 }
 0x1ff   : > { %v2541_v9 = vadd.f32 %v2540_v19, %v8314_v7  ;;  %v2629_v62 = vpop.f32.mrf.mxu1 }
 0x201   : > { %v2630_v35 = vadd.f32 %v2629_v62, %v2541_v9 }
 0x202   : > { %v2718_v7 = vpop.f32.mrf.mxu2 }
 0x203   : > { %v2719_v63 = vadd.f32 %v2718_v7, %v2630_v35  ;;  %v8882_v19 = vpop.f32.mrf.mxu3  ;;  %v7131_v7 = vld [vmem:[%s7867_s26 + $0x324] sm:$0xf] }
 0x205   : > { %v4681_v54 = vmax.f32 %v2719_v63, 0.0  ;;  %v6014_v63 = vld [vmem:[%s7867_s26 + $0x33c] sm:$0xf0] }
 0x206   : > { %v2543_v52 = vpop.f32.mrf.mxu0 }
 0x207   : > { %v2544_v9 = vadd.f32 %v2543_v52, %v8321_v29  ;;  %v2632_v62 = vpop.f32.mrf.mxu1  ;;  %6847 = vmatmul.msk.bf16.gmra.mxu2 %vm2104_vm0, %v8886_v51  ;;  %v8893_v30 = vpack.c.bf16 %v4681_v54, %v4677_v46  ;;  %v8905_v46 = vor.u32 %v7134_v60, %v6012_v43  ;;  %v6806_v60 = vld [vmem:[%s10904_s1 + $0x5f0] sm:$0xf0] }
 0x208   : > { %2849 = vmatmul.bf16.gmra.mxu3 %v8305_v8 }
 0x209   : > { %v2633_v28 = vadd.f32 %v2632_v62, %v2544_v9  ;;  %2582 = vmatmul.bf16.gmra.mxu0 %v8880_v36  ;;  %11272 = vst [vmem:[#allocation120_spill] sm:$0xff] %v8893_v30  ;;  %v6020_v9 = vld [vmem:[%s7867_s26 + $0x328] sm:$0xf]  ;;  %v7135_v62 = vld [vmem:[%s7867_s26 + $0x340] sm:$0xf0] }
 0x20a   : > { %2671 = vmatmul.bf16.gmra.mxu1 %v8884_v14  ;;  %v2721_v52 = vpop.f32.mrf.mxu2  ;;  %11273 = vst [vmem:[#allocation121_spill] sm:$0xff] %v8905_v46  ;;  %v8911_v8 = vor.u32 %v7135_v62, %v6020_v9 }
 0x20b   : > { %v2722_v29 = vadd.f32 %v2721_v52, %v2633_v28  ;;  %v8896_v38 = vpop.f32.mrf.mxu3  ;;  %v8909_v52 = vor.u32 %v7131_v7, %v6014_v63  ;;  %v6300_v7 = vld [vmem:[%s10904_s1 + $0x1e8] sm:$0xf]  ;;  %v7206_v63 = vld [vmem:[%s10904_s1 + $0x1f4] sm:$0xf0] }
 0x20c   : > { %11275 = vst [vmem:[#allocation123_spill] sm:$0xff] %v8911_v8 }
 0x20d   : > { %11274 = vst [vmem:[#allocation122_spill] sm:$0xff] %v8909_v52 }
 0x20e   : > { %v2545_v35 = vpop.f32.mrf.mxu0 }
 0x20f   : > { %v2546_v16 = vadd.f32 %v2545_v35, %v8340_v40  ;;  %v2634_v57 = vpop.f32.mrf.mxu1 }
 0x211   : > { %v2635_v42 = vadd.f32 %v2634_v57, %v2546_v16  ;;  %v4685_v16 = vmax.f32 %v2722_v29, 0.0  ;;  %v7331_v29 = vld [vmem:[%s10904_s1 + $0x5e4] sm:$0xf] }
 0x212   : > { %v2723_v51 = vpop.f32.mrf.mxu2  ;;  %v6809_v62 = vor.u32 %v7331_v29, %v6806_v60  ;;  %v6040_v60 = vld [vmem:[%s7867_s26 + $0x358] sm:$0xf] }
 0x213   : > { %v2724_v54 = vadd.f32 %v2723_v51, %v2635_v42  ;;  %v8907_v30 = vpop.f32.mrf.mxu3  ;;  %v6172_v42 = vld [vmem:[%s10904_s1 + $0xe8] sm:$0xf] }
 0x214   : > { %3221 = vmatpush.bf16.msrb.mxu0 %v6809_v62 }
 0x215   : > { %v4689_v57 = vmax.f32 %v2724_v54, 0.0  ;;  %v6301_v54 = vor.u32 %v7206_v63, %v6300_v7  ;;  %v7141_v7 = vld [vmem:[%s7867_s26 + $0x370] sm:$0xf0]  ;;  %v7138_v63 = vld [vmem:[%s7867_s26 + $0x35c] sm:$0xf] }
 0x216   : > { %v2548_v28 = vpop.f32.mrf.mxu0  ;;  %v8954_v62 = vor.u32 %v7141_v7, %v6040_v60 }
 0x217   : > { %v2549_v40 = vadd.f32 %v2548_v28, %v8365_v3  ;;  %v2637_v35 = vpop.f32.mrf.mxu1  ;;  %6848 = vmatmul.msk.bf16.gmra.mxu2 %vm2104_vm0, %v8911_v8  ;;  %v8918_v51 = vpack.c.bf16 %v4689_v57, %v4685_v16  ;;  %v7174_v3 = vld [vmem:[%s10904_s1 + $0xf4] sm:$0xf0]  ;;  %3488 = vmatpush.bf16.msrb.mxu3 %v6301_v54 }
 0x218   : > { %2854 = vmatmul.bf16.gmra.mxu3 %v8331_v5  ;;  %v6173_v43 = vor.u32 %v7174_v3, %v6172_v42  ;;  %v7335_v42 = vld [vmem:[%s10904_s1 + $0x604] sm:$0xf]  ;;  %v6822_v3 = vld [vmem:[%s10904_s1 + $0x610] sm:$0xf0]  ;;  %11277 = vst [vmem:[#allocation125_spill] sm:$0xff] %v8954_v62 }
 0x219   : > { %v2638_v14 = vadd.f32 %v2637_v35, %v2549_v40  ;;  %2587 = vmatmul.bf16.gmra.mxu0 %v8905_v46  ;;  %11276 = vst [vmem:[#allocation124_spill] sm:$0xff] %v8918_v51  ;;  %v6825_v29 = vor.u32 %v7335_v42, %v6822_v3  ;;  %v7142_v51 = vld [vmem:[%s7867_s26 + $0x378] sm:$0xf0] }
 0x21a   : > { %2676 = vmatmul.bf16.gmra.mxu1 %v8909_v52  ;;  %v2726_v9 = vpop.f32.mrf.mxu2  ;;  %3399 = vmatpush.bf16.msrb.mxu2 %v6173_v43  ;;  %v6048_v43 = vld [vmem:[%s7867_s26 + $0x360] sm:$0xf] }
 0x21b   : > { %v2727_v28 = vadd.f32 %v2726_v9, %v2638_v14  ;;  %v8939_v40 = vpop.f32.mrf.mxu3  ;;  %v6042_v9 = vld [vmem:[%s7867_s26 + $0x374] sm:$0xf0]  ;;  %3317 = vmatpush.bf16.msrb.mxu1 %v6825_v29  ;;  %v8960_v52 = vor.u32 %v7142_v51, %v6048_v43 }
 0x21c   : > { %v8958_v8 = vor.u32 %v7138_v63, %v6042_v9 }
 0x21d   : > { %11279 = vst [vmem:[#allocation127_spill] sm:$0xff] %v8960_v52  ;;  %v4693_v42 = vmax.f32 %v2727_v28, 0.0 }
 0x21e   : > { %v2550_v35 = vpop.f32.mrf.mxu0  ;;  %11278 = vst [vmem:[#allocation126_spill] sm:$0xff] %v8958_v8 }
 0x21f   : > { %v2551_v16 = vadd.f32 %v2550_v35, %v8390_v26  ;;  %v2639_v57 = vpop.f32.mrf.mxu1 }
 0x221   : > { %v2640_v14 = vadd.f32 %v2639_v57, %v2551_v16 }
 0x222   : > { %v2728_v26 = vpop.f32.mrf.mxu2 }
 0x223   : > { %v2729_v54 = vadd.f32 %v2728_v26, %v2640_v14  ;;  %v8956_v35 = vpop.f32.mrf.mxu3 }
 0x225   : > { %v4697_v3 = vmax.f32 %v2729_v54, 0.0 }
 0x226   : > { %v2553_v5 = vpop.f32.mrf.mxu0 }
 0x227   : > { %v2554_v16 = vadd.f32 %v2553_v5, %v8397_v55  ;;  %v2642_v57 = vpop.f32.mrf.mxu1  ;;  %6849 = vmatmul.msk.bf16.gmra.mxu2 %vm2104_vm0, %v8960_v52  ;;  %v8967_v14 = vpack.c.bf16 %v4697_v3, %v4693_v42 }
 0x228   : > { %2859 = vmatmul.bf16.gmra.mxu3 %v8381_v1 }
 0x229   : > { %v2643_v46 = vadd.f32 %v2642_v57, %v2554_v16  ;;  %2592 = vmatmul.bf16.gmra.mxu0 %v8954_v62  ;;  %11280 = vst [vmem:[#allocation128_spill] sm:$0xff] %v8967_v14 }
 0x22a   : > { %2681 = vmatmul.bf16.gmra.mxu1 %v8958_v8  ;;  %v2731_v29 = vpop.f32.mrf.mxu2 }
 0x22b   : > { %v2732_v51 = vadd.f32 %v2731_v29, %v2643_v46  ;;  %v8970_v60 = vpop.f32.mrf.mxu3  ;;  %v6156_v46 = vld [vmem:[%s10904_s1 + $0xc8] sm:$0xf]  ;;  %v7327_v29 = vld [vmem:[%s10904_s1 + $0x5c4] sm:$0xf] }
 0x22d   : > { %v4701_v57 = vmax.f32 %v2732_v51, 0.0 }
 0x22e   : > { %v2555_v5 = vpop.f32.mrf.mxu0 }
 0x22f   : > { %v2556_v55 = vadd.f32 %v2555_v5, %v8412_v31  ;;  %v2644_v28 = vpop.f32.mrf.mxu1  ;;  %v6790_v5 = vld [vmem:[%s10904_s1 + $0x5d0] sm:$0xf0] }
 0x231   : > { %v2645_v7 = vadd.f32 %v2644_v28, %v2556_v55  ;;  %v6284_v55 = vld [vmem:[%s10904_s1 + $0x1c8] sm:$0xf]  ;;  %v7202_v28 = vld [vmem:[%s10904_s1 + $0x1d4] sm:$0xf0] }
 0x232   : > { %v2733_v63 = vpop.f32.mrf.mxu2 }
 0x233   : > { %v2734_v9 = vadd.f32 %v2733_v63, %v2645_v7  ;;  %v8973_v43 = vpop.f32.mrf.mxu3  ;;  %v6793_v63 = vor.u32 %v7327_v29, %v6790_v5 }
 0x235   : > { %v4705_v42 = vmax.f32 %v2734_v9, 0.0  ;;  %v6285_v9 = vor.u32 %v7202_v28, %v6284_v55  ;;  %3222 = vmatpush.bf16.msrb.mxu0 %v6793_v63 }
 0x236   : > { %v2558_v26 = vpop.f32.mrf.mxu0 }
 0x237   : > { %v2559_v54 = vadd.f32 %v2558_v26, %v8438_v34  ;;  %v2647_v16 = vpop.f32.mrf.mxu1  ;;  %3051 = vmatmul.bf16.vlgmr.msra.gmra.mxu2 %v7892_v53  ;;  %v8979_v31 = vpack.c.bf16 %v4705_v42, %v4701_v57  ;;  %v7170_v34 = vld [vmem:[%s10904_s1 + $0xd4] sm:$0xf0]  ;;  %3489 = vmatpush.bf16.msrb.mxu3 %v6285_v9 }
 0x238   : > { %3140 = vmatmul.bf16.vlgmr.msra.gmra.mxu3 %v8405_v61  ;;  %v6157_v51 = vor.u32 %v7170_v34, %v6156_v46 }
 0x239   : > { %v2648_v3 = vadd.f32 %v2647_v16, %v2559_v54  ;;  %2873 = vmatmul.bf16.vlgmr.msra.gmra.mxu0 %v7886_v49  ;;  %11281 = vst [vmem:[#allocation129_spill] sm:$0xff] %v8979_v31 }
 0x23a   : > { %2962 = vmatmul.bf16.vlgmr.msra.gmra.mxu1 %v7888_v50  ;;  %v2736_v7 = vpop.f32.mrf.mxu2  ;;  %3400 = vmatpush.bf16.msrb.mxu2 %v6157_v51 }
 0x23b   : > { %v2737_v26 = vadd.f32 %v2736_v7, %v2648_v3  ;;  %v9000_v54 = vpop.f32.mrf.mxu3 }
 0x23d   : > { %v4709_v5 = vmax.f32 %v2737_v26, 0.0 }
 0x23e   : > { %v2560_v16 = vpop.f32.mrf.mxu0 }
 0x23f   : > { %v2561_v57 = vadd.f32 %v2560_v16, %v8459_v20  ;;  %v2649_v42 = vpop.f32.mrf.mxu1 }
 0x241   : > { %v2650_v46 = vadd.f32 %v2649_v42, %v2561_v57 }
 0x242   : > { %v2738_v34 = vpop.f32.mrf.mxu2 }
 0x243   : > { %v2739_v31 = vadd.f32 %v2738_v34, %v2650_v46  ;;  %v9003_v14 = vpop.f32.mrf.mxu3 }
 0x245   : > { %v4713_v3 = vmax.f32 %v2739_v31, 0.0 }
 0x246   : > { %v2563_v61 = vpop.f32.mrf.mxu0 }
 0x247   : > { %v2564_v53 = vadd.f32 %v2563_v61, %v8467_v56  ;;  %v2652_v29 = vpop.f32.mrf.mxu1  ;;  %3056 = vmatmul.bf16.gmra.mxu2 %v7930_v12  ;;  %v9009_v20 = vpack.c.bf16 %v4713_v3, %v4709_v5  ;;  %v11283_v5 = vld [vmem:[#allocation16_spill] sm:$0xff]  ;;  %v11285_v3 = vld [vmem:[#allocation75_spill] sm:$0xff] }
 0x248   : > { %3145 = vmatmul.bf16.gmra.mxu3 %v8452_v18 }
 0x249   : > { %v2653_v55 = vadd.f32 %v2652_v29, %v2564_v53  ;;  %2878 = vmatmul.bf16.gmra.mxu0 %v7926_v10  ;;  %11282 = vst [vmem:[#allocation130_spill] sm:$0xff] %v9009_v20 }
 0x24a   : > { %2967 = vmatmul.bf16.gmra.mxu1 %v7928_v11  ;;  %v2741_v51 = vpop.f32.mrf.mxu2 }
 0x24b   : > { %v2742_v28 = vadd.f32 %v2741_v51, %v2653_v55  ;;  %v9012_v7 = vpop.f32.mrf.mxu3  ;;  %v6140_v55 = vld [vmem:[%s10904_s1 + $0xa8] sm:$0xf]  ;;  %v7323_v51 = vld [vmem:[%s10904_s1 + $0x5a4] sm:$0xf] }
 0x24d   : > { %v4717_v46 = vmax.f32 %v2742_v28, 0.0 }
 0x24e   : > { %v2565_v63 = vpop.f32.mrf.mxu0 }
 0x24f   : > { %v2566_v61 = vadd.f32 %v2565_v63, %v8482_v39  ;;  %v2654_v56 = vpop.f32.mrf.mxu1  ;;  %v6774_v63 = vld [vmem:[%s10904_s1 + $0x5b0] sm:$0xf0] }
 0x251   : > { %v2655_v31 = vadd.f32 %v2654_v56, %v2566_v61  ;;  %v6268_v61 = vld [vmem:[%s10904_s1 + $0x1a8] sm:$0xf]  ;;  %v7198_v56 = vld [vmem:[%s10904_s1 + $0x1b4] sm:$0xf0] }
 0x252   : > { %v2743_v53 = vpop.f32.mrf.mxu2 }
 0x253   : > { %v2744_v9 = vadd.f32 %v2743_v53, %v2655_v31  ;;  %v9015_v26 = vpop.f32.mrf.mxu3  ;;  %v6777_v53 = vor.u32 %v7323_v51, %v6774_v63 }
 0x255   : > { %v4721_v34 = vmax.f32 %v2744_v9, 0.0  ;;  %v6269_v9 = vor.u32 %v7198_v56, %v6268_v61  ;;  %3223 = vmatpush.bf16.msrb.mxu0 %v6777_v53  ;;  %v11287_v56 = vld [vmem:[#allocation18_spill] sm:$0xff] }
 0x256   : > { %v2568_v16 = vpop.f32.mrf.mxu0 }
 0x257   : > { %v2569_v57 = vadd.f32 %v2568_v16, %v8508_v47  ;;  %v2657_v42 = vpop.f32.mrf.mxu1  ;;  %3061 = vmatmul.bf16.gmra.mxu2 %v11283_v5  ;;  %v9021_v39 = vpack.c.bf16 %v4721_v34, %v4717_v46  ;;  %v7166_v47 = vld [vmem:[%s10904_s1 + $0xb4] sm:$0xf0]  ;;  %v11286_v46 = vld [vmem:[#allocation81_spill] sm:$0xff]  ;;  %3490 = vmatpush.bf16.msrb.mxu3 %v6269_v9  ;;  %v11291_v9 = vld [vmem:[#allocation78_spill] sm:$0xff] }
 0x258   : > { %3150 = vmatmul.bf16.gmra.mxu3 %v11285_v3  ;;  %v6141_v28 = vor.u32 %v7166_v47, %v6140_v55 }
 0x259   : > { %v2658_v29 = vadd.f32 %v2657_v42, %v2569_v57  ;;  %2883 = vmatmul.bf16.gmra.mxu0 %v7946_v22  ;;  %11284 = vst [vmem:[#allocation131_spill] sm:$0xff] %v9021_v39 }
 0x25a   : > { %2972 = vmatmul.bf16.gmra.mxu1 %v7948_v23  ;;  %v2746_v31 = vpop.f32.mrf.mxu2  ;;  %3401 = vmatpush.bf16.msrb.mxu2 %v6141_v28  ;;  %v11288_v28 = vld [vmem:[#allocation19_spill] sm:$0xff] }
 0x25b   : > { %v2747_v16 = vadd.f32 %v2746_v31, %v2658_v29  ;;  %v9042_v57 = vpop.f32.mrf.mxu3  ;;  %v11289_v31 = vld [vmem:[#allocation20_spill] sm:$0xff] }
 0x25d   : > { %v4725_v63 = vmax.f32 %v2747_v16, 0.0 }
 0x25e   : > { %v2570_v42 = vpop.f32.mrf.mxu0 }
 0x25f   : > { %v2571_v34 = vadd.f32 %v2570_v42, %v11286_v46  ;;  %v2659_v55 = vpop.f32.mrf.mxu1 }
 0x261   : > { %v2660_v47 = vadd.f32 %v2659_v55, %v2571_v34 }
 0x262   : > { %v2748_v39 = vpop.f32.mrf.mxu2 }
 0x263   : > { %v2749_v20 = vadd.f32 %v2748_v39, %v2660_v47  ;;  %v9045_v3 = vpop.f32.mrf.mxu3 }
 0x265   : > { %v4729_v29 = vmax.f32 %v2749_v20, 0.0 }
 0x266   : > { %v2573_v5 = vpop.f32.mrf.mxu0 }
 0x267   : > { %v2574_v23 = vadd.f32 %v2573_v5, %v8537_v33  ;;  %v2662_v51 = vpop.f32.mrf.mxu1  ;;  %3066 = vmatmul.bf16.gmra.mxu2 %v11289_v31  ;;  %v9051_v53 = vpack.c.bf16 %v4729_v29, %v4725_v63 }
 0x268   : > { %3155 = vmatmul.bf16.gmra.mxu3 %v11291_v9 }
 0x269   : > { %v2663_v61 = vadd.f32 %v2662_v51, %v2574_v23  ;;  %2888 = vmatmul.bf16.gmra.mxu0 %v11287_v56  ;;  %11290 = vst [vmem:[#allocation81_spill] sm:$0xff] %v9051_v53  ;;  %v11292_v51 = vld [vmem:[#allocation85_spill] sm:$0xff] }
 0x26a   : > { %2977 = vmatmul.bf16.gmra.mxu1 %v11288_v28  ;;  %v2751_v39 = vpop.f32.mrf.mxu2  ;;  %v11293_v28 = vld [vmem:[#allocation22_spill] sm:$0xff] }
 0x26b   : > { %v2752_v42 = vadd.f32 %v2751_v39, %v2663_v61  ;;  %v9054_v46 = vpop.f32.mrf.mxu3  ;;  %v11294_v61 = vld [vmem:[#allocation23_spill] sm:$0xff]  ;;  %v11295_v39 = vld [vmem:[#allocation24_spill] sm:$0xff] }
 0x26d   : > { %v4733_v29 = vmax.f32 %v2752_v42, 0.0  ;;  %v7162_v42 = vld [vmem:[%s10904_s1 + $0x94] sm:$0xf0] }
 0x26e   : > { %v2575_v34 = vpop.f32.mrf.mxu0 }
 0x26f   : > { %v2576_v33 = vadd.f32 %v2575_v34, %v8552_v37  ;;  %v2664_v5 = vpop.f32.mrf.mxu1  ;;  %v11297_v34 = vld [vmem:[#allocation82_spill] sm:$0xff] }
 0x271   : > { %v2665_v20 = vadd.f32 %v2664_v5, %v2576_v33  ;;  %v6124_v33 = vld [vmem:[%s10904_s1 + $0x88] sm:$0xf] }
 0x272   : > { %v2753_v23 = vpop.f32.mrf.mxu2  ;;  %v6125_v5 = vor.u32 %v7162_v42, %v6124_v33  ;;  %v11298_v33 = vld [vmem:[#allocation89_spill] sm:$0xff] }
 0x273   : > { %v2754_v16 = vadd.f32 %v2753_v23, %v2665_v20  ;;  %v9057_v55 = vpop.f32.mrf.mxu3  ;;  %v6252_v20 = vld [vmem:[%s10904_s1 + $0x188] sm:$0xf]  ;;  %v7194_v23 = vld [vmem:[%s10904_s1 + $0x194] sm:$0xf0] }
 0x274   : > { %3402 = vmatpush.bf16.msrb.mxu2 %v6125_v5  ;;  %v11300_v5 = vld [vmem:[#allocation27_spill] sm:$0xff] }
 0x275   : > { %v4737_v53 = vmax.f32 %v2754_v16, 0.0 }
 0x276   : > { %v2578_v47 = vpop.f32.mrf.mxu0 }
 0x277   : > { %v2579_v31 = vadd.f32 %v2578_v47, %v11292_v51  ;;  %v2667_v63 = vpop.f32.mrf.mxu1  ;;  %3071 = vmatmul.bf16.gmra.mxu2 %v11295_v39  ;;  %v9063_v37 = vpack.c.bf16 %v4737_v53, %v4733_v29  ;;  %v6758_v53 = vld [vmem:[%s10904_s1 + $0x590] sm:$0xf0]  ;;  %v6253_v51 = vor.u32 %v7194_v23, %v6252_v20  ;;  %v11299_v23 = vld [vmem:[#allocation26_spill] sm:$0xff] }
 0x278   : > { %3160 = vmatmul.bf16.gmra.mxu3 %v11297_v34 }
 0x279   : > { %v2668_v9 = vadd.f32 %v2667_v63, %v2579_v31  ;;  %2893 = vmatmul.bf16.gmra.mxu0 %v11293_v28  ;;  %11296 = vst [vmem:[#allocation85_spill] sm:$0xff] %v9063_v37  ;;  %v7319_v31 = vld [vmem:[%s10904_s1 + $0x584] sm:$0xf]  ;;  %3491 = vmatpush.bf16.msrb.mxu3 %v6253_v51 }
 0x27a   : > { %2982 = vmatmul.bf16.gmra.mxu1 %v11294_v61  ;;  %v2756_v16 = vpop.f32.mrf.mxu2  ;;  %v6761_v47 = vor.u32 %v7319_v31, %v6758_v53 }
 0x27b   : > { %v2757_v63 = vadd.f32 %v2756_v16, %v2668_v9  ;;  %v9084_v29 = vpop.f32.mrf.mxu3 }
 0x27c   : > { %3224 = vmatpush.bf16.msrb.mxu0 %v6761_v47 }
 0x27d   : > { %v4741_v53 = vmax.f32 %v2757_v63, 0.0 }
 0x27e   : > { %v2580_v37 = vpop.f32.mrf.mxu0 }
 0x27f   : > { %v2581_v42 = vadd.f32 %v2580_v37, %v11298_v33  ;;  %v2669_v34 = vpop.f32.mrf.mxu1  ;;  %v11301_v37 = vld [vmem:[#allocation28_spill] sm:$0xff] }
 0x281   : > { %v2670_v39 = vadd.f32 %v2669_v34, %v2581_v42  ;;  %v11303_v34 = vld [vmem:[#allocation86_spill] sm:$0xff] }
 0x282   : > { %v2758_v61 = vpop.f32.mrf.mxu2 }
 0x283   : > { %v2759_v18 = vadd.f32 %v2758_v61, %v2670_v39  ;;  %v9087_v12 = vpop.f32.mrf.mxu3 }
 0x285   : > { %v4745_v9 = vmax.f32 %v2759_v18, 0.0 }
 0x286   : > { %v2583_v11 = vpop.f32.mrf.mxu0 }
 0x287   : > { %v2584_v50 = vadd.f32 %v2583_v11, %v8607_v32  ;;  %v2672_v31 = vpop.f32.mrf.mxu1  ;;  %3076 = vmatmul.bf16.gmra.mxu2 %v11301_v37  ;;  %v9093_v16 = vpack.c.bf16 %v4745_v9, %v4741_v53 }
 0x288   : > { %3165 = vmatmul.bf16.gmra.mxu3 %v11303_v34 }
 0x289   : > { %v2673_v20 = vadd.f32 %v2672_v31, %v2584_v50  ;;  %2898 = vmatmul.bf16.gmra.mxu0 %v11299_v23  ;;  %11302 = vst [vmem:[#allocation89_spill] sm:$0xff] %v9093_v16  ;;  %v11304_v31 = vld [vmem:[#allocation93_spill] sm:$0xff] }
 0x28a   : > { %2987 = vmatmul.bf16.gmra.mxu1 %v11300_v5  ;;  %v2761_v61 = vpop.f32.mrf.mxu2  ;;  %v11305_v5 = vld [vmem:[#allocation30_spill] sm:$0xff] }
 0x28b   : > { %v2762_v39 = vadd.f32 %v2761_v61, %v2673_v20  ;;  %v9096_v47 = vpop.f32.mrf.mxu3  ;;  %v11306_v20 = vld [vmem:[#allocation31_spill] sm:$0xff]  ;;  %v11307_v61 = vld [vmem:[#allocation32_spill] sm:$0xff] }
 0x28d   : > { %v4749_v9 = vmax.f32 %v2762_v39, 0.0  ;;  %v7158_v39 = vld [vmem:[%s10904_s1 + $0x74] sm:$0xf0] }
 0x28e   : > { %v2585_v51 = vpop.f32.mrf.mxu0 }
 0x28f   : > { %v2586_v11 = vadd.f32 %v2585_v51, %v8622_v45  ;;  %v2674_v32 = vpop.f32.mrf.mxu1  ;;  %v11309_v51 = vld [vmem:[#allocation90_spill] sm:$0xff] }
 0x291   : > { %v2675_v18 = vadd.f32 %v2674_v32, %v2586_v11  ;;  %v6108_v11 = vld [vmem:[%s10904_s1 + $0x68] sm:$0xf] }
 0x292   : > { %v2763_v50 = vpop.f32.mrf.mxu2  ;;  %v6109_v32 = vor.u32 %v7158_v39, %v6108_v11  ;;  %v11310_v11 = vld [vmem:[#allocation97_spill] sm:$0xff] }
 0x293   : > { %v2764_v63 = vadd.f32 %v2763_v50, %v2675_v18  ;;  %v9099_v33 = vpop.f32.mrf.mxu3  ;;  %v6236_v18 = vld [vmem:[%s10904_s1 + $0x168] sm:$0xf]  ;;  %v7190_v50 = vld [vmem:[%s10904_s1 + $0x174] sm:$0xf0] }
 0x294   : > { %3403 = vmatpush.bf16.msrb.mxu2 %v6109_v32  ;;  %v11312_v32 = vld [vmem:[#allocation35_spill] sm:$0xff] }
 0x295   : > { %v4753_v16 = vmax.f32 %v2764_v63, 0.0 }
 0x296   : > { %v2588_v42 = vpop.f32.mrf.mxu0 }
 0x297   : > { %v2589_v37 = vadd.f32 %v2588_v42, %v11304_v31  ;;  %v2677_v53 = vpop.f32.mrf.mxu1  ;;  %3081 = vmatmul.bf16.gmra.mxu2 %v11307_v61  ;;  %v9105_v45 = vpack.c.bf16 %v4753_v16, %v4749_v9  ;;  %v6742_v16 = vld [vmem:[%s10904_s1 + $0x570] sm:$0xf0]  ;;  %v6237_v31 = vor.u32 %v7190_v50, %v6236_v18  ;;  %v11311_v50 = vld [vmem:[#allocation34_spill] sm:$0xff] }
 0x298   : > { %3170 = vmatmul.bf16.gmra.mxu3 %v11309_v51 }
 0x299   : > { %v2678_v34 = vadd.f32 %v2677_v53, %v2589_v37  ;;  %2903 = vmatmul.bf16.gmra.mxu0 %v11305_v5  ;;  %11308 = vst [vmem:[#allocation93_spill] sm:$0xff] %v9105_v45  ;;  %v7315_v37 = vld [vmem:[%s10904_s1 + $0x564] sm:$0xf]  ;;  %3492 = vmatpush.bf16.msrb.mxu3 %v6237_v31 }
 0x29a   : > { %2992 = vmatmul.bf16.gmra.mxu1 %v11306_v20  ;;  %v2766_v63 = vpop.f32.mrf.mxu2  ;;  %v6745_v42 = vor.u32 %v7315_v37, %v6742_v16 }
 0x29b   : > { %v2767_v53 = vadd.f32 %v2766_v63, %v2678_v34  ;;  %v9126_v9 = vpop.f32.mrf.mxu3 }
 0x29c   : > { %3225 = vmatpush.bf16.msrb.mxu0 %v6745_v42 }
 0x29d   : > { %v4757_v16 = vmax.f32 %v2767_v53, 0.0 }
 0x29e   : > { %v2590_v45 = vpop.f32.mrf.mxu0 }
 0x29f   : > { %v2591_v39 = vadd.f32 %v2590_v45, %v11310_v11  ;;  %v2679_v51 = vpop.f32.mrf.mxu1  ;;  %v11313_v45 = vld [vmem:[#allocation36_spill] sm:$0xff] }
 0x2a1   : > { %v2680_v61 = vadd.f32 %v2679_v51, %v2591_v39  ;;  %v11315_v51 = vld [vmem:[#allocation94_spill] sm:$0xff] }
 0x2a2   : > { %v2768_v20 = vpop.f32.mrf.mxu2 }
 0x2a3   : > { %v2769_v1 = vadd.f32 %v2768_v20, %v2680_v61  ;;  %v9129_v52 = vpop.f32.mrf.mxu3 }
 0x2a5   : > { %v4761_v34 = vmax.f32 %v2769_v1, 0.0  ;;  %v9144_v1 = vld [vmem:[%s10905_s2] sm:$0xf] }
 0x2a6   : > { %v2593_v8 = vpop.f32.mrf.mxu0  ;;  %11316 = vst [vmem:[#allocation132_spill] sm:$0xff] %v9144_v1 }
 0x2a7   : > { %v2594_v5 = vadd.f32 %v2593_v8, %v8677_v59  ;;  %v2682_v37 = vpop.f32.mrf.mxu1  ;;  %3086 = vmatmul.bf16.gmra.mxu2 %v11313_v45  ;;  %v9135_v63 = vpack.c.bf16 %v4761_v34, %v4757_v16  ;;  %v11319_v45 = vld [vmem:[#allocation39_spill] sm:$0xff] }
 0x2a8   : > { %3175 = vmatmul.bf16.gmra.mxu3 %v11315_v51  ;;  %v11318_v51 = vld [vmem:[#allocation38_spill] sm:$0xff] }
 0x2a9   : > { %v2683_v18 = vadd.f32 %v2682_v37, %v2594_v5  ;;  %2908 = vmatmul.bf16.gmra.mxu0 %v11311_v50  ;;  %11314 = vst [vmem:[#allocation97_spill] sm:$0xff] %v9135_v63  ;;  %v9147_v5 = vperm.slane %v9144_v1, 1 }
 0x2aa   : > { %2997 = vmatmul.bf16.gmra.mxu1 %v11312_v32  ;;  %v2771_v20 = vpop.f32.mrf.mxu2  ;;  %v11320_v32 = vld [vmem:[#allocation40_spill] sm:$0xff] }
 0x2ab   : > { %v2772_v61 = vadd.f32 %v2771_v20, %v2683_v18  ;;  %v9138_v42 = vpop.f32.mrf.mxu3  ;;  %v2786_v11 = vadd.f32 %v8717_v21, %v9147_v5  ;;  %v6092_v21 = vld [vmem:[%s10904_s1 + $0x48] sm:$0xf] }
 0x2ad   : > { %v4765_v20 = vmax.f32 %v2772_v61, 0.0  ;;  %v7154_v61 = vld [vmem:[%s10904_s1 + $0x54] sm:$0xf0] }
 0x2ae   : > { %v2595_v31 = vpop.f32.mrf.mxu0 }
 0x2af   : > { %v2596_v8 = vadd.f32 %v2595_v31, %v8692_v58  ;;  %v2684_v59 = vpop.f32.mrf.mxu1 }
 0x2b1   : > { %v2685_v53 = vadd.f32 %v2684_v59, %v2596_v8  ;;  %v7311_v59 = vld [vmem:[%s10904_s1 + $0x544] sm:$0xf] }
 0x2b2   : > { %v2773_v39 = vpop.f32.mrf.mxu2 }
 0x2b3   : > { %v2774_v37 = vadd.f32 %v2773_v39, %v2685_v53  ;;  %v9151_v16 = vpop.f32.mrf.mxu3  ;;  %v6093_v53 = vor.u32 %v7154_v61, %v6092_v21  ;;  %v6220_v39 = vld [vmem:[%s10904_s1 + $0x148] sm:$0xf] }
 0x2b4   : > { %11317 = vst [vmem:[#allocation133_spill] sm:$0xff] %v9151_v16 }
 0x2b5   : > { %v4769_v31 = vmax.f32 %v2774_v37, 0.0  ;;  %v7186_v37 = vld [vmem:[%s10904_s1 + $0x154] sm:$0xf0]  ;;  %3404 = vmatpush.bf16.msrb.mxu2 %v6093_v53  ;;  %v11322_v53 = vld [vmem:[#allocation42_spill] sm:$0xff] }
 0x2b6   : > { %v2874_v34 = vpop.f32.mrf.mxu0 }
 0x2b7   : > { %v2875_v18 = vadd.f32 %v2874_v34, %v2786_v11  ;;  %v2963_v58 = vpop.f32.mrf.mxu1  ;;  %3091 = vmatmul.bf16.gmra.mxu2 %v11320_v32  ;;  %v9156_v8 = vpack.c.bf16 %v4769_v31, %v4765_v20  ;;  %v6726_v11 = vld [vmem:[%s10904_s1 + $0x550] sm:$0xf0]  ;;  %v2788_v34 = vadd.f32 %v8734_v24, %v9147_v5  ;;  %v6221_v20 = vor.u32 %v7186_v37, %v6220_v39 }
 0x2b8   : > { %3180 = vmatmul.bf16.gmra.mxu3 %v8685_v48  ;;  %v11323_v37 = vld [vmem:[#allocation43_spill] sm:$0xff] }
 0x2b9   : > { %v2964_v63 = vadd.f32 %v2963_v58, %v2875_v18  ;;  %2913 = vmatmul.bf16.gmra.mxu0 %v11318_v51  ;;  %11321 = vst [vmem:[#allocation134_spill] sm:$0xff] %v9156_v8  ;;  %v6729_v58 = vor.u32 %v7311_v59, %v6726_v11  ;;  %3493 = vmatpush.bf16.msrb.mxu3 %v6221_v20 }
 0x2ba   : > { %3002 = vmatmul.bf16.gmra.mxu1 %v11319_v45  ;;  %v3052_v18 = vpop.f32.mrf.mxu2  ;;  %v2791_v51 = vadd.f32 %v8748_v0, %v9147_v5 }
 0x2bb   : > { %v3053_v31 = vadd.f32 %v3052_v18, %v2964_v63  ;;  %v3141_v21 = vpop.f32.mrf.mxu3  ;;  %3226 = vmatpush.bf16.msrb.mxu0 %v6729_v58  ;;  %v2796_v58 = vadd.f32 %v8791_v15, %v9147_v5  ;;  %v6076_v15 = vld [vmem:[%s10904_s1 + $0x28] sm:$0xf] }
 0x2bd   : > { %v9179_v32 = vadd.f32 %v3141_v21, %v3053_v31 }
 0x2be   : > { %v2876_v61 = vpop.f32.mrf.mxu0 }
 0x2bf   : > { %v2877_v8 = vadd.f32 %v2876_v61, %v2788_v34  ;;  %v2965_v48 = vpop.f32.mrf.mxu1  ;;  %v11324_v34 = vld [vmem:[#allocation44_spill] sm:$0xff] }
 0x2c1   : > { %v2966_v45 = vadd.f32 %v2965_v48, %v2877_v8  ;;  %v2793_v48 = vadd.f32 %v8759_v41, %v9147_v5 }
 0x2c2   : > { %v3054_v1 = vpop.f32.mrf.mxu2 }
 0x2c3   : > { %v3055_v16 = vadd.f32 %v3054_v1, %v2966_v45  ;;  %v3143_v24 = vpop.f32.mrf.mxu3 }
 0x2c5   : > { %v9183_v63 = vadd.f32 %v3143_v24, %v3055_v16 }
 0x2c6   : > { %v2879_v50 = vpop.f32.mrf.mxu0 }
 0x2c7   : > { %v2880_v59 = vadd.f32 %v2879_v50, %v2791_v51  ;;  %v2968_v11 = vpop.f32.mrf.mxu1  ;;  %3096 = vmatmul.bf16.gmra.mxu2 %v11324_v34 }
 0x2c8   : > { %3185 = vmatmul.bf16.gmra.mxu3 %v8732_v6 }
 0x2c9   : > { %v2969_v39 = vadd.f32 %v2968_v11, %v2880_v59  ;;  %2918 = vmatmul.bf16.gmra.mxu0 %v11322_v53 }
 0x2ca   : > { %3007 = vmatmul.bf16.gmra.mxu1 %v11323_v37  ;;  %v3057_v0 = vpop.f32.mrf.mxu2 }
 0x2cb   : > { %v3058_v45 = vadd.f32 %v3057_v0, %v2969_v39  ;;  %v3146_v1 = vpop.f32.mrf.mxu3  ;;  %v11325_v39 = vld [vmem:[#allocation46_spill] sm:$0xff]  ;;  %v11326_v0 = vld [vmem:[#allocation47_spill] sm:$0xff] }
 0x2cd   : > { %v9191_v16 = vadd.f32 %v3146_v1, %v3058_v45  ;;  %v7150_v45 = vld [vmem:[%s10904_s1 + $0x34] sm:$0xf0]  ;;  %v7307_v1 = vld [vmem:[%s10904_s1 + $0x524] sm:$0xf] }
 0x2ce   : > { %v2881_v8 = vpop.f32.mrf.mxu0 }
 0x2cf   : > { %v2882_v50 = vadd.f32 %v2881_v8, %v2793_v48  ;;  %v2970_v51 = vpop.f32.mrf.mxu1  ;;  %v11327_v48 = vld [vmem:[#allocation48_spill] sm:$0xff]  ;;  %v6077_v8 = vor.u32 %v7150_v45, %v6076_v15 }
 0x2d1   : > { %v2971_v18 = vadd.f32 %v2970_v51, %v2882_v50  ;;  %v6710_v50 = vld [vmem:[%s10904_s1 + $0x530] sm:$0xf0]  ;;  %v6204_v51 = vld [vmem:[%s10904_s1 + $0x128] sm:$0xf]  ;;  %3405 = vmatpush.bf16.msrb.mxu2 %v6077_v8 }
 0x2d2   : > { %v3059_v20 = vpop.f32.mrf.mxu2  ;;  %v11328_v8 = vld [vmem:[#allocation50_spill] sm:$0xff] }
 0x2d3   : > { %v3060_v31 = vadd.f32 %v3059_v20, %v2971_v18  ;;  %v3148_v21 = vpop.f32.mrf.mxu3  ;;  %v7182_v18 = vld [vmem:[%s10904_s1 + $0x134] sm:$0xf0] }
 0x2d5   : > { %v9195_v11 = vadd.f32 %v3148_v21, %v3060_v31  ;;  %v6713_v31 = vor.u32 %v7307_v1, %v6710_v50  ;;  %v6205_v21 = vor.u32 %v7182_v18, %v6204_v51  ;;  %v11329_v18 = vld [vmem:[#allocation51_spill] sm:$0xff] }
 0x2d6   : > { %v2884_v61 = vpop.f32.mrf.mxu0 }
 0x2d7   : > { %v2885_v24 = vadd.f32 %v2884_v61, %v2796_v58  ;;  %v2973_v59 = vpop.f32.mrf.mxu1  ;;  %3101 = vmatmul.bf16.gmra.mxu2 %v11327_v48  ;;  %v2798_v58 = vadd.f32 %v8808_v4, %v9147_v5  ;;  %3227 = vmatpush.bf16.msrb.mxu0 %v6713_v31 }
 0x2d8   : > { %3190 = vmatmul.bf16.gmra.mxu3 %v8757_v17 }
 0x2d9   : > { %v2974_v41 = vadd.f32 %v2973_v59, %v2885_v24  ;;  %2923 = vmatmul.bf16.gmra.mxu0 %v11325_v39  ;;  %3494 = vmatpush.bf16.msrb.mxu3 %v6205_v21 }
 0x2da   : > { %3012 = vmatmul.bf16.gmra.mxu1 %v11326_v0  ;;  %v3062_v20 = vpop.f32.mrf.mxu2  ;;  %v2801_v0 = vadd.f32 %v8822_v2, %v9147_v5  ;;  %v2803_v2 = vadd.f32 %v8833_v25, %v9147_v5 }
 0x2db   : > { %v3063_v61 = vadd.f32 %v3062_v20, %v2974_v41  ;;  %v3151_v24 = vpop.f32.mrf.mxu3 }
 0x2dd   : > { %v9221_v17 = vadd.f32 %v3151_v24, %v3063_v61  ;;  %v2806_v61 = vadd.f32 %v8865_v27, %v9147_v5  ;;  %v6060_v27 = vld [vmem:[%s10904_s1 + $0x8] sm:$0xf] }
 0x2de   : > { %v2886_v59 = vpop.f32.mrf.mxu0 }
 0x2df   : > { %v2887_v15 = vadd.f32 %v2886_v59, %v2798_v58  ;;  %v2975_v45 = vpop.f32.mrf.mxu1  ;;  %v11330_v58 = vld [vmem:[#allocation52_spill] sm:$0xff] }
 0x2e1   : > { %v2976_v48 = vadd.f32 %v2975_v45, %v2887_v15 }
 0x2e2   : > { %v3064_v6 = vpop.f32.mrf.mxu2 }
 0x2e3   : > { %v3065_v34 = vadd.f32 %v3064_v6, %v2976_v48  ;;  %v3153_v4 = vpop.f32.mrf.mxu3 }
 0x2e5   : > { %v9225_v41 = vadd.f32 %v3153_v4, %v3065_v34 }
 0x2e6   : > { %v2889_v37 = vpop.f32.mrf.mxu0 }
 0x2e7   : > { %v2890_v1 = vadd.f32 %v2889_v37, %v2801_v0  ;;  %v2978_v50 = vpop.f32.mrf.mxu1  ;;  %3106 = vmatmul.bf16.gmra.mxu2 %v11330_v58 }
 0x2e8   : > { %3195 = vmatmul.bf16.gmra.mxu3 %v8806_v13 }
 0x2e9   : > { %v2979_v51 = vadd.f32 %v2978_v50, %v2890_v1  ;;  %2928 = vmatmul.bf16.gmra.mxu0 %v11328_v8 }
 0x2ea   : > { %3017 = vmatmul.bf16.gmra.mxu1 %v11329_v18  ;;  %v3067_v20 = vpop.f32.mrf.mxu2 }
 0x2eb   : > { %v3068_v6 = vadd.f32 %v3067_v20, %v2979_v51  ;;  %v3156_v48 = vpop.f32.mrf.mxu3  ;;  %v11331_v51 = vld [vmem:[#allocation54_spill] sm:$0xff]  ;;  %v11332_v20 = vld [vmem:[#allocation55_spill] sm:$0xff] }
 0x2ed   : > { %v9233_v34 = vadd.f32 %v3156_v48, %v3068_v6  ;;  %v7146_v6 = vld [vmem:[%s10904_s1 + $0x14] sm:$0xf0]  ;;  %v7303_v48 = vld [vmem:[%s10904_s1 + $0x504] sm:$0xf] }
 0x2ee   : > { %v2891_v31 = vpop.f32.mrf.mxu0 }
 0x2ef   : > { %v2892_v37 = vadd.f32 %v2891_v31, %v2803_v2  ;;  %v2980_v0 = vpop.f32.mrf.mxu1  ;;  %v11333_v2 = vld [vmem:[#allocation56_spill] sm:$0xff]  ;;  %v6061_v31 = vor.u32 %v7146_v6, %v6060_v27 }
 0x2f1   : > { %v2981_v21 = vadd.f32 %v2980_v0, %v2892_v37  ;;  %v6694_v37 = vld [vmem:[%s10904_s1 + $0x510] sm:$0xf0]  ;;  %v6188_v0 = vld [vmem:[%s10904_s1 + $0x108] sm:$0xf]  ;;  %3406 = vmatpush.bf16.msrb.mxu2 %v6061_v31 }
 0x2f2   : > { %v3069_v24 = vpop.f32.mrf.mxu2  ;;  %v11334_v31 = vld [vmem:[#allocation58_spill] sm:$0xff] }
 0x2f3   : > { %v3070_v59 = vadd.f32 %v3069_v24, %v2981_v21  ;;  %v3158_v15 = vpop.f32.mrf.mxu3  ;;  %v7178_v21 = vld [vmem:[%s10904_s1 + $0x114] sm:$0xf0] }
 0x2f5   : > { %v9237_v50 = vadd.f32 %v3158_v15, %v3070_v59  ;;  %v6697_v59 = vor.u32 %v7303_v48, %v6694_v37  ;;  %v6189_v15 = vor.u32 %v7178_v21, %v6188_v0  ;;  %v11335_v21 = vld [vmem:[#allocation59_spill] sm:$0xff] }
 0x2f6   : > { %v2894_v45 = vpop.f32.mrf.mxu0 }
 0x2f7   : > { %v2895_v4 = vadd.f32 %v2894_v45, %v2806_v61  ;;  %v2983_v1 = vpop.f32.mrf.mxu1  ;;  %3111 = vmatmul.bf16.gmra.mxu2 %v11333_v2  ;;  %v2808_v61 = vadd.f32 %v8882_v19, %v9147_v5  ;;  %3228 = vmatpush.bf16.msrb.mxu0 %v6697_v59 }
 0x2f8   : > { %3200 = vmatmul.bf16.gmra.mxu3 %v8831_v44 }
 0x2f9   : > { %v2984_v25 = vadd.f32 %v2983_v1, %v2895_v4  ;;  %2933 = vmatmul.bf16.gmra.mxu0 %v11331_v51  ;;  %3495 = vmatpush.bf16.msrb.mxu3 %v6189_v15 }
 0x2fa   : > { %3022 = vmatmul.bf16.gmra.mxu1 %v11332_v20  ;;  %v3072_v24 = vpop.f32.mrf.mxu2  ;;  %v2811_v20 = vadd.f32 %v8896_v38, %v9147_v5  ;;  %v2813_v38 = vadd.f32 %v8907_v30, %v9147_v5 }
 0x2fb   : > { %v3073_v45 = vadd.f32 %v3072_v24, %v2984_v25  ;;  %v3161_v4 = vpop.f32.mrf.mxu3 }
 0x2fd   : > { %v9263_v44 = vadd.f32 %v3161_v4, %v3073_v45  ;;  %v2816_v45 = vadd.f32 %v8939_v40, %v9147_v5  ;;  %v6684_v40 = vld [vmem:[%s10904_s1 + $0x4e8] sm:$0xf] }
 0x2fe   : > { %v2896_v1 = vpop.f32.mrf.mxu0 }
 0x2ff   : > { %v2897_v27 = vadd.f32 %v2896_v1, %v2808_v61  ;;  %v2985_v6 = vpop.f32.mrf.mxu1  ;;  %v11336_v61 = vld [vmem:[#allocation60_spill] sm:$0xff] }
 0x301   : > { %v2986_v2 = vadd.f32 %v2985_v6, %v2897_v27 }
 0x302   : > { %v3074_v13 = vpop.f32.mrf.mxu2 }
 0x303   : > { %v3075_v58 = vadd.f32 %v3074_v13, %v2986_v2  ;;  %v3163_v19 = vpop.f32.mrf.mxu3 }
 0x305   : > { %v9267_v25 = vadd.f32 %v3163_v19, %v3075_v58 }
 0x306   : > { %v2899_v18 = vpop.f32.mrf.mxu0 }
 0x307   : > { %v2900_v48 = vadd.f32 %v2899_v18, %v2811_v20  ;;  %v2988_v37 = vpop.f32.mrf.mxu1  ;;  %3116 = vmatmul.bf16.gmra.mxu2 %v11336_v61 }
 0x308   : > { %3205 = vmatmul.bf16.gmra.mxu3 %v8880_v36  ;;  %v11343_v36 = vld [vmem:[#allocation68_spill] sm:$0xff] }
 0x309   : > { %v2989_v0 = vadd.f32 %v2988_v37, %v2900_v48  ;;  %2938 = vmatmul.bf16.gmra.mxu0 %v11334_v31 }
 0x30a   : > { %3027 = vmatmul.bf16.gmra.mxu1 %v11335_v21  ;;  %v3077_v24 = vpop.f32.mrf.mxu2 }
 0x30b   : > { %v3078_v13 = vadd.f32 %v3077_v24, %v2989_v0  ;;  %v3166_v2 = vpop.f32.mrf.mxu3  ;;  %v11337_v0 = vld [vmem:[#allocation62_spill] sm:$0xff]  ;;  %v11338_v24 = vld [vmem:[#allocation63_spill] sm:$0xff] }
 0x30d   : > { %v9275_v58 = vadd.f32 %v3166_v2, %v3078_v13  ;;  %v11340_v13 = vld [vmem:[#allocation121_spill] sm:$0xff]  ;;  %v7302_v2 = vld [vmem:[%s10904_s1 + $0x4f4] sm:$0xf0] }
 0x30e   : > { %v2901_v59 = vpop.f32.mrf.mxu0 }
 0x30f   : > { %v2902_v18 = vadd.f32 %v2901_v59, %v2813_v38  ;;  %v2990_v20 = vpop.f32.mrf.mxu1  ;;  %v11339_v38 = vld [vmem:[#allocation64_spill] sm:$0xff]  ;;  %v6428_v59 = vld [vmem:[%s10904_s1 + $0x2e8] sm:$0xf] }
 0x311   : > { %v2991_v15 = vadd.f32 %v2990_v20, %v2902_v18  ;;  %v6685_v18 = vor.u32 %v7302_v2, %v6684_v40  ;;  %v7238_v20 = vld [vmem:[%s10904_s1 + $0x2f4] sm:$0xf0] }
 0x312   : > { %v3079_v4 = vpop.f32.mrf.mxu2 }
 0x313   : > { %v3080_v1 = vadd.f32 %v3079_v4, %v2991_v15  ;;  %v3168_v27 = vpop.f32.mrf.mxu3  ;;  %v6812_v15 = vld [vmem:[%s10904_s1 + $0x5e8] sm:$0xf]  ;;  %v2818_v4 = vadd.f32 %v8956_v35, %v9147_v5  ;;  %3755 = vmatpush.bf16.msra.mxu2 %v6685_v18  ;;  %v7270_v35 = vld [vmem:[%s10904_s1 + $0x3f4] sm:$0xf0] }
 0x315   : > { %v9279_v37 = vadd.f32 %v3168_v27, %v3080_v1  ;;  %v6429_v27 = vor.u32 %v7238_v20, %v6428_v59 }
 0x316   : > { %v2904_v6 = vpop.f32.mrf.mxu0 }
 0x317   : > { %v2905_v19 = vadd.f32 %v2904_v6, %v2816_v45  ;;  %v2993_v48 = vpop.f32.mrf.mxu1  ;;  %3121 = vmatmul.bf16.gmra.mxu2 %v11339_v38  ;;  %v7334_v45 = vld [vmem:[%s10904_s1 + $0x5f4] sm:$0xf0]  ;;  %3577 = vmatpush.bf16.msra.mxu0 %v6429_v27 }
 0x318   : > { %3210 = vmatmul.bf16.gmra.mxu3 %v11340_v13  ;;  %v6813_v6 = vor.u32 %v7334_v45, %v6812_v15 }
 0x319   : > { %v2994_v30 = vadd.f32 %v2993_v48, %v2905_v19  ;;  %2943 = vmatmul.bf16.gmra.mxu0 %v11337_v0 }
 0x31a   : > { %3032 = vmatmul.bf16.gmra.mxu1 %v11338_v24  ;;  %v3082_v1 = vpop.f32.mrf.mxu2  ;;  %3844 = vmatpush.bf16.msra.mxu3 %v6813_v6  ;;  %v6556_v24 = vld [vmem:[%s10904_s1 + $0x3e8] sm:$0xf] }
 0x31b   : > { %v3083_v19 = vadd.f32 %v3082_v1, %v2994_v30  ;;  %v3171_v48 = vpop.f32.mrf.mxu3  ;;  %v6557_v20 = vor.u32 %v7270_v35, %v6556_v24  ;;  %v2821_v30 = vadd.f32 %v8970_v60, %v9147_v5  ;;  %v2823_v60 = vadd.f32 %v8973_v43, %v9147_v5 }
 0x31d   : > { %v9305_v38 = vadd.f32 %v3171_v48, %v3083_v19  ;;  %3666 = vmatpush.bf16.msra.mxu1 %v6557_v20  ;;  %v11341_v48 = vld [vmem:[#allocation66_spill] sm:$0xff] }
 0x31e   : > { %v2906_v40 = vpop.f32.mrf.mxu0 }
 0x31f   : > { %v2907_v2 = vadd.f32 %v2906_v40, %v2818_v4  ;;  %v2995_v13 = vpop.f32.mrf.mxu1  ;;  %v11342_v40 = vld [vmem:[#allocation67_spill] sm:$0xff] }
 0x321   : > { %v2996_v59 = vadd.f32 %v2995_v13, %v2907_v2 }
 0x322   : > { %v3084_v18 = vpop.f32.mrf.mxu2 }
 0x323   : > { %v3085_v15 = vadd.f32 %v3084_v18, %v2996_v59  ;;  %v3173_v45 = vpop.f32.mrf.mxu3 }
 0x325   : > { %v9315_v6 = vadd.f32 %v3173_v45, %v3085_v15  ;;  %v2826_v15 = vadd.f32 %v9000_v54, %v9147_v5  ;;  %v6668_v54 = vld [vmem:[%s10904_s1 + $0x4c8] sm:$0xf] }
 0x326   : > { %v2909_v4 = vpop.f32.mrf.mxu0 }
 0x327   : > { %v2910_v1 = vadd.f32 %v2909_v4, %v2821_v30  ;;  %v2998_v27 = vpop.f32.mrf.mxu1  ;;  %3126 = vmatmul.bf16.gmra.mxu2 %v11343_v36 }
 0x328   : > { %3215 = vmatmul.bf16.gmra.mxu3 %v8954_v62 }
 0x329   : > { %v2999_v19 = vadd.f32 %v2998_v27, %v2910_v1  ;;  %2948 = vmatmul.bf16.gmra.mxu0 %v11341_v48 }
 0x32a   : > { %3037 = vmatmul.bf16.gmra.mxu1 %v11342_v40  ;;  %v3087_v24 = vpop.f32.mrf.mxu2 }
 0x32b   : > { %v3088_v13 = vadd.f32 %v3087_v24, %v2999_v19  ;;  %v3176_v2 = vpop.f32.mrf.mxu3  ;;  %v11344_v19 = vld [vmem:[#allocation70_spill] sm:$0xff]  ;;  %v11345_v24 = vld [vmem:[#allocation71_spill] sm:$0xff] }
 0x32d   : > { %v9323_v30 = vadd.f32 %v3176_v2, %v3088_v13  ;;  %v7298_v13 = vld [vmem:[%s10904_s1 + $0x4d4] sm:$0xf0] }
 0x32e   : > { %v2911_v35 = vpop.f32.mrf.mxu0  ;;  %v7234_v2 = vld [vmem:[%s10904_s1 + $0x2d4] sm:$0xf0] }
 0x32f   : > { %v2912_v59 = vadd.f32 %v2911_v35, %v2823_v60  ;;  %v3000_v20 = vpop.f32.mrf.mxu1  ;;  %v11346_v60 = vld [vmem:[#allocation5_spill] sm:$0xff]  ;;  %v6796_v35 = vld [vmem:[%s10904_s1 + $0x5c8] sm:$0xf] }
 0x331   : > { %v3001_v18 = vadd.f32 %v3000_v20, %v2912_v59  ;;  %v7330_v59 = vld [vmem:[%s10904_s1 + $0x5d4] sm:$0xf0]  ;;  %v2828_v20 = vadd.f32 %v9003_v14, %v9147_v5 }
 0x332   : > { %v3089_v45 = vpop.f32.mrf.mxu2  ;;  %v7266_v14 = vld [vmem:[%s10904_s1 + $0x3d4] sm:$0xf0] }
 0x333   : > { %v3090_v4 = vadd.f32 %v3089_v45, %v3001_v18  ;;  %v3178_v1 = vpop.f32.mrf.mxu3  ;;  %v6797_v45 = vor.u32 %v7330_v59, %v6796_v35 }
 0x335   : > { %v9327_v40 = vadd.f32 %v3178_v1, %v3090_v4  ;;  %3845 = vmatpush.bf16.msra.mxu3 %v6797_v45 }
 0x336   : > { %v2914_v27 = vpop.f32.mrf.mxu0 }
 0x337   : > { %v2915_v62 = vadd.f32 %v2914_v27, %v2826_v15  ;;  %v3003_v36 = vpop.f32.mrf.mxu1  ;;  %3407 = vmatmul.bf16.vlgmr.msrb.gmra.mxu2 %v11346_v60  ;;  %v6540_v60 = vld [vmem:[%s10904_s1 + $0x3c8] sm:$0xf] }
 0x338   : > { %3496 = vmatmul.bf16.vlgmr.msrb.gmra.mxu3 %v7886_v49 }
 0x339   : > { %v3004_v43 = vadd.f32 %v3003_v36, %v2915_v62  ;;  %3229 = vmatmul.bf16.vlgmr.msrb.gmra.mxu0 %v11344_v19  ;;  %v6412_v36 = vld [vmem:[%s10904_s1 + $0x2c8] sm:$0xf]  ;;  %v6669_v62 = vor.u32 %v7298_v13, %v6668_v54 }
 0x33a   : > { %6850 = vmatmul.msk.bf16.vlgmr.msrb.gmra.mxu1 %vm2104_vm0, %v11345_v24  ;;  %v3092_v18 = vpop.f32.mrf.mxu2  ;;  %v6413_v15 = vor.u32 %v7234_v2, %v6412_v36  ;;  %v6541_v2 = vor.u32 %v7266_v14, %v6540_v60 }
 0x33b   : > { %v3093_v4 = vadd.f32 %v3092_v18, %v3004_v43  ;;  %v3181_v1 = vpop.f32.mrf.mxu3  ;;  %3756 = vmatpush.bf16.msra.mxu2 %v6669_v62  ;;  %v2831_v43 = vadd.f32 %v9012_v7, %v9147_v5  ;;  %v2833_v7 = vadd.f32 %v9015_v26, %v9147_v5 }
 0x33c   : > { %3578 = vmatpush.bf16.msra.mxu0 %v6413_v15  ;;  %3667 = vmatpush.bf16.msra.mxu1 %v6541_v2 }
 0x33d   : > { %v9354_v49 = vadd.f32 %v3181_v1, %v3093_v4  ;;  %v11347_v1 = vld [vmem:[#allocation73_spill] sm:$0xff] }
 0x33e   : > { %v2916_v27 = vpop.f32.mrf.mxu0 }
 0x33f   : > { %v2917_v54 = vadd.f32 %v2916_v27, %v2828_v20  ;;  %v3005_v13 = vpop.f32.mrf.mxu1  ;;  %v11348_v27 = vld [vmem:[#allocation74_spill] sm:$0xff] }
 0x341   : > { %v3006_v36 = vadd.f32 %v3005_v13, %v2917_v54  ;;  %v11349_v54 = vld [vmem:[#allocation9_spill] sm:$0xff] }
 0x342   : > { %v3094_v62 = vpop.f32.mrf.mxu2 }
 0x343   : > { %v3095_v35 = vadd.f32 %v3094_v62, %v3006_v36  ;;  %v3183_v59 = vpop.f32.mrf.mxu3 }
 0x345   : > { %v9364_v45 = vadd.f32 %v3183_v59, %v3095_v35  ;;  %v2836_v59 = vadd.f32 %v9042_v57, %v9147_v5  ;;  %v6652_v57 = vld [vmem:[%s10904_s1 + $0x4a8] sm:$0xf] }
 0x346   : > { %v2919_v20 = vpop.f32.mrf.mxu0 }
 0x347   : > { %v2920_v18 = vadd.f32 %v2919_v20, %v2831_v43  ;;  %v3008_v15 = vpop.f32.mrf.mxu1  ;;  %3412 = vmatmul.bf16.gmra.mxu2 %v11349_v54 }
 0x348   : > { %3501 = vmatmul.bf16.gmra.mxu3 %v7926_v10 }
 0x349   : > { %v3009_v4 = vadd.f32 %v3008_v15, %v2920_v18  ;;  %3234 = vmatmul.bf16.gmra.mxu0 %v11347_v1 }
 0x34a   : > { %6851 = vmatmul.msk.bf16.gmra.mxu1 %vm2104_vm0, %v11348_v27  ;;  %v3097_v60 = vpop.f32.mrf.mxu2 }
 0x34b   : > { %v3098_v13 = vadd.f32 %v3097_v60, %v3009_v4  ;;  %v3186_v14 = vpop.f32.mrf.mxu3  ;;  %v11350_v4 = vld [vmem:[#allocation76_spill] sm:$0xff]  ;;  %v11351_v60 = vld [vmem:[#allocation77_spill] sm:$0xff] }
 0x34d   : > { %v9373_v62 = vadd.f32 %v3186_v14, %v3098_v13  ;;  %v7230_v13 = vld [vmem:[%s10904_s1 + $0x2b4] sm:$0xf0]  ;;  %v6780_v14 = vld [vmem:[%s10904_s1 + $0x5a8] sm:$0xf] }
 0x34e   : > { %v2921_v36 = vpop.f32.mrf.mxu0 }
 0x34f   : > { %v2922_v2 = vadd.f32 %v2921_v36, %v2833_v7  ;;  %v3010_v43 = vpop.f32.mrf.mxu1  ;;  %v11352_v7 = vld [vmem:[#allocation13_spill] sm:$0xff]  ;;  %v7326_v36 = vld [vmem:[%s10904_s1 + $0x5b4] sm:$0xf0] }
 0x351   : > { %v3011_v35 = vadd.f32 %v3010_v43, %v2922_v2  ;;  %v2838_v2 = vadd.f32 %v9045_v3, %v9147_v5  ;;  %v7262_v3 = vld [vmem:[%s10904_s1 + $0x3b4] sm:$0xf0] }
 0x352   : > { %v3099_v20 = vpop.f32.mrf.mxu2 }
 0x353   : > { %v3100_v18 = vadd.f32 %v3099_v20, %v3011_v35  ;;  %v3188_v15 = vpop.f32.mrf.mxu3 }
 0x355   : > { %v9377_v24 = vadd.f32 %v3188_v15, %v3100_v18 }
 0x356   : > { %v2924_v54 = vpop.f32.mrf.mxu0 }
 0x357   : > { %v2925_v10 = vadd.f32 %v2924_v54, %v2836_v59  ;;  %v3013_v27 = vpop.f32.mrf.mxu1  ;;  %3417 = vmatmul.bf16.gmra.mxu2 %v11352_v7  ;;  %v7294_v54 = vld [vmem:[%s10904_s1 + $0x4b4] sm:$0xf0]  ;;  %v6781_v59 = vor.u32 %v7326_v36, %v6780_v14  ;;  %v6524_v7 = vld [vmem:[%s10904_s1 + $0x3a8] sm:$0xf] }
 0x358   : > { %3506 = vmatmul.bf16.gmra.mxu3 %v7946_v22 }
 0x359   : > { %v3014_v26 = vadd.f32 %v3013_v27, %v2925_v10  ;;  %3239 = vmatmul.bf16.gmra.mxu0 %v11350_v4  ;;  %v6396_v10 = vld [vmem:[%s10904_s1 + $0x2a8] sm:$0xf]  ;;  %v6653_v27 = vor.u32 %v7294_v54, %v6652_v57  ;;  %3846 = vmatpush.bf16.msra.mxu3 %v6781_v59 }
 0x35a   : > { %6852 = vmatmul.msk.bf16.gmra.mxu1 %vm2104_vm0, %v11351_v60  ;;  %v3102_v43 = vpop.f32.mrf.mxu2  ;;  %v6397_v35 = vor.u32 %v7230_v13, %v6396_v10  ;;  %v6525_v13 = vor.u32 %v7262_v3, %v6524_v7 }
 0x35b   : > { %v3103_v20 = vadd.f32 %v3102_v43, %v3014_v26  ;;  %v3191_v18 = vpop.f32.mrf.mxu3  ;;  %3757 = vmatpush.bf16.msra.mxu2 %v6653_v27  ;;  %v2841_v26 = vadd.f32 %v9054_v46, %v9147_v5  ;;  %v2843_v46 = vadd.f32 %v9057_v55, %v9147_v5 }
 0x35c   : > { %3579 = vmatpush.bf16.msra.mxu0 %v6397_v35  ;;  %3668 = vmatpush.bf16.msra.mxu1 %v6525_v13 }
 0x35d   : > { %v9404_v22 = vadd.f32 %v3191_v18, %v3103_v20  ;;  %v11353_v18 = vld [vmem:[#allocation79_spill] sm:$0xff] }
 0x35e   : > { %v2926_v15 = vpop.f32.mrf.mxu0 }
 0x35f   : > { %v2927_v57 = vadd.f32 %v2926_v15, %v2838_v2  ;;  %v3015_v54 = vpop.f32.mrf.mxu1  ;;  %v11354_v15 = vld [vmem:[#allocation80_spill] sm:$0xff] }
 0x361   : > { %v3016_v10 = vadd.f32 %v3015_v54, %v2927_v57  ;;  %v11355_v57 = vld [vmem:[#allocation17_spill] sm:$0xff] }
 0x362   : > { %v3104_v27 = vpop.f32.mrf.mxu2 }
 0x363   : > { %v3105_v14 = vadd.f32 %v3104_v27, %v3016_v10  ;;  %v3193_v36 = vpop.f32.mrf.mxu3 }
 0x365   : > { %v9414_v59 = vadd.f32 %v3193_v36, %v3105_v14  ;;  %v2846_v36 = vadd.f32 %v9084_v29, %v9147_v5  ;;  %v6636_v29 = vld [vmem:[%s10904_s1 + $0x488] sm:$0xf] }
 0x366   : > { %v2929_v2 = vpop.f32.mrf.mxu0 }
 0x367   : > { %v2930_v43 = vadd.f32 %v2929_v2, %v2841_v26  ;;  %v3018_v35 = vpop.f32.mrf.mxu1  ;;  %3422 = vmatmul.bf16.gmra.mxu2 %v11355_v57 }
 0x368   : > { %3511 = vmatmul.bf16.gmra.mxu3 %v11287_v56 }
 0x369   : > { %v3019_v20 = vadd.f32 %v3018_v35, %v2930_v43  ;;  %3244 = vmatmul.bf16.gmra.mxu0 %v11353_v18 }
 0x36a   : > { %6853 = vmatmul.msk.bf16.gmra.mxu1 %vm2104_vm0, %v11354_v15  ;;  %v3107_v7 = vpop.f32.mrf.mxu2 }
 0x36b   : > { %v3108_v54 = vadd.f32 %v3107_v7, %v3019_v20  ;;  %v3196_v3 = vpop.f32.mrf.mxu3  ;;  %v11356_v20 = vld [vmem:[#allocation83_spill] sm:$0xff]  ;;  %v11357_v7 = vld [vmem:[#allocation84_spill] sm:$0xff] }
 0x36d   : > { %v9423_v27 = vadd.f32 %v3196_v3, %v3108_v54  ;;  %v7226_v54 = vld [vmem:[%s10904_s1 + $0x294] sm:$0xf0]  ;;  %v6764_v3 = vld [vmem:[%s10904_s1 + $0x588] sm:$0xf] }
 0x36e   : > { %v2931_v10 = vpop.f32.mrf.mxu0 }
 0x36f   : > { %v2932_v13 = vadd.f32 %v2931_v10, %v2843_v46  ;;  %v3020_v26 = vpop.f32.mrf.mxu1  ;;  %v11358_v46 = vld [vmem:[#allocation21_spill] sm:$0xff]  ;;  %v7322_v10 = vld [vmem:[%s10904_s1 + $0x594] sm:$0xf0] }
 0x371   : > { %v3021_v14 = vadd.f32 %v3020_v26, %v2932_v13  ;;  %v2848_v13 = vadd.f32 %v9087_v12, %v9147_v5  ;;  %v7258_v12 = vld [vmem:[%s10904_s1 + $0x394] sm:$0xf0] }
 0x372   : > { %v3109_v2 = vpop.f32.mrf.mxu2 }
 0x373   : > { %v3110_v43 = vadd.f32 %v3109_v2, %v3021_v14  ;;  %v3198_v35 = vpop.f32.mrf.mxu3 }
 0x375   : > { %v9427_v60 = vadd.f32 %v3198_v35, %v3110_v43 }
 0x376   : > { %v2934_v57 = vpop.f32.mrf.mxu0 }
 0x377   : > { %v2935_v56 = vadd.f32 %v2934_v57, %v2846_v36  ;;  %v3023_v15 = vpop.f32.mrf.mxu1  ;;  %3427 = vmatmul.bf16.gmra.mxu2 %v11358_v46  ;;  %v7290_v57 = vld [vmem:[%s10904_s1 + $0x494] sm:$0xf0]  ;;  %v6765_v36 = vor.u32 %v7322_v10, %v6764_v3  ;;  %v6508_v46 = vld [vmem:[%s10904_s1 + $0x388] sm:$0xf] }
 0x378   : > { %3516 = vmatmul.bf16.gmra.mxu3 %v11293_v28 }
 0x379   : > { %v3024_v55 = vadd.f32 %v3023_v15, %v2935_v56  ;;  %3249 = vmatmul.bf16.gmra.mxu0 %v11356_v20  ;;  %v6380_v56 = vld [vmem:[%s10904_s1 + $0x288] sm:$0xf]  ;;  %v6637_v15 = vor.u32 %v7290_v57, %v6636_v29  ;;  %3847 = vmatpush.bf16.msra.mxu3 %v6765_v36 }
 0x37a   : > { %6854 = vmatmul.msk.bf16.gmra.mxu1 %vm2104_vm0, %v11357_v7  ;;  %v3112_v26 = vpop.f32.mrf.mxu2  ;;  %v6381_v14 = vor.u32 %v7226_v54, %v6380_v56  ;;  %v6509_v54 = vor.u32 %v7258_v12, %v6508_v46 }
 0x37b   : > { %v3113_v2 = vadd.f32 %v3112_v26, %v3024_v55  ;;  %v3201_v43 = vpop.f32.mrf.mxu3  ;;  %3758 = vmatpush.bf16.msra.mxu2 %v6637_v15  ;;  %v2851_v55 = vadd.f32 %v9096_v47, %v9147_v5  ;;  %v2853_v47 = vadd.f32 %v9099_v33, %v9147_v5 }
 0x37c   : > { %3580 = vmatpush.bf16.msra.mxu0 %v6381_v14  ;;  %3669 = vmatpush.bf16.msra.mxu1 %v6509_v54 }
 0x37d   : > { %v9454_v28 = vadd.f32 %v3201_v43, %v3113_v2  ;;  %v11359_v43 = vld [vmem:[#allocation87_spill] sm:$0xff] }
 0x37e   : > { %v2936_v35 = vpop.f32.mrf.mxu0 }
 0x37f   : > { %v2937_v29 = vadd.f32 %v2936_v35, %v2848_v13  ;;  %v3025_v57 = vpop.f32.mrf.mxu1  ;;  %v11360_v35 = vld [vmem:[#allocation88_spill] sm:$0xff] }
 0x381   : > { %v3026_v56 = vadd.f32 %v3025_v57, %v2937_v29  ;;  %v11361_v29 = vld [vmem:[#allocation25_spill] sm:$0xff] }
 0x382   : > { %v3114_v15 = vpop.f32.mrf.mxu2 }
 0x383   : > { %v3115_v3 = vadd.f32 %v3114_v15, %v3026_v56  ;;  %v3203_v10 = vpop.f32.mrf.mxu3 }
 0x385   : > { %v9464_v36 = vadd.f32 %v3203_v10, %v3115_v3  ;;  %v2856_v10 = vadd.f32 %v9126_v9, %v9147_v5  ;;  %v6620_v9 = vld [vmem:[%s10904_s1 + $0x468] sm:$0xf] }
 0x386   : > { %v2939_v13 = vpop.f32.mrf.mxu0 }
 0x387   : > { %v2940_v26 = vadd.f32 %v2939_v13, %v2851_v55  ;;  %v3028_v14 = vpop.f32.mrf.mxu1  ;;  %3432 = vmatmul.bf16.gmra.mxu2 %v11361_v29 }
 0x388   : > { %3521 = vmatmul.bf16.gmra.mxu3 %v11299_v23 }
 0x389   : > { %v3029_v2 = vadd.f32 %v3028_v14, %v2940_v26  ;;  %3254 = vmatmul.bf16.gmra.mxu0 %v11359_v43 }
 0x38a   : > { %6855 = vmatmul.msk.bf16.gmra.mxu1 %vm2104_vm0, %v11360_v35  ;;  %v3117_v46 = vpop.f32.mrf.mxu2 }
 0x38b   : > { %v3118_v57 = vadd.f32 %v3117_v46, %v3029_v2  ;;  %v3206_v12 = vpop.f32.mrf.mxu3  ;;  %v11362_v2 = vld [vmem:[#allocation91_spill] sm:$0xff]  ;;  %v11363_v46 = vld [vmem:[#allocation92_spill] sm:$0xff] }
 0x38d   : > { %v9473_v15 = vadd.f32 %v3206_v12, %v3118_v57  ;;  %v11365_v57 = vld [vmem:[#allocation30_spill] sm:$0xff]  ;;  %v7222_v12 = vld [vmem:[%s10904_s1 + $0x274] sm:$0xf0] }
 0x38e   : > { %v2941_v56 = vpop.f32.mrf.mxu0 }
 0x38f   : > { %v2942_v54 = vadd.f32 %v2941_v56, %v2853_v47  ;;  %v3030_v55 = vpop.f32.mrf.mxu1  ;;  %v11364_v47 = vld [vmem:[#allocation29_spill] sm:$0xff]  ;;  %v6748_v56 = vld [vmem:[%s10904_s1 + $0x568] sm:$0xf] }
 0x391   : > { %v3031_v3 = vadd.f32 %v3030_v55, %v2942_v54  ;;  %v7318_v54 = vld [vmem:[%s10904_s1 + $0x574] sm:$0xf0]  ;;  %v2858_v55 = vadd.f32 %v9129_v52, %v9147_v5 }
 0x392   : > { %v3119_v13 = vpop.f32.mrf.mxu2  ;;  %v7254_v52 = vld [vmem:[%s10904_s1 + $0x374] sm:$0xf0] }
 0x393   : > { %v3120_v26 = vadd.f32 %v3119_v13, %v3031_v3  ;;  %v3208_v14 = vpop.f32.mrf.mxu3  ;;  %v6749_v13 = vor.u32 %v7318_v54, %v6748_v56 }
 0x395   : > { %v9477_v7 = vadd.f32 %v3208_v14, %v3120_v26  ;;  %3848 = vmatpush.bf16.msra.mxu3 %v6749_v13 }
 0x396   : > { %v2944_v29 = vpop.f32.mrf.mxu0 }
 0x397   : > { %v2945_v23 = vadd.f32 %v2944_v29, %v2856_v10  ;;  %v3033_v35 = vpop.f32.mrf.mxu1  ;;  %3437 = vmatmul.bf16.gmra.mxu2 %v11364_v47  ;;  %v7286_v29 = vld [vmem:[%s10904_s1 + $0x474] sm:$0xf0] }
 0x398   : > { %3526 = vmatmul.bf16.gmra.mxu3 %v11365_v57 }
 0x399   : > { %v3034_v33 = vadd.f32 %v3033_v35, %v2945_v23  ;;  %3259 = vmatmul.bf16.gmra.mxu0 %v11362_v2  ;;  %v6364_v23 = vld [vmem:[%s10904_s1 + $0x268] sm:$0xf]  ;;  %v6621_v35 = vor.u32 %v7286_v29, %v6620_v9 }
 0x39a   : > { %6856 = vmatmul.msk.bf16.gmra.mxu1 %vm2104_vm0, %v11363_v46  ;;  %v3122_v3 = vpop.f32.mrf.mxu2  ;;  %v6365_v10 = vor.u32 %v7222_v12, %v6364_v23  ;;  %v6492_v46 = vld [vmem:[%s10904_s1 + $0x368] sm:$0xf] }
 0x39b   : > { %v3123_v26 = vadd.f32 %v3122_v3, %v3034_v33  ;;  %v3211_v14 = vpop.f32.mrf.mxu3  ;;  %3759 = vmatpush.bf16.msra.mxu2 %v6621_v35  ;;  %v6493_v12 = vor.u32 %v7254_v52, %v6492_v46  ;;  %v2861_v33 = vadd.f32 %v9138_v42, %v9147_v5  ;;  %v11369_v46 = vld [vmem:[#allocation34_spill] sm:$0xff]  ;;  %v11370_v42 = vld [vmem:[#allocation133_spill] sm:$0xff] }
 0x39c   : > { %3581 = vmatpush.bf16.msra.mxu0 %v6365_v10 }
 0x39d   : > { %v9504_v47 = vadd.f32 %v3211_v14, %v3123_v26  ;;  %3670 = vmatpush.bf16.msra.mxu1 %v6493_v12  ;;  %v11366_v14 = vld [vmem:[#allocation95_spill] sm:$0xff] }
 0x39e   : > { %v2946_v9 = vpop.f32.mrf.mxu0 }
 0x39f   : > { %v2947_v29 = vadd.f32 %v2946_v9, %v2858_v55  ;;  %v3035_v57 = vpop.f32.mrf.mxu1  ;;  %v11367_v9 = vld [vmem:[#allocation96_spill] sm:$0xff] }
 0x3a1   : > { %v3036_v23 = vadd.f32 %v3035_v57, %v2947_v29  ;;  %v11368_v57 = vld [vmem:[#allocation33_spill] sm:$0xff]  ;;  %v2863_v29 = vadd.f32 %v11370_v42, %v9147_v5  ;;  %v11371_v5 = vld [vmem:[#allocation99_spill] sm:$0xff] }
 0x3a2   : > { %v3124_v35 = vpop.f32.mrf.mxu2  ;;  %v11373_v42 = vld [vmem:[#allocation37_spill] sm:$0xff] }
 0x3a3   : > { %v3125_v56 = vadd.f32 %v3124_v35, %v3036_v23  ;;  %v3213_v54 = vpop.f32.mrf.mxu3 }
 0x3a5   : > { %v9514_v13 = vadd.f32 %v3213_v54, %v3125_v56 }
 0x3a6   : > { %v2949_v55 = vpop.f32.mrf.mxu0 }
 0x3a7   : > { %v2950_v3 = vadd.f32 %v2949_v55, %v2861_v33  ;;  %v3038_v10 = vpop.f32.mrf.mxu1  ;;  %3442 = vmatmul.bf16.gmra.mxu2 %v11368_v57 }
 0x3a8   : > { %3531 = vmatmul.bf16.gmra.mxu3 %v11369_v46 }
 0x3a9   : > { %v3039_v26 = vadd.f32 %v3038_v10, %v2950_v3  ;;  %3264 = vmatmul.bf16.gmra.mxu0 %v11366_v14 }
 0x3aa   : > { %6857 = vmatmul.msk.bf16.gmra.mxu1 %vm2104_vm0, %v11367_v9  ;;  %v3127_v52 = vpop.f32.mrf.mxu2 }
 0x3ab   : > { %v3128_v23 = vadd.f32 %v3127_v52, %v3039_v26  ;;  %v3216_v12 = vpop.f32.mrf.mxu3  ;;  %v11372_v26 = vld [vmem:[#allocation100_spill] sm:$0xff] }
 0x3ad   : > { %v9523_v54 = vadd.f32 %v3216_v12, %v3128_v23  ;;  %v11375_v23 = vld [vmem:[#allocation38_spill] sm:$0xff] }
 0x3ae   : > { %v2951_v33 = vpop.f32.mrf.mxu0  ;;  %v6732_v12 = vld [vmem:[%s10904_s1 + $0x548] sm:$0xf] }
 0x3af   : > { %v2952_v35 = vadd.f32 %v2951_v33, %v2863_v29  ;;  %v3040_v56 = vpop.f32.mrf.mxu1  ;;  %v11374_v29 = vld [vmem:[#allocation132_spill] sm:$0xff] }
 0x3b0   : > { %v9533_v52 = vperm.slane %v11374_v29, 2 }
 0x3b1   : > { %v3041_v55 = vadd.f32 %v3040_v56, %v2952_v35  ;;  %v7314_v56 = vld [vmem:[%s10904_s1 + $0x554] sm:$0xf0] }
 0x3b2   : > { %v3129_v3 = vpop.f32.mrf.mxu2  ;;  %v6733_v29 = vor.u32 %v7314_v56, %v6732_v12 }
 0x3b3   : > { %v3130_v10 = vadd.f32 %v3129_v3, %v3041_v55  ;;  %v3218_v61 = vpop.f32.mrf.mxu3 }
 0x3b4   : > { %3849 = vmatpush.bf16.msra.mxu3 %v6733_v29 }
 0x3b5   : > { %v9526_v46 = vadd.f32 %v3218_v61, %v3130_v10 }
 0x3b6   : > { %v3230_v9 = vpop.f32.mrf.mxu0 }
 0x3b7   : > { %v3231_v57 = vadd.f32 %v3230_v9, %v9179_v32  ;;  %v3319_v21 = vpop.f32.mrf.mxu1  ;;  %3447 = vmatmul.bf16.gmra.mxu2 %v11373_v42  ;;  %v6604_v32 = vld [vmem:[%s10904_s1 + $0x448] sm:$0xf] }
 0x3b8   : > { %3536 = vmatmul.bf16.gmra.mxu3 %v11375_v23  ;;  %v6348_v9 = vld [vmem:[%s10904_s1 + $0x248] sm:$0xf] }
 0x3b9   : > { %v3320_v14 = vadd.f32 %v3319_v21, %v3231_v57  ;;  %3269 = vmatmul.bf16.gmra.mxu0 %v11371_v5  ;;  %v7282_v21 = vld [vmem:[%s10904_s1 + $0x454] sm:$0xf0] }
 0x3ba   : > { %6858 = vmatmul.msk.bf16.gmra.mxu1 %vm2104_vm0, %v11372_v26  ;;  %v6605_v61 = vor.u32 %v7282_v21, %v6604_v32  ;;  %v7218_v57 = vld [vmem:[%s10904_s1 + $0x254] sm:$0xf0]  ;;  %v3408_v33 = vpop.f32.mrf.mxu2 }
 0x3bb   : > { %v6349_v35 = vor.u32 %v7218_v57, %v6348_v9  ;;  %v3409_v55 = vadd.f32 %v3408_v33, %v9533_v52  ;;  %v3497_v3 = vpop.f32.mrf.mxu3  ;;  %v6476_v9 = vld [vmem:[%s10904_s1 + $0x348] sm:$0xf]  ;;  %v7250_v57 = vld [vmem:[%s10904_s1 + $0x354] sm:$0xf0]  ;;  %v4646_v26 = vmax.f32 %v3320_v14, 0.0  ;;  %v11380_v14 = vld [vmem:[#allocation41_spill] sm:$0xff] }
 0x3bc   : > { %3760 = vmatpush.bf16.msra.mxu2 %v6605_v61  ;;  %v6477_v42 = vor.u32 %v7250_v57, %v6476_v9 }
 0x3bd   : > { %3582 = vmatpush.bf16.msra.mxu0 %v6349_v35  ;;  %v9556_v23 = vadd.f32 %v3497_v3, %v3409_v55 }
 0x3be   : > { %v3232_v10 = vpop.f32.mrf.mxu0  ;;  %3671 = vmatpush.bf16.msra.mxu1 %v6477_v42 }
 0x3bf   : > { %v3233_v32 = vadd.f32 %v3232_v10, %v9183_v63  ;;  %v3321_v21 = vpop.f32.mrf.mxu1  ;;  %11376 = vst [vmem:[#allocation133_spill] sm:$0xff] %v9556_v23  ;;  %v11378_v23 = vld [vmem:[#allocation102_spill] sm:$0xff] }
 0x3c1   : > { %v3322_v33 = vadd.f32 %v3321_v21, %v3233_v32  ;;  %v11379_v32 = vld [vmem:[#allocation103_spill] sm:$0xff] }
 0x3c2   : > { %v3410_v63 = vpop.f32.mrf.mxu2 }
 0x3c3   : > { %v4650_v61 = vmax.f32 %v3322_v33, 0.0  ;;  %v3411_v35 = vadd.f32 %v3410_v63, %v9533_v52  ;;  %v3499_v56 = vpop.f32.mrf.mxu3 }
 0x3c5   : > { %v9564_v12 = vpack.c.bf16 %v4650_v61, %v4646_v26  ;;  %v9568_v29 = vadd.f32 %v3499_v56, %v3411_v35 }
 0x3c6   : > { %v3235_v55 = vpop.f32.mrf.mxu0 }
 0x3c7   : > { %11377 = vst [vmem:[#allocation132_spill] sm:$0xff] %v9564_v12  ;;  %v3236_v3 = vadd.f32 %v3235_v55, %v9191_v16  ;;  %v3324_v10 = vpop.f32.mrf.mxu1  ;;  %3452 = vmatmul.bf16.gmra.mxu2 %v11380_v14 }
 0x3c8   : > { %3541 = vmatmul.bf16.gmra.mxu3 %v11322_v53 }
 0x3c9   : > { %v3325_v5 = vadd.f32 %v3324_v10, %v3236_v3  ;;  %3274 = vmatmul.bf16.gmra.mxu0 %v11378_v23 }
 0x3ca   : > { %6859 = vmatmul.msk.bf16.gmra.mxu1 %vm2104_vm0, %v11379_v32  ;;  %v3413_v26 = vpop.f32.mrf.mxu2 }
 0x3cb   : > { %v3414_v42 = vadd.f32 %v3413_v26, %v9533_v52  ;;  %v3502_v21 = vpop.f32.mrf.mxu3  ;;  %v4654_v63 = vmax.f32 %v3325_v5, 0.0  ;;  %v11384_v5 = vld [vmem:[#allocation45_spill] sm:$0xff] }
 0x3cd   : > { %v9577_v33 = vadd.f32 %v3502_v21, %v3414_v42  ;;  %v11383_v42 = vld [vmem:[#allocation107_spill] sm:$0xff]  ;;  %v6588_v21 = vld [vmem:[%s10904_s1 + $0x428] sm:$0xf] }
 0x3ce   : > { %v3237_v9 = vpop.f32.mrf.mxu0 }
 0x3cf   : > { %v3238_v16 = vadd.f32 %v3237_v9, %v9195_v11  ;;  %v3326_v57 = vpop.f32.mrf.mxu1  ;;  %v11382_v11 = vld [vmem:[#allocation106_spill] sm:$0xff]  ;;  %v7214_v9 = vld [vmem:[%s10904_s1 + $0x234] sm:$0xf0] }
 0x3d1   : > { %v3327_v61 = vadd.f32 %v3326_v57, %v3238_v16  ;;  %v6716_v16 = vld [vmem:[%s10904_s1 + $0x528] sm:$0xf] }
 0x3d2   : > { %v3415_v56 = vpop.f32.mrf.mxu2 }
 0x3d3   : > { %v4658_v35 = vmax.f32 %v3327_v61, 0.0  ;;  %v3416_v3 = vadd.f32 %v3415_v56, %v9533_v52  ;;  %v3504_v10 = vpop.f32.mrf.mxu3 }
 0x3d5   : > { %v9579_v55 = vpack.c.bf16 %v4658_v35, %v4654_v63  ;;  %v9583_v14 = vadd.f32 %v3504_v10, %v3416_v3  ;;  %v7310_v63 = vld [vmem:[%s10904_s1 + $0x534] sm:$0xf0] }
 0x3d6   : > { %v3240_v12 = vpop.f32.mrf.mxu0  ;;  %v6717_v10 = vor.u32 %v7310_v63, %v6716_v16 }
 0x3d7   : > { %11381 = vst [vmem:[#allocation135_spill] sm:$0xff] %v9579_v55  ;;  %v3241_v53 = vadd.f32 %v3240_v12, %v9221_v17  ;;  %v3329_v26 = vpop.f32.mrf.mxu1  ;;  %3457 = vmatmul.bf16.gmra.mxu2 %v11384_v5  ;;  %v7278_v17 = vld [vmem:[%s10904_s1 + $0x434] sm:$0xf0] }
 0x3d8   : > { %3546 = vmatmul.bf16.gmra.mxu3 %v11325_v39  ;;  %v6589_v12 = vor.u32 %v7278_v17, %v6588_v21 }
 0x3d9   : > { %v3330_v32 = vadd.f32 %v3329_v26, %v3241_v53  ;;  %3279 = vmatmul.bf16.gmra.mxu0 %v11382_v11  ;;  %v6332_v53 = vld [vmem:[%s10904_s1 + $0x228] sm:$0xf]  ;;  %3850 = vmatpush.bf16.msra.mxu3 %v6717_v10 }
 0x3da   : > { %6860 = vmatmul.msk.bf16.gmra.mxu1 %vm2104_vm0, %v11383_v42  ;;  %v3418_v57 = vpop.f32.mrf.mxu2  ;;  %v6333_v61 = vor.u32 %v7214_v9, %v6332_v53  ;;  %3761 = vmatpush.bf16.msra.mxu2 %v6589_v12  ;;  %v6460_v53 = vld [vmem:[%s10904_s1 + $0x328] sm:$0xf]  ;;  %v7246_v9 = vld [vmem:[%s10904_s1 + $0x334] sm:$0xf0] }
 0x3db   : > { %v3419_v35 = vadd.f32 %v3418_v57, %v9533_v52  ;;  %v3507_v56 = vpop.f32.mrf.mxu3  ;;  %v6461_v55 = vor.u32 %v7246_v9, %v6460_v53  ;;  %v4662_v39 = vmax.f32 %v3330_v32, 0.0  ;;  %v11386_v42 = vld [vmem:[#allocation110_spill] sm:$0xff]  ;;  %v11388_v32 = vld [vmem:[#allocation49_spill] sm:$0xff] }
 0x3dc   : > { %3583 = vmatpush.bf16.msra.mxu0 %v6333_v61 }
 0x3dd   : > { %v9610_v17 = vadd.f32 %v3507_v56, %v3419_v35  ;;  %3672 = vmatpush.bf16.msra.mxu1 %v6461_v55 }
 0x3de   : > { %v3242_v3 = vpop.f32.mrf.mxu0 }
 0x3df   : > { %v3243_v26 = vadd.f32 %v3242_v3, %v9225_v41  ;;  %v3331_v21 = vpop.f32.mrf.mxu1 }
 0x3e1   : > { %v3332_v57 = vadd.f32 %v3331_v21, %v3243_v26  ;;  %v11387_v26 = vld [vmem:[#allocation111_spill] sm:$0xff] }
 0x3e2   : > { %v3420_v16 = vpop.f32.mrf.mxu2 }
 0x3e3   : > { %v4666_v12 = vmax.f32 %v3332_v57, 0.0  ;;  %v3421_v61 = vadd.f32 %v3420_v16, %v9533_v52  ;;  %v3509_v63 = vpop.f32.mrf.mxu3 }
 0x3e5   : > { %v9618_v41 = vpack.c.bf16 %v4666_v12, %v4662_v39  ;;  %v9622_v10 = vadd.f32 %v3509_v63, %v3421_v61 }
 0x3e6   : > { %v3245_v35 = vpop.f32.mrf.mxu0 }
 0x3e7   : > { %11385 = vst [vmem:[#allocation136_spill] sm:$0xff] %v9618_v41  ;;  %v3246_v56 = vadd.f32 %v3245_v35, %v9233_v34  ;;  %v3334_v3 = vpop.f32.mrf.mxu1  ;;  %3462 = vmatmul.bf16.gmra.mxu2 %v11388_v32 }
 0x3e8   : > { %3551 = vmatmul.bf16.gmra.mxu3 %v11328_v8 }
 0x3e9   : > { %v3335_v5 = vadd.f32 %v3334_v3, %v3246_v56  ;;  %3284 = vmatmul.bf16.gmra.mxu0 %v11386_v42 }
 0x3ea   : > { %6861 = vmatmul.msk.bf16.gmra.mxu1 %vm2104_vm0, %v11387_v26  ;;  %v3423_v39 = vpop.f32.mrf.mxu2 }
 0x3eb   : > { %v3424_v55 = vadd.f32 %v3423_v39, %v9533_v52  ;;  %v3512_v21 = vpop.f32.mrf.mxu3  ;;  %v4670_v16 = vmax.f32 %v3335_v5, 0.0  ;;  %v11392_v5 = vld [vmem:[#allocation53_spill] sm:$0xff] }
 0x3ed   : > { %v9631_v57 = vadd.f32 %v3512_v21, %v3424_v55  ;;  %v11391_v55 = vld [vmem:[#allocation115_spill] sm:$0xff]  ;;  %v6572_v21 = vld [vmem:[%s10904_s1 + $0x408] sm:$0xf] }
 0x3ee   : > { %v3247_v53 = vpop.f32.mrf.mxu0 }
 0x3ef   : > { %v3248_v34 = vadd.f32 %v3247_v53, %v9237_v50  ;;  %v3336_v9 = vpop.f32.mrf.mxu1  ;;  %v11390_v50 = vld [vmem:[#allocation114_spill] sm:$0xff]  ;;  %v7210_v53 = vld [vmem:[%s10904_s1 + $0x214] sm:$0xf0] }
 0x3f1   : > { %v3337_v12 = vadd.f32 %v3336_v9, %v3248_v34  ;;  %v6700_v34 = vld [vmem:[%s10904_s1 + $0x508] sm:$0xf] }
 0x3f2   : > { %v3425_v63 = vpop.f32.mrf.mxu2 }
 0x3f3   : > { %v4674_v61 = vmax.f32 %v3337_v12, 0.0  ;;  %v3426_v56 = vadd.f32 %v3425_v63, %v9533_v52  ;;  %v3514_v3 = vpop.f32.mrf.mxu3 }
 0x3f5   : > { %v9633_v35 = vpack.c.bf16 %v4674_v61, %v4670_v16  ;;  %v9637_v32 = vadd.f32 %v3514_v3, %v3426_v56  ;;  %v7306_v16 = vld [vmem:[%s10904_s1 + $0x514] sm:$0xf0] }
 0x3f6   : > { %v3250_v41 = vpop.f32.mrf.mxu0  ;;  %v6701_v3 = vor.u32 %v7306_v16, %v6700_v34 }
 0x3f7   : > { %11389 = vst [vmem:[#allocation137_spill] sm:$0xff] %v9633_v35  ;;  %v3251_v8 = vadd.f32 %v3250_v41, %v9263_v44  ;;  %v3339_v39 = vpop.f32.mrf.mxu1  ;;  %3467 = vmatmul.bf16.gmra.mxu2 %v11392_v5  ;;  %v7274_v44 = vld [vmem:[%s10904_s1 + $0x414] sm:$0xf0] }
 0x3f8   : > { %3556 = vmatmul.bf16.gmra.mxu3 %v11331_v51  ;;  %v6573_v41 = vor.u32 %v7274_v44, %v6572_v21 }
 0x3f9   : > { %v3340_v26 = vadd.f32 %v3339_v39, %v3251_v8  ;;  %3289 = vmatmul.bf16.gmra.mxu0 %v11390_v50  ;;  %v6316_v8 = vld [vmem:[%s10904_s1 + $0x208] sm:$0xf]  ;;  %3851 = vmatpush.bf16.msra.mxu3 %v6701_v3 }
 0x3fa   : > { %6862 = vmatmul.msk.bf16.gmra.mxu1 %vm2104_vm0, %v11391_v55  ;;  %v3428_v9 = vpop.f32.mrf.mxu2  ;;  %v6317_v12 = vor.u32 %v7210_v53, %v6316_v8  ;;  %3762 = vmatpush.bf16.msra.mxu2 %v6573_v41  ;;  %v6444_v8 = vld [vmem:[%s10904_s1 + $0x308] sm:$0xf]  ;;  %v7242_v53 = vld [vmem:[%s10904_s1 + $0x314] sm:$0xf0] }
 0x3fb   : > { %v3429_v61 = vadd.f32 %v3428_v9, %v9533_v52  ;;  %v3517_v63 = vpop.f32.mrf.mxu3  ;;  %v6445_v35 = vor.u32 %v7242_v53, %v6444_v8  ;;  %v4678_v51 = vmax.f32 %v3340_v26, 0.0  ;;  %v11394_v55 = vld [vmem:[#allocation118_spill] sm:$0xff]  ;;  %v11396_v26 = vld [vmem:[#allocation57_spill] sm:$0xff] }
 0x3fc   : > { %3584 = vmatpush.bf16.msra.mxu0 %v6317_v12 }
 0x3fd   : > { %v9664_v44 = vadd.f32 %v3517_v63, %v3429_v61  ;;  %3673 = vmatpush.bf16.msra.mxu1 %v6445_v35 }
 0x3fe   : > { %v3252_v56 = vpop.f32.mrf.mxu0 }
 0x3ff   : > { %v3253_v39 = vadd.f32 %v3252_v56, %v9267_v25  ;;  %v3341_v21 = vpop.f32.mrf.mxu1 }
 0x401   : > { %v3342_v9 = vadd.f32 %v3341_v21, %v3253_v39  ;;  %v11395_v39 = vld [vmem:[#allocation119_spill] sm:$0xff] }
 0x402   : > { %v3430_v34 = vpop.f32.mrf.mxu2 }
 0x403   : > { %v4682_v41 = vmax.f32 %v3342_v9, 0.0  ;;  %v3431_v12 = vadd.f32 %v3430_v34, %v9533_v52  ;;  %v3519_v16 = vpop.f32.mrf.mxu3 }
 0x405   : > { %v9672_v25 = vpack.c.bf16 %v4682_v41, %v4678_v51  ;;  %v9676_v3 = vadd.f32 %v3519_v16, %v3431_v12 }
 0x406   : > { %v3255_v61 = vpop.f32.mrf.mxu0 }
 0x407   : > { %11393 = vst [vmem:[#allocation138_spill] sm:$0xff] %v9672_v25  ;;  %v3256_v63 = vadd.f32 %v3255_v61, %v9275_v58  ;;  %v3344_v56 = vpop.f32.mrf.mxu1  ;;  %3472 = vmatmul.bf16.gmra.mxu2 %v11396_v26 }
 0x408   : > { %3561 = vmatmul.bf16.gmra.mxu3 %v11334_v31 }
 0x409   : > { %v3345_v5 = vadd.f32 %v3344_v56, %v3256_v63  ;;  %3294 = vmatmul.bf16.gmra.mxu0 %v11394_v55 }
 0x40a   : > { %6863 = vmatmul.msk.bf16.gmra.mxu1 %vm2104_vm0, %v11395_v39  ;;  %v3433_v51 = vpop.f32.mrf.mxu2 }
 0x40b   : > { %v3434_v35 = vadd.f32 %v3433_v51, %v9533_v52  ;;  %v3522_v21 = vpop.f32.mrf.mxu3  ;;  %v4686_v34 = vmax.f32 %v3345_v5, 0.0  ;;  %v11400_v5 = vld [vmem:[#allocation61_spill] sm:$0xff] }
 0x40d   : > { %v9685_v9 = vadd.f32 %v3522_v21, %v3434_v35  ;;  %v11399_v35 = vld [vmem:[#allocation123_spill] sm:$0xff]  ;;  %v7204_v21 = vld [vmem:[%s10904_s1 + $0x1ec] sm:$0xf] }
 0x40e   : > { %v3257_v8 = vpop.f32.mrf.mxu0 }
 0x40f   : > { %v3258_v58 = vadd.f32 %v3257_v8, %v9279_v37  ;;  %v3346_v53 = vpop.f32.mrf.mxu1  ;;  %v11398_v37 = vld [vmem:[#allocation122_spill] sm:$0xff]  ;;  %v7338_v8 = vld [vmem:[%s10904_s1 + $0x614] sm:$0xf0] }
 0x411   : > { %v3347_v41 = vadd.f32 %v3346_v53, %v3258_v58  ;;  %v7236_v58 = vld [vmem:[%s10904_s1 + $0x2ec] sm:$0xf] }
 0x412   : > { %v3435_v16 = vpop.f32.mrf.mxu2 }
 0x413   : > { %v4690_v12 = vmax.f32 %v3347_v41, 0.0  ;;  %v3436_v63 = vadd.f32 %v3435_v16, %v9533_v52  ;;  %v3524_v56 = vpop.f32.mrf.mxu3 }
 0x415   : > { %v9687_v61 = vpack.c.bf16 %v4690_v12, %v4686_v34  ;;  %v9691_v26 = vadd.f32 %v3524_v56, %v3436_v63  ;;  %v6430_v34 = vld [vmem:[%s10904_s1 + $0x2f8] sm:$0xf0] }
 0x416   : > { %v3260_v25 = vpop.f32.mrf.mxu0  ;;  %v6433_v56 = vor.u32 %v7236_v58, %v6430_v34 }
 0x417   : > { %11397 = vst [vmem:[#allocation139_spill] sm:$0xff] %v9687_v61  ;;  %v3261_v31 = vadd.f32 %v3260_v25, %v9305_v38  ;;  %v3349_v51 = vpop.f32.mrf.mxu1  ;;  %3477 = vmatmul.bf16.gmra.mxu2 %v11400_v5  ;;  %v6302_v38 = vld [vmem:[%s10904_s1 + $0x1f8] sm:$0xf0] }
 0x418   : > { %3566 = vmatmul.bf16.gmra.mxu3 %v11337_v0  ;;  %v6305_v25 = vor.u32 %v7204_v21, %v6302_v38 }
 0x419   : > { %v3350_v39 = vadd.f32 %v3349_v51, %v3261_v31  ;;  %3299 = vmatmul.bf16.gmra.mxu0 %v11398_v37  ;;  %v6828_v31 = vld [vmem:[%s10904_s1 + $0x608] sm:$0xf]  ;;  %4200 = vmatpush.bf16.msrb.mxu3 %v6433_v56 }
 0x41a   : > { %6864 = vmatmul.msk.bf16.gmra.mxu1 %vm2104_vm0, %v11399_v35  ;;  %v3438_v53 = vpop.f32.mrf.mxu2  ;;  %v6829_v41 = vor.u32 %v7338_v8, %v6828_v31  ;;  %4111 = vmatpush.bf16.msrb.mxu2 %v6305_v25  ;;  %v7172_v31 = vld [vmem:[%s10904_s1 + $0xec] sm:$0xf]  ;;  %v6174_v8 = vld [vmem:[%s10904_s1 + $0xf8] sm:$0xf0] }
 0x41b   : > { %v3439_v12 = vadd.f32 %v3438_v53, %v9533_v52  ;;  %v3527_v16 = vpop.f32.mrf.mxu3  ;;  %v6177_v61 = vor.u32 %v7172_v31, %v6174_v8  ;;  %v4694_v0 = vmax.f32 %v3350_v39, 0.0  ;;  %v11402_v35 = vld [vmem:[#allocation126_spill] sm:$0xff]  ;;  %v11404_v39 = vld [vmem:[#allocation65_spill] sm:$0xff] }
 0x41c   : > { %3940 = vmatpush.bf16.msrb.mxu0 %v6829_v41 }
 0x41d   : > { %v9718_v38 = vadd.f32 %v3527_v16, %v3439_v12  ;;  %4022 = vmatpush.bf16.msrb.mxu1 %v6177_v61 }
 0x41e   : > { %v3262_v63 = vpop.f32.mrf.mxu0 }
 0x41f   : > { %v3263_v51 = vadd.f32 %v3262_v63, %v9315_v6  ;;  %v3351_v21 = vpop.f32.mrf.mxu1 }
 0x421   : > { %v3352_v53 = vadd.f32 %v3351_v21, %v3263_v51  ;;  %v11403_v51 = vld [vmem:[#allocation127_spill] sm:$0xff] }
 0x422   : > { %v3440_v58 = vpop.f32.mrf.mxu2 }
 0x423   : > { %v4698_v25 = vmax.f32 %v3352_v53, 0.0  ;;  %v3441_v41 = vadd.f32 %v3440_v58, %v9533_v52  ;;  %v3529_v34 = vpop.f32.mrf.mxu3 }
 0x425   : > { %v9726_v6 = vpack.c.bf16 %v4698_v25, %v4694_v0  ;;  %v9730_v56 = vadd.f32 %v3529_v34, %v3441_v41 }
 0x426   : > { %v3265_v12 = vpop.f32.mrf.mxu0 }
 0x427   : > { %11401 = vst [vmem:[#allocation140_spill] sm:$0xff] %v9726_v6  ;;  %v3266_v16 = vadd.f32 %v3265_v12, %v9323_v30  ;;  %v3354_v63 = vpop.f32.mrf.mxu1  ;;  %3482 = vmatmul.bf16.gmra.mxu2 %v11404_v39 }
 0x428   : > { %3571 = vmatmul.bf16.gmra.mxu3 %v11341_v48 }
 0x429   : > { %v3355_v5 = vadd.f32 %v3354_v63, %v3266_v16  ;;  %3304 = vmatmul.bf16.gmra.mxu0 %v11402_v35 }
 0x42a   : > { %6865 = vmatmul.msk.bf16.gmra.mxu1 %vm2104_vm0, %v11403_v51  ;;  %v3443_v0 = vpop.f32.mrf.mxu2 }
 0x42b   : > { %v3444_v61 = vadd.f32 %v3443_v0, %v9533_v52  ;;  %v3532_v21 = vpop.f32.mrf.mxu3  ;;  %v4702_v58 = vmax.f32 %v3355_v5, 0.0  ;;  %v7200_v5 = vld [vmem:[%s10904_s1 + $0x1cc] sm:$0xf] }
 0x42d   : > { %v9739_v53 = vadd.f32 %v3532_v21, %v3444_v61  ;;  %v11407_v61 = vld [vmem:[#allocation8_spill] sm:$0xff]  ;;  %v11408_v21 = vld [vmem:[#allocation69_spill] sm:$0xff] }
 0x42e   : > { %v3267_v31 = vpop.f32.mrf.mxu0 }
 0x42f   : > { %v3268_v30 = vadd.f32 %v3267_v31, %v9327_v40  ;;  %v3356_v8 = vpop.f32.mrf.mxu1  ;;  %v11406_v40 = vld [vmem:[#allocation7_spill] sm:$0xff]  ;;  %v6414_v31 = vld [vmem:[%s10904_s1 + $0x2d8] sm:$0xf0] }
 0x431   : > { %v3357_v25 = vadd.f32 %v3356_v8, %v3268_v30 }
 0x432   : > { %v3445_v34 = vpop.f32.mrf.mxu2 }
 0x433   : > { %v4706_v41 = vmax.f32 %v3357_v25, 0.0  ;;  %v3446_v16 = vadd.f32 %v3445_v34, %v9533_v52  ;;  %v3534_v63 = vpop.f32.mrf.mxu3 }
 0x435   : > { %v9741_v12 = vpack.c.bf16 %v4706_v41, %v4702_v58  ;;  %v9745_v39 = vadd.f32 %v3534_v63, %v3446_v16 }
 0x436   : > { %v3270_v6 = vpop.f32.mrf.mxu0 }
 0x437   : > { %11405 = vst [vmem:[#allocation141_spill] sm:$0xff] %v9741_v12  ;;  %v3271_v48 = vadd.f32 %v3270_v6, %v9354_v49  ;;  %v3359_v0 = vpop.f32.mrf.mxu1  ;;  %3763 = vmatmul.bf16.vlgmr.msra.gmra.mxu2 %v11408_v21  ;;  %v6286_v49 = vld [vmem:[%s10904_s1 + $0x1d8] sm:$0xf0] }
 0x438   : > { %3852 = vmatmul.bf16.vlgmr.msra.gmra.mxu3 %v11344_v19  ;;  %v6289_v6 = vor.u32 %v7200_v5, %v6286_v49  ;;  %v6158_v5 = vld [vmem:[%s10904_s1 + $0xd8] sm:$0xf0] }
 0x439   : > { %v3360_v51 = vadd.f32 %v3359_v0, %v3271_v48  ;;  %3585 = vmatmul.bf16.vlgmr.msra.gmra.mxu0 %v11406_v40  ;;  %v7232_v48 = vld [vmem:[%s10904_s1 + $0x2cc] sm:$0xf] }
 0x43a   : > { %3674 = vmatmul.bf16.vlgmr.msra.gmra.mxu1 %v11407_v61  ;;  %v3448_v30 = vpop.f32.mrf.mxu2  ;;  %v6417_v8 = vor.u32 %v7232_v48, %v6414_v31  ;;  %4112 = vmatpush.bf16.msrb.mxu2 %v6289_v6  ;;  %v7168_v0 = vld [vmem:[%s10904_s1 + $0xcc] sm:$0xf]  ;;  %v11410_v61 = vld [vmem:[#allocation11_spill] sm:$0xff] }
 0x43b   : > { %v3449_v25 = vadd.f32 %v3448_v30, %v9533_v52  ;;  %v3537_v58 = vpop.f32.mrf.mxu3  ;;  %v6161_v48 = vor.u32 %v7168_v0, %v6158_v5  ;;  %v4710_v31 = vmax.f32 %v3360_v51, 0.0  ;;  %v11412_v51 = vld [vmem:[#allocation72_spill] sm:$0xff] }
 0x43c   : > { %4201 = vmatpush.bf16.msrb.mxu3 %v6417_v8 }
 0x43d   : > { %v9765_v63 = vadd.f32 %v3537_v58, %v3449_v25  ;;  %4023 = vmatpush.bf16.msrb.mxu1 %v6161_v48 }
 0x43e   : > { %v3272_v41 = vpop.f32.mrf.mxu0 }
 0x43f   : > { %v3273_v34 = vadd.f32 %v3272_v41, %v9364_v45  ;;  %v3361_v16 = vpop.f32.mrf.mxu1 }
 0x441   : > { %v3362_v49 = vadd.f32 %v3361_v16, %v3273_v34  ;;  %v11411_v34 = vld [vmem:[#allocation12_spill] sm:$0xff] }
 0x442   : > { %v3450_v6 = vpop.f32.mrf.mxu2 }
 0x443   : > { %v4714_v30 = vmax.f32 %v3362_v49, 0.0  ;;  %v3451_v45 = vadd.f32 %v3450_v6, %v9533_v52  ;;  %v3539_v8 = vpop.f32.mrf.mxu3 }
 0x445   : > { %v9773_v12 = vpack.c.bf16 %v4714_v30, %v4710_v31  ;;  %v9777_v19 = vadd.f32 %v3539_v8, %v3451_v45 }
 0x446   : > { %v3275_v25 = vpop.f32.mrf.mxu0 }
 0x447   : > { %11409 = vst [vmem:[#allocation7_spill] sm:$0xff] %v9773_v12  ;;  %v3276_v58 = vadd.f32 %v3275_v25, %v9373_v62  ;;  %v3364_v41 = vpop.f32.mrf.mxu1  ;;  %3768 = vmatmul.bf16.gmra.mxu2 %v11412_v51 }
 0x448   : > { %3857 = vmatmul.bf16.gmra.mxu3 %v11347_v1 }
 0x449   : > { %v3365_v21 = vadd.f32 %v3364_v41, %v3276_v58  ;;  %3590 = vmatmul.bf16.gmra.mxu0 %v11410_v61 }
 0x44a   : > { %3679 = vmatmul.bf16.gmra.mxu1 %v11411_v34  ;;  %v3453_v16 = vpop.f32.mrf.mxu2 }
 0x44b   : > { %v3454_v0 = vadd.f32 %v3453_v16, %v9533_v52  ;;  %v3542_v5 = vpop.f32.mrf.mxu3  ;;  %v4718_v6 = vmax.f32 %v3365_v21, 0.0  ;;  %v7196_v21 = vld [vmem:[%s10904_s1 + $0x1ac] sm:$0xf] }
 0x44d   : > { %v9785_v31 = vadd.f32 %v3542_v5, %v3454_v0  ;;  %v11415_v0 = vld [vmem:[#allocation16_spill] sm:$0xff]  ;;  %v11416_v5 = vld [vmem:[#allocation75_spill] sm:$0xff] }
 0x44e   : > { %v3277_v49 = vpop.f32.mrf.mxu0 }
 0x44f   : > { %v3278_v48 = vadd.f32 %v3277_v49, %v9377_v24  ;;  %v3366_v62 = vpop.f32.mrf.mxu1  ;;  %v11414_v24 = vld [vmem:[#allocation15_spill] sm:$0xff]  ;;  %v6398_v49 = vld [vmem:[%s10904_s1 + $0x2b8] sm:$0xf0] }
 0x451   : > { %v3367_v30 = vadd.f32 %v3366_v62, %v3278_v48 }
 0x452   : > { %v3455_v8 = vpop.f32.mrf.mxu2 }
 0x453   : > { %v4722_v45 = vmax.f32 %v3367_v30, 0.0  ;;  %v3456_v58 = vadd.f32 %v3455_v8, %v9533_v52  ;;  %v3544_v41 = vpop.f32.mrf.mxu3 }
 0x455   : > { %v9787_v25 = vpack.c.bf16 %v4722_v45, %v4718_v6  ;;  %v9791_v51 = vadd.f32 %v3544_v41, %v3456_v58 }
 0x456   : > { %v3280_v12 = vpop.f32.mrf.mxu0 }
 0x457   : > { %11413 = vst [vmem:[#allocation11_spill] sm:$0xff] %v9787_v25  ;;  %v3281_v1 = vadd.f32 %v3280_v12, %v9404_v22  ;;  %v3369_v16 = vpop.f32.mrf.mxu1  ;;  %3773 = vmatmul.bf16.gmra.mxu2 %v11416_v5  ;;  %v6270_v22 = vld [vmem:[%s10904_s1 + $0x1b8] sm:$0xf0] }
 0x458   : > { %3862 = vmatmul.bf16.gmra.mxu3 %v11350_v4  ;;  %v6273_v12 = vor.u32 %v7196_v21, %v6270_v22  ;;  %v6142_v21 = vld [vmem:[%s10904_s1 + $0xb8] sm:$0xf0] }
 0x459   : > { %v3370_v34 = vadd.f32 %v3369_v16, %v3281_v1  ;;  %3595 = vmatmul.bf16.gmra.mxu0 %v11414_v24  ;;  %v7228_v1 = vld [vmem:[%s10904_s1 + $0x2ac] sm:$0xf] }
 0x45a   : > { %3684 = vmatmul.bf16.gmra.mxu1 %v11415_v0  ;;  %v3458_v48 = vpop.f32.mrf.mxu2  ;;  %v6401_v62 = vor.u32 %v7228_v1, %v6398_v49  ;;  %4113 = vmatpush.bf16.msrb.mxu2 %v6273_v12  ;;  %v7164_v16 = vld [vmem:[%s10904_s1 + $0xac] sm:$0xf]  ;;  %v11418_v0 = vld [vmem:[#allocation19_spill] sm:$0xff] }
 0x45b   : > { %v3459_v30 = vadd.f32 %v3458_v48, %v9533_v52  ;;  %v3547_v6 = vpop.f32.mrf.mxu3  ;;  %v6145_v1 = vor.u32 %v7164_v16, %v6142_v21  ;;  %v4726_v49 = vmax.f32 %v3370_v34, 0.0  ;;  %v11420_v34 = vld [vmem:[#allocation78_spill] sm:$0xff] }
 0x45c   : > { %4202 = vmatpush.bf16.msrb.mxu3 %v6401_v62 }
 0x45d   : > { %v9811_v41 = vadd.f32 %v3547_v6, %v3459_v30  ;;  %4024 = vmatpush.bf16.msrb.mxu1 %v6145_v1 }
 0x45e   : > { %v3282_v45 = vpop.f32.mrf.mxu0 }
 0x45f   : > { %v3283_v8 = vadd.f32 %v3282_v45, %v9414_v59  ;;  %v3371_v58 = vpop.f32.mrf.mxu1 }
 0x461   : > { %v3372_v22 = vadd.f32 %v3371_v58, %v3283_v8  ;;  %v11419_v8 = vld [vmem:[#allocation20_spill] sm:$0xff] }
 0x462   : > { %v3460_v12 = vpop.f32.mrf.mxu2 }
 0x463   : > { %v4730_v48 = vmax.f32 %v3372_v22, 0.0  ;;  %v3461_v59 = vadd.f32 %v3460_v12, %v9533_v52  ;;  %v3549_v62 = vpop.f32.mrf.mxu3 }
 0x465   : > { %v9819_v25 = vpack.c.bf16 %v4730_v48, %v4726_v49  ;;  %v9823_v4 = vadd.f32 %v3549_v62, %v3461_v59 }
 0x466   : > { %v3285_v30 = vpop.f32.mrf.mxu0 }
 0x467   : > { %11417 = vst [vmem:[#allocation15_spill] sm:$0xff] %v9819_v25  ;;  %v3286_v6 = vadd.f32 %v3285_v30, %v9423_v27  ;;  %v3374_v45 = vpop.f32.mrf.mxu1  ;;  %3778 = vmatmul.bf16.gmra.mxu2 %v11420_v34 }
 0x468   : > { %3867 = vmatmul.bf16.gmra.mxu3 %v11353_v18 }
 0x469   : > { %v3375_v5 = vadd.f32 %v3374_v45, %v3286_v6  ;;  %3600 = vmatmul.bf16.gmra.mxu0 %v11418_v0 }
 0x46a   : > { %3689 = vmatmul.bf16.gmra.mxu1 %v11419_v8  ;;  %v3463_v58 = vpop.f32.mrf.mxu2 }
 0x46b   : > { %v3464_v16 = vadd.f32 %v3463_v58, %v9533_v52  ;;  %v3552_v21 = vpop.f32.mrf.mxu3  ;;  %v4734_v12 = vmax.f32 %v3375_v5, 0.0  ;;  %v7192_v5 = vld [vmem:[%s10904_s1 + $0x18c] sm:$0xf] }
 0x46d   : > { %v9831_v49 = vadd.f32 %v3552_v21, %v3464_v16  ;;  %v11423_v16 = vld [vmem:[#allocation24_spill] sm:$0xff]  ;;  %v11424_v21 = vld [vmem:[#allocation82_spill] sm:$0xff] }
 0x46e   : > { %v3287_v22 = vpop.f32.mrf.mxu0 }
 0x46f   : > { %v3288_v1 = vadd.f32 %v3287_v22, %v9427_v60  ;;  %v3376_v27 = vpop.f32.mrf.mxu1  ;;  %v11422_v60 = vld [vmem:[#allocation23_spill] sm:$0xff]  ;;  %v6382_v22 = vld [vmem:[%s10904_s1 + $0x298] sm:$0xf0] }
 0x471   : > { %v3377_v48 = vadd.f32 %v3376_v27, %v3288_v1 }
 0x472   : > { %v3465_v62 = vpop.f32.mrf.mxu2 }
 0x473   : > { %v4738_v59 = vmax.f32 %v3377_v48, 0.0  ;;  %v3466_v6 = vadd.f32 %v3465_v62, %v9533_v52  ;;  %v3554_v45 = vpop.f32.mrf.mxu3 }
 0x475   : > { %v9833_v30 = vpack.c.bf16 %v4738_v59, %v4734_v12  ;;  %v9837_v34 = vadd.f32 %v3554_v45, %v3466_v6 }
 0x476   : > { %v3290_v25 = vpop.f32.mrf.mxu0 }
 0x477   : > { %11421 = vst [vmem:[#allocation19_spill] sm:$0xff] %v9833_v30  ;;  %v3291_v18 = vadd.f32 %v3290_v25, %v9454_v28  ;;  %v3379_v58 = vpop.f32.mrf.mxu1  ;;  %3783 = vmatmul.bf16.gmra.mxu2 %v11424_v21  ;;  %v6254_v28 = vld [vmem:[%s10904_s1 + $0x198] sm:$0xf0] }
 0x478   : > { %3872 = vmatmul.bf16.gmra.mxu3 %v11356_v20  ;;  %v6257_v25 = vor.u32 %v7192_v5, %v6254_v28  ;;  %v6126_v5 = vld [vmem:[%s10904_s1 + $0x98] sm:$0xf0] }
 0x479   : > { %v3380_v8 = vadd.f32 %v3379_v58, %v3291_v18  ;;  %3605 = vmatmul.bf16.gmra.mxu0 %v11422_v60  ;;  %v7224_v18 = vld [vmem:[%s10904_s1 + $0x28c] sm:$0xf] }
 0x47a   : > { %3694 = vmatmul.bf16.gmra.mxu1 %v11423_v16  ;;  %v3468_v1 = vpop.f32.mrf.mxu2  ;;  %v6385_v27 = vor.u32 %v7224_v18, %v6382_v22  ;;  %4114 = vmatpush.bf16.msrb.mxu2 %v6257_v25  ;;  %v7160_v58 = vld [vmem:[%s10904_s1 + $0x8c] sm:$0xf]  ;;  %v11426_v16 = vld [vmem:[#allocation27_spill] sm:$0xff] }
 0x47b   : > { %v3469_v48 = vadd.f32 %v3468_v1, %v9533_v52  ;;  %v3557_v12 = vpop.f32.mrf.mxu3  ;;  %v6129_v18 = vor.u32 %v7160_v58, %v6126_v5  ;;  %v4742_v22 = vmax.f32 %v3380_v8, 0.0  ;;  %v11428_v8 = vld [vmem:[#allocation86_spill] sm:$0xff] }
 0x47c   : > { %4203 = vmatpush.bf16.msrb.mxu3 %v6385_v27 }
 0x47d   : > { %v9857_v45 = vadd.f32 %v3557_v12, %v3469_v48  ;;  %4025 = vmatpush.bf16.msrb.mxu1 %v6129_v18 }
 0x47e   : > { %v3292_v59 = vpop.f32.mrf.mxu0 }
 0x47f   : > { %v3293_v62 = vadd.f32 %v3292_v59, %v9464_v36  ;;  %v3381_v6 = vpop.f32.mrf.mxu1 }
 0x481   : > { %v3382_v28 = vadd.f32 %v3381_v6, %v3293_v62  ;;  %v11427_v62 = vld [vmem:[#allocation28_spill] sm:$0xff] }
 0x482   : > { %v3470_v25 = vpop.f32.mrf.mxu2 }
 0x483   : > { %v4746_v1 = vmax.f32 %v3382_v28, 0.0  ;;  %v3471_v36 = vadd.f32 %v3470_v25, %v9533_v52  ;;  %v3559_v27 = vpop.f32.mrf.mxu3 }
 0x485   : > { %v9865_v30 = vpack.c.bf16 %v4746_v1, %v4742_v22  ;;  %v9869_v20 = vadd.f32 %v3559_v27, %v3471_v36 }
 0x486   : > { %v3295_v48 = vpop.f32.mrf.mxu0 }
 0x487   : > { %11425 = vst [vmem:[#allocation23_spill] sm:$0xff] %v9865_v30  ;;  %v3296_v12 = vadd.f32 %v3295_v48, %v9473_v15  ;;  %v3384_v59 = vpop.f32.mrf.mxu1  ;;  %3788 = vmatmul.bf16.gmra.mxu2 %v11428_v8 }
 0x488   : > { %3877 = vmatmul.bf16.gmra.mxu3 %v11359_v43 }
 0x489   : > { %v3385_v21 = vadd.f32 %v3384_v59, %v3296_v12  ;;  %3610 = vmatmul.bf16.gmra.mxu0 %v11426_v16 }
 0x48a   : > { %3699 = vmatmul.bf16.gmra.mxu1 %v11427_v62  ;;  %v3473_v6 = vpop.f32.mrf.mxu2 }
 0x48b   : > { %v3474_v58 = vadd.f32 %v3473_v6, %v9533_v52  ;;  %v3562_v5 = vpop.f32.mrf.mxu3  ;;  %v4750_v25 = vmax.f32 %v3385_v21, 0.0  ;;  %v7188_v21 = vld [vmem:[%s10904_s1 + $0x16c] sm:$0xf] }
 0x48d   : > { %v9877_v22 = vadd.f32 %v3562_v5, %v3474_v58  ;;  %v11431_v58 = vld [vmem:[#allocation32_spill] sm:$0xff]  ;;  %v11432_v5 = vld [vmem:[#allocation90_spill] sm:$0xff] }
 0x48e   : > { %v3297_v28 = vpop.f32.mrf.mxu0 }
 0x48f   : > { %v3298_v18 = vadd.f32 %v3297_v28, %v9477_v7  ;;  %v3386_v15 = vpop.f32.mrf.mxu1  ;;  %v11430_v7 = vld [vmem:[#allocation31_spill] sm:$0xff]  ;;  %v6366_v28 = vld [vmem:[%s10904_s1 + $0x278] sm:$0xf0] }
 0x491   : > { %v3387_v1 = vadd.f32 %v3386_v15, %v3298_v18 }
 0x492   : > { %v3475_v27 = vpop.f32.mrf.mxu2 }
 0x493   : > { %v4754_v36 = vmax.f32 %v3387_v1, 0.0  ;;  %v3476_v12 = vadd.f32 %v3475_v27, %v9533_v52  ;;  %v3564_v59 = vpop.f32.mrf.mxu3 }
 0x495   : > { %v9879_v48 = vpack.c.bf16 %v4754_v36, %v4750_v25  ;;  %v9883_v8 = vadd.f32 %v3564_v59, %v3476_v12 }
 0x496   : > { %v3300_v30 = vpop.f32.mrf.mxu0 }
 0x497   : > { %11429 = vst [vmem:[#allocation27_spill] sm:$0xff] %v9879_v48  ;;  %v3301_v43 = vadd.f32 %v3300_v30, %v9504_v47  ;;  %v3389_v6 = vpop.f32.mrf.mxu1  ;;  %3793 = vmatmul.bf16.gmra.mxu2 %v11432_v5  ;;  %v6238_v47 = vld [vmem:[%s10904_s1 + $0x178] sm:$0xf0] }
 0x498   : > { %3882 = vmatmul.bf16.gmra.mxu3 %v11362_v2  ;;  %v6241_v30 = vor.u32 %v7188_v21, %v6238_v47  ;;  %v6110_v21 = vld [vmem:[%s10904_s1 + $0x78] sm:$0xf0] }
 0x499   : > { %v3390_v62 = vadd.f32 %v3389_v6, %v3301_v43  ;;  %3615 = vmatmul.bf16.gmra.mxu0 %v11430_v7  ;;  %v7220_v43 = vld [vmem:[%s10904_s1 + $0x26c] sm:$0xf] }
 0x49a   : > { %3704 = vmatmul.bf16.gmra.mxu1 %v11431_v58  ;;  %v3478_v18 = vpop.f32.mrf.mxu2  ;;  %v6369_v15 = vor.u32 %v7220_v43, %v6366_v28  ;;  %4115 = vmatpush.bf16.msrb.mxu2 %v6241_v30  ;;  %v7156_v6 = vld [vmem:[%s10904_s1 + $0x6c] sm:$0xf]  ;;  %v11435_v58 = vld [vmem:[#allocation35_spill] sm:$0xff] }
 0x49b   : > { %v3479_v1 = vadd.f32 %v3478_v18, %v9533_v52  ;;  %v3567_v25 = vpop.f32.mrf.mxu3  ;;  %v6113_v43 = vor.u32 %v7156_v6, %v6110_v21  ;;  %v4758_v28 = vmax.f32 %v3390_v62, 0.0  ;;  %v11437_v62 = vld [vmem:[#allocation94_spill] sm:$0xff] }
 0x49c   : > { %4204 = vmatpush.bf16.msrb.mxu3 %v6369_v15 }
 0x49d   : > { %v9903_v59 = vadd.f32 %v3567_v25, %v3479_v1  ;;  %4026 = vmatpush.bf16.msrb.mxu1 %v6113_v43 }
 0x49e   : > { %v3302_v36 = vpop.f32.mrf.mxu0 }
 0x49f   : > { %v3303_v27 = vadd.f32 %v3302_v36, %v9514_v13  ;;  %v3391_v12 = vpop.f32.mrf.mxu1 }
 0x4a1   : > { %v3392_v47 = vadd.f32 %v3391_v12, %v3303_v27  ;;  %v11436_v27 = vld [vmem:[#allocation36_spill] sm:$0xff]  ;;  %v11438_v12 = vld [vmem:[#allocation95_spill] sm:$0xff] }
 0x4a2   : > { %v3480_v30 = vpop.f32.mrf.mxu2 }
 0x4a3   : > { %v4762_v18 = vmax.f32 %v3392_v47, 0.0  ;;  %v3481_v13 = vadd.f32 %v3480_v30, %v9533_v52  ;;  %v3569_v15 = vpop.f32.mrf.mxu3 }
 0x4a5   : > { %v9911_v48 = vpack.c.bf16 %v4762_v18, %v4758_v28  ;;  %v9915_v2 = vadd.f32 %v3569_v15, %v3481_v13 }
 0x4a6   : > { %v3305_v1 = vpop.f32.mrf.mxu0 }
 0x4a7   : > { %11433 = vst [vmem:[#allocation31_spill] sm:$0xff] %v9911_v48  ;;  %v3306_v25 = vadd.f32 %v3305_v1, %v9523_v54  ;;  %v3394_v36 = vpop.f32.mrf.mxu1  ;;  %3798 = vmatmul.bf16.gmra.mxu2 %v11437_v62  ;;  %v11440_v62 = vld [vmem:[#allocation133_spill] sm:$0xff] }
 0x4a8   : > { %11434 = vst [vmem:[#allocation142_spill] sm:$0xff] %v9915_v2  ;;  %3887 = vmatmul.bf16.gmra.mxu3 %v11438_v12 }
 0x4a9   : > { %v3395_v5 = vadd.f32 %v3394_v36, %v3306_v25  ;;  %3620 = vmatmul.bf16.gmra.mxu0 %v11435_v58 }
 0x4aa   : > { %3709 = vmatmul.bf16.gmra.mxu1 %v11436_v27  ;;  %v3483_v6 = vpop.f32.mrf.mxu2 }
 0x4ab   : > { %v3484_v21 = vadd.f32 %v3483_v6, %v9533_v52  ;;  %v3572_v47 = vpop.f32.mrf.mxu3  ;;  %v4766_v13 = vmax.f32 %v3395_v5, 0.0  ;;  %v11444_v5 = vld [vmem:[#allocation99_spill] sm:$0xff] }
 0x4ad   : > { %v9923_v18 = vadd.f32 %v3572_v47, %v3484_v21  ;;  %v11442_v21 = vld [vmem:[#allocation40_spill] sm:$0xff]  ;;  %v11443_v47 = vld [vmem:[#allocation98_spill] sm:$0xff] }
 0x4ae   : > { %v3307_v43 = vpop.f32.mrf.mxu0 }
 0x4af   : > { %v3308_v28 = vadd.f32 %v3307_v43, %v9526_v46  ;;  %v3396_v54 = vpop.f32.mrf.mxu1  ;;  %v11441_v46 = vld [vmem:[#allocation39_spill] sm:$0xff] }
 0x4b1   : > { %v3397_v30 = vadd.f32 %v3396_v54, %v3308_v28 }
 0x4b2   : > { %v3485_v1 = vpop.f32.mrf.mxu2 }
 0x4b3   : > { %v4770_v15 = vmax.f32 %v3397_v30, 0.0  ;;  %v3486_v36 = vadd.f32 %v3485_v1, %v9533_v52  ;;  %v3574_v48 = vpop.f32.mrf.mxu3  ;;  %v7184_v52 = vld [vmem:[%s10904_s1 + $0x14c] sm:$0xf] }
 0x4b5   : > { %v9925_v25 = vpack.c.bf16 %v4770_v15, %v4766_v13  ;;  %v9929_v58 = vadd.f32 %v3574_v48, %v3486_v36  ;;  %v7216_v48 = vld [vmem:[%s10904_s1 + $0x24c] sm:$0xf] }
 0x4b6   : > { %v3586_v12 = vpop.f32.mrf.mxu0 }
 0x4b7   : > { %11439 = vst [vmem:[#allocation143_spill] sm:$0xff] %v9925_v25  ;;  %v3587_v27 = vadd.f32 %v3586_v12, %v11440_v62  ;;  %v3675_v6 = vpop.f32.mrf.mxu1  ;;  %3803 = vmatmul.bf16.gmra.mxu2 %v11443_v47  ;;  %v6222_v62 = vld [vmem:[%s10904_s1 + $0x158] sm:$0xf0]  ;;  %v11448_v47 = vld [vmem:[#allocation47_spill] sm:$0xff] }
 0x4b8   : > { %3892 = vmatmul.bf16.gmra.mxu3 %v11444_v5  ;;  %v6350_v12 = vld [vmem:[%s10904_s1 + $0x258] sm:$0xf0]  ;;  %v11447_v5 = vld [vmem:[#allocation101_spill] sm:$0xff] }
 0x4b9   : > { %v3676_v2 = vadd.f32 %v3675_v6, %v3587_v27  ;;  %3625 = vmatmul.bf16.gmra.mxu0 %v11441_v46  ;;  %v6225_v27 = vor.u32 %v7184_v52, %v6222_v62  ;;  %v6353_v28 = vor.u32 %v7216_v48, %v6350_v12  ;;  %v7152_v6 = vld [vmem:[%s10904_s1 + $0x4c] sm:$0xf]  ;;  %v6094_v52 = vld [vmem:[%s10904_s1 + $0x58] sm:$0xf0] }
 0x4ba   : > { %3714 = vmatmul.bf16.gmra.mxu1 %v11442_v21  ;;  %v3764_v43 = vpop.f32.mrf.mxu2  ;;  %v6097_v48 = vor.u32 %v7152_v6, %v6094_v52  ;;  %v11446_v25 = vld [vmem:[#allocation44_spill] sm:$0xff] }
 0x4bb   : > { %v3765_v54 = vadd.f32 %v3764_v43, %v3676_v2  ;;  %v3853_v30 = vpop.f32.mrf.mxu3  ;;  %4116 = vmatpush.bf16.msrb.mxu2 %v6225_v27  ;;  %4205 = vmatpush.bf16.msrb.mxu3 %v6353_v28 }
 0x4bc   : > { %4027 = vmatpush.bf16.msrb.mxu1 %v6097_v48 }
 0x4bd   : > { %v9948_v36 = vadd.f32 %v3853_v30, %v3765_v54 }
 0x4be   : > { %v3588_v13 = vpop.f32.mrf.mxu0 }
 0x4bf   : > { %v3589_v15 = vadd.f32 %v3588_v13, %v9568_v29  ;;  %v3677_v1 = vpop.f32.mrf.mxu1  ;;  %v11445_v13 = vld [vmem:[#allocation43_spill] sm:$0xff] }
 0x4c1   : > { %v3678_v62 = vadd.f32 %v3677_v1, %v3589_v15 }
 0x4c2   : > { %v3766_v2 = vpop.f32.mrf.mxu2 }
 0x4c3   : > { %v3767_v12 = vadd.f32 %v3766_v2, %v3678_v62  ;;  %v3855_v27 = vpop.f32.mrf.mxu3 }
 0x4c5   : > { %v9957_v54 = vadd.f32 %v3855_v27, %v3767_v12 }
 0x4c6   : > { %v3591_v43 = vpop.f32.mrf.mxu0 }
 0x4c7   : > { %v3592_v29 = vadd.f32 %v3591_v43, %v9577_v33  ;;  %v3680_v28 = vpop.f32.mrf.mxu1  ;;  %3808 = vmatmul.bf16.gmra.mxu2 %v11447_v5 }
 0x4c8   : > { %3897 = vmatmul.bf16.gmra.mxu3 %v11378_v23 }
 0x4c9   : > { %v3681_v30 = vadd.f32 %v3680_v28, %v3592_v29  ;;  %3630 = vmatmul.bf16.gmra.mxu0 %v11445_v13 }
 0x4ca   : > { %3719 = vmatmul.bf16.gmra.mxu1 %v11446_v25  ;;  %v3769_v15 = vpop.f32.mrf.mxu2 }
 0x4cb   : > { %v3770_v1 = vadd.f32 %v3769_v15, %v3681_v30  ;;  %v3858_v6 = vpop.f32.mrf.mxu3  ;;  %v11449_v30 = vld [vmem:[#allocation48_spill] sm:$0xff]  ;;  %v11450_v15 = vld [vmem:[#allocation105_spill] sm:$0xff] }
 0x4cd   : > { %v9964_v33 = vadd.f32 %v3858_v6, %v3770_v1  ;;  %v6334_v6 = vld [vmem:[%s10904_s1 + $0x238] sm:$0xf0] }
 0x4ce   : > { %v3593_v52 = vpop.f32.mrf.mxu0 }
 0x4cf   : > { %v3594_v62 = vadd.f32 %v3593_v52, %v9583_v14  ;;  %v3682_v48 = vpop.f32.mrf.mxu1  ;;  %v7180_v14 = vld [vmem:[%s10904_s1 + $0x12c] sm:$0xf] }
 0x4d1   : > { %v3683_v2 = vadd.f32 %v3682_v48, %v3594_v62 }
 0x4d2   : > { %v3771_v12 = vpop.f32.mrf.mxu2 }
 0x4d3   : > { %v3772_v27 = vadd.f32 %v3771_v12, %v3683_v2  ;;  %v3860_v43 = vpop.f32.mrf.mxu3 }
 0x4d5   : > { %v9967_v5 = vadd.f32 %v3860_v43, %v3772_v27 }
 0x4d6   : > { %v3596_v29 = vpop.f32.mrf.mxu0 }
 0x4d7   : > { %v3597_v28 = vadd.f32 %v3596_v29, %v9610_v17  ;;  %v3685_v25 = vpop.f32.mrf.mxu1  ;;  %3813 = vmatmul.bf16.gmra.mxu2 %v11450_v15  ;;  %v6206_v17 = vld [vmem:[%s10904_s1 + $0x138] sm:$0xf0]  ;;  %v11453_v15 = vld [vmem:[#allocation109_spill] sm:$0xff] }
 0x4d8   : > { %3902 = vmatmul.bf16.gmra.mxu3 %v11382_v11  ;;  %v6209_v1 = vor.u32 %v7180_v14, %v6206_v17  ;;  %v6078_v14 = vld [vmem:[%s10904_s1 + $0x38] sm:$0xf0] }
 0x4d9   : > { %v3686_v23 = vadd.f32 %v3685_v25, %v3597_v28  ;;  %3635 = vmatmul.bf16.gmra.mxu0 %v11448_v47  ;;  %v7212_v25 = vld [vmem:[%s10904_s1 + $0x22c] sm:$0xf]  ;;  %v11452_v11 = vld [vmem:[#allocation52_spill] sm:$0xff] }
 0x4da   : > { %3724 = vmatmul.bf16.gmra.mxu1 %v11449_v30  ;;  %v3774_v52 = vpop.f32.mrf.mxu2  ;;  %v6337_v62 = vor.u32 %v7212_v25, %v6334_v6  ;;  %4117 = vmatpush.bf16.msrb.mxu2 %v6209_v1  ;;  %v7148_v28 = vld [vmem:[%s10904_s1 + $0x2c] sm:$0xf]  ;;  %v11454_v30 = vld [vmem:[#allocation55_spill] sm:$0xff] }
 0x4db   : > { %v3775_v48 = vadd.f32 %v3774_v52, %v3686_v23  ;;  %v3863_v2 = vpop.f32.mrf.mxu3  ;;  %v6081_v25 = vor.u32 %v7148_v28, %v6078_v14 }
 0x4dc   : > { %4206 = vmatpush.bf16.msrb.mxu3 %v6337_v62 }
 0x4dd   : > { %v9986_v29 = vadd.f32 %v3863_v2, %v3775_v48  ;;  %4028 = vmatpush.bf16.msrb.mxu1 %v6081_v25 }
 0x4de   : > { %v3598_v12 = vpop.f32.mrf.mxu0 }
 0x4df   : > { %v3599_v27 = vadd.f32 %v3598_v12, %v9622_v10  ;;  %v3687_v43 = vpop.f32.mrf.mxu1  ;;  %v11451_v12 = vld [vmem:[#allocation51_spill] sm:$0xff] }
 0x4e1   : > { %v3688_v17 = vadd.f32 %v3687_v43, %v3599_v27 }
 0x4e2   : > { %v3776_v23 = vpop.f32.mrf.mxu2 }
 0x4e3   : > { %v3777_v6 = vadd.f32 %v3776_v23, %v3688_v17  ;;  %v3865_v1 = vpop.f32.mrf.mxu3 }
 0x4e5   : > { %v9995_v48 = vadd.f32 %v3865_v1, %v3777_v6 }
 0x4e6   : > { %v3601_v52 = vpop.f32.mrf.mxu0 }
 0x4e7   : > { %v3602_v10 = vadd.f32 %v3601_v52, %v9631_v57  ;;  %v3690_v62 = vpop.f32.mrf.mxu1  ;;  %3818 = vmatmul.bf16.gmra.mxu2 %v11453_v15 }
 0x4e8   : > { %3907 = vmatmul.bf16.gmra.mxu3 %v11386_v42 }
 0x4e9   : > { %v3691_v2 = vadd.f32 %v3690_v62, %v3602_v10  ;;  %3640 = vmatmul.bf16.gmra.mxu0 %v11451_v12 }
 0x4ea   : > { %3729 = vmatmul.bf16.gmra.mxu1 %v11452_v11  ;;  %v3779_v27 = vpop.f32.mrf.mxu2 }
 0x4eb   : > { %v3780_v43 = vadd.f32 %v3779_v27, %v3691_v2  ;;  %v3868_v28 = vpop.f32.mrf.mxu3  ;;  %v11455_v2 = vld [vmem:[#allocation56_spill] sm:$0xff]  ;;  %v11456_v27 = vld [vmem:[#allocation113_spill] sm:$0xff] }
 0x4ed   : > { %v10002_v57 = vadd.f32 %v3868_v28, %v3780_v43  ;;  %v6318_v28 = vld [vmem:[%s10904_s1 + $0x218] sm:$0xf0] }
 0x4ee   : > { %v3603_v14 = vpop.f32.mrf.mxu0 }
 0x4ef   : > { %v3604_v17 = vadd.f32 %v3603_v14, %v9637_v32  ;;  %v3692_v25 = vpop.f32.mrf.mxu1  ;;  %v7176_v32 = vld [vmem:[%s10904_s1 + $0x10c] sm:$0xf] }
 0x4f1   : > { %v3693_v23 = vadd.f32 %v3692_v25, %v3604_v17 }
 0x4f2   : > { %v3781_v6 = vpop.f32.mrf.mxu2 }
 0x4f3   : > { %v3782_v1 = vadd.f32 %v3781_v6, %v3693_v23  ;;  %v3870_v52 = vpop.f32.mrf.mxu3 }
 0x4f5   : > { %v10005_v15 = vadd.f32 %v3870_v52, %v3782_v1 }
 0x4f6   : > { %v3606_v10 = vpop.f32.mrf.mxu0 }
 0x4f7   : > { %v3607_v62 = vadd.f32 %v3606_v10, %v9664_v44  ;;  %v3695_v11 = vpop.f32.mrf.mxu1  ;;  %3823 = vmatmul.bf16.gmra.mxu2 %v11456_v27  ;;  %v6190_v44 = vld [vmem:[%s10904_s1 + $0x118] sm:$0xf0]  ;;  %v11459_v27 = vld [vmem:[#allocation117_spill] sm:$0xff] }
 0x4f8   : > { %3912 = vmatmul.bf16.gmra.mxu3 %v11390_v50  ;;  %v6193_v43 = vor.u32 %v7176_v32, %v6190_v44  ;;  %v6062_v32 = vld [vmem:[%s10904_s1 + $0x18] sm:$0xf0] }
 0x4f9   : > { %v3696_v42 = vadd.f32 %v3695_v11, %v3607_v62  ;;  %3645 = vmatmul.bf16.gmra.mxu0 %v11454_v30  ;;  %v7208_v11 = vld [vmem:[%s10904_s1 + $0x20c] sm:$0xf]  ;;  %v11458_v50 = vld [vmem:[#allocation60_spill] sm:$0xff] }
 0x4fa   : > { %3734 = vmatmul.bf16.gmra.mxu1 %v11455_v2  ;;  %v3784_v14 = vpop.f32.mrf.mxu2  ;;  %v6321_v17 = vor.u32 %v7208_v11, %v6318_v28  ;;  %4118 = vmatpush.bf16.msrb.mxu2 %v6193_v43  ;;  %v7144_v62 = vld [vmem:[%s10904_s1 + $0xc] sm:$0xf]  ;;  %v11460_v2 = vld [vmem:[#allocation63_spill] sm:$0xff] }
 0x4fb   : > { %v3785_v25 = vadd.f32 %v3784_v14, %v3696_v42  ;;  %v3873_v23 = vpop.f32.mrf.mxu3  ;;  %v6065_v11 = vor.u32 %v7144_v62, %v6062_v32 }
 0x4fc   : > { %4207 = vmatpush.bf16.msrb.mxu3 %v6321_v17 }
 0x4fd   : > { %v10024_v10 = vadd.f32 %v3873_v23, %v3785_v25  ;;  %4029 = vmatpush.bf16.msrb.mxu1 %v6065_v11 }
 0x4fe   : > { %v3608_v6 = vpop.f32.mrf.mxu0 }
 0x4ff   : > { %v3609_v1 = vadd.f32 %v3608_v6, %v9676_v3  ;;  %v3697_v52 = vpop.f32.mrf.mxu1  ;;  %v11457_v6 = vld [vmem:[#allocation59_spill] sm:$0xff] }
 0x501   : > { %v3698_v44 = vadd.f32 %v3697_v52, %v3609_v1 }
 0x502   : > { %v3786_v42 = vpop.f32.mrf.mxu2 }
 0x503   : > { %v3787_v28 = vadd.f32 %v3786_v42, %v3698_v44  ;;  %v3875_v43 = vpop.f32.mrf.mxu3 }
 0x505   : > { %v10033_v25 = vadd.f32 %v3875_v43, %v3787_v28 }
 0x506   : > { %v3611_v14 = vpop.f32.mrf.mxu0 }
 0x507   : > { %v3612_v3 = vadd.f32 %v3611_v14, %v9685_v9  ;;  %v3700_v17 = vpop.f32.mrf.mxu1  ;;  %3828 = vmatmul.bf16.gmra.mxu2 %v11459_v27 }
 0x508   : > { %3917 = vmatmul.bf16.gmra.mxu3 %v11394_v55 }
 0x509   : > { %v3701_v23 = vadd.f32 %v3700_v17, %v3612_v3  ;;  %3650 = vmatmul.bf16.gmra.mxu0 %v11457_v6 }
 0x50a   : > { %3739 = vmatmul.bf16.gmra.mxu1 %v11458_v50  ;;  %v3789_v1 = vpop.f32.mrf.mxu2 }
 0x50b   : > { %v3790_v52 = vadd.f32 %v3789_v1, %v3701_v23  ;;  %v3878_v62 = vpop.f32.mrf.mxu3  ;;  %v11461_v23 = vld [vmem:[#allocation64_spill] sm:$0xff]  ;;  %v11462_v1 = vld [vmem:[#allocation121_spill] sm:$0xff] }
 0x50d   : > { %v10040_v9 = vadd.f32 %v3878_v62, %v3790_v52  ;;  %v6558_v62 = vld [vmem:[%s10904_s1 + $0x3f8] sm:$0xf0] }
 0x50e   : > { %v3613_v32 = vpop.f32.mrf.mxu0 }
 0x50f   : > { %v3614_v44 = vadd.f32 %v3613_v32, %v9691_v26  ;;  %v3702_v11 = vpop.f32.mrf.mxu1  ;;  %v7332_v26 = vld [vmem:[%s10904_s1 + $0x5ec] sm:$0xf] }
 0x510   : > { %v7336_v32 = vld [vmem:[%s10904_s1 + $0x60c] sm:$0xf] }
 0x511   : > { %v3703_v42 = vadd.f32 %v3702_v11, %v3614_v44  ;;  %v6830_v44 = vld [vmem:[%s10904_s1 + $0x618] sm:$0xf0] }
 0x512   : > { %v3791_v28 = vpop.f32.mrf.mxu2 }
 0x513   : > { %v3792_v43 = vadd.f32 %v3791_v28, %v3703_v42  ;;  %v3880_v14 = vpop.f32.mrf.mxu3  ;;  %v6833_v28 = vor.u32 %v7336_v32, %v6830_v44 }
 0x515   : > { %v10043_v27 = vadd.f32 %v3880_v14, %v3792_v43  ;;  %4563 = vmatpush.bf16.msra.mxu3 %v6833_v28 }
 0x516   : > { %v3616_v3 = vpop.f32.mrf.mxu0 }
 0x517   : > { %v3617_v17 = vadd.f32 %v3616_v3, %v9718_v38  ;;  %v3705_v50 = vpop.f32.mrf.mxu1  ;;  %3833 = vmatmul.bf16.gmra.mxu2 %v11462_v1  ;;  %v6814_v38 = vld [vmem:[%s10904_s1 + $0x5f8] sm:$0xf0]  ;;  %v11465_v1 = vld [vmem:[#allocation125_spill] sm:$0xff] }
 0x518   : > { %3922 = vmatmul.bf16.gmra.mxu3 %v11398_v37  ;;  %v6817_v52 = vor.u32 %v7332_v26, %v6814_v38  ;;  %v7300_v37 = vld [vmem:[%s10904_s1 + $0x4ec] sm:$0xf] }
 0x519   : > { %v3706_v55 = vadd.f32 %v3705_v50, %v3617_v17  ;;  %3655 = vmatmul.bf16.gmra.mxu0 %v11460_v2  ;;  %v7268_v50 = vld [vmem:[%s10904_s1 + $0x3ec] sm:$0xf] }
 0x51a   : > { %3744 = vmatmul.bf16.gmra.mxu1 %v11461_v23  ;;  %v3794_v11 = vpop.f32.mrf.mxu2  ;;  %v6561_v42 = vor.u32 %v7268_v50, %v6558_v62  ;;  %4467 = vmatpush.bf16.msra.mxu2 %v6817_v52  ;;  %v6686_v50 = vld [vmem:[%s10904_s1 + $0x4f8] sm:$0xf0]  ;;  %v11466_v23 = vld [vmem:[#allocation71_spill] sm:$0xff] }
 0x51b   : > { %v3795_v43 = vadd.f32 %v3794_v11, %v3706_v55  ;;  %v3883_v14 = vpop.f32.mrf.mxu3  ;;  %v6689_v55 = vor.u32 %v7300_v37, %v6686_v50 }
 0x51c   : > { %4289 = vmatpush.bf16.msra.mxu0 %v6561_v42 }
 0x51d   : > { %v10068_v38 = vadd.f32 %v3883_v14, %v3795_v43  ;;  %4378 = vmatpush.bf16.msra.mxu1 %v6689_v55  ;;  %v11463_v14 = vld [vmem:[#allocation67_spill] sm:$0xff] }
 0x51e   : > { %v3618_v3 = vpop.f32.mrf.mxu0 }
 0x51f   : > { %v3619_v17 = vadd.f32 %v3618_v3, %v9730_v56  ;;  %v3707_v26 = vpop.f32.mrf.mxu1  ;;  %v11464_v3 = vld [vmem:[#allocation68_spill] sm:$0xff] }
 0x521   : > { %v3708_v62 = vadd.f32 %v3707_v26, %v3619_v17 }
 0x522   : > { %v3796_v32 = vpop.f32.mrf.mxu2 }
 0x523   : > { %v3797_v52 = vadd.f32 %v3796_v32, %v3708_v62  ;;  %v3885_v44 = vpop.f32.mrf.mxu3 }
 0x525   : > { %v10077_v28 = vadd.f32 %v3885_v44, %v3797_v52 }
 0x526   : > { %v3621_v56 = vpop.f32.mrf.mxu0 }
 0x527   : > { %v3622_v11 = vadd.f32 %v3621_v56, %v9739_v53  ;;  %v3710_v42 = vpop.f32.mrf.mxu1  ;;  %3838 = vmatmul.bf16.gmra.mxu2 %v11465_v1 }
 0x528   : > { %3927 = vmatmul.bf16.gmra.mxu3 %v11402_v35 }
 0x529   : > { %v3711_v43 = vadd.f32 %v3710_v42, %v3622_v11  ;;  %3660 = vmatmul.bf16.gmra.mxu0 %v11463_v14 }
 0x52a   : > { %3749 = vmatmul.bf16.gmra.mxu1 %v11464_v3  ;;  %v3799_v37 = vpop.f32.mrf.mxu2 }
 0x52b   : > { %v3800_v17 = vadd.f32 %v3799_v37, %v3711_v43  ;;  %v3888_v26 = vpop.f32.mrf.mxu3  ;;  %v11467_v43 = vld [vmem:[#allocation5_spill] sm:$0xff]  ;;  %v7328_v37 = vld [vmem:[%s10904_s1 + $0x5cc] sm:$0xf] }
 0x52d   : > { %v10084_v53 = vadd.f32 %v3888_v26, %v3800_v17  ;;  %v6542_v26 = vld [vmem:[%s10904_s1 + $0x3d8] sm:$0xf0] }
 0x52e   : > { %v3623_v50 = vpop.f32.mrf.mxu0 }
 0x52f   : > { %v3624_v62 = vadd.f32 %v3623_v50, %v9745_v39  ;;  %v3712_v55 = vpop.f32.mrf.mxu1  ;;  %v11468_v39 = vld [vmem:[#allocation6_spill] sm:$0xff] }
 0x531   : > { %v3713_v32 = vadd.f32 %v3712_v55, %v3624_v62 }
 0x532   : > { %v3801_v52 = vpop.f32.mrf.mxu2 }
 0x533   : > { %v3802_v44 = vadd.f32 %v3801_v52, %v3713_v32  ;;  %v3890_v56 = vpop.f32.mrf.mxu3 }
 0x535   : > { %v10087_v1 = vadd.f32 %v3890_v56, %v3802_v44 }
 0x536   : > { %v3626_v11 = vpop.f32.mrf.mxu0 }
 0x537   : > { %v3627_v42 = vadd.f32 %v3626_v11, %v9765_v63  ;;  %v3715_v3 = vpop.f32.mrf.mxu1  ;;  %4119 = vmatmul.bf16.vlgmr.msrb.gmra.mxu2 %v11468_v39  ;;  %v6798_v63 = vld [vmem:[%s10904_s1 + $0x5d8] sm:$0xf0]  ;;  %v7296_v11 = vld [vmem:[%s10904_s1 + $0x4cc] sm:$0xf] }
 0x538   : > { %4208 = vmatmul.bf16.vlgmr.msrb.gmra.mxu3 %v11406_v40  ;;  %v6801_v17 = vor.u32 %v7328_v37, %v6798_v63 }
 0x539   : > { %v3716_v35 = vadd.f32 %v3715_v3, %v3627_v42  ;;  %6866 = vmatmul.msk.bf16.vlgmr.msrb.gmra.mxu0 %vm2104_vm0, %v11466_v23  ;;  %v7264_v3 = vld [vmem:[%s10904_s1 + $0x3cc] sm:$0xf]  ;;  %v6670_v42 = vld [vmem:[%s10904_s1 + $0x4d8] sm:$0xf0] }
 0x53a   : > { %4030 = vmatmul.bf16.vlgmr.msrb.gmra.mxu1 %v11467_v43  ;;  %v3804_v50 = vpop.f32.mrf.mxu2  ;;  %v6545_v62 = vor.u32 %v7264_v3, %v6542_v26  ;;  %4468 = vmatpush.bf16.msra.mxu2 %v6801_v17  ;;  %v6673_v39 = vor.u32 %v7296_v11, %v6670_v42 }
 0x53b   : > { %v3805_v40 = vadd.f32 %v3804_v50, %v3716_v35  ;;  %v3893_v55 = vpop.f32.mrf.mxu3 }
 0x53c   : > { %4290 = vmatpush.bf16.msra.mxu0 %v6545_v62  ;;  %4379 = vmatpush.bf16.msra.mxu1 %v6673_v39  ;;  %v11469_v62 = vld [vmem:[#allocation74_spill] sm:$0xff] }
 0x53d   : > { %v10107_v56 = vadd.f32 %v3893_v55, %v3805_v40  ;;  %v11470_v40 = vld [vmem:[#allocation9_spill] sm:$0xff]  ;;  %v11471_v55 = vld [vmem:[#allocation10_spill] sm:$0xff] }
 0x53e   : > { %v3628_v32 = vpop.f32.mrf.mxu0 }
 0x53f   : > { %v3629_v52 = vadd.f32 %v3628_v32, %v9777_v19  ;;  %v3717_v44 = vpop.f32.mrf.mxu1 }
 0x541   : > { %v3718_v43 = vadd.f32 %v3717_v44, %v3629_v52 }
 0x542   : > { %v3806_v35 = vpop.f32.mrf.mxu2 }
 0x543   : > { %v3807_v37 = vadd.f32 %v3806_v35, %v3718_v43  ;;  %v3895_v63 = vpop.f32.mrf.mxu3 }
 0x545   : > { %v10116_v26 = vadd.f32 %v3895_v63, %v3807_v37 }
 0x546   : > { %v3631_v3 = vpop.f32.mrf.mxu0 }
 0x547   : > { %v3632_v19 = vadd.f32 %v3631_v3, %v9785_v31  ;;  %v3720_v17 = vpop.f32.mrf.mxu1  ;;  %4124 = vmatmul.bf16.gmra.mxu2 %v11471_v55  ;;  %v11472_v55 = vld [vmem:[#allocation77_spill] sm:$0xff] }
 0x548   : > { %4213 = vmatmul.bf16.gmra.mxu3 %v11410_v61 }
 0x549   : > { %v3721_v50 = vadd.f32 %v3720_v17, %v3632_v19  ;;  %6867 = vmatmul.msk.bf16.gmra.mxu0 %vm2104_vm0, %v11469_v62 }
 0x54a   : > { %4035 = vmatmul.bf16.gmra.mxu1 %v11470_v40  ;;  %v3809_v32 = vpop.f32.mrf.mxu2 }
 0x54b   : > { %v3810_v52 = vadd.f32 %v3809_v32, %v3721_v50  ;;  %v3898_v44 = vpop.f32.mrf.mxu3  ;;  %v11473_v50 = vld [vmem:[#allocation13_spill] sm:$0xff]  ;;  %v7324_v32 = vld [vmem:[%s10904_s1 + $0x5ac] sm:$0xf] }
 0x54d   : > { %v10124_v43 = vadd.f32 %v3898_v44, %v3810_v52  ;;  %v7260_v52 = vld [vmem:[%s10904_s1 + $0x3ac] sm:$0xf] }
 0x54e   : > { %v3633_v11 = vpop.f32.mrf.mxu0 }
 0x54f   : > { %v3634_v42 = vadd.f32 %v3633_v11, %v9791_v51  ;;  %v3722_v31 = vpop.f32.mrf.mxu1  ;;  %v11474_v51 = vld [vmem:[#allocation14_spill] sm:$0xff]  ;;  %v6526_v11 = vld [vmem:[%s10904_s1 + $0x3b8] sm:$0xf0] }
 0x551   : > { %v3723_v39 = vadd.f32 %v3722_v31, %v3634_v42  ;;  %v6529_v31 = vor.u32 %v7260_v52, %v6526_v11 }
 0x552   : > { %v3811_v35 = vpop.f32.mrf.mxu2 }
 0x553   : > { %v3812_v37 = vadd.f32 %v3811_v35, %v3723_v39  ;;  %v3900_v63 = vpop.f32.mrf.mxu3  ;;  %4291 = vmatpush.bf16.msra.mxu0 %v6529_v31  ;;  %v11475_v31 = vld [vmem:[#allocation80_spill] sm:$0xff] }
 0x555   : > { %v10127_v40 = vadd.f32 %v3900_v63, %v3812_v37 }
 0x556   : > { %v3636_v3 = vpop.f32.mrf.mxu0 }
 0x557   : > { %v3637_v19 = vadd.f32 %v3636_v3, %v9811_v41  ;;  %v3725_v17 = vpop.f32.mrf.mxu1  ;;  %4129 = vmatmul.bf16.gmra.mxu2 %v11474_v51  ;;  %v6782_v41 = vld [vmem:[%s10904_s1 + $0x5b8] sm:$0xf0] }
 0x558   : > { %4218 = vmatmul.bf16.gmra.mxu3 %v11414_v24  ;;  %v6785_v44 = vor.u32 %v7324_v32, %v6782_v41 }
 0x559   : > { %v3726_v61 = vadd.f32 %v3725_v17, %v3637_v19  ;;  %6868 = vmatmul.msk.bf16.gmra.mxu0 %vm2104_vm0, %v11472_v55  ;;  %v7292_v19 = vld [vmem:[%s10904_s1 + $0x4ac] sm:$0xf]  ;;  %v6654_v17 = vld [vmem:[%s10904_s1 + $0x4b8] sm:$0xf0] }
 0x55a   : > { %4040 = vmatmul.bf16.gmra.mxu1 %v11473_v50  ;;  %v3814_v42 = vpop.f32.mrf.mxu2  ;;  %4469 = vmatpush.bf16.msra.mxu2 %v6785_v44  ;;  %v6657_v51 = vor.u32 %v7292_v19, %v6654_v17 }
 0x55b   : > { %v3815_v24 = vadd.f32 %v3814_v42, %v3726_v61  ;;  %v3903_v39 = vpop.f32.mrf.mxu3 }
 0x55c   : > { %4380 = vmatpush.bf16.msra.mxu1 %v6657_v51 }
 0x55d   : > { %v10147_v3 = vadd.f32 %v3903_v39, %v3815_v24  ;;  %v11476_v24 = vld [vmem:[#allocation17_spill] sm:$0xff]  ;;  %v11477_v39 = vld [vmem:[#allocation18_spill] sm:$0xff] }
 0x55e   : > { %v3638_v35 = vpop.f32.mrf.mxu0 }
 0x55f   : > { %v3639_v37 = vadd.f32 %v3638_v35, %v9823_v4  ;;  %v3727_v63 = vpop.f32.mrf.mxu1 }
 0x561   : > { %v3728_v50 = vadd.f32 %v3727_v63, %v3639_v37 }
 0x562   : > { %v3816_v61 = vpop.f32.mrf.mxu2 }
 0x563   : > { %v3817_v32 = vadd.f32 %v3816_v61, %v3728_v50  ;;  %v3905_v41 = vpop.f32.mrf.mxu3 }
 0x565   : > { %v10156_v11 = vadd.f32 %v3905_v41, %v3817_v32 }
 0x566   : > { %v3641_v52 = vpop.f32.mrf.mxu0 }
 0x567   : > { %v3642_v4 = vadd.f32 %v3641_v52, %v9831_v49  ;;  %v3730_v44 = vpop.f32.mrf.mxu1  ;;  %4134 = vmatmul.bf16.gmra.mxu2 %v11477_v39  ;;  %v11478_v39 = vld [vmem:[#allocation84_spill] sm:$0xff] }
 0x568   : > { %4223 = vmatmul.bf16.gmra.mxu3 %v11418_v0 }
 0x569   : > { %v3731_v42 = vadd.f32 %v3730_v44, %v3642_v4  ;;  %6869 = vmatmul.msk.bf16.gmra.mxu0 %vm2104_vm0, %v11475_v31 }
 0x56a   : > { %4045 = vmatmul.bf16.gmra.mxu1 %v11476_v24  ;;  %v3819_v35 = vpop.f32.mrf.mxu2 }
 0x56b   : > { %v3820_v37 = vadd.f32 %v3819_v35, %v3731_v42  ;;  %v3908_v63 = vpop.f32.mrf.mxu3  ;;  %v11479_v42 = vld [vmem:[#allocation21_spill] sm:$0xff]  ;;  %v7320_v35 = vld [vmem:[%s10904_s1 + $0x58c] sm:$0xf] }
 0x56d   : > { %v10164_v50 = vadd.f32 %v3908_v63, %v3820_v37  ;;  %v7256_v37 = vld [vmem:[%s10904_s1 + $0x38c] sm:$0xf] }
 0x56e   : > { %v3643_v19 = vpop.f32.mrf.mxu0 }
 0x56f   : > { %v3644_v17 = vadd.f32 %v3643_v19, %v9837_v34  ;;  %v3732_v49 = vpop.f32.mrf.mxu1  ;;  %v11480_v34 = vld [vmem:[#allocation22_spill] sm:$0xff]  ;;  %v6510_v19 = vld [vmem:[%s10904_s1 + $0x398] sm:$0xf0] }
 0x571   : > { %v3733_v51 = vadd.f32 %v3732_v49, %v3644_v17  ;;  %v6513_v49 = vor.u32 %v7256_v37, %v6510_v19 }
 0x572   : > { %v3821_v61 = vpop.f32.mrf.mxu2 }
 0x573   : > { %v3822_v32 = vadd.f32 %v3821_v61, %v3733_v51  ;;  %v3910_v41 = vpop.f32.mrf.mxu3  ;;  %4292 = vmatpush.bf16.msra.mxu0 %v6513_v49  ;;  %v11481_v49 = vld [vmem:[#allocation88_spill] sm:$0xff] }
 0x575   : > { %v10167_v24 = vadd.f32 %v3910_v41, %v3822_v32 }
 0x576   : > { %v3646_v52 = vpop.f32.mrf.mxu0 }
 0x577   : > { %v3647_v4 = vadd.f32 %v3646_v52, %v9857_v45  ;;  %v3735_v44 = vpop.f32.mrf.mxu1  ;;  %4139 = vmatmul.bf16.gmra.mxu2 %v11480_v34  ;;  %v6766_v45 = vld [vmem:[%s10904_s1 + $0x598] sm:$0xf0] }
 0x578   : > { %4228 = vmatmul.bf16.gmra.mxu3 %v11422_v60  ;;  %v6769_v63 = vor.u32 %v7320_v35, %v6766_v45 }
 0x579   : > { %v3736_v0 = vadd.f32 %v3735_v44, %v3647_v4  ;;  %6870 = vmatmul.msk.bf16.gmra.mxu0 %vm2104_vm0, %v11478_v39  ;;  %v7288_v4 = vld [vmem:[%s10904_s1 + $0x48c] sm:$0xf]  ;;  %v6638_v44 = vld [vmem:[%s10904_s1 + $0x498] sm:$0xf0] }
 0x57a   : > { %4050 = vmatmul.bf16.gmra.mxu1 %v11479_v42  ;;  %v3824_v17 = vpop.f32.mrf.mxu2  ;;  %4470 = vmatpush.bf16.msra.mxu2 %v6769_v63  ;;  %v6641_v34 = vor.u32 %v7288_v4, %v6638_v44 }
 0x57b   : > { %v3825_v60 = vadd.f32 %v3824_v17, %v3736_v0  ;;  %v3913_v51 = vpop.f32.mrf.mxu3 }
 0x57c   : > { %4381 = vmatpush.bf16.msra.mxu1 %v6641_v34 }
 0x57d   : > { %v10187_v52 = vadd.f32 %v3913_v51, %v3825_v60  ;;  %v11482_v60 = vld [vmem:[#allocation25_spill] sm:$0xff]  ;;  %v11483_v51 = vld [vmem:[#allocation26_spill] sm:$0xff] }
 0x57e   : > { %v3648_v61 = vpop.f32.mrf.mxu0 }
 0x57f   : > { %v3649_v32 = vadd.f32 %v3648_v61, %v9869_v20  ;;  %v3737_v41 = vpop.f32.mrf.mxu1 }
 0x581   : > { %v3738_v42 = vadd.f32 %v3737_v41, %v3649_v32 }
 0x582   : > { %v3826_v0 = vpop.f32.mrf.mxu2 }
 0x583   : > { %v3827_v35 = vadd.f32 %v3826_v0, %v3738_v42  ;;  %v3915_v45 = vpop.f32.mrf.mxu3 }
 0x585   : > { %v10196_v19 = vadd.f32 %v3915_v45, %v3827_v35 }
 0x586   : > { %v3651_v37 = vpop.f32.mrf.mxu0 }
 0x587   : > { %v3652_v20 = vadd.f32 %v3651_v37, %v9877_v22  ;;  %v3740_v63 = vpop.f32.mrf.mxu1  ;;  %4144 = vmatmul.bf16.gmra.mxu2 %v11483_v51  ;;  %v11484_v51 = vld [vmem:[#allocation92_spill] sm:$0xff] }
 0x588   : > { %4233 = vmatmul.bf16.gmra.mxu3 %v11426_v16 }
 0x589   : > { %v3741_v17 = vadd.f32 %v3740_v63, %v3652_v20  ;;  %6871 = vmatmul.msk.bf16.gmra.mxu0 %vm2104_vm0, %v11481_v49 }
 0x58a   : > { %4055 = vmatmul.bf16.gmra.mxu1 %v11482_v60  ;;  %v3829_v61 = vpop.f32.mrf.mxu2 }
 0x58b   : > { %v3830_v32 = vadd.f32 %v3829_v61, %v3741_v17  ;;  %v3918_v41 = vpop.f32.mrf.mxu3  ;;  %v11485_v17 = vld [vmem:[#allocation29_spill] sm:$0xff]  ;;  %v7316_v61 = vld [vmem:[%s10904_s1 + $0x56c] sm:$0xf] }
 0x58d   : > { %v10204_v42 = vadd.f32 %v3918_v41, %v3830_v32  ;;  %v7252_v32 = vld [vmem:[%s10904_s1 + $0x36c] sm:$0xf] }
 0x58e   : > { %v3653_v4 = vpop.f32.mrf.mxu0 }
 0x58f   : > { %v3654_v44 = vadd.f32 %v3653_v4, %v9883_v8  ;;  %v3742_v22 = vpop.f32.mrf.mxu1  ;;  %v11486_v8 = vld [vmem:[#allocation30_spill] sm:$0xff]  ;;  %v6494_v4 = vld [vmem:[%s10904_s1 + $0x378] sm:$0xf0] }
 0x591   : > { %v3743_v34 = vadd.f32 %v3742_v22, %v3654_v44  ;;  %v6497_v22 = vor.u32 %v7252_v32, %v6494_v4 }
 0x592   : > { %v3831_v0 = vpop.f32.mrf.mxu2 }
 0x593   : > { %v3832_v35 = vadd.f32 %v3831_v0, %v3743_v34  ;;  %v3920_v45 = vpop.f32.mrf.mxu3  ;;  %4293 = vmatpush.bf16.msra.mxu0 %v6497_v22 }
 0x595   : > { %v10207_v60 = vadd.f32 %v3920_v45, %v3832_v35  ;;  %v11487_v35 = vld [vmem:[#allocation142_spill] sm:$0xff] }
 0x596   : > { %v3656_v37 = vpop.f32.mrf.mxu0 }
 0x597   : > { %v3657_v20 = vadd.f32 %v3656_v37, %v9903_v59  ;;  %v3745_v63 = vpop.f32.mrf.mxu1  ;;  %4149 = vmatmul.bf16.gmra.mxu2 %v11486_v8  ;;  %v6750_v59 = vld [vmem:[%s10904_s1 + $0x578] sm:$0xf0] }
 0x598   : > { %4238 = vmatmul.bf16.gmra.mxu3 %v11430_v7  ;;  %v6753_v41 = vor.u32 %v7316_v61, %v6750_v59 }
 0x599   : > { %v3746_v16 = vadd.f32 %v3745_v63, %v3657_v20  ;;  %6872 = vmatmul.msk.bf16.gmra.mxu0 %vm2104_vm0, %v11484_v51  ;;  %v7284_v63 = vld [vmem:[%s10904_s1 + $0x46c] sm:$0xf] }
 0x59a   : > { %4060 = vmatmul.bf16.gmra.mxu1 %v11485_v17  ;;  %v3834_v44 = vpop.f32.mrf.mxu2  ;;  %4471 = vmatpush.bf16.msra.mxu2 %v6753_v41  ;;  %v6622_v17 = vld [vmem:[%s10904_s1 + $0x478] sm:$0xf0] }
 0x59b   : > { %v3835_v7 = vadd.f32 %v3834_v44, %v3746_v16  ;;  %v3923_v34 = vpop.f32.mrf.mxu3  ;;  %v6625_v61 = vor.u32 %v7284_v63, %v6622_v17 }
 0x59d   : > { %v10227_v20 = vadd.f32 %v3923_v34, %v3835_v7  ;;  %4382 = vmatpush.bf16.msra.mxu1 %v6625_v61  ;;  %v11488_v34 = vld [vmem:[#allocation96_spill] sm:$0xff] }
 0x59e   : > { %v3658_v0 = vpop.f32.mrf.mxu0 }
 0x59f   : > { %v3659_v45 = vadd.f32 %v3658_v0, %v11487_v35  ;;  %v3747_v37 = vpop.f32.mrf.mxu1  ;;  %v11489_v0 = vld [vmem:[#allocation33_spill] sm:$0xff]  ;;  %v11490_v35 = vld [vmem:[#allocation34_spill] sm:$0xff] }
 0x5a1   : > { %v3748_v8 = vadd.f32 %v3747_v37, %v3659_v45  ;;  %v11491_v45 = vld [vmem:[#allocation35_spill] sm:$0xff] }
 0x5a2   : > { %v3836_v16 = vpop.f32.mrf.mxu2 }
 0x5a3   : > { %v3837_v59 = vadd.f32 %v3836_v16, %v3748_v8  ;;  %v3925_v32 = vpop.f32.mrf.mxu3 }
 0x5a5   : > { %v10236_v22 = vadd.f32 %v3925_v32, %v3837_v59 }
 0x5a6   : > { %v3661_v41 = vpop.f32.mrf.mxu0 }
 0x5a7   : > { %v3662_v4 = vadd.f32 %v3661_v41, %v9923_v18  ;;  %v3750_v44 = vpop.f32.mrf.mxu1  ;;  %4154 = vmatmul.bf16.gmra.mxu2 %v11490_v35 }
 0x5a8   : > { %4243 = vmatmul.bf16.gmra.mxu3 %v11491_v45 }
 0x5a9   : > { %v3751_v7 = vadd.f32 %v3750_v44, %v3662_v4  ;;  %6873 = vmatmul.msk.bf16.gmra.mxu0 %vm2104_vm0, %v11488_v34 }
 0x5aa   : > { %4065 = vmatmul.bf16.gmra.mxu1 %v11489_v0  ;;  %v3839_v37 = vpop.f32.mrf.mxu2  ;;  %v7511_v0 = vld [vmem:[%s10905_s2] sm:$0xf] }
 0x5ab   : > { %v3840_v63 = vadd.f32 %v3839_v37, %v3751_v7  ;;  %v3928_v17 = vpop.f32.mrf.mxu3  ;;  %v10249_v35 = vperm.slane %v7511_v0, 3 }
 0x5ad   : > { %v10244_v16 = vadd.f32 %v3928_v17, %v3840_v63  ;;  %v11493_v17 = vld [vmem:[#allocation37_spill] sm:$0xff] }
 0x5ae   : > { %v3663_v8 = vpop.f32.mrf.mxu0 }
 0x5af   : > { %v3664_v61 = vadd.f32 %v3663_v8, %v9929_v58  ;;  %v3752_v18 = vpop.f32.mrf.mxu1  ;;  %v11492_v58 = vld [vmem:[#allocation100_spill] sm:$0xff]  ;;  %v11494_v8 = vld [vmem:[#allocation38_spill] sm:$0xff] }
 0x5b1   : > { %v3753_v59 = vadd.f32 %v3752_v18, %v3664_v61  ;;  %v7312_v61 = vld [vmem:[%s10904_s1 + $0x54c] sm:$0xf] }
 0x5b2   : > { %v3841_v32 = vpop.f32.mrf.mxu2  ;;  %v7248_v18 = vld [vmem:[%s10904_s1 + $0x34c] sm:$0xf] }
 0x5b3   : > { %v3842_v41 = vadd.f32 %v3841_v32, %v3753_v59  ;;  %v3930_v4 = vpop.f32.mrf.mxu3  ;;  %v6478_v32 = vld [vmem:[%s10904_s1 + $0x358] sm:$0xf0] }
 0x5b5   : > { %v10252_v37 = vadd.f32 %v3930_v4, %v3842_v41  ;;  %v6481_v4 = vor.u32 %v7248_v18, %v6478_v32 }
 0x5b6   : > { %v3942_v44 = vpop.f32.mrf.mxu0 }
 0x5b7   : > { %v3943_v7 = vadd.f32 %v3942_v44, %v9948_v36  ;;  %v4031_v45 = vpop.f32.mrf.mxu1  ;;  %4159 = vmatmul.bf16.gmra.mxu2 %v11494_v8  ;;  %v6734_v36 = vld [vmem:[%s10904_s1 + $0x558] sm:$0xf0]  ;;  %4294 = vmatpush.bf16.msra.mxu0 %v6481_v4 }
 0x5b8   : > { %v4032_v63 = vadd.f32 %v4031_v45, %v10249_v35  ;;  %4248 = vmatmul.bf16.gmra.mxu3 %v11441_v46  ;;  %v6737_v59 = vor.u32 %v7312_v61, %v6734_v36  ;;  %v7280_v61 = vld [vmem:[%s10904_s1 + $0x44c] sm:$0xf]  ;;  %v6606_v36 = vld [vmem:[%s10904_s1 + $0x458] sm:$0xf0] }
 0x5b9   : > { %6874 = vmatmul.msk.bf16.gmra.mxu0 %vm2104_vm0, %v11492_v58  ;;  %v4647_v58 = vmax.f32 %v3943_v7, 0.0 }
 0x5ba   : > { %4070 = vmatmul.bf16.gmra.mxu1 %v11493_v17  ;;  %v4120_v41 = vpop.f32.mrf.mxu2  ;;  %4472 = vmatpush.bf16.msra.mxu2 %v6737_v59 }
 0x5bb   : > { %v4121_v46 = vadd.f32 %v4120_v41, %v4032_v63  ;;  %v4209_v44 = vpop.f32.mrf.mxu3  ;;  %v6609_v63 = vor.u32 %v7280_v61, %v6606_v36 }
 0x5bd   : > { %v10273_v8 = vadd.f32 %v4209_v44, %v4121_v46  ;;  %4383 = vmatpush.bf16.msra.mxu1 %v6609_v63 }
 0x5be   : > { %v3944_v0 = vpop.f32.mrf.mxu0 }
 0x5bf   : > { %v3945_v45 = vadd.f32 %v3944_v0, %v9957_v54  ;;  %v4033_v17 = vpop.f32.mrf.mxu1  ;;  %11495 = vst [vmem:[#allocation133_spill] sm:$0xff] %v10273_v8  ;;  %v11497_v8 = vld [vmem:[#allocation103_spill] sm:$0xff] }
 0x5c0   : > { %v4034_v54 = vadd.f32 %v4033_v17, %v10249_v35 }
 0x5c1   : > { %v4651_v18 = vmax.f32 %v3945_v45, 0.0  ;;  %v11498_v45 = vld [vmem:[#allocation41_spill] sm:$0xff] }
 0x5c2   : > { %v4122_v59 = vpop.f32.mrf.mxu2 }
 0x5c3   : > { %v10281_v32 = vpack.c.bf16 %v4651_v18, %v4647_v58  ;;  %v4123_v41 = vadd.f32 %v4122_v59, %v4034_v54  ;;  %v4211_v4 = vpop.f32.mrf.mxu3  ;;  %v11499_v58 = vld [vmem:[#allocation42_spill] sm:$0xff] }
 0x5c5   : > { %11496 = vst [vmem:[#allocation39_spill] sm:$0xff] %v10281_v32  ;;  %v10285_v21 = vadd.f32 %v4211_v4, %v4123_v41 }
 0x5c6   : > { %v3947_v46 = vpop.f32.mrf.mxu0 }
 0x5c7   : > { %v3948_v44 = vadd.f32 %v3947_v46, %v9964_v33  ;;  %v4036_v0 = vpop.f32.mrf.mxu1  ;;  %4164 = vmatmul.bf16.gmra.mxu2 %v11499_v58 }
 0x5c8   : > { %v4037_v7 = vadd.f32 %v4036_v0, %v10249_v35  ;;  %4253 = vmatmul.bf16.gmra.mxu3 %v11445_v13 }
 0x5c9   : > { %6875 = vmatmul.msk.bf16.gmra.mxu0 %vm2104_vm0, %v11497_v8  ;;  %v4655_v59 = vmax.f32 %v3948_v44, 0.0  ;;  %v11501_v8 = vld [vmem:[#allocation107_spill] sm:$0xff]  ;;  %v11502_v44 = vld [vmem:[#allocation45_spill] sm:$0xff] }
 0x5ca   : > { %4075 = vmatmul.bf16.gmra.mxu1 %v11498_v45  ;;  %v4125_v17 = vpop.f32.mrf.mxu2 }
 0x5cb   : > { %v4126_v61 = vadd.f32 %v4125_v17, %v4037_v7  ;;  %v4214_v36 = vpop.f32.mrf.mxu3 }
 0x5cd   : > { %v10294_v54 = vadd.f32 %v4214_v36, %v4126_v61  ;;  %v11503_v61 = vld [vmem:[#allocation46_spill] sm:$0xff] }
 0x5ce   : > { %v3949_v18 = vpop.f32.mrf.mxu0  ;;  %v7308_v36 = vld [vmem:[%s10904_s1 + $0x52c] sm:$0xf] }
 0x5cf   : > { %v3950_v33 = vadd.f32 %v3949_v18, %v9967_v5  ;;  %v4038_v63 = vpop.f32.mrf.mxu1 }
 0x5d0   : > { %v4039_v46 = vadd.f32 %v4038_v63, %v10249_v35 }
 0x5d1   : > { %v4659_v41 = vmax.f32 %v3950_v33, 0.0  ;;  %v6462_v33 = vld [vmem:[%s10904_s1 + $0x338] sm:$0xf0] }
 0x5d2   : > { %v4127_v0 = vpop.f32.mrf.mxu2 }
 0x5d3   : > { %v10296_v4 = vpack.c.bf16 %v4659_v41, %v4655_v59  ;;  %v4128_v45 = vadd.f32 %v4127_v0, %v4039_v46  ;;  %v4216_v58 = vpop.f32.mrf.mxu3 }
 0x5d5   : > { %11500 = vst [vmem:[#allocation43_spill] sm:$0xff] %v10296_v4  ;;  %v10300_v17 = vadd.f32 %v4216_v58, %v4128_v45  ;;  %v11509_v4 = vld [vmem:[#allocation115_spill] sm:$0xff] }
 0x5d6   : > { %v3952_v32 = vpop.f32.mrf.mxu0 }
 0x5d7   : > { %v3953_v13 = vadd.f32 %v3952_v32, %v9986_v29  ;;  %v4041_v7 = vpop.f32.mrf.mxu1  ;;  %4169 = vmatmul.bf16.gmra.mxu2 %v11503_v61  ;;  %v6718_v29 = vld [vmem:[%s10904_s1 + $0x538] sm:$0xf0]  ;;  %v7244_v32 = vld [vmem:[%s10904_s1 + $0x32c] sm:$0xf] }
 0x5d8   : > { %v4042_v5 = vadd.f32 %v4041_v7, %v10249_v35  ;;  %4258 = vmatmul.bf16.gmra.mxu3 %v11448_v47  ;;  %v6721_v18 = vor.u32 %v7308_v36, %v6718_v29  ;;  %v6465_v59 = vor.u32 %v7244_v32, %v6462_v33  ;;  %v7276_v7 = vld [vmem:[%s10904_s1 + $0x42c] sm:$0xf] }
 0x5d9   : > { %6876 = vmatmul.msk.bf16.gmra.mxu0 %vm2104_vm0, %v11501_v8  ;;  %v4663_v61 = vmax.f32 %v3953_v13, 0.0 }
 0x5da   : > { %4080 = vmatmul.bf16.gmra.mxu1 %v11502_v44  ;;  %v4130_v63 = vpop.f32.mrf.mxu2  ;;  %4473 = vmatpush.bf16.msra.mxu2 %v6721_v18  ;;  %v6590_v44 = vld [vmem:[%s10904_s1 + $0x438] sm:$0xf0] }
 0x5db   : > { %v4131_v47 = vadd.f32 %v4130_v63, %v4042_v5  ;;  %v4219_v41 = vpop.f32.mrf.mxu3  ;;  %4295 = vmatpush.bf16.msra.mxu0 %v6465_v59  ;;  %v6593_v5 = vor.u32 %v7276_v7, %v6590_v44  ;;  %v11507_v7 = vld [vmem:[#allocation50_spill] sm:$0xff] }
 0x5dd   : > { %v10321_v58 = vadd.f32 %v4219_v41, %v4131_v47  ;;  %4384 = vmatpush.bf16.msra.mxu1 %v6593_v5 }
 0x5de   : > { %v3954_v46 = vpop.f32.mrf.mxu0 }
 0x5df   : > { %v3955_v0 = vadd.f32 %v3954_v46, %v9995_v48  ;;  %v4043_v45 = vpop.f32.mrf.mxu1  ;;  %v11505_v46 = vld [vmem:[#allocation111_spill] sm:$0xff] }
 0x5e0   : > { %v4044_v48 = vadd.f32 %v4043_v45, %v10249_v35 }
 0x5e1   : > { %v4667_v36 = vmax.f32 %v3955_v0, 0.0  ;;  %v11506_v0 = vld [vmem:[#allocation49_spill] sm:$0xff] }
 0x5e2   : > { %v4132_v32 = vpop.f32.mrf.mxu2 }
 0x5e3   : > { %v10329_v29 = vpack.c.bf16 %v4667_v36, %v4663_v61  ;;  %v4133_v18 = vadd.f32 %v4132_v32, %v4044_v48  ;;  %v4221_v33 = vpop.f32.mrf.mxu3 }
 0x5e5   : > { %11504 = vst [vmem:[#allocation47_spill] sm:$0xff] %v10329_v29  ;;  %v10333_v41 = vadd.f32 %v4221_v33, %v4133_v18 }
 0x5e6   : > { %v3957_v63 = vpop.f32.mrf.mxu0 }
 0x5e7   : > { %v3958_v59 = vadd.f32 %v3957_v63, %v10002_v57  ;;  %v4046_v47 = vpop.f32.mrf.mxu1  ;;  %4174 = vmatmul.bf16.gmra.mxu2 %v11507_v7 }
 0x5e8   : > { %v4047_v13 = vadd.f32 %v4046_v47, %v10249_v35  ;;  %4263 = vmatmul.bf16.gmra.mxu3 %v11451_v12 }
 0x5e9   : > { %6877 = vmatmul.msk.bf16.gmra.mxu0 %vm2104_vm0, %v11505_v46  ;;  %v4671_v32 = vmax.f32 %v3958_v59, 0.0  ;;  %v11510_v59 = vld [vmem:[#allocation53_spill] sm:$0xff] }
 0x5ea   : > { %4085 = vmatmul.bf16.gmra.mxu1 %v11506_v0  ;;  %v4135_v45 = vpop.f32.mrf.mxu2 }
 0x5eb   : > { %v4136_v44 = vadd.f32 %v4135_v45, %v4047_v13  ;;  %v4224_v61 = vpop.f32.mrf.mxu3 }
 0x5ed   : > { %v10342_v48 = vadd.f32 %v4224_v61, %v4136_v44  ;;  %v11511_v44 = vld [vmem:[#allocation54_spill] sm:$0xff] }
 0x5ee   : > { %v3959_v36 = vpop.f32.mrf.mxu0  ;;  %v7304_v61 = vld [vmem:[%s10904_s1 + $0x50c] sm:$0xf] }
 0x5ef   : > { %v3960_v57 = vadd.f32 %v3959_v36, %v10005_v15  ;;  %v4048_v5 = vpop.f32.mrf.mxu1 }
 0x5f0   : > { %v4049_v63 = vadd.f32 %v4048_v5, %v10249_v35 }
 0x5f1   : > { %v4675_v18 = vmax.f32 %v3960_v57, 0.0  ;;  %v6446_v57 = vld [vmem:[%s10904_s1 + $0x318] sm:$0xf0] }
 0x5f2   : > { %v4137_v47 = vpop.f32.mrf.mxu2 }
 0x5f3   : > { %v10344_v33 = vpack.c.bf16 %v4675_v18, %v4671_v32  ;;  %v4138_v0 = vadd.f32 %v4137_v47, %v4049_v63  ;;  %v4226_v7 = vpop.f32.mrf.mxu3 }
 0x5f5   : > { %11508 = vst [vmem:[#allocation51_spill] sm:$0xff] %v10344_v33  ;;  %v10348_v45 = vadd.f32 %v4226_v7, %v4138_v0  ;;  %v11517_v33 = vld [vmem:[#allocation123_spill] sm:$0xff] }
 0x5f6   : > { %v3962_v29 = vpop.f32.mrf.mxu0 }
 0x5f7   : > { %v3963_v12 = vadd.f32 %v3962_v29, %v10024_v10  ;;  %v4051_v13 = vpop.f32.mrf.mxu1  ;;  %4179 = vmatmul.bf16.gmra.mxu2 %v11511_v44  ;;  %v6702_v10 = vld [vmem:[%s10904_s1 + $0x518] sm:$0xf0]  ;;  %v7240_v29 = vld [vmem:[%s10904_s1 + $0x30c] sm:$0xf] }
 0x5f8   : > { %v4052_v15 = vadd.f32 %v4051_v13, %v10249_v35  ;;  %4268 = vmatmul.bf16.gmra.mxu3 %v11454_v30  ;;  %v6705_v36 = vor.u32 %v7304_v61, %v6702_v10  ;;  %v6449_v32 = vor.u32 %v7240_v29, %v6446_v57  ;;  %v7272_v13 = vld [vmem:[%s10904_s1 + $0x40c] sm:$0xf] }
 0x5f9   : > { %6878 = vmatmul.msk.bf16.gmra.mxu0 %vm2104_vm0, %v11509_v4  ;;  %v4679_v44 = vmax.f32 %v3963_v12, 0.0 }
 0x5fa   : > { %4090 = vmatmul.bf16.gmra.mxu1 %v11510_v59  ;;  %v4140_v5 = vpop.f32.mrf.mxu2  ;;  %4474 = vmatpush.bf16.msra.mxu2 %v6705_v36  ;;  %v6574_v59 = vld [vmem:[%s10904_s1 + $0x418] sm:$0xf0] }
 0x5fb   : > { %v4141_v30 = vadd.f32 %v4140_v5, %v4052_v15  ;;  %v4229_v18 = vpop.f32.mrf.mxu3  ;;  %4296 = vmatpush.bf16.msra.mxu0 %v6449_v32  ;;  %v6577_v15 = vor.u32 %v7272_v13, %v6574_v59  ;;  %v11515_v13 = vld [vmem:[#allocation58_spill] sm:$0xff] }
 0x5fd   : > { %v10369_v7 = vadd.f32 %v4229_v18, %v4141_v30  ;;  %4385 = vmatpush.bf16.msra.mxu1 %v6577_v15 }
 0x5fe   : > { %v3964_v63 = vpop.f32.mrf.mxu0 }
 0x5ff   : > { %v3965_v47 = vadd.f32 %v3964_v63, %v10033_v25  ;;  %v4053_v0 = vpop.f32.mrf.mxu1  ;;  %v11513_v63 = vld [vmem:[#allocation119_spill] sm:$0xff] }
 0x600   : > { %v4054_v25 = vadd.f32 %v4053_v0, %v10249_v35 }
 0x601   : > { %v4683_v61 = vmax.f32 %v3965_v47, 0.0  ;;  %v11514_v47 = vld [vmem:[#allocation57_spill] sm:$0xff] }
 0x602   : > { %v4142_v29 = vpop.f32.mrf.mxu2 }
 0x603   : > { %v10377_v10 = vpack.c.bf16 %v4683_v61, %v4679_v44  ;;  %v4143_v36 = vadd.f32 %v4142_v29, %v4054_v25  ;;  %v4231_v57 = vpop.f32.mrf.mxu3 }
 0x605   : > { %11512 = vst [vmem:[#allocation55_spill] sm:$0xff] %v10377_v10  ;;  %v10381_v18 = vadd.f32 %v4231_v57, %v4143_v36 }
 0x606   : > { %v3967_v5 = vpop.f32.mrf.mxu0 }
 0x607   : > { %v3968_v32 = vadd.f32 %v3967_v5, %v10040_v9  ;;  %v4056_v30 = vpop.f32.mrf.mxu1  ;;  %4184 = vmatmul.bf16.gmra.mxu2 %v11515_v13 }
 0x608   : > { %v4057_v12 = vadd.f32 %v4056_v30, %v10249_v35  ;;  %4273 = vmatmul.bf16.gmra.mxu3 %v11457_v6 }
 0x609   : > { %6879 = vmatmul.msk.bf16.gmra.mxu0 %vm2104_vm0, %v11513_v63  ;;  %v4687_v29 = vmax.f32 %v3968_v32, 0.0  ;;  %v11518_v32 = vld [vmem:[#allocation61_spill] sm:$0xff] }
 0x60a   : > { %4095 = vmatmul.bf16.gmra.mxu1 %v11514_v47  ;;  %v4145_v0 = vpop.f32.mrf.mxu2 }
 0x60b   : > { %v4146_v59 = vadd.f32 %v4145_v0, %v4057_v12  ;;  %v4234_v44 = vpop.f32.mrf.mxu3 }
 0x60d   : > { %v10390_v25 = vadd.f32 %v4234_v44, %v4146_v59  ;;  %v11519_v59 = vld [vmem:[#allocation62_spill] sm:$0xff]  ;;  %v7362_v44 = vld [vmem:[%s10906_s3 + $0xb8] sm:$0xff] }
 0x60e   : > { %v3969_v61 = vpop.f32.mrf.mxu0  ;;  %5275 = vmatpush.bf16.msrb.mxu2 %v7362_v44 }
 0x60f   : > { %v3970_v9 = vadd.f32 %v3969_v61, %v10043_v27  ;;  %v4058_v15 = vpop.f32.mrf.mxu1 }
 0x610   : > { %v4059_v5 = vadd.f32 %v4058_v15, %v10249_v35 }
 0x611   : > { %v4691_v36 = vmax.f32 %v3970_v9, 0.0 }
 0x612   : > { %v4147_v30 = vpop.f32.mrf.mxu2 }
 0x613   : > { %v10392_v57 = vpack.c.bf16 %v4691_v36, %v4687_v29  ;;  %v4148_v47 = vadd.f32 %v4147_v30, %v4059_v5  ;;  %v4236_v13 = vpop.f32.mrf.mxu3  ;;  %v7354_v30 = vld [vmem:[%s10906_s3 + $0x78] sm:$0xff] }
 0x614   : > { %5186 = vmatpush.bf16.msrb.mxu1 %v7354_v30 }
 0x615   : > { %11516 = vst [vmem:[#allocation59_spill] sm:$0xff] %v10392_v57  ;;  %v10396_v0 = vadd.f32 %v4236_v13, %v4148_v47  ;;  %v11524_v57 = vld [vmem:[#allocation8_spill] sm:$0xff] }
 0x616   : > { %v3972_v10 = vpop.f32.mrf.mxu0 }
 0x617   : > { %v3973_v6 = vadd.f32 %v3972_v10, %v10068_v38  ;;  %v4061_v12 = vpop.f32.mrf.mxu1  ;;  %4189 = vmatmul.bf16.gmra.mxu2 %v11519_v59  ;;  %v7346_v38 = vld [vmem:[%s10906_s3 + $0x38] sm:$0xff] }
 0x618   : > { %v4062_v27 = vadd.f32 %v4061_v12, %v10249_v35  ;;  %4278 = vmatmul.bf16.gmra.mxu3 %v11460_v2  ;;  %v7370_v10 = vld [vmem:[%s10906_s3 + $0xf8] sm:$0xff]  ;;  %5097 = vmatpush.bf16.msrb.mxu0 %v7346_v38 }
 0x619   : > { %6880 = vmatmul.msk.bf16.gmra.mxu0 %vm2104_vm0, %v11517_v33  ;;  %5364 = vmatpush.bf16.msrb.mxu3 %v7370_v10  ;;  %v4695_v47 = vmax.f32 %v3973_v6, 0.0 }
 0x61a   : > { %4100 = vmatmul.bf16.gmra.mxu1 %v11518_v32  ;;  %v4150_v61 = vpop.f32.mrf.mxu2 }
 0x61b   : > { %v4151_v9 = vadd.f32 %v4150_v61, %v4062_v27  ;;  %v4239_v15 = vpop.f32.mrf.mxu3 }
 0x61d   : > { %v10414_v5 = vadd.f32 %v4239_v15, %v4151_v9  ;;  %v11521_v9 = vld [vmem:[#allocation127_spill] sm:$0xff]  ;;  %v11522_v15 = vld [vmem:[#allocation65_spill] sm:$0xff] }
 0x61e   : > { %v3974_v29 = vpop.f32.mrf.mxu0 }
 0x61f   : > { %v3975_v2 = vadd.f32 %v3974_v29, %v10077_v28  ;;  %v4063_v36 = vpop.f32.mrf.mxu1  ;;  %v11523_v29 = vld [vmem:[#allocation66_spill] sm:$0xff] }
 0x620   : > { %v4064_v32 = vadd.f32 %v4063_v36, %v10249_v35 }
 0x621   : > { %v4699_v13 = vmax.f32 %v3975_v2, 0.0 }
 0x622   : > { %v4152_v27 = vpop.f32.mrf.mxu2 }
 0x623   : > { %v10419_v12 = vpack.c.bf16 %v4699_v13, %v4695_v47  ;;  %v4153_v59 = vadd.f32 %v4152_v27, %v4064_v32  ;;  %v4241_v44 = vpop.f32.mrf.mxu3 }
 0x625   : > { %11520 = vst [vmem:[#allocation63_spill] sm:$0xff] %v10419_v12  ;;  %v10423_v61 = vadd.f32 %v4241_v44, %v4153_v59 }
 0x626   : > { %v3977_v38 = vpop.f32.mrf.mxu0 }
 0x627   : > { %v3978_v28 = vadd.f32 %v3977_v38, %v10084_v53  ;;  %v4066_v10 = vpop.f32.mrf.mxu1  ;;  %4194 = vmatmul.bf16.gmra.mxu2 %v11523_v29 }
 0x628   : > { %v4067_v6 = vadd.f32 %v4066_v10, %v10249_v35  ;;  %4283 = vmatmul.bf16.gmra.mxu3 %v11463_v14 }
 0x629   : > { %6881 = vmatmul.msk.bf16.gmra.mxu0 %vm2104_vm0, %v11521_v9  ;;  %v4703_v27 = vmax.f32 %v3978_v28, 0.0  ;;  %v11526_v28 = vld [vmem:[#allocation70_spill] sm:$0xff] }
 0x62a   : > { %4105 = vmatmul.bf16.gmra.mxu1 %v11522_v15  ;;  %v4155_v2 = vpop.f32.mrf.mxu2 }
 0x62b   : > { %v4156_v36 = vadd.f32 %v4155_v2, %v4067_v6  ;;  %v4244_v30 = vpop.f32.mrf.mxu3 }
 0x62d   : > { %v10432_v32 = vadd.f32 %v4244_v30, %v4156_v36  ;;  %v11525_v36 = vld [vmem:[#allocation69_spill] sm:$0xff]  ;;  %v7361_v30 = vld [vmem:[%s10906_s3 + $0xb0] sm:$0xff] }
 0x62e   : > { %v3979_v47 = vpop.f32.mrf.mxu0  ;;  %5276 = vmatpush.bf16.msrb.mxu2 %v7361_v30 }
 0x62f   : > { %v3980_v53 = vadd.f32 %v3979_v47, %v10087_v1  ;;  %v4068_v13 = vpop.f32.mrf.mxu1 }
 0x630   : > { %v4069_v38 = vadd.f32 %v4068_v13, %v10249_v35 }
 0x631   : > { %v4707_v59 = vmax.f32 %v3980_v53, 0.0 }
 0x632   : > { %v4157_v10 = vpop.f32.mrf.mxu2 }
 0x633   : > { %v10434_v44 = vpack.c.bf16 %v4707_v59, %v4703_v27  ;;  %v4158_v15 = vadd.f32 %v4157_v10, %v4069_v38  ;;  %v4246_v29 = vpop.f32.mrf.mxu3  ;;  %v7353_v38 = vld [vmem:[%s10906_s3 + $0x70] sm:$0xff] }
 0x634   : > { %5187 = vmatpush.bf16.msrb.mxu1 %v7353_v38 }
 0x635   : > { %v10438_v2 = vadd.f32 %v4246_v29, %v4158_v15 }
 0x636   : > { %v3982_v12 = vpop.f32.mrf.mxu0 }
 0x637   : > { %v3983_v14 = vadd.f32 %v3982_v12, %v10107_v56  ;;  %v4071_v6 = vpop.f32.mrf.mxu1  ;;  %4475 = vmatmul.bf16.vlgmr.msra.gmra.mxu2 %v11526_v28  ;;  %v7345_v56 = vld [vmem:[%s10906_s3 + $0x30] sm:$0xff] }
 0x638   : > { %v4072_v1 = vadd.f32 %v4071_v6, %v10249_v35  ;;  %6882 = vmatmul.msk.bf16.vlgmr.msra.gmra.mxu3 %vm2104_vm0, %v11466_v23  ;;  %5098 = vmatpush.bf16.msrb.mxu0 %v7345_v56 }
 0x639   : > { %4297 = vmatmul.bf16.vlgmr.msra.gmra.mxu0 %v11524_v57  ;;  %v7369_v57 = vld [vmem:[%s10906_s3 + $0xf0] sm:$0xff]  ;;  %v4711_v10 = vmax.f32 %v3983_v14, 0.0  ;;  %v11528_v14 = vld [vmem:[#allocation72_spill] sm:$0xff] }
 0x63a   : > { %4386 = vmatmul.bf16.vlgmr.msra.gmra.mxu1 %v11525_v36  ;;  %v4160_v12 = vpop.f32.mrf.mxu2  ;;  %5365 = vmatpush.bf16.msrb.mxu3 %v7369_v57 }
 0x63b   : > { %v4161_v47 = vadd.f32 %v4160_v12, %v4072_v1  ;;  %v4249_v53 = vpop.f32.mrf.mxu3  ;;  %v11527_v12 = vld [vmem:[#allocation12_spill] sm:$0xff] }
 0x63d   : > { %v10456_v59 = vadd.f32 %v4249_v53, %v4161_v47  ;;  %v11529_v53 = vld [vmem:[#allocation73_spill] sm:$0xff] }
 0x63e   : > { %v3984_v13 = vpop.f32.mrf.mxu0 }
 0x63f   : > { %v3985_v23 = vadd.f32 %v3984_v13, %v10116_v26  ;;  %v4073_v27 = vpop.f32.mrf.mxu1 }
 0x640   : > { %v4074_v6 = vadd.f32 %v4073_v27, %v10249_v35 }
 0x641   : > { %v4715_v15 = vmax.f32 %v3985_v23, 0.0 }
 0x642   : > { %v4162_v1 = vpop.f32.mrf.mxu2 }
 0x643   : > { %v10461_v29 = vpack.c.bf16 %v4715_v15, %v4711_v10  ;;  %v4163_v36 = vadd.f32 %v4162_v1, %v4074_v6  ;;  %v4251_v28 = vpop.f32.mrf.mxu3 }
 0x645   : > { %v10465_v57 = vadd.f32 %v4251_v28, %v4163_v36 }
 0x646   : > { %v3987_v30 = vpop.f32.mrf.mxu0 }
 0x647   : > { %v3988_v26 = vadd.f32 %v3987_v30, %v10124_v43  ;;  %v4076_v56 = vpop.f32.mrf.mxu1  ;;  %4480 = vmatmul.bf16.gmra.mxu2 %v11529_v53 }
 0x648   : > { %v4077_v47 = vadd.f32 %v4076_v56, %v10249_v35  ;;  %6883 = vmatmul.msk.bf16.gmra.mxu3 %vm2104_vm0, %v11469_v62 }
 0x649   : > { %4302 = vmatmul.bf16.gmra.mxu0 %v11527_v12  ;;  %v4719_v6 = vmax.f32 %v3988_v26, 0.0  ;;  %v11532_v26 = vld [vmem:[#allocation76_spill] sm:$0xff] }
 0x64a   : > { %4391 = vmatmul.bf16.gmra.mxu1 %v11528_v14  ;;  %v4165_v13 = vpop.f32.mrf.mxu2 }
 0x64b   : > { %v4166_v23 = vadd.f32 %v4165_v13, %v4077_v47  ;;  %v4254_v27 = vpop.f32.mrf.mxu3  ;;  %v11530_v13 = vld [vmem:[#allocation16_spill] sm:$0xff] }
 0x64d   : > { %v10474_v15 = vadd.f32 %v4254_v27, %v4166_v23  ;;  %v11531_v23 = vld [vmem:[#allocation75_spill] sm:$0xff]  ;;  %v7360_v27 = vld [vmem:[%s10906_s3 + $0xa8] sm:$0xff] }
 0x64e   : > { %v3989_v38 = vpop.f32.mrf.mxu0  ;;  %5277 = vmatpush.bf16.msrb.mxu2 %v7360_v27 }
 0x64f   : > { %v3990_v43 = vadd.f32 %v3989_v38, %v10127_v40  ;;  %v4078_v10 = vpop.f32.mrf.mxu1  ;;  %v7368_v38 = vld [vmem:[%s10906_s3 + $0xe8] sm:$0xff] }
 0x650   : > { %v4079_v28 = vadd.f32 %v4078_v10, %v10249_v35  ;;  %5366 = vmatpush.bf16.msrb.mxu3 %v7368_v38 }
 0x651   : > { %v4723_v1 = vmax.f32 %v3990_v43, 0.0 }
 0x652   : > { %v4167_v30 = vpop.f32.mrf.mxu2 }
 0x653   : > { %v10476_v36 = vpack.c.bf16 %v4723_v1, %v4719_v6  ;;  %v4168_v56 = vadd.f32 %v4167_v30, %v4079_v28  ;;  %v4256_v12 = vpop.f32.mrf.mxu3 }
 0x655   : > { %v10480_v53 = vadd.f32 %v4256_v12, %v4168_v56  ;;  %v7352_v56 = vld [vmem:[%s10906_s3 + $0x68] sm:$0xff] }
 0x656   : > { %v3992_v14 = vpop.f32.mrf.mxu0  ;;  %5188 = vmatpush.bf16.msrb.mxu1 %v7352_v56 }
 0x657   : > { %v3993_v62 = vadd.f32 %v3992_v14, %v10147_v3  ;;  %v4081_v47 = vpop.f32.mrf.mxu1  ;;  %4485 = vmatmul.bf16.gmra.mxu2 %v11532_v26  ;;  %v7344_v3 = vld [vmem:[%s10906_s3 + $0x28] sm:$0xff] }
 0x658   : > { %v4082_v40 = vadd.f32 %v4081_v47, %v10249_v35  ;;  %6884 = vmatmul.msk.bf16.gmra.mxu3 %vm2104_vm0, %v11472_v55  ;;  %5099 = vmatpush.bf16.msrb.mxu0 %v7344_v3 }
 0x659   : > { %4307 = vmatmul.bf16.gmra.mxu0 %v11530_v13  ;;  %v4727_v12 = vmax.f32 %v3993_v62, 0.0  ;;  %v11534_v62 = vld [vmem:[#allocation78_spill] sm:$0xff] }
 0x65a   : > { %4396 = vmatmul.bf16.gmra.mxu1 %v11531_v23  ;;  %v4170_v43 = vpop.f32.mrf.mxu2 }
 0x65b   : > { %v4171_v10 = vadd.f32 %v4170_v43, %v4082_v40  ;;  %v4259_v6 = vpop.f32.mrf.mxu3  ;;  %v11533_v43 = vld [vmem:[#allocation20_spill] sm:$0xff] }
 0x65d   : > { %v10498_v30 = vadd.f32 %v4259_v6, %v4171_v10  ;;  %v11535_v6 = vld [vmem:[#allocation79_spill] sm:$0xff] }
 0x65e   : > { %v3994_v1 = vpop.f32.mrf.mxu0 }
 0x65f   : > { %v3995_v55 = vadd.f32 %v3994_v1, %v10156_v11  ;;  %v4083_v28 = vpop.f32.mrf.mxu1 }
 0x660   : > { %v4084_v13 = vadd.f32 %v4083_v28, %v10249_v35 }
 0x661   : > { %v4731_v14 = vmax.f32 %v3995_v55, 0.0 }
 0x662   : > { %v4172_v40 = vpop.f32.mrf.mxu2 }
 0x663   : > { %v10503_v47 = vpack.c.bf16 %v4731_v14, %v4727_v12  ;;  %v4173_v23 = vadd.f32 %v4172_v40, %v4084_v13  ;;  %v4261_v26 = vpop.f32.mrf.mxu3 }
 0x665   : > { %v10507_v38 = vadd.f32 %v4261_v26, %v4173_v23 }
 0x666   : > { %v3997_v27 = vpop.f32.mrf.mxu0 }
 0x667   : > { %v3998_v11 = vadd.f32 %v3997_v27, %v10164_v50  ;;  %v4086_v3 = vpop.f32.mrf.mxu1  ;;  %4490 = vmatmul.bf16.gmra.mxu2 %v11535_v6 }
 0x668   : > { %v4087_v10 = vadd.f32 %v4086_v3, %v10249_v35  ;;  %6885 = vmatmul.msk.bf16.gmra.mxu3 %vm2104_vm0, %v11475_v31 }
 0x669   : > { %4312 = vmatmul.bf16.gmra.mxu0 %v11533_v43  ;;  %v4735_v13 = vmax.f32 %v3998_v11, 0.0  ;;  %v11538_v11 = vld [vmem:[#allocation83_spill] sm:$0xff] }
 0x66a   : > { %4401 = vmatmul.bf16.gmra.mxu1 %v11534_v62  ;;  %v4175_v1 = vpop.f32.mrf.mxu2 }
 0x66b   : > { %v4176_v55 = vadd.f32 %v4175_v1, %v4087_v10  ;;  %v4264_v28 = vpop.f32.mrf.mxu3  ;;  %v11536_v1 = vld [vmem:[#allocation24_spill] sm:$0xff] }
 0x66d   : > { %v10516_v14 = vadd.f32 %v4264_v28, %v4176_v55  ;;  %v11537_v55 = vld [vmem:[#allocation82_spill] sm:$0xff]  ;;  %v7359_v28 = vld [vmem:[%s10906_s3 + $0xa0] sm:$0xff] }
 0x66e   : > { %v3999_v56 = vpop.f32.mrf.mxu0  ;;  %5278 = vmatpush.bf16.msrb.mxu2 %v7359_v28 }
 0x66f   : > { %v4000_v50 = vadd.f32 %v3999_v56, %v10167_v24  ;;  %v4088_v12 = vpop.f32.mrf.mxu1  ;;  %v7367_v56 = vld [vmem:[%s10906_s3 + $0xe0] sm:$0xff] }
 0x670   : > { %v4089_v26 = vadd.f32 %v4088_v12, %v10249_v35  ;;  %5367 = vmatpush.bf16.msrb.mxu3 %v7367_v56 }
 0x671   : > { %v4739_v40 = vmax.f32 %v4000_v50, 0.0 }
 0x672   : > { %v4177_v27 = vpop.f32.mrf.mxu2 }
 0x673   : > { %v10518_v23 = vpack.c.bf16 %v4739_v40, %v4735_v13  ;;  %v4178_v3 = vadd.f32 %v4177_v27, %v4089_v26  ;;  %v4266_v43 = vpop.f32.mrf.mxu3 }
 0x675   : > { %v10522_v6 = vadd.f32 %v4266_v43, %v4178_v3  ;;  %v7351_v3 = vld [vmem:[%s10906_s3 + $0x60] sm:$0xff] }
 0x676   : > { %v4002_v62 = vpop.f32.mrf.mxu0  ;;  %5189 = vmatpush.bf16.msrb.mxu1 %v7351_v3 }
 0x677   : > { %v4003_v31 = vadd.f32 %v4002_v62, %v10187_v52  ;;  %v4091_v10 = vpop.f32.mrf.mxu1  ;;  %4495 = vmatmul.bf16.gmra.mxu2 %v11538_v11  ;;  %v7343_v52 = vld [vmem:[%s10906_s3 + $0x20] sm:$0xff] }
 0x678   : > { %v4092_v24 = vadd.f32 %v4091_v10, %v10249_v35  ;;  %6886 = vmatmul.msk.bf16.gmra.mxu3 %vm2104_vm0, %v11478_v39  ;;  %5100 = vmatpush.bf16.msrb.mxu0 %v7343_v52 }
 0x679   : > { %4317 = vmatmul.bf16.gmra.mxu0 %v11536_v1  ;;  %v4743_v43 = vmax.f32 %v4003_v31, 0.0  ;;  %v11540_v31 = vld [vmem:[#allocation86_spill] sm:$0xff] }
 0x67a   : > { %4406 = vmatmul.bf16.gmra.mxu1 %v11537_v55  ;;  %v4180_v50 = vpop.f32.mrf.mxu2 }
 0x67b   : > { %v4181_v12 = vadd.f32 %v4180_v50, %v4092_v24  ;;  %v4269_v13 = vpop.f32.mrf.mxu3  ;;  %v11539_v50 = vld [vmem:[#allocation28_spill] sm:$0xff] }
 0x67d   : > { %v10540_v27 = vadd.f32 %v4269_v13, %v4181_v12  ;;  %v11541_v13 = vld [vmem:[#allocation87_spill] sm:$0xff] }
 0x67e   : > { %v4004_v40 = vpop.f32.mrf.mxu0 }
 0x67f   : > { %v4005_v39 = vadd.f32 %v4004_v40, %v10196_v19  ;;  %v4093_v26 = vpop.f32.mrf.mxu1 }
 0x680   : > { %v4094_v1 = vadd.f32 %v4093_v26, %v10249_v35 }
 0x681   : > { %v4747_v62 = vmax.f32 %v4005_v39, 0.0 }
 0x682   : > { %v4182_v24 = vpop.f32.mrf.mxu2 }
 0x683   : > { %v10545_v10 = vpack.c.bf16 %v4747_v62, %v4743_v43  ;;  %v4183_v55 = vadd.f32 %v4182_v24, %v4094_v1  ;;  %v4271_v11 = vpop.f32.mrf.mxu3 }
 0x685   : > { %v10549_v56 = vadd.f32 %v4271_v11, %v4183_v55 }
 0x686   : > { %v4007_v28 = vpop.f32.mrf.mxu0 }
 0x687   : > { %v4008_v19 = vadd.f32 %v4007_v28, %v10204_v42  ;;  %v4096_v52 = vpop.f32.mrf.mxu1  ;;  %4500 = vmatmul.bf16.gmra.mxu2 %v11541_v13 }
 0x688   : > { %v4097_v12 = vadd.f32 %v4096_v52, %v10249_v35  ;;  %6887 = vmatmul.msk.bf16.gmra.mxu3 %vm2104_vm0, %v11481_v49 }
 0x689   : > { %4322 = vmatmul.bf16.gmra.mxu0 %v11539_v50  ;;  %v4751_v1 = vmax.f32 %v4008_v19, 0.0  ;;  %v11544_v19 = vld [vmem:[#allocation91_spill] sm:$0xff] }
 0x68a   : > { %4411 = vmatmul.bf16.gmra.mxu1 %v11540_v31  ;;  %v4185_v40 = vpop.f32.mrf.mxu2 }
 0x68b   : > { %v4186_v39 = vadd.f32 %v4185_v40, %v4097_v12  ;;  %v4274_v26 = vpop.f32.mrf.mxu3  ;;  %v11542_v40 = vld [vmem:[#allocation32_spill] sm:$0xff] }
 0x68d   : > { %v10558_v62 = vadd.f32 %v4274_v26, %v4186_v39  ;;  %v11543_v39 = vld [vmem:[#allocation90_spill] sm:$0xff]  ;;  %v7358_v26 = vld [vmem:[%s10906_s3 + $0x98] sm:$0xff] }
 0x68e   : > { %v4009_v3 = vpop.f32.mrf.mxu0  ;;  %5279 = vmatpush.bf16.msrb.mxu2 %v7358_v26 }
 0x68f   : > { %v4010_v42 = vadd.f32 %v4009_v3, %v10207_v60  ;;  %v4098_v43 = vpop.f32.mrf.mxu1  ;;  %v7366_v3 = vld [vmem:[%s10906_s3 + $0xd8] sm:$0xff] }
 0x690   : > { %v4099_v11 = vadd.f32 %v4098_v43, %v10249_v35  ;;  %5368 = vmatpush.bf16.msrb.mxu3 %v7366_v3 }
 0x691   : > { %v4755_v24 = vmax.f32 %v4010_v42, 0.0 }
 0x692   : > { %v4187_v28 = vpop.f32.mrf.mxu2 }
 0x693   : > { %v10560_v55 = vpack.c.bf16 %v4755_v24, %v4751_v1  ;;  %v4188_v52 = vadd.f32 %v4187_v28, %v4099_v11  ;;  %v4276_v50 = vpop.f32.mrf.mxu3 }
 0x695   : > { %v10564_v13 = vadd.f32 %v4276_v50, %v4188_v52 }
 0x696   : > { %v4012_v31 = vpop.f32.mrf.mxu0 }
 0x697   : > { %v4013_v49 = vadd.f32 %v4012_v31, %v10227_v20  ;;  %v4101_v12 = vpop.f32.mrf.mxu1  ;;  %4505 = vmatmul.bf16.gmra.mxu2 %v11544_v19  ;;  %v7342_v20 = vld [vmem:[%s10906_s3 + $0x18] sm:$0xff] }
 0x698   : > { %v4102_v60 = vadd.f32 %v4101_v12, %v10249_v35  ;;  %6888 = vmatmul.msk.bf16.gmra.mxu3 %vm2104_vm0, %v11484_v51  ;;  %5101 = vmatpush.bf16.msrb.mxu0 %v7342_v20  ;;  %v7350_v31 = vld [vmem:[%s10906_s3 + $0x58] sm:$0xff] }
 0x699   : > { %4327 = vmatmul.bf16.gmra.mxu0 %v11542_v40  ;;  %v4759_v52 = vmax.f32 %v4013_v49, 0.0  ;;  %5190 = vmatpush.bf16.msrb.mxu1 %v7350_v31  ;;  %v11546_v49 = vld [vmem:[#allocation36_spill] sm:$0xff] }
 0x69a   : > { %4416 = vmatmul.bf16.gmra.mxu1 %v11543_v39  ;;  %v4190_v42 = vpop.f32.mrf.mxu2 }
 0x69b   : > { %v4191_v43 = vadd.f32 %v4190_v42, %v4102_v60  ;;  %v4279_v1 = vpop.f32.mrf.mxu3 }
 0x69d   : > { %v10582_v28 = vadd.f32 %v4279_v1, %v4191_v43  ;;  %v11547_v43 = vld [vmem:[#allocation94_spill] sm:$0xff]  ;;  %v11548_v1 = vld [vmem:[#allocation95_spill] sm:$0xff] }
 0x69e   : > { %v4014_v24 = vpop.f32.mrf.mxu0 }
 0x69f   : > { %v4015_v51 = vadd.f32 %v4014_v24, %v10236_v22  ;;  %v4103_v11 = vpop.f32.mrf.mxu1 }
 0x6a0   : > { %v4104_v40 = vadd.f32 %v4103_v11, %v10249_v35 }
 0x6a1   : > { %v4763_v50 = vmax.f32 %v4015_v51, 0.0 }
 0x6a2   : > { %v4192_v60 = vpop.f32.mrf.mxu2 }
 0x6a3   : > { %v10587_v12 = vpack.c.bf16 %v4763_v50, %v4759_v52  ;;  %v4193_v39 = vadd.f32 %v4192_v60, %v4104_v40  ;;  %v4281_v19 = vpop.f32.mrf.mxu3 }
 0x6a5   : > { %11545 = vst [vmem:[#allocation67_spill] sm:$0xff] %v10587_v12  ;;  %v10591_v3 = vadd.f32 %v4281_v19, %v4193_v39 }
 0x6a6   : > { %v4017_v26 = vpop.f32.mrf.mxu0 }
 0x6a7   : > { %v4018_v22 = vadd.f32 %v4017_v26, %v10244_v16  ;;  %v4106_v20 = vpop.f32.mrf.mxu1  ;;  %4510 = vmatmul.bf16.gmra.mxu2 %v11548_v1 }
 0x6a8   : > { %v4107_v42 = vadd.f32 %v4106_v20, %v10249_v35  ;;  %6889 = vmatmul.msk.bf16.gmra.mxu3 %vm2104_vm0, %v11488_v34  ;;  %v11549_v34 = vld [vmem:[#allocation133_spill] sm:$0xff] }
 0x6a9   : > { %4332 = vmatmul.bf16.gmra.mxu0 %v11546_v49  ;;  %v4767_v40 = vmax.f32 %v4018_v22, 0.0  ;;  %v11552_v22 = vld [vmem:[#allocation99_spill] sm:$0xff] }
 0x6aa   : > { %4421 = vmatmul.bf16.gmra.mxu1 %v11547_v43  ;;  %v4195_v24 = vpop.f32.mrf.mxu2 }
 0x6ab   : > { %v4196_v51 = vadd.f32 %v4195_v24, %v4107_v42  ;;  %v4284_v11 = vpop.f32.mrf.mxu3 }
 0x6ad   : > { %v10600_v31 = vadd.f32 %v4284_v11, %v4196_v51  ;;  %v11551_v51 = vld [vmem:[#allocation98_spill] sm:$0xff]  ;;  %v11553_v11 = vld [vmem:[#allocation100_spill] sm:$0xff] }
 0x6ae   : > { %v4019_v52 = vpop.f32.mrf.mxu0 }
 0x6af   : > { %v4020_v16 = vadd.f32 %v4019_v52, %v10252_v37  ;;  %v4108_v50 = vpop.f32.mrf.mxu1  ;;  %v11550_v37 = vld [vmem:[#allocation40_spill] sm:$0xff]  ;;  %v7341_v52 = vld [vmem:[%s10906_s3 + $0x10] sm:$0xff] }
 0x6b0   : > { %v4109_v19 = vadd.f32 %v4108_v50, %v10249_v35  ;;  %v7357_v35 = vld [vmem:[%s10906_s3 + $0x90] sm:$0xff]  ;;  %5102 = vmatpush.bf16.msrb.mxu0 %v7341_v52  ;;  %v11554_v52 = vld [vmem:[#allocation44_spill] sm:$0xff] }
 0x6b1   : > { %v4771_v60 = vmax.f32 %v4020_v16, 0.0  ;;  %v7365_v16 = vld [vmem:[%s10906_s3 + $0xd0] sm:$0xff]  ;;  %5280 = vmatpush.bf16.msrb.mxu2 %v7357_v35 }
 0x6b2   : > { %v4197_v26 = vpop.f32.mrf.mxu2  ;;  %5369 = vmatpush.bf16.msrb.mxu3 %v7365_v16 }
 0x6b3   : > { %v10602_v39 = vpack.c.bf16 %v4771_v60, %v4767_v40  ;;  %v4198_v20 = vadd.f32 %v4197_v26, %v4109_v19  ;;  %v4286_v49 = vpop.f32.mrf.mxu3 }
 0x6b5   : > { %v10606_v24 = vadd.f32 %v4286_v49, %v4198_v20 }
 0x6b6   : > { %v4298_v43 = vpop.f32.mrf.mxu0 }
 0x6b7   : > { %v4299_v1 = vadd.f32 %v4298_v43, %v11549_v34  ;;  %v4387_v42 = vpop.f32.mrf.mxu1  ;;  %4515 = vmatmul.bf16.gmra.mxu2 %v11552_v22  ;;  %v7349_v34 = vld [vmem:[%s10906_s3 + $0x50] sm:$0xff] }
 0x6b8   : > { %6890 = vmatmul.msk.bf16.gmra.mxu3 %vm2104_vm0, %v11553_v11  ;;  %5191 = vmatpush.bf16.msrb.mxu1 %v7349_v34 }
 0x6b9   : > { %v4388_v12 = vadd.f32 %v4387_v42, %v4299_v1  ;;  %4337 = vmatmul.bf16.gmra.mxu0 %v11550_v37 }
 0x6ba   : > { %4426 = vmatmul.bf16.gmra.mxu1 %v11551_v51  ;;  %v4476_v50 = vpop.f32.mrf.mxu2 }
 0x6bb   : > { %v4477_v40 = vadd.f32 %v4476_v50, %v4388_v12  ;;  %v4565_v60 = vpop.f32.mrf.mxu3  ;;  %v11555_v50 = vld [vmem:[#allocation101_spill] sm:$0xff] }
 0x6bd   : > { %v4566_v49 = vadd.f32 %v4565_v60, %v4477_v40  ;;  %v11556_v40 = vld [vmem:[#allocation102_spill] sm:$0xff]  ;;  %v11557_v60 = vld [vmem:[#allocation103_spill] sm:$0xff] }
 0x6be   : > { %v4300_v19 = vpop.f32.mrf.mxu0 }
 0x6bf   : > { %v4301_v26 = vadd.f32 %v4300_v19, %v10285_v21  ;;  %v4389_v20 = vpop.f32.mrf.mxu1  ;;  %v4648_v21 = vmax.f32 %v4566_v49, 0.0 }
 0x6c1   : > { %v4390_v43 = vadd.f32 %v4389_v20, %v4301_v26 }
 0x6c2   : > { %v4478_v1 = vpop.f32.mrf.mxu2 }
 0x6c3   : > { %v4479_v42 = vadd.f32 %v4478_v1, %v4390_v43  ;;  %v4567_v37 = vpop.f32.mrf.mxu3 }
 0x6c5   : > { %v4568_v11 = vadd.f32 %v4567_v37, %v4479_v42 }
 0x6c6   : > { %v4303_v51 = vpop.f32.mrf.mxu0 }
 0x6c7   : > { %v4304_v22 = vadd.f32 %v4303_v51, %v10294_v54  ;;  %v4392_v12 = vpop.f32.mrf.mxu1  ;;  %v4652_v16 = vmax.f32 %v4568_v11, 0.0  ;;  %4520 = vmatmul.bf16.gmra.mxu2 %v11556_v40 }
 0x6c8   : > { %6891 = vmatmul.msk.bf16.gmra.mxu3 %vm2104_vm0, %v11557_v60  ;;  %v11559_v60 = vld [vmem:[#allocation105_spill] sm:$0xff] }
 0x6c9   : > { %v4393_v35 = vadd.f32 %v4392_v12, %v4304_v22  ;;  %4342 = vmatmul.bf16.gmra.mxu0 %v11554_v52  ;;  %v10632_v19 = vpack.c.bf16 %v4652_v16, %v4648_v21  ;;  %v11558_v21 = vld [vmem:[#allocation48_spill] sm:$0xff] }
 0x6ca   : > { %4431 = vmatmul.bf16.gmra.mxu1 %v11555_v50  ;;  %v4481_v26 = vpop.f32.mrf.mxu2 }
 0x6cb   : > { %v4482_v20 = vadd.f32 %v4481_v26, %v4393_v35  ;;  %v4570_v43 = vpop.f32.mrf.mxu3  ;;  %v11560_v26 = vld [vmem:[#allocation106_spill] sm:$0xff] }
 0x6cd   : > { %v4571_v42 = vadd.f32 %v4570_v43, %v4482_v20  ;;  %v7364_v20 = vld [vmem:[%s10906_s3 + $0xc8] sm:$0xff] }
 0x6ce   : > { %v4305_v54 = vpop.f32.mrf.mxu0  ;;  %5370 = vmatpush.bf16.msrb.mxu3 %v7364_v20 }
 0x6cf   : > { %v4306_v34 = vadd.f32 %v4305_v54, %v10300_v17  ;;  %v4394_v1 = vpop.f32.mrf.mxu1  ;;  %v4656_v16 = vmax.f32 %v4571_v42, 0.0  ;;  %v7356_v17 = vld [vmem:[%s10906_s3 + $0x88] sm:$0xff] }
 0x6d0   : > { %5281 = vmatpush.bf16.msrb.mxu2 %v7356_v17  ;;  %v11562_v17 = vld [vmem:[#allocation109_spill] sm:$0xff] }
 0x6d1   : > { %v4395_v37 = vadd.f32 %v4394_v1, %v4306_v34 }
 0x6d2   : > { %v4483_v49 = vpop.f32.mrf.mxu2 }
 0x6d3   : > { %v4484_v51 = vadd.f32 %v4483_v49, %v4395_v37  ;;  %v4572_v22 = vpop.f32.mrf.mxu3 }
 0x6d5   : > { %v4573_v50 = vadd.f32 %v4572_v22, %v4484_v51  ;;  %v7348_v22 = vld [vmem:[%s10906_s3 + $0x48] sm:$0xff] }
 0x6d6   : > { %v4308_v12 = vpop.f32.mrf.mxu0  ;;  %5192 = vmatpush.bf16.msrb.mxu1 %v7348_v22 }
 0x6d7   : > { %v4309_v11 = vadd.f32 %v4308_v12, %v10321_v58  ;;  %v4397_v52 = vpop.f32.mrf.mxu1  ;;  %v4660_v35 = vmax.f32 %v4573_v50, 0.0  ;;  %4525 = vmatmul.bf16.gmra.mxu2 %v11560_v26  ;;  %v7340_v58 = vld [vmem:[%s10906_s3 + $0x8] sm:$0xff] }
 0x6d8   : > { %6892 = vmatmul.msk.bf16.gmra.mxu3 %vm2104_vm0, %v11501_v8  ;;  %5103 = vmatpush.bf16.msrb.mxu0 %v7340_v58  ;;  %v11563_v58 = vld [vmem:[#allocation110_spill] sm:$0xff] }
 0x6d9   : > { %v4398_v40 = vadd.f32 %v4397_v52, %v4309_v11  ;;  %4347 = vmatmul.bf16.gmra.mxu0 %v11558_v21  ;;  %v10650_v43 = vpack.c.bf16 %v4660_v35, %v4656_v16 }
 0x6da   : > { %4436 = vmatmul.bf16.gmra.mxu1 %v11559_v60  ;;  %v4486_v54 = vpop.f32.mrf.mxu2  ;;  %v11561_v60 = vld [vmem:[#allocation52_spill] sm:$0xff] }
 0x6db   : > { %v4487_v34 = vadd.f32 %v4486_v54, %v4398_v40  ;;  %v4575_v1 = vpop.f32.mrf.mxu3 }
 0x6dd   : > { %v4576_v49 = vadd.f32 %v4575_v1, %v4487_v34 }
 0x6de   : > { %v4310_v8 = vpop.f32.mrf.mxu0 }
 0x6df   : > { %v4311_v42 = vadd.f32 %v4310_v8, %v10333_v41  ;;  %v4399_v37 = vpop.f32.mrf.mxu1  ;;  %v4664_v41 = vmax.f32 %v4576_v49, 0.0 }
 0x6e1   : > { %v4400_v51 = vadd.f32 %v4399_v37, %v4311_v42 }
 0x6e2   : > { %v4488_v12 = vpop.f32.mrf.mxu2 }
 0x6e3   : > { %v4489_v11 = vadd.f32 %v4488_v12, %v4400_v51  ;;  %v4577_v52 = vpop.f32.mrf.mxu3 }
 0x6e5   : > { %v4578_v16 = vadd.f32 %v4577_v52, %v4489_v11 }
 0x6e6   : > { %v4313_v50 = vpop.f32.mrf.mxu0 }
 0x6e7   : > { %v4314_v21 = vadd.f32 %v4313_v50, %v10342_v48  ;;  %v4402_v40 = vpop.f32.mrf.mxu1  ;;  %v4668_v26 = vmax.f32 %v4578_v16, 0.0  ;;  %4530 = vmatmul.bf16.gmra.mxu2 %v11563_v58 }
 0x6e8   : > { %6893 = vmatmul.msk.bf16.gmra.mxu3 %vm2104_vm0, %v11505_v46 }
 0x6e9   : > { %v4403_v35 = vadd.f32 %v4402_v40, %v4314_v21  ;;  %4352 = vmatmul.bf16.gmra.mxu0 %v11561_v60  ;;  %v10662_v20 = vpack.c.bf16 %v4668_v26, %v4664_v41  ;;  %v11564_v40 = vld [vmem:[#allocation56_spill] sm:$0xff]  ;;  %v11565_v60 = vld [vmem:[#allocation113_spill] sm:$0xff]  ;;  %v11566_v41 = vld [vmem:[#allocation114_spill] sm:$0xff] }
 0x6ea   : > { %4441 = vmatmul.bf16.gmra.mxu1 %v11562_v17  ;;  %v4491_v54 = vpop.f32.mrf.mxu2  ;;  %v7363_v26 = vld [vmem:[%s10906_s3 + $0xc0] sm:$0xff] }
 0x6eb   : > { %v4492_v34 = vadd.f32 %v4491_v54, %v4403_v35  ;;  %v4580_v1 = vpop.f32.mrf.mxu3  ;;  %5371 = vmatpush.bf16.msrb.mxu3 %v7363_v26 }
 0x6ed   : > { %v4581_v37 = vadd.f32 %v4580_v1, %v4492_v34 }
 0x6ee   : > { %v4315_v48 = vpop.f32.mrf.mxu0 }
 0x6ef   : > { %v4316_v8 = vadd.f32 %v4315_v48, %v10348_v45  ;;  %v4404_v42 = vpop.f32.mrf.mxu1  ;;  %v4672_v16 = vmax.f32 %v4581_v37, 0.0  ;;  %v7355_v45 = vld [vmem:[%s10906_s3 + $0x80] sm:$0xff] }
 0x6f0   : > { %5282 = vmatpush.bf16.msrb.mxu2 %v7355_v45  ;;  %v7347_v37 = vld [vmem:[%s10906_s3 + $0x40] sm:$0xff] }
 0x6f1   : > { %v4405_v51 = vadd.f32 %v4404_v42, %v4316_v8  ;;  %5193 = vmatpush.bf16.msrb.mxu1 %v7347_v37 }
 0x6f2   : > { %v4493_v49 = vpop.f32.mrf.mxu2 }
 0x6f3   : > { %v4494_v22 = vadd.f32 %v4493_v49, %v4405_v51  ;;  %v4582_v12 = vpop.f32.mrf.mxu3 }
 0x6f5   : > { %v4583_v21 = vadd.f32 %v4582_v12, %v4494_v22 }
 0x6f6   : > { %v4318_v11 = vpop.f32.mrf.mxu0 }
 0x6f7   : > { %v4319_v52 = vadd.f32 %v4318_v11, %v10369_v7  ;;  %v4407_v50 = vpop.f32.mrf.mxu1  ;;  %v4676_v35 = vmax.f32 %v4583_v21, 0.0  ;;  %4535 = vmatmul.bf16.gmra.mxu2 %v11566_v41  ;;  %v7339_v7 = vld [vmem:[%s10906_s3] sm:$0xff] }
 0x6f8   : > { %6894 = vmatmul.msk.bf16.gmra.mxu3 %vm2104_vm0, %v11509_v4  ;;  %5104 = vmatpush.bf16.msrb.mxu0 %v7339_v7 }
 0x6f9   : > { %v4408_v46 = vadd.f32 %v4407_v50, %v4319_v52  ;;  %4357 = vmatmul.bf16.gmra.mxu0 %v11564_v40  ;;  %v10680_v17 = vpack.c.bf16 %v4676_v35, %v4672_v16  ;;  %v11568_v16 = vld [vmem:[#allocation117_spill] sm:$0xff]  ;;  %v11569_v35 = vld [vmem:[#allocation118_spill] sm:$0xff] }
 0x6fa   : > { %4446 = vmatmul.bf16.gmra.mxu1 %v11565_v60  ;;  %v4496_v58 = vpop.f32.mrf.mxu2 }
 0x6fb   : > { %v4497_v54 = vadd.f32 %v4496_v58, %v4408_v46  ;;  %v4585_v34 = vpop.f32.mrf.mxu3  ;;  %v11567_v46 = vld [vmem:[#allocation60_spill] sm:$0xff] }
 0x6fd   : > { %v4586_v8 = vadd.f32 %v4585_v34, %v4497_v54 }
 0x6fe   : > { %v4320_v4 = vpop.f32.mrf.mxu0 }
 0x6ff   : > { %v4321_v1 = vadd.f32 %v4320_v4, %v10381_v18  ;;  %v4409_v48 = vpop.f32.mrf.mxu1  ;;  %v4680_v18 = vmax.f32 %v4586_v8, 0.0 }
 0x701   : > { %v4410_v42 = vadd.f32 %v4409_v48, %v4321_v1 }
 0x702   : > { %v4498_v51 = vpop.f32.mrf.mxu2 }
 0x703   : > { %v4499_v49 = vadd.f32 %v4498_v51, %v4410_v42  ;;  %v4587_v22 = vpop.f32.mrf.mxu3 }
 0x705   : > { %v4588_v50 = vadd.f32 %v4587_v22, %v4499_v49  ;;  %v11570_v49 = vld [vmem:[#allocation64_spill] sm:$0xff] }
 0x706   : > { %v4323_v12 = vpop.f32.mrf.mxu0 }
 0x707   : > { %v4324_v11 = vadd.f32 %v4323_v12, %v10390_v25  ;;  %v4412_v52 = vpop.f32.mrf.mxu1  ;;  %v4684_v40 = vmax.f32 %v4588_v50, 0.0  ;;  %4540 = vmatmul.bf16.gmra.mxu2 %v11569_v35 }
 0x708   : > { %6895 = vmatmul.msk.bf16.gmra.mxu3 %vm2104_vm0, %v11513_v63 }
 0x709   : > { %v4413_v21 = vadd.f32 %v4412_v52, %v4324_v11  ;;  %4362 = vmatmul.bf16.gmra.mxu0 %v11567_v46  ;;  %v10692_v60 = vpack.c.bf16 %v4684_v40, %v4680_v18  ;;  %v11571_v11 = vld [vmem:[#allocation121_spill] sm:$0xff]  ;;  %v11572_v52 = vld [vmem:[#allocation122_spill] sm:$0xff] }
 0x70a   : > { %4451 = vmatmul.bf16.gmra.mxu1 %v11568_v16  ;;  %v4501_v41 = vpop.f32.mrf.mxu2 }
 0x70b   : > { %v4502_v45 = vadd.f32 %v4501_v41, %v4413_v21  ;;  %v4590_v7 = vpop.f32.mrf.mxu3 }
 0x70d   : > { %v4591_v54 = vadd.f32 %v4590_v7, %v4502_v45 }
 0x70e   : > { %v4325_v25 = vpop.f32.mrf.mxu0 }
 0x70f   : > { %v4326_v26 = vadd.f32 %v4325_v25, %v10396_v0  ;;  %v4414_v58 = vpop.f32.mrf.mxu1  ;;  %v4688_v22 = vmax.f32 %v4591_v54, 0.0 }
 0x711   : > { %v4415_v34 = vadd.f32 %v4414_v58, %v4326_v26 }
 0x712   : > { %v4503_v4 = vpop.f32.mrf.mxu2 }
 0x713   : > { %v4504_v1 = vadd.f32 %v4503_v4, %v4415_v34  ;;  %v4592_v48 = vpop.f32.mrf.mxu3  ;;  %v11573_v34 = vld [vmem:[#allocation68_spill] sm:$0xff] }
 0x715   : > { %v4593_v51 = vadd.f32 %v4592_v48, %v4504_v1  ;;  %v11574_v48 = vld [vmem:[#allocation125_spill] sm:$0xff] }
 0x716   : > { %v4328_v8 = vpop.f32.mrf.mxu0 }
 0x717   : > { %v4329_v42 = vadd.f32 %v4328_v8, %v10414_v5  ;;  %v4417_v37 = vpop.f32.mrf.mxu1  ;;  %v4692_v12 = vmax.f32 %v4593_v51, 0.0  ;;  %4545 = vmatmul.bf16.gmra.mxu2 %v11572_v52  ;;  %v11575_v8 = vld [vmem:[#allocation126_spill] sm:$0xff] }
 0x718   : > { %6896 = vmatmul.msk.bf16.gmra.mxu3 %vm2104_vm0, %v11517_v33 }
 0x719   : > { %v4418_v63 = vadd.f32 %v4417_v37, %v4329_v42  ;;  %4367 = vmatmul.bf16.gmra.mxu0 %v11570_v49  ;;  %v10701_v0 = vpack.c.bf16 %v4692_v12, %v4688_v22 }
 0x71a   : > { %4456 = vmatmul.bf16.gmra.mxu1 %v11571_v11  ;;  %v4506_v50 = vpop.f32.mrf.mxu2 }
 0x71b   : > { %v4507_v21 = vadd.f32 %v4506_v50, %v4418_v63  ;;  %v4595_v46 = vpop.f32.mrf.mxu3 }
 0x71d   : > { %v4596_v16 = vadd.f32 %v4595_v46, %v4507_v21 }
 0x71e   : > { %v4330_v5 = vpop.f32.mrf.mxu0 }
 0x71f   : > { %v4331_v18 = vadd.f32 %v4330_v5, %v10423_v61  ;;  %v4419_v40 = vpop.f32.mrf.mxu1  ;;  %v4696_v4 = vmax.f32 %v4596_v16, 0.0 }
 0x721   : > { %v4420_v35 = vadd.f32 %v4419_v40, %v4331_v18  ;;  %v11576_v40 = vld [vmem:[#allocation104_spill] sm:$0xff] }
 0x722   : > { %v4508_v41 = vpop.f32.mrf.mxu2 }
 0x723   : > { %v4509_v45 = vadd.f32 %v4508_v41, %v4420_v35  ;;  %v4597_v7 = vpop.f32.mrf.mxu3  ;;  %v11577_v41 = vld [vmem:[#allocation132_spill] sm:$0xff] }
 0x725   : > { %v4598_v54 = vadd.f32 %v4597_v7, %v4509_v45  ;;  %v11578_v45 = vld [vmem:[#allocation39_spill] sm:$0xff] }
 0x726   : > { %v4333_v25 = vpop.f32.mrf.mxu0 }
 0x727   : > { %v4334_v26 = vadd.f32 %v4333_v25, %v10432_v32  ;;  %v4422_v58 = vpop.f32.mrf.mxu1  ;;  %v4700_v1 = vmax.f32 %v4598_v54, 0.0  ;;  %4550 = vmatmul.bf16.gmra.mxu2 %v11575_v8 }
 0x728   : > { %6897 = vmatmul.msk.bf16.gmra.mxu3 %vm2104_vm0, %v11521_v9 }
 0x729   : > { %v4423_v33 = vadd.f32 %v4422_v58, %v4334_v26  ;;  %4372 = vmatmul.bf16.gmra.mxu0 %v11573_v34  ;;  %v10710_v61 = vpack.c.bf16 %v4700_v1, %v4696_v4 }
 0x72a   : > { %4461 = vmatmul.bf16.gmra.mxu1 %v11574_v48  ;;  %v4511_v42 = vpop.f32.mrf.mxu2 }
 0x72b   : > { %v4512_v37 = vadd.f32 %v4511_v42, %v4423_v33  ;;  %v4600_v51 = vpop.f32.mrf.mxu3 }
 0x72d   : > { %v4601_v22 = vadd.f32 %v4600_v51, %v4512_v37 }
 0x72e   : > { %v4335_v32 = vpop.f32.mrf.mxu0 }
 0x72f   : > { %v4336_v63 = vadd.f32 %v4335_v32, %v10438_v2  ;;  %v4424_v49 = vpop.f32.mrf.mxu1  ;;  %v4704_v16 = vmax.f32 %v4601_v22, 0.0  ;;  %v11579_v32 = vld [vmem:[#allocation108_spill] sm:$0xff]  ;;  %v11580_v22 = vld [vmem:[#allocation135_spill] sm:$0xff] }
 0x731   : > { %v4425_v12 = vadd.f32 %v4424_v49, %v4336_v63 }
 0x732   : > { %v4513_v11 = vpop.f32.mrf.mxu2 }
 0x733   : > { %v4514_v52 = vadd.f32 %v4513_v11, %v4425_v12  ;;  %v4602_v50 = vpop.f32.mrf.mxu3  ;;  %v11581_v12 = vld [vmem:[#allocation43_spill] sm:$0xff] }
 0x735   : > { %v4603_v18 = vadd.f32 %v4602_v50, %v4514_v52 }
 0x736   : > { %v4338_v21 = vpop.f32.mrf.mxu0 }
 0x737   : > { %v4339_v46 = vadd.f32 %v4338_v21, %v10456_v59  ;;  %v4427_v5 = vpop.f32.mrf.mxu1  ;;  %v4708_v35 = vmax.f32 %v4603_v18, 0.0  ;;  %5283 = vmatmul.bf16.vlgmr.msrb.gmra.mxu2 %v11578_v45 }
 0x738   : > { %5372 = vmatmul.bf16.vlgmr.msrb.gmra.mxu3 %v10632_v19 }
 0x739   : > { %v4428_v9 = vadd.f32 %v4427_v5, %v4339_v46  ;;  %5105 = vmatmul.bf16.vlgmr.msrb.gmra.mxu0 %v11576_v40  ;;  %v10718_v2 = vpack.c.bf16 %v4708_v35, %v4704_v16 }
 0x73a   : > { %5194 = vmatmul.bf16.vlgmr.msrb.gmra.mxu1 %v11577_v41  ;;  %v4516_v7 = vpop.f32.mrf.mxu2 }
 0x73b   : > { %v4517_v25 = vadd.f32 %v4516_v7, %v4428_v9  ;;  %v4605_v26 = vpop.f32.mrf.mxu3 }
 0x73d   : > { %v4606_v33 = vadd.f32 %v4605_v26, %v4517_v25  ;;  %v11582_v25 = vld [vmem:[#allocation112_spill] sm:$0xff] }
 0x73e   : > { %v4340_v58 = vpop.f32.mrf.mxu0 }
 0x73f   : > { %v4341_v59 = vadd.f32 %v4340_v58, %v10465_v57  ;;  %v4429_v54 = vpop.f32.mrf.mxu1  ;;  %v4712_v63 = vmax.f32 %v4606_v33, 0.0 }
 0x741   : > { %v4430_v34 = vadd.f32 %v4429_v54, %v4341_v59  ;;  %v11583_v59 = vld [vmem:[#allocation136_spill] sm:$0xff]  ;;  %v11584_v54 = vld [vmem:[#allocation47_spill] sm:$0xff] }
 0x742   : > { %v4518_v4 = vpop.f32.mrf.mxu2 }
 0x743   : > { %v4519_v1 = vadd.f32 %v4518_v4, %v4430_v34  ;;  %v4607_v48 = vpop.f32.mrf.mxu3 }
 0x745   : > { %v4608_v51 = vadd.f32 %v4607_v48, %v4519_v1 }
 0x746   : > { %v4343_v8 = vpop.f32.mrf.mxu0 }
 0x747   : > { %v4344_v42 = vadd.f32 %v4343_v8, %v10474_v15  ;;  %v4432_v37 = vpop.f32.mrf.mxu1  ;;  %v4716_v49 = vmax.f32 %v4608_v51, 0.0  ;;  %5288 = vmatmul.bf16.gmra.mxu2 %v11581_v12  ;;  %v11585_v12 = vld [vmem:[#allocation116_spill] sm:$0xff] }
 0x748   : > { %5377 = vmatmul.bf16.gmra.mxu3 %v10650_v43 }
 0x749   : > { %v4433_v19 = vadd.f32 %v4432_v37, %v4344_v42  ;;  %5110 = vmatmul.bf16.gmra.mxu0 %v11579_v32  ;;  %v10726_v57 = vpack.c.bf16 %v4716_v49, %v4712_v63 }
 0x74a   : > { %5199 = vmatmul.bf16.gmra.mxu1 %v11580_v22  ;;  %v4521_v11 = vpop.f32.mrf.mxu2 }
 0x74b   : > { %v4522_v52 = vadd.f32 %v4521_v11, %v4433_v19  ;;  %v4610_v50 = vpop.f32.mrf.mxu3 }
 0x74d   : > { %v4611_v5 = vadd.f32 %v4610_v50, %v4522_v52  ;;  %v11586_v50 = vld [vmem:[#allocation137_spill] sm:$0xff] }
 0x74e   : > { %v4345_v21 = vpop.f32.mrf.mxu0 }
 0x74f   : > { %v4346_v15 = vadd.f32 %v4345_v21, %v10480_v53  ;;  %v4434_v46 = vpop.f32.mrf.mxu1  ;;  %v4720_v26 = vmax.f32 %v4611_v5, 0.0  ;;  %v11587_v21 = vld [vmem:[#allocation51_spill] sm:$0xff] }
 0x751   : > { %v4435_v18 = vadd.f32 %v4434_v46, %v4346_v15 }
 0x752   : > { %v4523_v9 = vpop.f32.mrf.mxu2 }
 0x753   : > { %v4524_v40 = vadd.f32 %v4523_v9, %v4435_v18  ;;  %v4612_v16 = vpop.f32.mrf.mxu3 }
 0x755   : > { %v4613_v7 = vadd.f32 %v4612_v16, %v4524_v40 }
 0x756   : > { %v4348_v35 = vpop.f32.mrf.mxu0 }
 0x757   : > { %v4349_v41 = vadd.f32 %v4348_v35, %v10498_v30  ;;  %v4437_v45 = vpop.f32.mrf.mxu1  ;;  %v4724_v58 = vmax.f32 %v4613_v7, 0.0  ;;  %5293 = vmatmul.bf16.gmra.mxu2 %v11584_v54 }
 0x758   : > { %5382 = vmatmul.bf16.gmra.mxu3 %v10662_v20 }
 0x759   : > { %v4438_v43 = vadd.f32 %v4437_v45, %v4349_v41  ;;  %5115 = vmatmul.bf16.gmra.mxu0 %v11582_v25  ;;  %v10734_v53 = vpack.c.bf16 %v4724_v58, %v4720_v26  ;;  %v11588_v58 = vld [vmem:[#allocation120_spill] sm:$0xff] }
 0x75a   : > { %5204 = vmatmul.bf16.gmra.mxu1 %v11583_v59  ;;  %v4526_v33 = vpop.f32.mrf.mxu2 }
 0x75b   : > { %v4527_v34 = vadd.f32 %v4526_v33, %v4438_v43  ;;  %v4615_v4 = vpop.f32.mrf.mxu3  ;;  %v11589_v33 = vld [vmem:[#allocation138_spill] sm:$0xff] }
 0x75d   : > { %v4616_v8 = vadd.f32 %v4615_v4, %v4527_v34  ;;  %v11590_v34 = vld [vmem:[#allocation55_spill] sm:$0xff] }
 0x75e   : > { %v4350_v1 = vpop.f32.mrf.mxu0 }
 0x75f   : > { %v4351_v30 = vadd.f32 %v4350_v1, %v10507_v38  ;;  %v4439_v48 = vpop.f32.mrf.mxu1  ;;  %v4728_v11 = vmax.f32 %v4616_v8, 0.0 }
 0x761   : > { %v4440_v42 = vadd.f32 %v4439_v48, %v4351_v30 }
 0x762   : > { %v4528_v37 = vpop.f32.mrf.mxu2 }
 0x763   : > { %v4529_v51 = vadd.f32 %v4528_v37, %v4440_v42  ;;  %v4617_v19 = vpop.f32.mrf.mxu3 }
 0x765   : > { %v4618_v22 = vadd.f32 %v4617_v19, %v4529_v51 }
 0x766   : > { %v4353_v32 = vpop.f32.mrf.mxu0 }
 0x767   : > { %v4354_v63 = vadd.f32 %v4353_v32, %v10516_v14  ;;  %v4442_v49 = vpop.f32.mrf.mxu1  ;;  %v4732_v52 = vmax.f32 %v4618_v22, 0.0  ;;  %5298 = vmatmul.bf16.gmra.mxu2 %v11587_v21  ;;  %v11593_v21 = vld [vmem:[#allocation59_spill] sm:$0xff] }
 0x768   : > { %5387 = vmatmul.bf16.gmra.mxu3 %v10680_v17 }
 0x769   : > { %v4443_v20 = vadd.f32 %v4442_v49, %v4354_v63  ;;  %5120 = vmatmul.bf16.gmra.mxu0 %v11585_v12  ;;  %v10742_v38 = vpack.c.bf16 %v4732_v52, %v4728_v11  ;;  %v11591_v12 = vld [vmem:[#allocation124_spill] sm:$0xff] }
 0x76a   : > { %5209 = vmatmul.bf16.gmra.mxu1 %v11586_v50  ;;  %v4531_v15 = vpop.f32.mrf.mxu2  ;;  %v11592_v50 = vld [vmem:[#allocation139_spill] sm:$0xff] }
 0x76b   : > { %v4532_v46 = vadd.f32 %v4531_v15, %v4443_v20  ;;  %v4620_v5 = vpop.f32.mrf.mxu3 }
 0x76d   : > { %v4621_v40 = vadd.f32 %v4620_v5, %v4532_v46 }
 0x76e   : > { %v4355_v18 = vpop.f32.mrf.mxu0 }
 0x76f   : > { %v4356_v14 = vadd.f32 %v4355_v18, %v10522_v6  ;;  %v4444_v9 = vpop.f32.mrf.mxu1  ;;  %v4736_v59 = vmax.f32 %v4621_v40, 0.0 }
 0x771   : > { %v4445_v16 = vadd.f32 %v4444_v9, %v4356_v14 }
 0x772   : > { %v4533_v35 = vpop.f32.mrf.mxu2 }
 0x773   : > { %v4534_v41 = vadd.f32 %v4533_v35, %v4445_v16  ;;  %v4622_v45 = vpop.f32.mrf.mxu3 }
 0x775   : > { %v4623_v26 = vadd.f32 %v4622_v45, %v4534_v41 }
 0x776   : > { %v4358_v7 = vpop.f32.mrf.mxu0 }
 0x777   : > { %v4359_v43 = vadd.f32 %v4358_v7, %v10540_v27  ;;  %v4447_v25 = vpop.f32.mrf.mxu1  ;;  %v4740_v54 = vmax.f32 %v4623_v26, 0.0  ;;  %5303 = vmatmul.bf16.gmra.mxu2 %v11590_v34  ;;  %v11594_v26 = vld [vmem:[#allocation128_spill] sm:$0xff] }
 0x778   : > { %5392 = vmatmul.bf16.gmra.mxu3 %v10692_v60 }
 0x779   : > { %v4448_v17 = vadd.f32 %v4447_v25, %v4359_v43  ;;  %5125 = vmatmul.bf16.gmra.mxu0 %v11588_v58  ;;  %v10750_v6 = vpack.c.bf16 %v4740_v54, %v4736_v59  ;;  %v11595_v59 = vld [vmem:[#allocation140_spill] sm:$0xff]  ;;  %v11596_v54 = vld [vmem:[#allocation63_spill] sm:$0xff] }
 0x77a   : > { %5214 = vmatmul.bf16.gmra.mxu1 %v11589_v33  ;;  %v4536_v4 = vpop.f32.mrf.mxu2 }
 0x77b   : > { %v4537_v1 = vadd.f32 %v4536_v4, %v4448_v17  ;;  %v4625_v30 = vpop.f32.mrf.mxu3 }
 0x77d   : > { %v4626_v42 = vadd.f32 %v4625_v30, %v4537_v1 }
 0x77e   : > { %v4360_v48 = vpop.f32.mrf.mxu0 }
 0x77f   : > { %v4361_v27 = vadd.f32 %v4360_v48, %v10549_v56  ;;  %v4449_v8 = vpop.f32.mrf.mxu1  ;;  %v4744_v11 = vmax.f32 %v4626_v42, 0.0 }
 0x781   : > { %v4450_v37 = vadd.f32 %v4449_v8, %v4361_v27 }
 0x782   : > { %v4538_v51 = vpop.f32.mrf.mxu2 }
 0x783   : > { %v4539_v19 = vadd.f32 %v4538_v51, %v4450_v37  ;;  %v4627_v32 = vpop.f32.mrf.mxu3 }
 0x785   : > { %v4628_v20 = vadd.f32 %v4627_v32, %v4539_v19 }
 0x786   : > { %v4363_v63 = vpop.f32.mrf.mxu0 }
 0x787   : > { %v4364_v49 = vadd.f32 %v4363_v63, %v10558_v62  ;;  %v4452_v22 = vpop.f32.mrf.mxu1  ;;  %v4748_v52 = vmax.f32 %v4628_v20, 0.0  ;;  %5308 = vmatmul.bf16.gmra.mxu2 %v11593_v21 }
 0x788   : > { %5397 = vmatmul.bf16.gmra.mxu3 %v10701_v0 }
 0x789   : > { %v4453_v60 = vadd.f32 %v4452_v22, %v4364_v49  ;;  %5130 = vmatmul.bf16.gmra.mxu0 %v11591_v12  ;;  %v10758_v56 = vpack.c.bf16 %v4748_v52, %v4744_v11  ;;  %v11597_v49 = vld [vmem:[#allocation129_spill] sm:$0xff] }
 0x78a   : > { %5219 = vmatmul.bf16.gmra.mxu1 %v11592_v50  ;;  %v4541_v15 = vpop.f32.mrf.mxu2 }
 0x78b   : > { %v4542_v46 = vadd.f32 %v4541_v15, %v4453_v60  ;;  %v4630_v5 = vpop.f32.mrf.mxu3  ;;  %v11598_v60 = vld [vmem:[#allocation141_spill] sm:$0xff] }
 0x78d   : > { %v4631_v9 = vadd.f32 %v4630_v5, %v4542_v46 }
 0x78e   : > { %v4365_v18 = vpop.f32.mrf.mxu0 }
 0x78f   : > { %v4366_v62 = vadd.f32 %v4365_v18, %v10564_v13  ;;  %v4454_v14 = vpop.f32.mrf.mxu1  ;;  %v4752_v17 = vmax.f32 %v4631_v9, 0.0 }
 0x791   : > { %v4455_v40 = vadd.f32 %v4454_v14, %v4366_v62 }
 0x792   : > { %v4543_v16 = vpop.f32.mrf.mxu2 }
 0x793   : > { %v4544_v35 = vadd.f32 %v4543_v16, %v4455_v40  ;;  %v4632_v41 = vpop.f32.mrf.mxu3 }
 0x795   : > { %v4633_v25 = vadd.f32 %v4632_v41, %v4544_v35  ;;  %v10781_v35 = vld [vmem:[%s10907_s4] ss:$0 sm:$0xff] }
 0x796   : > { %v4368_v45 = vpop.f32.mrf.mxu0 }
 0x797   : > { %v4369_v7 = vadd.f32 %v4368_v45, %v10582_v28  ;;  %v4457_v43 = vpop.f32.mrf.mxu1  ;;  %v4756_v58 = vmax.f32 %v4633_v25, 0.0  ;;  %5313 = vmatmul.bf16.gmra.mxu2 %v11596_v54 }
 0x798   : > { %5402 = vmatmul.bf16.gmra.mxu3 %v10710_v61 }
 0x799   : > { %v4458_v0 = vadd.f32 %v4457_v43, %v4369_v7  ;;  %5135 = vmatmul.bf16.gmra.mxu0 %v11594_v26  ;;  %v10766_v13 = vpack.c.bf16 %v4756_v58, %v4752_v17 }
 0x79a   : > { %5224 = vmatmul.bf16.gmra.mxu1 %v11595_v59  ;;  %v4546_v33 = vpop.f32.mrf.mxu2 }
 0x79b   : > { %v4547_v34 = vadd.f32 %v4546_v33, %v4458_v0  ;;  %v4635_v4 = vpop.f32.mrf.mxu3 }
 0x79d   : > { %v4636_v48 = vadd.f32 %v4635_v4, %v4547_v34 }
 0x79e   : > { %v4370_v1 = vpop.f32.mrf.mxu0 }
 0x79f   : > { %v4371_v28 = vadd.f32 %v4370_v1, %v10591_v3  ;;  %v4459_v30 = vpop.f32.mrf.mxu1  ;;  %v4760_v22 = vmax.f32 %v4636_v48, 0.0  ;;  %v11602_v48 = vld [vmem:[#allocation11_spill] sm:$0xff] }
 0x7a1   : > { %v4460_v27 = vadd.f32 %v4459_v30, %v4371_v28  ;;  %v11601_v28 = vld [vmem:[#allocation131_spill] sm:$0xff] }
 0x7a2   : > { %v4548_v8 = vpop.f32.mrf.mxu2 }
 0x7a3   : > { %v4549_v42 = vadd.f32 %v4548_v8, %v4460_v27  ;;  %v4637_v37 = vpop.f32.mrf.mxu3 }
 0x7a5   : > { %v4638_v63 = vadd.f32 %v4637_v37, %v4549_v42 }
 0x7a6   : > { %v4373_v51 = vpop.f32.mrf.mxu0 }
 0x7a7   : > { %v4374_v19 = vadd.f32 %v4373_v51, %v10600_v31  ;;  %v4462_v32 = vpop.f32.mrf.mxu1  ;;  %v4764_v20 = vmax.f32 %v4638_v63, 0.0  ;;  %5318 = vmatmul.bf16.gmra.mxu2 %v10434_v44  ;;  %v11599_v44 = vld [vmem:[#allocation130_spill] sm:$0xff] }
 0x7a8   : > { %5407 = vmatmul.bf16.gmra.mxu3 %v10718_v2 }
 0x7a9   : > { %v4463_v61 = vadd.f32 %v4462_v32, %v4374_v19  ;;  %5140 = vmatmul.bf16.gmra.mxu0 %v11597_v49  ;;  %v10774_v3 = vpack.c.bf16 %v4764_v20, %v4760_v22 }
 0x7aa   : > { %5229 = vmatmul.bf16.gmra.mxu1 %v11598_v60  ;;  %v4551_v12 = vpop.f32.mrf.mxu2 }
 0x7ab   : > { %v4552_v11 = vadd.f32 %v4551_v12, %v4463_v61  ;;  %v4640_v52 = vpop.f32.mrf.mxu3 }
 0x7ad   : > { %v4641_v15 = vadd.f32 %v4640_v52, %v4552_v11  ;;  %v11603_v11 = vld [vmem:[#allocation81_spill] sm:$0xff] }
 0x7ae   : > { %v4375_v50 = vpop.f32.mrf.mxu0 }
 0x7af   : > { %v4376_v31 = vadd.f32 %v4375_v50, %v10606_v24  ;;  %v4464_v21 = vpop.f32.mrf.mxu1  ;;  %v4768_v2 = vmax.f32 %v4641_v15, 0.0  ;;  %v11600_v24 = vld [vmem:[#allocation7_spill] sm:$0xff] }
 0x7b0   : > { %v11604_v50 = vld [vmem:[#allocation15_spill] sm:$0xff] }
 0x7b1   : > { %v4465_v46 = vadd.f32 %v4464_v21, %v4376_v31 }
 0x7b2   : > { %v4553_v5 = vpop.f32.mrf.mxu2 }
 0x7b3   : > { %v4554_v18 = vadd.f32 %v4553_v5, %v4465_v46  ;;  %v4642_v62 = vpop.f32.mrf.mxu3 }
 0x7b5   : > { %v4643_v40 = vadd.f32 %v4642_v62, %v4554_v18 }
 0x7b6   : > { %v5106_v14 = vpop.f32.mrf.mxu0 }
 0x7b7   : > { %v5195_v9 = vpop.f32.mrf.mxu1  ;;  %v4772_v16 = vmax.f32 %v4643_v40, 0.0  ;;  %5323 = vmatmul.bf16.gmra.mxu2 %v10461_v29  ;;  %v5107_v7 = vadd.f32 %v10781_v35, %v5106_v14 }
 0x7b8   : > { %5412 = vmatmul.bf16.gmra.mxu3 %v10726_v57 }
 0x7b9   : > { %5145 = vmatmul.bf16.gmra.mxu0 %v11599_v44  ;;  %v10786_v41 = vpack.c.bf16 %v4772_v16, %v4768_v2  ;;  %v5196_v17 = vadd.f32 %v5195_v9, %v5107_v7 }
 0x7ba   : > { %5234 = vmatmul.bf16.gmra.mxu1 %v11600_v24  ;;  %v5284_v45 = vpop.f32.mrf.mxu2 }
 0x7bb   : > { %v5373_v43 = vpop.f32.mrf.mxu3  ;;  %v5285_v58 = vadd.f32 %v5284_v45, %v5196_v17  ;;  %v11605_v45 = vld [vmem:[#allocation85_spill] sm:$0xff] }
 0x7bd   : > { %v5374_v4 = vadd.f32 %v5373_v43, %v5285_v58  ;;  %v11606_v43 = vld [vmem:[#allocation19_spill] sm:$0xff] }
 0x7be   : > { %v5108_v25 = vpop.f32.mrf.mxu0 }
 0x7bf   : > { %v5197_v0 = vpop.f32.mrf.mxu1  ;;  %v5109_v26 = vadd.f32 %v10781_v35, %v5108_v25 }
 0x7c1   : > { %v5198_v59 = vadd.f32 %v5197_v0, %v5109_v26 }
 0x7c2   : > { %v5286_v54 = vpop.f32.mrf.mxu2 }
 0x7c3   : > { %v5287_v33 = vadd.f32 %v5286_v54, %v5198_v59  ;;  %v5375_v29 = vpop.f32.mrf.mxu3 }
 0x7c5   : > { %v5376_v1 = vadd.f32 %v5375_v29, %v5287_v33 }
 0x7c6   : > { %v5111_v57 = vpop.f32.mrf.mxu0 }
 0x7c7   : > { %v5200_v34 = vpop.f32.mrf.mxu1  ;;  %v7375_v30 = vpack.c.bf16 %v5376_v1, %v5374_v4  ;;  %5328 = vmatmul.bf16.gmra.mxu2 %v10476_v36  ;;  %v5112_v8 = vadd.f32 %v10781_v35, %v5111_v57 }
 0x7c8   : > { %5417 = vmatmul.bf16.gmra.mxu3 %v10734_v53 }
 0x7c9   : > { %5150 = vmatmul.bf16.gmra.mxu0 %v11601_v28  ;;  %7376 = vst [vmem:[%s10797_s23] sm:$0xff] %v7375_v30   ;;  %v5201_v32 = vadd.f32 %v5200_v34, %v5112_v8  ;;  %v11607_v30 = vld [vmem:[#allocation89_spill] sm:$0xff] }
 0x7ca   : > { %5239 = vmatmul.bf16.gmra.mxu1 %v11602_v48  ;;  %v5289_v27 = vpop.f32.mrf.mxu2 }
 0x7cb   : > { %v5378_v42 = vpop.f32.mrf.mxu3  ;;  %v5290_v63 = vadd.f32 %v5289_v27, %v5201_v32  ;;  %v11608_v27 = vld [vmem:[#allocation23_spill] sm:$0xff] }
 0x7cd   : > { %v5379_v60 = vadd.f32 %v5378_v42, %v5290_v63 }
 0x7ce   : > { %v5113_v37 = vpop.f32.mrf.mxu0 }
 0x7cf   : > { %v5202_v51 = vpop.f32.mrf.mxu1  ;;  %v5114_v19 = vadd.f32 %v10781_v35, %v5113_v37 }
 0x7d1   : > { %v5203_v61 = vadd.f32 %v5202_v51, %v5114_v19 }
 0x7d2   : > { %v5291_v49 = vpop.f32.mrf.mxu2 }
 0x7d3   : > { %v5292_v36 = vadd.f32 %v5291_v49, %v5203_v61  ;;  %v5380_v22 = vpop.f32.mrf.mxu3 }
 0x7d5   : > { %v5381_v12 = vadd.f32 %v5380_v22, %v5292_v36 }
 0x7d6   : > { %v5116_v53 = vpop.f32.mrf.mxu0 }
 0x7d7   : > { %v5205_v20 = vpop.f32.mrf.mxu1  ;;  %v7380_v52 = vpack.c.bf16 %v5381_v12, %v5379_v60  ;;  %5333 = vmatmul.bf16.gmra.mxu2 %v10503_v47  ;;  %v5117_v21 = vadd.f32 %v10781_v35, %v5116_v53  ;;  %v11609_v12 = vld [vmem:[#allocation93_spill] sm:$0xff] }
 0x7d8   : > { %5422 = vmatmul.bf16.gmra.mxu3 %v10742_v38 }
 0x7d9   : > { %5155 = vmatmul.bf16.gmra.mxu0 %v11603_v11  ;;  %7452 = vst [vmem:[%s10797_s23 + $0x8] sm:$0xff] %v7380_v52   ;;  %v5206_v62 = vadd.f32 %v5205_v20, %v5117_v21  ;;  %v11610_v52 = vld [vmem:[#allocation27_spill] sm:$0xff] }
 0x7da   : > { %5244 = vmatmul.bf16.gmra.mxu1 %v11604_v50  ;;  %v5294_v31 = vpop.f32.mrf.mxu2 }
 0x7db   : > { %v5383_v15 = vpop.f32.mrf.mxu3  ;;  %v5295_v14 = vadd.f32 %v5294_v31, %v5206_v62 }
 0x7dd   : > { %v5384_v24 = vadd.f32 %v5383_v15, %v5295_v14 }
 0x7de   : > { %v5118_v46 = vpop.f32.mrf.mxu0 }
 0x7df   : > { %v5207_v5 = vpop.f32.mrf.mxu1  ;;  %v5119_v18 = vadd.f32 %v10781_v35, %v5118_v46 }
 0x7e1   : > { %v5208_v9 = vadd.f32 %v5207_v5, %v5119_v18 }
 0x7e2   : > { %v5296_v40 = vpop.f32.mrf.mxu2 }
 0x7e3   : > { %v5297_v44 = vadd.f32 %v5296_v40, %v5208_v9  ;;  %v5385_v2 = vpop.f32.mrf.mxu3 }
 0x7e5   : > { %v5386_v38 = vadd.f32 %v5385_v2, %v5297_v44 }
 0x7e6   : > { %v5121_v16 = vpop.f32.mrf.mxu0 }
 0x7e7   : > { %v5210_v47 = vpop.f32.mrf.mxu1  ;;  %v7385_v7 = vpack.c.bf16 %v5386_v38, %v5384_v24  ;;  %5338 = vmatmul.bf16.gmra.mxu2 %v10518_v23  ;;  %v5122_v0 = vadd.f32 %v10781_v35, %v5121_v16  ;;  %v11612_v38 = vld [vmem:[#allocation31_spill] sm:$0xff] }
 0x7e8   : > { %5427 = vmatmul.bf16.gmra.mxu3 %v10750_v6 }
 0x7e9   : > { %5160 = vmatmul.bf16.gmra.mxu0 %v11605_v45  ;;  %7453 = vst [vmem:[%s10797_s23 + $0x10] sm:$0xff] %v7385_v7   ;;  %v5211_v54 = vadd.f32 %v5210_v47, %v5122_v0  ;;  %v11611_v47 = vld [vmem:[#allocation97_spill] sm:$0xff]  ;;  %v11613_v45 = vld [vmem:[#allocation67_spill] sm:$0xff] }
 0x7ea   : > { %5249 = vmatmul.bf16.gmra.mxu1 %v11606_v43  ;;  %v5299_v25 = vpop.f32.mrf.mxu2 }
 0x7eb   : > { %v5388_v26 = vpop.f32.mrf.mxu3  ;;  %v5300_v33 = vadd.f32 %v5299_v25, %v5211_v54 }
 0x7ed   : > { %v5389_v28 = vadd.f32 %v5388_v26, %v5300_v33 }
 0x7ee   : > { %v5123_v17 = vpop.f32.mrf.mxu0 }
 0x7ef   : > { %v5212_v58 = vpop.f32.mrf.mxu1  ;;  %v5124_v59 = vadd.f32 %v10781_v35, %v5123_v17 }
 0x7f1   : > { %v5213_v29 = vadd.f32 %v5212_v58, %v5124_v59 }
 0x7f2   : > { %v5301_v57 = vpop.f32.mrf.mxu2 }
 0x7f3   : > { %v5302_v34 = vadd.f32 %v5301_v57, %v5213_v29  ;;  %v5390_v4 = vpop.f32.mrf.mxu3 }
 0x7f5   : > { %v5391_v6 = vadd.f32 %v5390_v4, %v5302_v34 }
 0x7f6   : > { %v5126_v1 = vpop.f32.mrf.mxu0 }
 0x7f7   : > { %v5215_v23 = vpop.f32.mrf.mxu1  ;;  %v7390_v48 = vpack.c.bf16 %v5391_v6, %v5389_v28  ;;  %5343 = vmatmul.bf16.gmra.mxu2 %v10545_v10  ;;  %v5127_v42 = vadd.f32 %v10781_v35, %v5126_v1  ;;  %v11615_v6 = vld [vmem:[#allocation143_spill] sm:$0xff] }
 0x7f8   : > { %5432 = vmatmul.bf16.gmra.mxu3 %v10758_v56 }
 0x7f9   : > { %5165 = vmatmul.bf16.gmra.mxu0 %v11607_v30  ;;  %7454 = vst [vmem:[%s10797_s23 + $0x18] sm:$0xff] %v7390_v48   ;;  %v5216_v63 = vadd.f32 %v5215_v23, %v5127_v42  ;;  %v11614_v23 = vld [vmem:[#allocation134_spill] sm:$0xff] }
 0x7fa   : > { %5254 = vmatmul.bf16.gmra.mxu1 %v11608_v27  ;;  %v5304_v8 = vpop.f32.mrf.mxu2 }
 0x7fb   : > { %v5393_v37 = vpop.f32.mrf.mxu3  ;;  %v5305_v61 = vadd.f32 %v5304_v8, %v5216_v63 }
 0x7fd   : > { %v5394_v60 = vadd.f32 %v5393_v37, %v5305_v61 }
 0x7fe   : > { %v5128_v51 = vpop.f32.mrf.mxu0 }
 0x7ff   : > { %v5217_v19 = vpop.f32.mrf.mxu1  ;;  %v5129_v32 = vadd.f32 %v10781_v35, %v5128_v51 }
 0x801   : > { %v5218_v49 = vadd.f32 %v5217_v19, %v5129_v32 }
 0x802   : > { %v5306_v36 = vpop.f32.mrf.mxu2 }
 0x803   : > { %v5307_v22 = vadd.f32 %v5306_v36, %v5218_v49  ;;  %v5395_v53 = vpop.f32.mrf.mxu3 }
 0x805   : > { %v5396_v56 = vadd.f32 %v5395_v53, %v5307_v22 }
 0x806   : > { %v5131_v20 = vpop.f32.mrf.mxu0 }
 0x807   : > { %v5220_v10 = vpop.f32.mrf.mxu1  ;;  %v7395_v11 = vpack.c.bf16 %v5396_v56, %v5394_v60  ;;  %5348 = vmatmul.bf16.gmra.mxu2 %v10560_v55  ;;  %v5132_v31 = vadd.f32 %v10781_v35, %v5131_v20 }
 0x808   : > { %5437 = vmatmul.bf16.gmra.mxu3 %v10766_v13 }
 0x809   : > { %5170 = vmatmul.bf16.gmra.mxu0 %v11609_v12  ;;  %7455 = vst [vmem:[%s10797_s23 + $0x20] sm:$0xff] %v7395_v11   ;;  %v5221_v18 = vadd.f32 %v5220_v10, %v5132_v31 }
 0x80a   : > { %5259 = vmatmul.bf16.gmra.mxu1 %v11610_v52  ;;  %v5309_v50 = vpop.f32.mrf.mxu2 }
 0x80b   : > { %v5398_v21 = vpop.f32.mrf.mxu3  ;;  %v5310_v62 = vadd.f32 %v5309_v50, %v5221_v18 }
 0x80d   : > { %v5399_v16 = vadd.f32 %v5398_v21, %v5310_v62 }
 0x80e   : > { %v5133_v15 = vpop.f32.mrf.mxu0 }
 0x80f   : > { %v5222_v46 = vpop.f32.mrf.mxu1  ;;  %v5134_v5 = vadd.f32 %v10781_v35, %v5133_v15 }
 0x811   : > { %v5223_v14 = vadd.f32 %v5222_v46, %v5134_v5 }
 0x812   : > { %v5311_v9 = vpop.f32.mrf.mxu2 }
 0x813   : > { %v5312_v40 = vadd.f32 %v5311_v9, %v5223_v14  ;;  %v5400_v44 = vpop.f32.mrf.mxu3 }
 0x815   : > { %v5401_v13 = vadd.f32 %v5400_v44, %v5312_v40 }
 0x816   : > { %v5136_v2 = vpop.f32.mrf.mxu0 }
 0x817   : > { %v5225_v55 = vpop.f32.mrf.mxu1  ;;  %v7400_v24 = vpack.c.bf16 %v5401_v13, %v5399_v16  ;;  %5353 = vmatmul.bf16.gmra.mxu2 %v11613_v45  ;;  %v5137_v43 = vadd.f32 %v10781_v35, %v5136_v2 }
 0x818   : > { %5442 = vmatmul.bf16.gmra.mxu3 %v10774_v3 }
 0x819   : > { %5175 = vmatmul.bf16.gmra.mxu0 %v11611_v47  ;;  %7456 = vst [vmem:[%s10797_s23 + $0x28] sm:$0xff] %v7400_v24   ;;  %v5226_v58 = vadd.f32 %v5225_v55, %v5137_v43 }
 0x81a   : > { %5264 = vmatmul.bf16.gmra.mxu1 %v11612_v38  ;;  %v5314_v7 = vpop.f32.mrf.mxu2 }
 0x81b   : > { %v5403_v25 = vpop.f32.mrf.mxu3  ;;  %v5315_v59 = vadd.f32 %v5314_v7, %v5226_v58 }
 0x81d   : > { %v5404_v1 = vadd.f32 %v5403_v25, %v5315_v59 }
 0x81e   : > { %v5138_v0 = vpop.f32.mrf.mxu0 }
 0x81f   : > { %v5227_v26 = vpop.f32.mrf.mxu1  ;;  %v5139_v17 = vadd.f32 %v10781_v35, %v5138_v0 }
 0x821   : > { %v5228_v54 = vadd.f32 %v5227_v26, %v5139_v17 }
 0x822   : > { %v5316_v33 = vpop.f32.mrf.mxu2 }
 0x823   : > { %v5317_v29 = vadd.f32 %v5316_v33, %v5228_v54  ;;  %v5405_v57 = vpop.f32.mrf.mxu3 }
 0x825   : > { %v5406_v3 = vadd.f32 %v5405_v57, %v5317_v29 }
 0x826   : > { %v5141_v34 = vpop.f32.mrf.mxu0 }
 0x827   : > { %v5230_v4 = vpop.f32.mrf.mxu1  ;;  %v7405_v28 = vpack.c.bf16 %v5406_v3, %v5404_v1  ;;  %5358 = vmatmul.bf16.gmra.mxu2 %v10602_v39  ;;  %v5142_v48 = vadd.f32 %v10781_v35, %v5141_v34 }
 0x828   : > { %5447 = vmatmul.bf16.gmra.mxu3 %v10786_v41 }
 0x829   : > { %5180 = vmatmul.bf16.gmra.mxu0 %v11614_v23  ;;  %7457 = vst [vmem:[%s10797_s23 + $0x30] sm:$0xff] %v7405_v28   ;;  %v5231_v51 = vadd.f32 %v5230_v4, %v5142_v48 }
 0x82a   : > { %5269 = vmatmul.bf16.gmra.mxu1 %v11615_v6  ;;  %v5319_v30 = vpop.f32.mrf.mxu2 }
 0x82b   : > { %v5408_v27 = vpop.f32.mrf.mxu3  ;;  %v5320_v19 = vadd.f32 %v5319_v30, %v5231_v51 }
 0x82d   : > { %v5409_v22 = vadd.f32 %v5408_v27, %v5320_v19 }
 0x82e   : > { %v5143_v8 = vpop.f32.mrf.mxu0 }
 0x82f   : > { %v5232_v42 = vpop.f32.mrf.mxu1  ;;  %v5144_v37 = vadd.f32 %v10781_v35, %v5143_v8 }
 0x831   : > { %v5233_v32 = vadd.f32 %v5232_v42, %v5144_v37 }
 0x832   : > { %v5321_v63 = vpop.f32.mrf.mxu2 }
 0x833   : > { %v5322_v61 = vadd.f32 %v5321_v63, %v5233_v32  ;;  %v5410_v49 = vpop.f32.mrf.mxu3 }
 0x835   : > { %v5411_v41 = vadd.f32 %v5410_v49, %v5322_v61 }
 0x836   : > { %v5146_v36 = vpop.f32.mrf.mxu0 }
 0x837   : > { %v5235_v39 = vpop.f32.mrf.mxu1  ;;  %v7410_v53 = vpack.c.bf16 %v5411_v41, %v5409_v22  ;;  %v5147_v10 = vadd.f32 %v10781_v35, %v5146_v36 }
 0x839   : > { %7458 = vst [vmem:[%s10797_s23 + $0x38] sm:$0xff] %v7410_v53   ;;  %v5236_v52 = vadd.f32 %v5235_v39, %v5147_v10 }
 0x83a   : > { %v5324_v20 = vpop.f32.mrf.mxu2 }
 0x83b   : > { %v5413_v60 = vpop.f32.mrf.mxu3  ;;  %v5325_v50 = vadd.f32 %v5324_v20, %v5236_v52 }
 0x83d   : > { %v5414_v62 = vadd.f32 %v5413_v60, %v5325_v50 }
 0x83e   : > { %v5148_v56 = vpop.f32.mrf.mxu0 }
 0x83f   : > { %v5237_v12 = vpop.f32.mrf.mxu1  ;;  %v5149_v11 = vadd.f32 %v10781_v35, %v5148_v56 }
 0x841   : > { %v5238_v31 = vadd.f32 %v5237_v12, %v5149_v11 }
 0x842   : > { %v5326_v21 = vpop.f32.mrf.mxu2 }
 0x843   : > { %v5327_v15 = vadd.f32 %v5326_v21, %v5238_v31  ;;  %v5415_v46 = vpop.f32.mrf.mxu3 }
 0x845   : > { %v5416_v14 = vadd.f32 %v5415_v46, %v5327_v15 }
 0x846   : > { %v5151_v5 = vpop.f32.mrf.mxu0 }
 0x847   : > { %v5240_v18 = vpop.f32.mrf.mxu1  ;;  %v7415_v9 = vpack.c.bf16 %v5416_v14, %v5414_v62  ;;  %v5152_v44 = vadd.f32 %v10781_v35, %v5151_v5 }
 0x849   : > { %7459 = vst [vmem:[%s10797_s23 + $0x40] sm:$0xff] %v7415_v9   ;;  %v5241_v47 = vadd.f32 %v5240_v18, %v5152_v44 }
 0x84a   : > { %v5329_v40 = vpop.f32.mrf.mxu2 }
 0x84b   : > { %v5418_v2 = vpop.f32.mrf.mxu3  ;;  %v5330_v24 = vadd.f32 %v5329_v40, %v5241_v47 }
 0x84d   : > { %v5419_v26 = vadd.f32 %v5418_v2, %v5330_v24 }
 0x84e   : > { %v5153_v55 = vpop.f32.mrf.mxu0 }
 0x84f   : > { %v5242_v16 = vpop.f32.mrf.mxu1  ;;  %v5154_v13 = vadd.f32 %v10781_v35, %v5153_v55 }
 0x851   : > { %v5243_v38 = vadd.f32 %v5242_v16, %v5154_v13 }
 0x852   : > { %v5331_v45 = vpop.f32.mrf.mxu2 }
 0x853   : > { %v5332_v7 = vadd.f32 %v5331_v45, %v5243_v38  ;;  %v5420_v43 = vpop.f32.mrf.mxu3 }
 0x855   : > { %v5421_v17 = vadd.f32 %v5420_v43, %v5332_v7 }
 0x856   : > { %v5156_v25 = vpop.f32.mrf.mxu0 }
 0x857   : > { %v5245_v0 = vpop.f32.mrf.mxu1  ;;  %v7420_v58 = vpack.c.bf16 %v5421_v17, %v5419_v26  ;;  %v5157_v54 = vadd.f32 %v10781_v35, %v5156_v25 }
 0x859   : > { %7460 = vst [vmem:[%s10797_s23 + $0x48] sm:$0xff] %v7420_v58   ;;  %v5246_v4 = vadd.f32 %v5245_v0, %v5157_v54 }
 0x85a   : > { %v5334_v59 = vpop.f32.mrf.mxu2 }
 0x85b   : > { %v5423_v33 = vpop.f32.mrf.mxu3  ;;  %v5335_v1 = vadd.f32 %v5334_v59, %v5246_v4 }
 0x85d   : > { %v5424_v27 = vadd.f32 %v5423_v33, %v5335_v1 }
 0x85e   : > { %v5158_v29 = vpop.f32.mrf.mxu0 }
 0x85f   : > { %v5247_v57 = vpop.f32.mrf.mxu1  ;;  %v5159_v34 = vadd.f32 %v10781_v35, %v5158_v29 }
 0x861   : > { %v5248_v3 = vadd.f32 %v5247_v57, %v5159_v34 }
 0x862   : > { %v5336_v23 = vpop.f32.mrf.mxu2 }
 0x863   : > { %v5337_v28 = vadd.f32 %v5336_v23, %v5248_v3  ;;  %v5425_v6 = vpop.f32.mrf.mxu3 }
 0x865   : > { %v5426_v8 = vadd.f32 %v5425_v6, %v5337_v28 }
 0x866   : > { %v5161_v30 = vpop.f32.mrf.mxu0 }
 0x867   : > { %v5250_v48 = vpop.f32.mrf.mxu1  ;;  %v7425_v42 = vpack.c.bf16 %v5426_v8, %v5424_v27  ;;  %v5162_v51 = vadd.f32 %v10781_v35, %v5161_v30 }
 0x869   : > { %7461 = vst [vmem:[%s10797_s23 + $0x50] sm:$0xff] %v7425_v42   ;;  %v5251_v49 = vadd.f32 %v5250_v48, %v5162_v51 }
 0x86a   : > { %v5339_v37 = vpop.f32.mrf.mxu2 }
 0x86b   : > { %v5428_v19 = vpop.f32.mrf.mxu3  ;;  %v5340_v36 = vadd.f32 %v5339_v37, %v5251_v49 }
 0x86d   : > { %v5429_v60 = vadd.f32 %v5428_v19, %v5340_v36 }
 0x86e   : > { %v5163_v32 = vpop.f32.mrf.mxu0 }
 0x86f   : > { %v5252_v63 = vpop.f32.mrf.mxu1  ;;  %v5164_v61 = vadd.f32 %v10781_v35, %v5163_v32 }
 0x871   : > { %v5253_v39 = vadd.f32 %v5252_v63, %v5164_v61 }
 0x872   : > { %v5341_v22 = vpop.f32.mrf.mxu2 }
 0x873   : > { %v5342_v41 = vadd.f32 %v5341_v22, %v5253_v39  ;;  %v5430_v53 = vpop.f32.mrf.mxu3 }
 0x875   : > { %v5431_v56 = vadd.f32 %v5430_v53, %v5342_v41 }
 0x876   : > { %v5166_v20 = vpop.f32.mrf.mxu0 }
 0x877   : > { %v5255_v10 = vpop.f32.mrf.mxu1  ;;  %v7430_v12 = vpack.c.bf16 %v5431_v56, %v5429_v60  ;;  %v5167_v52 = vadd.f32 %v10781_v35, %v5166_v20 }
 0x879   : > { %7462 = vst [vmem:[%s10797_s23 + $0x58] sm:$0xff] %v7430_v12   ;;  %v5256_v46 = vadd.f32 %v5255_v10, %v5167_v52 }
 0x87a   : > { %v5344_v11 = vpop.f32.mrf.mxu2 }
 0x87b   : > { %v5433_v50 = vpop.f32.mrf.mxu3  ;;  %v5345_v5 = vadd.f32 %v5344_v11, %v5256_v46 }
 0x87d   : > { %v5434_v2 = vadd.f32 %v5433_v50, %v5345_v5 }
 0x87e   : > { %v5168_v31 = vpop.f32.mrf.mxu0 }
 0x87f   : > { %v5257_v21 = vpop.f32.mrf.mxu1  ;;  %v5169_v15 = vadd.f32 %v10781_v35, %v5168_v31 }
 0x881   : > { %v5258_v18 = vadd.f32 %v5257_v21, %v5169_v15 }
 0x882   : > { %v5346_v62 = vpop.f32.mrf.mxu2 }
 0x883   : > { %v5347_v14 = vadd.f32 %v5346_v62, %v5258_v18  ;;  %v5435_v9 = vpop.f32.mrf.mxu3 }
 0x885   : > { %v5436_v55 = vadd.f32 %v5435_v9, %v5347_v14 }
 0x886   : > { %v5171_v40 = vpop.f32.mrf.mxu0 }
 0x887   : > { %v5260_v44 = vpop.f32.mrf.mxu1  ;;  %v7435_v16 = vpack.c.bf16 %v5436_v55, %v5434_v2  ;;  %v5172_v47 = vadd.f32 %v10781_v35, %v5171_v40 }
 0x889   : > { %7463 = vst [vmem:[%s10797_s23 + $0x60] sm:$0xff] %v7435_v16   ;;  %v5261_v43 = vadd.f32 %v5260_v44, %v5172_v47 }
 0x88a   : > { %v5349_v13 = vpop.f32.mrf.mxu2 }
 0x88b   : > { %v5438_v24 = vpop.f32.mrf.mxu3  ;;  %v5350_v25 = vadd.f32 %v5349_v13, %v5261_v43 }
 0x88d   : > { %v5439_v33 = vadd.f32 %v5438_v24, %v5350_v25 }
 0x88e   : > { %v5173_v38 = vpop.f32.mrf.mxu0 }
 0x88f   : > { %v5262_v45 = vpop.f32.mrf.mxu1  ;;  %v5174_v7 = vadd.f32 %v10781_v35, %v5173_v38 }
 0x891   : > { %v5263_v0 = vadd.f32 %v5262_v45, %v5174_v7 }
 0x892   : > { %v5351_v26 = vpop.f32.mrf.mxu2 }
 0x893   : > { %v5352_v17 = vadd.f32 %v5351_v26, %v5263_v0  ;;  %v5440_v58 = vpop.f32.mrf.mxu3 }
 0x895   : > { %v5441_v29 = vadd.f32 %v5440_v58, %v5352_v17 }
 0x896   : > { %v5176_v59 = vpop.f32.mrf.mxu0 }
 0x897   : > { %v5265_v54 = vpop.f32.mrf.mxu1  ;;  %v7440_v57 = vpack.c.bf16 %v5441_v29, %v5439_v33  ;;  %v5177_v4 = vadd.f32 %v10781_v35, %v5176_v59 }
 0x899   : > { %7464 = vst [vmem:[%s10797_s23 + $0x68] sm:$0xff] %v7440_v57   ;;  %v5266_v6 = vadd.f32 %v5265_v54, %v5177_v4 }
 0x89a   : > { %v5354_v34 = vpop.f32.mrf.mxu2 }
 0x89b   : > { %v5443_v1 = vpop.f32.mrf.mxu3  ;;  %v5355_v30 = vadd.f32 %v5354_v34, %v5266_v6 }
 0x89d   : > { %v5444_v51 = vadd.f32 %v5443_v1, %v5355_v30 }
 0x89e   : > { %v5178_v3 = vpop.f32.mrf.mxu0 }
 0x89f   : > { %v5267_v23 = vpop.f32.mrf.mxu1  ;;  %v5179_v28 = vadd.f32 %v10781_v35, %v5178_v3 }
 0x8a1   : > { %v5268_v48 = vadd.f32 %v5267_v23, %v5179_v28 }
 0x8a2   : > { %v5356_v27 = vpop.f32.mrf.mxu2 }
 0x8a3   : > { %v5357_v8 = vadd.f32 %v5356_v27, %v5268_v48  ;;  %v5445_v42 = vpop.f32.mrf.mxu3 }
 0x8a5   : > { %v5446_v19 = vadd.f32 %v5445_v42, %v5357_v8 }
 0x8a6   : > { %v5181_v37 = vpop.f32.mrf.mxu0 }
 0x8a7   : > { %v5270_v32 = vpop.f32.mrf.mxu1  ;;  %v7445_v63 = vpack.c.bf16 %v5446_v19, %v5444_v51  ;;  %v5182_v49 = vadd.f32 %v10781_v35, %v5181_v37 }
 0x8a9   : > { %7465 = vst [vmem:[%s10797_s23 + $0x70] sm:$0xff] %v7445_v63   ;;  %v5271_v41 = vadd.f32 %v5270_v32, %v5182_v49 }
 0x8aa   : > { %v5359_v61 = vpop.f32.mrf.mxu2 }
 0x8ab   : > { %v5448_v36 = vpop.f32.mrf.mxu3  ;;  %v5360_v20 = vadd.f32 %v5359_v61, %v5271_v41 }
 0x8ad   : > { %v5449_v11 = vadd.f32 %v5448_v36, %v5360_v20 }
 0x8ae   : > { %v5183_v39 = vpop.f32.mrf.mxu0 }
 0x8af   : > { %v5184_v22 = vadd.f32 %v10781_v35, %v5183_v39  ;;  %v5272_v53 = vpop.f32.mrf.mxu1 }
 0x8b1   : > { %v5273_v10 = vadd.f32 %v5272_v53, %v5184_v22 }
 0x8b2   : > { %v5361_v60 = vpop.f32.mrf.mxu2 }
 0x8b3   : > { %v5362_v56 = vadd.f32 %v5361_v60, %v5273_v10  ;;  %v5450_v12 = vpop.f32.mrf.mxu3 }
 0x8b5   : > { %v5451_v52 = vadd.f32 %v5450_v12, %v5362_v56 }
 0x8b7   : > { %v7450_v35 = vpack.c.bf16 %v5451_v52, %v5449_v11 }
 0x8b9   : > { %7466 = vst [vmem:[%s10797_s23 + $0x78] sm:$0xff] %v7450_v35  }
 0x8ba   : > { %7539 = shalt.err (!%p7536_p3)
}
 0x8bb   : > { %s7576_s25 = smov 64   ;;  %s7577_s17 = smov 4  }
 0x8bc   : > { %7468 = dma.vmem_to_hbm [thread:$0]  (%p7646_p5), %s5531_s10, 2048, %s5533_s11, %s5518_s22, %s7576_s25, %s7576_s25, %s7577_s17  }
 0x8bd PF: > { %p7474_p4 = scmp.ge.s32.totalorder %s7574_s21, 2  ;;  %s5547_s23 = sand.u32 1, %s7562_s18  }
 0x8be   : > { %s5548_s30 = scalar_lea.sflag [#allocation3], %s5547_s23 }
 0x8bf   : > { %p7471_p7 = pnand %p7474_p4, %p7650_p6 }
 0x8c1   : > { %p7472_p8 = pneg %p7471_p7 }
 0x8c3   : > { %7557 = dma.done.wait (%p7472_p8), %s5548_s30, 2048  }
 0x8c4   : > { %7559 = vsyncadd (%p7472_p8), %s5548_s30, 4294965248  ;;  %p15_p9 = scmp.ge.s32.totalorder %s7633_s24, 4   ;;  %s11616_s18 = smov %s7566_s19 }
 0x8c5   : > { %s11617_s19 = smov %s7570_s20  ;;  %s11618_s20 = smov %s7644_s27 }
 0x8c6   : > { %s11619_s21 = smov %s7633_s24  ;;  %17 = sbr.rel (!%p15_p9) target bundleno = 3 (0x3), region = 75 }
 0x8cb   :  { %5554 = vsyncpa [#allocation3], 1 }
 0x8cc   :  { %5556 = vsyncpa [#allocation3 + $0x1], 1 }

</bundles_post_ra>
